<compile_context>
chip_gen: v7x
topology: tpu7x:2x2x1
jax: 0.10.0
libtpu: 0.0.40
codegen_flags: <defaults>
</compile_context>

<pallas_src>
import jax
import jax.numpy as jnp
import numpy as np
from jax.experimental import pallas as pl
from jax.experimental.pallas import tpu as pltpu


# --------------------------------------------------------------------------
# Pallas kernel 1: cross-modal attention fusion (bmm/softmax/bmm hot path)
# Channels-last: per-batch blocks are (HW, C) -> C on lanes (lane-dense).
# --------------------------------------------------------------------------
def _fusion_kernel(img_ref, th_ref, out_ref):
    img = img_ref[0]      # (HW, C): spatial on sublanes, channels on lanes
    th = th_ref[0]        # (HW, C)
    eps = 1e-12           # F.normalize default eps

    # F.normalize along the channel axis == lane-axis L2 normalization here.
    img_n = img / jnp.maximum(
        jnp.sqrt(jnp.sum(img * img, axis=-1, keepdims=True)), eps)
    th_n = th / jnp.maximum(
        jnp.sqrt(jnp.sum(th * th, axis=-1, keepdims=True)), eps)

    # image_similarity[i, j] = <img_n[i, :], th_n[j, :]>   (single K=C matmul;
    # thermal_similarity is exactly its transpose, so we never recompute it).
    sim = jax.lax.dot_general(img_n, th_n, (((1,), (1,)), ((), ())),
                              preferred_element_type=jnp.float32)   # (HW, HW)

    attn_rgb = jax.nn.softmax(sim, axis=-1)    # softmax(image_similarity, dim=2)
    # softmax(thermal_similarity, dim=2) stored transposed:
    # attn_th_t[j, i] == attn_th[i, j]
    attn_th_t = jax.nn.softmax(sim, axis=0)

    # rgb_base_enhanced^T  = attn_rgb @ thermal^T
    rgb_enh = jnp.dot(attn_rgb, th, preferred_element_type=jnp.float32)
    # thermal_base_enhanced^T = attn_th @ image^T = attn_th_t^T @ image^T
    th_enh = jax.lax.dot_general(attn_th_t, img, (((0,), (0,)), ((), ())),
                                 preferred_element_type=jnp.float32)

    # output = (rgb_base_enhanced + image) + (thermal_base_enhanced + thermal)
    out_ref[0] = (rgb_enh + img) + (th_enh + th)


def cross_attention_fusion(image_mat, thermal_mat):
    # image_mat / thermal_mat : (B, HW, C) float32 -> (B, HW, C)
    B, HW, C = image_mat.shape
    return pl.pallas_call(
        _fusion_kernel,
        out_shape=jax.ShapeDtypeStruct((B, HW, C), jnp.float32),
        grid_spec=pltpu.PrefetchScalarGridSpec(
            num_scalar_prefetch=0,
            grid=(B,),
            in_specs=[pl.BlockSpec((1, HW, C), lambda b: (b, 0, 0)),
                      pl.BlockSpec((1, HW, C), lambda b: (b, 0, 0))],
            out_specs=pl.BlockSpec((1, HW, C), lambda b: (b, 0, 0)),
        ),
        compiler_params=pltpu.CompilerParams(
            dimension_semantics=("parallel",)),
    )(image_mat, thermal_mat)


# --------------------------------------------------------------------------
# Pallas kernel 2: matmul + bias (backs the patch embed and all convs)
# Batch is folded into M; grid = (N tiles [parallel], K tiles [arbitrary]);
# bf16 inputs, f32 VMEM accumulator.
# --------------------------------------------------------------------------
def _matmul_bias_kernel(x_ref, w_ref, b_ref, o_ref, acc_ref):
    k = pl.program_id(1)

    @pl.when(k == 0)
    def _():
        acc_ref[...] = jnp.zeros_like(acc_ref)

    acc_ref[...] += jnp.dot(x_ref[...], w_ref[...],
                            preferred_element_type=jnp.float32)

    @pl.when(k == pl.num_programs(1) - 1)
    def _():
        o_ref[...] = (acc_ref[...] + b_ref[...]).astype(o_ref.dtype)


def matmul_bias(x, w, bias, *, tk=None, tn=None):
    # x: (M, K) @ w: (K, N) + bias: (N,) -> (M, N), f32 out.
    M, K = x.shape
    K2, N = w.shape
    assert K == K2
    if tk is None or tk > K:
        tk = K
    if tn is None or tn > N:
        tn = N
    assert K % tk == 0 and N % tn == 0

    # bf16 at the pallas_call boundary halves weight/activation DMA bytes;
    # accumulation stays f32 (preferred_element_type + f32 scratch).
    x16 = x.astype(jnp.bfloat16)
    w16 = w.astype(jnp.bfloat16)
    bias2d = bias.reshape(1, N).astype(jnp.float32)

    return pl.pallas_call(
        _matmul_bias_kernel,
        out_shape=jax.ShapeDtypeStruct((M, N), jnp.float32),
        grid_spec=pltpu.PrefetchScalarGridSpec(
            num_scalar_prefetch=0,
            grid=(N // tn, K // tk),
            in_specs=[
                pl.BlockSpec((M, tk), lambda j, k: (0, k)),
                pl.BlockSpec((tk, tn), lambda j, k: (k, j)),
                pl.BlockSpec((1, tn), lambda j, k: (0, j)),
            ],
            out_specs=pl.BlockSpec((M, tn), lambda j, k: (0, j)),
            scratch_shapes=[pltpu.VMEM((M, tn), jnp.float32)],
        ),
        compiler_params=pltpu.CompilerParams(
            dimension_semantics=("parallel", "arbitrary")),
    )(x16, w16, bias2d)


# --------------------------------------------------------------------------
# Glue (layout plumbing in plain JAX, all channels-last)
# --------------------------------------------------------------------------
def im2col_3x3_nhwc(x):
    # x: (B, H, W, C) -> (B*H*W, C*9), ordered (c major, kernel-pos minor) to
    # match the reshaped PyTorch weight (Cout, Cin, 3, 3) -> (Cout, Cin*9).
    # TODO(synk): at larger resolutions move im2col into the matmul kernel
    # (9 shifted accumulations) instead of materializing the 9x blow-up in HBM.
    B, H, W, C = x.shape
    xp = jnp.pad(x, ((0, 0), (1, 1), (1, 1), (0, 0)))
    cols = [xp[:, ky:ky + H, kx:kx + W, :] for ky in range(3) for kx in range(3)]
    patches = jnp.stack(cols, axis=-1)               # (B, H, W, C, 9)
    return patches.reshape(B * H * W, C * 9)


def conv3x3_nhwc(x, w_pt, b, *, tk=None, tn=None, pad_cout_to=None):
    # PyTorch Conv2d(kernel_size=3, stride=1, padding=1), channels-last I/O.
    # w_pt: PyTorch layout (Cout, Cin, 3, 3).
    B, H, W, C = x.shape
    Cout = w_pt.shape[0]
    patches = im2col_3x3_nhwc(x)                     # (B*H*W, Cin*9)
    wm = w_pt.reshape(Cout, C * 9).T                 # (Cin*9, Cout)
    bb = b
    if pad_cout_to is not None and pad_cout_to > Cout:
        # Lane-dense output slab: pad Cout to a full 128-lane width, slice after.
        wm = jnp.pad(wm, ((0, 0), (0, pad_cout_to - Cout)))
        bb = jnp.pad(b, (0, pad_cout_to - Cout))
        y = matmul_bias(patches, wm, bb, tk=tk, tn=tn)[:, :Cout]
    else:
        y = matmul_bias(patches, wm, bb, tk=tk, tn=tn)
    return y.reshape(B, H, W, Cout)


def _bilinear_matrix(n_in):
    # interpolation matrix for nn.Upsample(scale_factor=2, bilinear, align_corners=True)
    n_out = 2 * n_in
    if n_in == 1:
        return jnp.ones((n_out, 1), jnp.float32)
    coord = np.arange(n_out, dtype=np.float64) * (n_in - 1) / (n_out - 1)
    i0 = np.clip(np.floor(coord).astype(np.int64), 0, n_in - 1)
    i1 = np.minimum(i0 + 1, n_in - 1)
    w1 = coord - i0
    w0 = 1.0 - w1
    A = np.zeros((n_out, n_in), dtype=np.float64)
    A[np.arange(n_out), i0] += w0
    A[np.arange(n_out), i1] += w1
    return jnp.asarray(A, jnp.float32)


def upsample2x_bilinear_align_corners(x):
    # x: (B, H, W, C) -> (B, 2H, 2W, C), channels-last
    B, H, W, C = x.shape
    Ah = _bilinear_matrix(H)
    Aw = _bilinear_matrix(W)
    y = jnp.einsum('oh,bhwc->bowc', Ah, x)
    y = jnp.einsum('pw,bowc->bopc', Aw, y)
    return y


def patch_embed(x, w, b, *, patch=32, tk=1024, tn=1024):
    # Deterministic stand-in for the truncated ResNet-50 backbone:
    # (B, 3, H, W) NCHW -> (B, H/patch, W/patch, 2048) channels-last.
    B, C, H, W = x.shape
    hp, wp = H // patch, W // patch
    p = x.reshape(B, C, hp, patch, wp, patch)
    p = p.transpose(0, 2, 4, 1, 3, 5).reshape(B * hp * wp, C * patch * patch)
    y = matmul_bias(p, w, b, tk=tk, tn=tn)           # (B*hw, 2048)
    return y.reshape(B, hp, wp, w.shape[1])


# --------------------------------------------------------------------------
# Full afnet forward
# --------------------------------------------------------------------------
def afnet_forward(params, x):
    rgb = x[:, :3]
    thermal = x[:, 3:]
    thermal3 = jnp.concatenate([thermal, thermal, thermal], axis=1)

    image = patch_embed(rgb, params['rgb_w'], params['rgb_b'])     # (B, h, w, 2048)
    therm = patch_embed(thermal3, params['th_w'], params['th_b'])  # (B, h, w, 2048)

    B, h, w, C = image.shape
    image_mat = image.reshape(B, h * w, C)
    thermal_mat = therm.reshape(B, h * w, C)

    # bmm / softmax / bmm cross-attention fusion (Pallas kernel, channels-on-lanes)
    out = cross_attention_fusion(image_mat, thermal_mat)           # (B, hw, C)
    out = out.reshape(B, h, w, C)

    out = upsample2x_bilinear_align_corners(out)
    out = conv3x3_nhwc(out, params['conv1_w'], params['conv1_b'], tk=2048, tn=256)
    out = upsample2x_bilinear_align_corners(out)
    out = conv3x3_nhwc(out, params['conv2_w'], params['conv2_b'], tk=1536, tn=128)
    out = upsample2x_bilinear_align_corners(out)
    out = conv3x3_nhwc(out, params['conv3_w'], params['conv3_b'],
                       tk=1152, tn=128, pad_cout_to=128)
    # Single layout conversion back to PyTorch NCHW at the very end.
    return out.transpose(0, 3, 1, 2)


if __name__ == "__main__":
    n_class = 8
    B, H, W = 2, 64, 64                     # stride-32 backbone -> 2x2 feature map

    key = jax.random.PRNGKey(0)
    ks = jax.random.split(key, 11)

    def nrm(k, shape, scale=0.02):
        return scale * jax.random.normal(k, shape, jnp.float32)

    params = {
        # backbone stand-ins (stride-32 patch embeddings, 3 -> 2048)
        'rgb_w': nrm(ks[0], (3 * 32 * 32, 2048)),
        'rgb_b': nrm(ks[1], (2048,)),
        'th_w': nrm(ks[2], (3 * 32 * 32, 2048)),
        'th_b': nrm(ks[3], (2048,)),
        # afnet head convs (exact shapes from the module __init__)
        'conv1_w': nrm(ks[4], (512, 2048, 3, 3)),
        'conv1_b': nrm(ks[5], (512,)),
        'conv2_w': nrm(ks[6], (128, 512, 3, 3)),
        'conv2_b': nrm(ks[7], (128,)),
        'conv3_w': nrm(ks[8], (n_class, 128, 3, 3)),
        'conv3_b': nrm(ks[9], (n_class,)),
    }

    x = jax.random.normal(ks[10], (B, 4, H, W), jnp.float32)

    out = jax.jit(afnet_forward)(params, x)
    out = jax.block_until_ready(out)

    expected = (B, n_class, (H // 32) * 8, (W // 32) * 8)   # 3x bilinear 2x upsample
    assert out.shape == expected, (out.shape, expected)
    assert bool(jnp.isfinite(out).all())
    print("KERNEL_OK")
</pallas_src>

<mosaic_0001>
module attributes {stable_mosaic.version = 11 : i64} {
  func.func @_matmul_bias_kernel(%arg0: i32, %arg1: i32, %arg2: memref<8x1024xbf16, #tpu.memory_space<vmem>>, %arg3: memref<1024x1024xbf16, #tpu.memory_space<vmem>>, %arg4: memref<1x1024xf32, #tpu.memory_space<vmem>>, %arg5: memref<8x1024xf32, #tpu.memory_space<vmem>>, %arg6: memref<8x1024xf32, #tpu.memory_space<vmem>>) attributes {dimension_semantics = [#tpu.dimension_semantics<parallel>, #tpu.dimension_semantics<arbitrary>], iteration_bounds = array<i64: 2, 3>, scalar_prefetch = 0 : i64, scratch_operands = 1 : i64, tpu.core_type = #tpu.core_type<tc>, window_params = [{transform_indices = @transform_0, window_bounds = array<i64: 8, 1024>}, {transform_indices = @transform_1, window_bounds = array<i64: 1024, 1024>}, {transform_indices = @transform_2, window_bounds = array<i64: 1, 1024>}, {transform_indices = @transform_3, window_bounds = array<i64: 8, 1024>}]} {
    %c0_i32 = arith.constant 0 : i32
    %0 = arith.cmpi eq, %arg1, %c0_i32 : i32
    %1 = arith.extui %0 : i1 to i32
    %c0_i32_0 = arith.constant 0 : i32
    %2 = arith.cmpi ne, %1, %c0_i32_0 : i32
    scf.if %2 {
      %cst_9 = arith.constant 0.000000e+00 : f32
      %12 = vector.broadcast %cst_9 : f32 to vector<8x1024xf32>
      %c0_10 = arith.constant 0 : index
      %c0_11 = arith.constant 0 : index
      %13 = vector.load %arg6[%c0_10, %c0_11] : memref<8x1024xf32, #tpu.memory_space<vmem>>, vector<8x1024xf32>
      tpu.vector_store %arg6[%c0_10, %c0_11], %12 {strides = array<i32>} : memref<8x1024xf32, #tpu.memory_space<vmem>>, vector<8x1024xf32>,
    } else {
    }
    %c0 = arith.constant 0 : index
    %c0_1 = arith.constant 0 : index
    %3 = vector.load %arg6[%c0, %c0_1] : memref<8x1024xf32, #tpu.memory_space<vmem>>, vector<8x1024xf32>
    %c0_2 = arith.constant 0 : index
    %c0_3 = arith.constant 0 : index
    %4 = vector.load %arg2[%c0_2, %c0_3] : memref<8x1024xbf16, #tpu.memory_space<vmem>>, vector<8x1024xbf16>
    %c0_4 = arith.constant 0 : index
    %c0_5 = arith.constant 0 : index
    %5 = vector.load %arg3[%c0_4, %c0_5] : memref<1024x1024xbf16, #tpu.memory_space<vmem>>, vector<1024x1024xbf16>
    %cst = arith.constant dense<0.000000e+00> : vector<8x1024xf32>
    %6 = tpu.matmul %4, %5, %cst {dimension_numbers = #tpu.dot_dimension_numbers<[1], [0], [0], [1], [0, 0, 1, 1], [], []>} : vector<8x1024xbf16>, vector<1024x1024xbf16>, vector<8x1024xf32> -> vector<8x1024xf32>
    %7 = arith.addf %3, %6 : vector<8x1024xf32>
    %c0_6 = arith.constant 0 : index
    %c0_7 = arith.constant 0 : index
    %8 = vector.load %arg6[%c0_6, %c0_7] : memref<8x1024xf32, #tpu.memory_space<vmem>>, vector<8x1024xf32>
    tpu.vector_store %arg6[%c0_6, %c0_7], %7 {strides = array<i32>} : memref<8x1024xf32, #tpu.memory_space<vmem>>, vector<8x1024xf32>,
    %c2_i32 = arith.constant 2 : i32
    %9 = arith.cmpi eq, %arg1, %c2_i32 : i32
    %10 = arith.extui %9 : i1 to i32
    %c0_i32_8 = arith.constant 0 : i32
    %11 = arith.cmpi ne, %10, %c0_i32_8 : i32
    scf.if %11 {
      %c0_9 = arith.constant 0 : index
      %c0_10 = arith.constant 0 : index
      %12 = vector.load %arg6[%c0_9, %c0_10] : memref<8x1024xf32, #tpu.memory_space<vmem>>, vector<8x1024xf32>
      %c0_11 = arith.constant 0 : index
      %c0_12 = arith.constant 0 : index
      %13 = vector.load %arg4[%c0_11, %c0_12] : memref<1x1024xf32, #tpu.memory_space<vmem>>, vector<1x1024xf32>
      %14 = vector.broadcast %13 : vector<1x1024xf32> to vector<8x1024xf32>
      %15 = arith.addf %12, %14 : vector<8x1024xf32>
      %c0_13 = arith.constant 0 : index
      %c0_14 = arith.constant 0 : index
      %16 = vector.load %arg5[%c0_13, %c0_14] : memref<8x1024xf32, #tpu.memory_space<vmem>>, vector<8x1024xf32>
      tpu.vector_store %arg5[%c0_13, %c0_14], %15 {strides = array<i32>} : memref<8x1024xf32, #tpu.memory_space<vmem>>, vector<8x1024xf32>,
    } else {
    }
    return
  }
  func.func @transform_0(%arg0: i32, %arg1: i32) -> (i32, i32) {
    %c0_i32 = arith.constant 0 : i32
    %c0_i32_0 = arith.constant 0 : i32
    return %c0_i32, %arg1 : i32, i32
  }
  func.func @transform_1(%arg0: i32, %arg1: i32) -> (i32, i32) {
    %c0_i32 = arith.constant 0 : i32
    return %arg1, %arg0 : i32, i32
  }
  func.func @transform_2(%arg0: i32, %arg1: i32) -> (i32, i32) {
    %c0_i32 = arith.constant 0 : i32
    %c0_i32_0 = arith.constant 0 : i32
    return %c0_i32, %arg0 : i32, i32
  }
  func.func @transform_3(%arg0: i32, %arg1: i32) -> (i32, i32) {
    %c0_i32 = arith.constant 0 : i32
    %c0_i32_0 = arith.constant 0 : i32
    return %c0_i32, %arg0 : i32, i32
  }
}

module attributes {stable_mosaic.version = 11 : i64} {
  func.func @_fusion_kernel(%arg0: i32, %arg1: memref<1x4x2048xf32, #tpu.memory_space<vmem>>, %arg2: memref<1x4x2048xf32, #tpu.memory_space<vmem>>, %arg3: memref<1x4x2048xf32, #tpu.memory_space<vmem>>) attributes {dimension_semantics = [#tpu.dimension_semantics<parallel>], iteration_bounds = array<i64: 2>, scalar_prefetch = 0 : i64, scratch_operands = 0 : i64, tpu.core_type = #tpu.core_type<tc>, window_params = [{transform_indices = @transform_0, window_bounds = array<i64: 1, 4, 2048>}, {transform_indices = @transform_1, window_bounds = array<i64: 1, 4, 2048>}, {transform_indices = @transform_2, window_bounds = array<i64: 1, 4, 2048>}]} {
    %c0 = arith.constant 0 : index
    %c0_0 = arith.constant 0 : index
    %c0_1 = arith.constant 0 : index
    %0 = vector.load %arg1[%c0, %c0_0, %c0_1] : memref<1x4x2048xf32, #tpu.memory_space<vmem>>, vector<1x4x2048xf32>
    %1 = vector.shape_cast %0 : vector<1x4x2048xf32> to vector<4x2048xf32>
    %c0_2 = arith.constant 0 : index
    %c0_3 = arith.constant 0 : index
    %c0_4 = arith.constant 0 : index
    %2 = vector.load %arg2[%c0_2, %c0_3, %c0_4] : memref<1x4x2048xf32, #tpu.memory_space<vmem>>, vector<1x4x2048xf32>
    %3 = vector.shape_cast %2 : vector<1x4x2048xf32> to vector<4x2048xf32>
    %4 = arith.mulf %1, %1 : vector<4x2048xf32>
    %cst = arith.constant dense<0.000000e+00> : vector<4xf32>
    %5 = vector.multi_reduction <add>, %4, %cst [1] : vector<4x2048xf32> to vector<4xf32>
    %6 = vector.shape_cast %5 : vector<4xf32> to vector<4x1xf32>
    %7 = math.sqrt %6 : vector<4x1xf32>
    %cst_5 = arith.constant 9.99999996E-13 : f32
    %8 = vector.broadcast %cst_5 : f32 to vector<4x1xf32>
    %9 = arith.maximumf %7, %8 : vector<4x1xf32>
    %10 = vector.broadcast %9 : vector<4x1xf32> to vector<4x2048xf32>
    %11 = arith.divf %1, %10 : vector<4x2048xf32>
    %12 = arith.mulf %3, %3 : vector<4x2048xf32>
    %cst_6 = arith.constant dense<0.000000e+00> : vector<4xf32>
    %13 = vector.multi_reduction <add>, %12, %cst_6 [1] : vector<4x2048xf32> to vector<4xf32>
    %14 = vector.shape_cast %13 : vector<4xf32> to vector<4x1xf32>
    %15 = math.sqrt %14 : vector<4x1xf32>
    %cst_7 = arith.constant 9.99999996E-13 : f32
    %16 = vector.broadcast %cst_7 : f32 to vector<4x1xf32>
    %17 = arith.maximumf %15, %16 : vector<4x1xf32>
    %18 = vector.broadcast %17 : vector<4x1xf32> to vector<4x2048xf32>
    %19 = arith.divf %3, %18 : vector<4x2048xf32>
    %cst_8 = arith.constant dense<0.000000e+00> : vector<4x4xf32>
    %20 = tpu.matmul %11, %19, %cst_8 {dimension_numbers = #tpu.dot_dimension_numbers<[1], [1], [0], [0], [0, 0, 1, 0], [], []>} : vector<4x2048xf32>, vector<4x2048xf32>, vector<4x4xf32> -> vector<4x4xf32>
    %cst_9 = arith.constant dense<0xFF800000> : vector<4xf32>
    %21 = vector.multi_reduction <maximumf>, %20, %cst_9 [1] : vector<4x4xf32> to vector<4xf32>
    %cst_10 = arith.constant 0xFF800000 : f32
    %22 = vector.broadcast %cst_10 : f32 to vector<4xf32>
    %23 = arith.maximumf %22, %21 : vector<4xf32>
    %24 = vector.shape_cast %23 : vector<4xf32> to vector<4x1xf32>
    %25 = vector.broadcast %24 : vector<4x1xf32> to vector<4x4xf32>
    %26 = arith.subf %20, %25 : vector<4x4xf32>
    %27 = math.exp %26 : vector<4x4xf32>
    %cst_11 = arith.constant dense<0.000000e+00> : vector<4xf32>
    %28 = vector.multi_reduction <add>, %27, %cst_11 [1] : vector<4x4xf32> to vector<4xf32>
    %29 = vector.shape_cast %28 : vector<4xf32> to vector<4x1xf32>
    %30 = vector.broadcast %29 : vector<4x1xf32> to vector<4x4xf32>
    %31 = arith.divf %27, %30 : vector<4x4xf32>
    %cst_12 = arith.constant dense<0xFF800000> : vector<4xf32>
    %32 = vector.multi_reduction <maximumf>, %20, %cst_12 [0] : vector<4x4xf32> to vector<4xf32>
    %cst_13 = arith.constant 0xFF800000 : f32
    %33 = vector.broadcast %cst_13 : f32 to vector<4xf32>
    %34 = arith.maximumf %33, %32 : vector<4xf32>
    %35 = vector.shape_cast %34 : vector<4xf32> to vector<1x4xf32>
    %36 = vector.broadcast %35 : vector<1x4xf32> to vector<4x4xf32>
    %37 = arith.subf %20, %36 : vector<4x4xf32>
    %38 = math.exp %37 : vector<4x4xf32>
    %cst_14 = arith.constant dense<0.000000e+00> : vector<4xf32>
    %39 = vector.multi_reduction <add>, %38, %cst_14 [0] : vector<4x4xf32> to vector<4xf32>
    %40 = vector.shape_cast %39 : vector<4xf32> to vector<1x4xf32>
    %41 = vector.broadcast %40 : vector<1x4xf32> to vector<4x4xf32>
    %42 = arith.divf %38, %41 : vector<4x4xf32>
    %cst_15 = arith.constant dense<0.000000e+00> : vector<4x2048xf32>
    %43 = tpu.matmul %31, %3, %cst_15 {dimension_numbers = #tpu.dot_dimension_numbers<[1], [0], [0], [1], [0, 0, 1, 1], [], []>} : vector<4x4xf32>, vector<4x2048xf32>, vector<4x2048xf32> -> vector<4x2048xf32>
    %cst_16 = arith.constant dense<0.000000e+00> : vector<4x2048xf32>
    %44 = tpu.matmul %42, %1, %cst_16 {dimension_numbers = #tpu.dot_dimension_numbers<[0], [0], [1], [1], [0, 1, 1, 1], [], []>} : vector<4x4xf32>, vector<4x2048xf32>, vector<4x2048xf32> -> vector<4x2048xf32>
    %45 = arith.addf %43, %1 : vector<4x2048xf32>
    %46 = arith.addf %44, %3 : vector<4x2048xf32>
    %47 = arith.addf %45, %46 : vector<4x2048xf32>
    %c0_17 = arith.constant 0 : index
    %c0_18 = arith.constant 0 : index
    %c0_19 = arith.constant 0 : index
    %48 = vector.load %arg3[%c0_17, %c0_18, %c0_19] : memref<1x4x2048xf32, #tpu.memory_space<vmem>>, vector<1x4x2048xf32>
    %49 = vector.shape_cast %48 : vector<1x4x2048xf32> to vector<4x2048xf32>
    %50 = vector.shape_cast %47 : vector<4x2048xf32> to vector<1x4x2048xf32>
    tpu.vector_store %arg3[%c0_17, %c0_18, %c0_19], %50 {strides = array<i32>} : memref<1x4x2048xf32, #tpu.memory_space<vmem>>, vector<1x4x2048xf32>,
    return
  }
  func.func @transform_0(%arg0: i32) -> (i32, i32, i32) {
    %c0_i32 = arith.constant 0 : i32
    %c0_i32_0 = arith.constant 0 : i32
    %c0_i32_1 = arith.constant 0 : i32
    return %arg0, %c0_i32, %c0_i32_0 : i32, i32, i32
  }
  func.func @transform_1(%arg0: i32) -> (i32, i32, i32) {
    %c0_i32 = arith.constant 0 : i32
    %c0_i32_0 = arith.constant 0 : i32
    %c0_i32_1 = arith.constant 0 : i32
    return %arg0, %c0_i32, %c0_i32_0 : i32, i32, i32
  }
  func.func @transform_2(%arg0: i32) -> (i32, i32, i32) {
    %c0_i32 = arith.constant 0 : i32
    %c0_i32_0 = arith.constant 0 : i32
    %c0_i32_1 = arith.constant 0 : i32
    return %arg0, %c0_i32, %c0_i32_0 : i32, i32, i32
  }
}

module attributes {stable_mosaic.version = 11 : i64} {
  func.func @_matmul_bias_kernel(%arg0: i32, %arg1: i32, %arg2: memref<32x2048xbf16, #tpu.memory_space<vmem>>, %arg3: memref<2048x256xbf16, #tpu.memory_space<vmem>>, %arg4: memref<1x256xf32, #tpu.memory_space<vmem>>, %arg5: memref<32x256xf32, #tpu.memory_space<vmem>>, %arg6: memref<32x256xf32, #tpu.memory_space<vmem>>) attributes {dimension_semantics = [#tpu.dimension_semantics<parallel>, #tpu.dimension_semantics<arbitrary>], iteration_bounds = array<i64: 2, 9>, scalar_prefetch = 0 : i64, scratch_operands = 1 : i64, tpu.core_type = #tpu.core_type<tc>, window_params = [{transform_indices = @transform_0, window_bounds = array<i64: 32, 2048>}, {transform_indices = @transform_1, window_bounds = array<i64: 2048, 256>}, {transform_indices = @transform_2, window_bounds = array<i64: 1, 256>}, {transform_indices = @transform_3, window_bounds = array<i64: 32, 256>}]} {
    %c0_i32 = arith.constant 0 : i32
    %0 = arith.cmpi eq, %arg1, %c0_i32 : i32
    %1 = arith.extui %0 : i1 to i32
    %c0_i32_0 = arith.constant 0 : i32
    %2 = arith.cmpi ne, %1, %c0_i32_0 : i32
    scf.if %2 {
      %cst_9 = arith.constant 0.000000e+00 : f32
      %12 = vector.broadcast %cst_9 : f32 to vector<32x256xf32>
      %c0_10 = arith.constant 0 : index
      %c0_11 = arith.constant 0 : index
      %13 = vector.load %arg6[%c0_10, %c0_11] : memref<32x256xf32, #tpu.memory_space<vmem>>, vector<32x256xf32>
      tpu.vector_store %arg6[%c0_10, %c0_11], %12 {strides = array<i32>} : memref<32x256xf32, #tpu.memory_space<vmem>>, vector<32x256xf32>,
    } else {
    }
    %c0 = arith.constant 0 : index
    %c0_1 = arith.constant 0 : index
    %3 = vector.load %arg6[%c0, %c0_1] : memref<32x256xf32, #tpu.memory_space<vmem>>, vector<32x256xf32>
    %c0_2 = arith.constant 0 : index
    %c0_3 = arith.constant 0 : index
    %4 = vector.load %arg2[%c0_2, %c0_3] : memref<32x2048xbf16, #tpu.memory_space<vmem>>, vector<32x2048xbf16>
    %c0_4 = arith.constant 0 : index
    %c0_5 = arith.constant 0 : index
    %5 = vector.load %arg3[%c0_4, %c0_5] : memref<2048x256xbf16, #tpu.memory_space<vmem>>, vector<2048x256xbf16>
    %cst = arith.constant dense<0.000000e+00> : vector<32x256xf32>
    %6 = tpu.matmul %4, %5, %cst {dimension_numbers = #tpu.dot_dimension_numbers<[1], [0], [0], [1], [0, 0, 1, 1], [], []>} : vector<32x2048xbf16>, vector<2048x256xbf16>, vector<32x256xf32> -> vector<32x256xf32>
    %7 = arith.addf %3, %6 : vector<32x256xf32>
    %c0_6 = arith.constant 0 : index
    %c0_7 = arith.constant 0 : index
    %8 = vector.load %arg6[%c0_6, %c0_7] : memref<32x256xf32, #tpu.memory_space<vmem>>, vector<32x256xf32>
    tpu.vector_store %arg6[%c0_6, %c0_7], %7 {strides = array<i32>} : memref<32x256xf32, #tpu.memory_space<vmem>>, vector<32x256xf32>,
    %c8_i32 = arith.constant 8 : i32
    %9 = arith.cmpi eq, %arg1, %c8_i32 : i32
    %10 = arith.extui %9 : i1 to i32
    %c0_i32_8 = arith.constant 0 : i32
    %11 = arith.cmpi ne, %10, %c0_i32_8 : i32
    scf.if %11 {
      %c0_9 = arith.constant 0 : index
      %c0_10 = arith.constant 0 : index
      %12 = vector.load %arg6[%c0_9, %c0_10] : memref<32x256xf32, #tpu.memory_space<vmem>>, vector<32x256xf32>
      %c0_11 = arith.constant 0 : index
      %c0_12 = arith.constant 0 : index
      %13 = vector.load %arg4[%c0_11, %c0_12] : memref<1x256xf32, #tpu.memory_space<vmem>>, vector<1x256xf32>
      %14 = vector.broadcast %13 : vector<1x256xf32> to vector<32x256xf32>
      %15 = arith.addf %12, %14 : vector<32x256xf32>
      %c0_13 = arith.constant 0 : index
      %c0_14 = arith.constant 0 : index
      %16 = vector.load %arg5[%c0_13, %c0_14] : memref<32x256xf32, #tpu.memory_space<vmem>>, vector<32x256xf32>
      tpu.vector_store %arg5[%c0_13, %c0_14], %15 {strides = array<i32>} : memref<32x256xf32, #tpu.memory_space<vmem>>, vector<32x256xf32>,
    } else {
    }
    return
  }
  func.func @transform_0(%arg0: i32, %arg1: i32) -> (i32, i32) {
    %c0_i32 = arith.constant 0 : i32
    %c0_i32_0 = arith.constant 0 : i32
    return %c0_i32, %arg1 : i32, i32
  }
  func.func @transform_1(%arg0: i32, %arg1: i32) -> (i32, i32) {
    %c0_i32 = arith.constant 0 : i32
    return %arg1, %arg0 : i32, i32
  }
  func.func @transform_2(%arg0: i32, %arg1: i32) -> (i32, i32) {
    %c0_i32 = arith.constant 0 : i32
    %c0_i32_0 = arith.constant 0 : i32
    return %c0_i32, %arg0 : i32, i32
  }
  func.func @transform_3(%arg0: i32, %arg1: i32) -> (i32, i32) {
    %c0_i32 = arith.constant 0 : i32
    %c0_i32_0 = arith.constant 0 : i32
    return %c0_i32, %arg0 : i32, i32
  }
}

module attributes {stable_mosaic.version = 11 : i64} {
  func.func @_matmul_bias_kernel(%arg0: i32, %arg1: i32, %arg2: memref<128x1536xbf16, #tpu.memory_space<vmem>>, %arg3: memref<1536x128xbf16, #tpu.memory_space<vmem>>, %arg4: memref<1x128xf32, #tpu.memory_space<vmem>>, %arg5: memref<128x128xf32, #tpu.memory_space<vmem>>, %arg6: memref<128x128xf32, #tpu.memory_space<vmem>>) attributes {dimension_semantics = [#tpu.dimension_semantics<parallel>, #tpu.dimension_semantics<arbitrary>], iteration_bounds = array<i64: 1, 3>, scalar_prefetch = 0 : i64, scratch_operands = 1 : i64, tpu.core_type = #tpu.core_type<tc>, window_params = [{transform_indices = @transform_0, window_bounds = array<i64: 128, 1536>}, {transform_indices = @transform_1, window_bounds = array<i64: 1536, 128>}, {transform_indices = @transform_2, window_bounds = array<i64: 1, 128>}, {transform_indices = @transform_3, window_bounds = array<i64: 128, 128>}]} {
    %c0_i32 = arith.constant 0 : i32
    %0 = arith.cmpi eq, %arg1, %c0_i32 : i32
    %1 = arith.extui %0 : i1 to i32
    %c0_i32_0 = arith.constant 0 : i32
    %2 = arith.cmpi ne, %1, %c0_i32_0 : i32
    scf.if %2 {
      %cst_9 = arith.constant 0.000000e+00 : f32
      %12 = vector.broadcast %cst_9 : f32 to vector<128x128xf32>
      %c0_10 = arith.constant 0 : index
      %c0_11 = arith.constant 0 : index
      %13 = vector.load %arg6[%c0_10, %c0_11] : memref<128x128xf32, #tpu.memory_space<vmem>>, vector<128x128xf32>
      tpu.vector_store %arg6[%c0_10, %c0_11], %12 {strides = array<i32>} : memref<128x128xf32, #tpu.memory_space<vmem>>, vector<128x128xf32>,
    } else {
    }
    %c0 = arith.constant 0 : index
    %c0_1 = arith.constant 0 : index
    %3 = vector.load %arg6[%c0, %c0_1] : memref<128x128xf32, #tpu.memory_space<vmem>>, vector<128x128xf32>
    %c0_2 = arith.constant 0 : index
    %c0_3 = arith.constant 0 : index
    %4 = vector.load %arg2[%c0_2, %c0_3] : memref<128x1536xbf16, #tpu.memory_space<vmem>>, vector<128x1536xbf16>
    %c0_4 = arith.constant 0 : index
    %c0_5 = arith.constant 0 : index
    %5 = vector.load %arg3[%c0_4, %c0_5] : memref<1536x128xbf16, #tpu.memory_space<vmem>>, vector<1536x128xbf16>
    %cst = arith.constant dense<0.000000e+00> : vector<128x128xf32>
    %6 = tpu.matmul %4, %5, %cst {dimension_numbers = #tpu.dot_dimension_numbers<[1], [0], [0], [1], [0, 0, 1, 1], [], []>} : vector<128x1536xbf16>, vector<1536x128xbf16>, vector<128x128xf32> -> vector<128x128xf32>
    %7 = arith.addf %3, %6 : vector<128x128xf32>
    %c0_6 = arith.constant 0 : index
    %c0_7 = arith.constant 0 : index
    %8 = vector.load %arg6[%c0_6, %c0_7] : memref<128x128xf32, #tpu.memory_space<vmem>>, vector<128x128xf32>
    tpu.vector_store %arg6[%c0_6, %c0_7], %7 {strides = array<i32>} : memref<128x128xf32, #tpu.memory_space<vmem>>, vector<128x128xf32>,
    %c2_i32 = arith.constant 2 : i32
    %9 = arith.cmpi eq, %arg1, %c2_i32 : i32
    %10 = arith.extui %9 : i1 to i32
    %c0_i32_8 = arith.constant 0 : i32
    %11 = arith.cmpi ne, %10, %c0_i32_8 : i32
    scf.if %11 {
      %c0_9 = arith.constant 0 : index
      %c0_10 = arith.constant 0 : index
      %12 = vector.load %arg6[%c0_9, %c0_10] : memref<128x128xf32, #tpu.memory_space<vmem>>, vector<128x128xf32>
      %c0_11 = arith.constant 0 : index
      %c0_12 = arith.constant 0 : index
      %13 = vector.load %arg4[%c0_11, %c0_12] : memref<1x128xf32, #tpu.memory_space<vmem>>, vector<1x128xf32>
      %14 = vector.broadcast %13 : vector<1x128xf32> to vector<128x128xf32>
      %15 = arith.addf %12, %14 : vector<128x128xf32>
      %c0_13 = arith.constant 0 : index
      %c0_14 = arith.constant 0 : index
      %16 = vector.load %arg5[%c0_13, %c0_14] : memref<128x128xf32, #tpu.memory_space<vmem>>, vector<128x128xf32>
      tpu.vector_store %arg5[%c0_13, %c0_14], %15 {strides = array<i32>} : memref<128x128xf32, #tpu.memory_space<vmem>>, vector<128x128xf32>,
    } else {
    }
    return
  }
  func.func @transform_0(%arg0: i32, %arg1: i32) -> (i32, i32) {
    %c0_i32 = arith.constant 0 : i32
    %c0_i32_0 = arith.constant 0 : i32
    return %c0_i32, %arg1 : i32, i32
  }
  func.func @transform_1(%arg0: i32, %arg1: i32) -> (i32, i32) {
    %c0_i32 = arith.constant 0 : i32
    return %arg1, %arg0 : i32, i32
  }
  func.func @transform_2(%arg0: i32, %arg1: i32) -> (i32, i32) {
    %c0_i32 = arith.constant 0 : i32
    %c0_i32_0 = arith.constant 0 : i32
    return %c0_i32, %arg0 : i32, i32
  }
  func.func @transform_3(%arg0: i32, %arg1: i32) -> (i32, i32) {
    %c0_i32 = arith.constant 0 : i32
    %c0_i32_0 = arith.constant 0 : i32
    return %c0_i32, %arg0 : i32, i32
  }
}

module attributes {stable_mosaic.version = 11 : i64} {
  func.func @_matmul_bias_kernel(%arg0: i32, %arg1: i32, %arg2: memref<512x1152xbf16, #tpu.memory_space<vmem>>, %arg3: memref<1152x128xbf16, #tpu.memory_space<vmem>>, %arg4: memref<1x128xf32, #tpu.memory_space<vmem>>, %arg5: memref<512x128xf32, #tpu.memory_space<vmem>>, %arg6: memref<512x128xf32, #tpu.memory_space<vmem>>) attributes {dimension_semantics = [#tpu.dimension_semantics<parallel>, #tpu.dimension_semantics<arbitrary>], iteration_bounds = array<i64: 1, 1>, scalar_prefetch = 0 : i64, scratch_operands = 1 : i64, tpu.core_type = #tpu.core_type<tc>, window_params = [{transform_indices = @transform_0, window_bounds = array<i64: 512, 1152>}, {transform_indices = @transform_1, window_bounds = array<i64: 1152, 128>}, {transform_indices = @transform_2, window_bounds = array<i64: 1, 128>}, {transform_indices = @transform_3, window_bounds = array<i64: 512, 128>}]} {
    %c0_i32 = arith.constant 0 : i32
    %0 = arith.cmpi eq, %arg1, %c0_i32 : i32
    %1 = arith.extui %0 : i1 to i32
    %c0_i32_0 = arith.constant 0 : i32
    %2 = arith.cmpi ne, %1, %c0_i32_0 : i32
    scf.if %2 {
      %cst_10 = arith.constant 0.000000e+00 : f32
      %12 = vector.broadcast %cst_10 : f32 to vector<512x128xf32>
      %c0_11 = arith.constant 0 : index
      %c0_12 = arith.constant 0 : index
      %13 = vector.load %arg6[%c0_11, %c0_12] : memref<512x128xf32, #tpu.memory_space<vmem>>, vector<512x128xf32>
      tpu.vector_store %arg6[%c0_11, %c0_12], %12 {strides = array<i32>} : memref<512x128xf32, #tpu.memory_space<vmem>>, vector<512x128xf32>,
    } else {
    }
    %c0 = arith.constant 0 : index
    %c0_1 = arith.constant 0 : index
    %3 = vector.load %arg6[%c0, %c0_1] : memref<512x128xf32, #tpu.memory_space<vmem>>, vector<512x128xf32>
    %c0_2 = arith.constant 0 : index
    %c0_3 = arith.constant 0 : index
    %4 = vector.load %arg2[%c0_2, %c0_3] : memref<512x1152xbf16, #tpu.memory_space<vmem>>, vector<512x1152xbf16>
    %c0_4 = arith.constant 0 : index
    %c0_5 = arith.constant 0 : index
    %5 = vector.load %arg3[%c0_4, %c0_5] : memref<1152x128xbf16, #tpu.memory_space<vmem>>, vector<1152x128xbf16>
    %cst = arith.constant dense<0.000000e+00> : vector<512x128xf32>
    %6 = tpu.matmul %4, %5, %cst {dimension_numbers = #tpu.dot_dimension_numbers<[1], [0], [0], [1], [0, 0, 1, 1], [], []>} : vector<512x1152xbf16>, vector<1152x128xbf16>, vector<512x128xf32> -> vector<512x128xf32>
    %7 = arith.addf %3, %6 : vector<512x128xf32>
    %c0_6 = arith.constant 0 : index
    %c0_7 = arith.constant 0 : index
    %8 = vector.load %arg6[%c0_6, %c0_7] : memref<512x128xf32, #tpu.memory_space<vmem>>, vector<512x128xf32>
    tpu.vector_store %arg6[%c0_6, %c0_7], %7 {strides = array<i32>} : memref<512x128xf32, #tpu.memory_space<vmem>>, vector<512x128xf32>,
    %c0_i32_8 = arith.constant 0 : i32
    %9 = arith.cmpi eq, %arg1, %c0_i32_8 : i32
    %10 = arith.extui %9 : i1 to i32
    %c0_i32_9 = arith.constant 0 : i32
    %11 = arith.cmpi ne, %10, %c0_i32_9 : i32
    scf.if %11 {
      %c0_10 = arith.constant 0 : index
      %c0_11 = arith.constant 0 : index
      %12 = vector.load %arg6[%c0_10, %c0_11] : memref<512x128xf32, #tpu.memory_space<vmem>>, vector<512x128xf32>
      %c0_12 = arith.constant 0 : index
      %c0_13 = arith.constant 0 : index
      %13 = vector.load %arg4[%c0_12, %c0_13] : memref<1x128xf32, #tpu.memory_space<vmem>>, vector<1x128xf32>
      %14 = vector.broadcast %13 : vector<1x128xf32> to vector<512x128xf32>
      %15 = arith.addf %12, %14 : vector<512x128xf32>
      %c0_14 = arith.constant 0 : index
      %c0_15 = arith.constant 0 : index
      %16 = vector.load %arg5[%c0_14, %c0_15] : memref<512x128xf32, #tpu.memory_space<vmem>>, vector<512x128xf32>
      tpu.vector_store %arg5[%c0_14, %c0_15], %15 {strides = array<i32>} : memref<512x128xf32, #tpu.memory_space<vmem>>, vector<512x128xf32>,
    } else {
    }
    return
  }
  func.func @transform_0(%arg0: i32, %arg1: i32) -> (i32, i32) {
    %c0_i32 = arith.constant 0 : i32
    %c0_i32_0 = arith.constant 0 : i32
    return %c0_i32, %arg1 : i32, i32
  }
  func.func @transform_1(%arg0: i32, %arg1: i32) -> (i32, i32) {
    %c0_i32 = arith.constant 0 : i32
    return %arg1, %arg0 : i32, i32
  }
  func.func @transform_2(%arg0: i32, %arg1: i32) -> (i32, i32) {
    %c0_i32 = arith.constant 0 : i32
    %c0_i32_0 = arith.constant 0 : i32
    return %c0_i32, %arg0 : i32, i32
  }
  func.func @transform_3(%arg0: i32, %arg1: i32) -> (i32, i32) {
    %c0_i32 = arith.constant 0 : i32
    %c0_i32_0 = arith.constant 0 : i32
    return %c0_i32, %arg0 : i32, i32
  }
}

</mosaic_0001>

<bundles_post_ra>
// kernel: afnet_forward.6
= control target key start
LH: loop header
LB: loop body
LE: loop exit
PB: predicated region body
PF: predicated region fallthrough
CT: control target
= control target key end

     0   :  { %s5921_s12 = smov 0   ;;  %s5923_s13 = smov 0   ;;  %s7669_s0 = inlined_call_operand.vmem [shape: bf16[8,3072], index: 0, kind: input, shape index: {}]   ;;  %s7670_s1 = inlined_call_operand.vmem [shape: bf16[3072,2048], index: 1, kind: input, shape index: {}]   ;;  %s7671_s2 = inlined_call_operand.vmem [shape: f32[1,2048], index: 2, kind: input, shape index: {}]   ;;  %s7672_s3 = inlined_call_operand.vmem [shape: f32[8,2048], index: 3, kind: output, shape index: {}]  }
   0x1   :  { %s5925_s14 = smov 0   ;;  %s5927_s15 = smov 0  }
   0x2   :  { %s5929_s16 = smov 0   ;;  %s5931_s17 = smov 0  }
   0x3   :  { %s5933_s18 = smov 0  }
   0x4 LB: > { %s22_s19 = sadd.s32 1, %s5890_s16  ;;  %s25_s20 = sadd.s32 1, %s5894_s17  ;;  %s5898_s18 = sphi %s5933_s18, %s13_s18   ;;  %s5894_s17 = sphi %s5931_s17, %s7678_s17   ;;  %s5890_s16 = sphi %s5929_s16, %s7677_s16   ;;  %s5886_s15 = sphi %s5927_s15, %s7676_s15   ;;  %s5882_s14 = sphi %s5925_s14, %s7675_s14   ;;  %s5878_s13 = sphi %s5923_s13, %s7674_s13   ;;  %s5874_s12 = sphi %s5921_s12, %s7673_s12  }
   0x5   : > { %p23_p0 = scmp.ge.s32.totalorder %s22_s19, 3  ;;  %p67_p1 = scmp.ne.s32.totalorder %s5878_s13, %s5874_s12 }
   0x6   : > { %p68_p2 = scmp.eq.s32.totalorder %s5898_s18, 0  ;;  %s60_s24 = sadd.s32 1, %s5878_s13 }
   0x7   : > { %s7680_s19 = smov (%p23_p0, %s22_s19), 0  ;;  %s7682_s20 = smov (!%p23_p0, %s25_s20), %s5894_s17 }
   0x8   : > { %p69_p3 = por %p68_p2, %p67_p1  ;;  %p27_p4 = scmp.ge.s32.totalorder %s7682_s20, 2 }
   0x9   : > { %s55_s21 = ssub.s32 %s5890_s16, %s7680_s19  ;;  %p5241_p6 = scmp.ge.s32.totalorder %s5898_s18, 6 }
   0xa   : > { %s7684_s20 = smov (%p27_p4, %s7682_s20), 0 }
   0xb   : > { %s56_s22 = ssub.s32 %s5894_s17, %s7684_s20  ;;  %145 = sbr.rel (%p5241_p6) target bundleno = 281 (0x119), region = 16 }
   0xc   : > { %s57_s23 = sor.u32 %s56_s22, %s55_s21 }
   0xd   : > { %p58_p5 = scmp.eq.s32.totalorder %s57_s23, 0 }
   0xf   : > { %s5972_s25 = scalar_select %p58_p5, %s5878_s13, %s60_s24  }
  0x12   : > { %157 = sbr.rel (!%p69_p3) target bundleno = 281 (0x119), region = 24  ;;  %s159_s26 = sand.u32 (%p69_p3), 1, %s5878_s13  }
  0x13   : > { %s5244_s27 = sshll.u32 (%p69_p3), %s5894_s17, 3  ;;  %s5242_s28 = sshll.u32 (%p69_p3), %s159_s26, 12 }
  0x14   : > { %s5778_s29 = sshll.u32 (%p69_p3), %s5890_s16, 11  ;;  %s5986_s8 = scalar_lea.vmem (%p69_p3), [#allocation3], %s5242_s28 }
  0x15   : > { %s165_s30 = sadd.s32 (%p69_p3), %s5778_s29, %s5244_s27 }
  0x16   : > { %s5246_s4 = sshll.u32 (%p69_p3), %s165_s30, 2 }
  0x17   : > { %s5981_s7 = scalar_lea.vmem (%p69_p3), %s7670_s1, %s5246_s4 }
  0x18   : > { %v180_v0 = vld [vmem:[%s5981_s7] sm:$0xff] (%p69_p3)  ;;  %v182_v1 = vld [vmem:[%s5981_s7 + $0x8] sm:$0xff] (%p69_p3)  ;;  %v184_v2 = vld [vmem:[%s5981_s7 + $0x10] sm:$0xff] (%p69_p3) }
  0x19   : > { %181 = vst [vmem:[%s5986_s8] sm:$0xff] %v180_v0  ;;  %183 = vst [vmem:[%s5986_s8 + $0x8] sm:$0xff] %v182_v1  ;;  %v186_v3 = vld [vmem:[%s5981_s7 + $0x18] sm:$0xff]  ;;  %v188_v4 = vld [vmem:[%s5981_s7 + $0x40] sm:$0xff] }
  0x1a   : > { %185 = vst [vmem:[%s5986_s8 + $0x10] sm:$0xff] %v184_v2  ;;  %v190_v5 = vld [vmem:[%s5981_s7 + $0x48] sm:$0xff]  ;;  %187 = vst [vmem:[%s5986_s8 + $0x18] sm:$0xff] %v186_v3  ;;  %v192_v6 = vld [vmem:[%s5981_s7 + $0x50] sm:$0xff] }
  0x1b   : > { %189 = vst [vmem:[%s5986_s8 + $0x20] sm:$0xff] %v188_v4  ;;  %191 = vst [vmem:[%s5986_s8 + $0x28] sm:$0xff] %v190_v5  ;;  %v194_v7 = vld [vmem:[%s5981_s7 + $0x58] sm:$0xff]  ;;  %v196_v8 = vld [vmem:[%s5981_s7 + $0x80] sm:$0xff] }
  0x1c   : > { %193 = vst [vmem:[%s5986_s8 + $0x30] sm:$0xff] %v192_v6  ;;  %195 = vst [vmem:[%s5986_s8 + $0x38] sm:$0xff] %v194_v7  ;;  %v198_v9 = vld [vmem:[%s5981_s7 + $0x88] sm:$0xff]  ;;  %v200_v10 = vld [vmem:[%s5981_s7 + $0x90] sm:$0xff] }
  0x1d   : > { %197 = vst [vmem:[%s5986_s8 + $0x40] sm:$0xff] %v196_v8  ;;  %v202_v11 = vld [vmem:[%s5981_s7 + $0x98] sm:$0xff]  ;;  %199 = vst [vmem:[%s5986_s8 + $0x48] sm:$0xff] %v198_v9  ;;  %v204_v12 = vld [vmem:[%s5981_s7 + $0xc0] sm:$0xff] }
  0x1e   : > { %201 = vst [vmem:[%s5986_s8 + $0x50] sm:$0xff] %v200_v10  ;;  %203 = vst [vmem:[%s5986_s8 + $0x58] sm:$0xff] %v202_v11  ;;  %v206_v13 = vld [vmem:[%s5981_s7 + $0xc8] sm:$0xff]  ;;  %v208_v14 = vld [vmem:[%s5981_s7 + $0xd0] sm:$0xff] }
  0x1f   : > { %205 = vst [vmem:[%s5986_s8 + $0x60] sm:$0xff] %v204_v12  ;;  %207 = vst [vmem:[%s5986_s8 + $0x68] sm:$0xff] %v206_v13  ;;  %v210_v15 = vld [vmem:[%s5981_s7 + $0xd8] sm:$0xff]  ;;  %v212_v16 = vld [vmem:[%s5981_s7 + $0x100] sm:$0xff] }
  0x20   : > { %209 = vst [vmem:[%s5986_s8 + $0x70] sm:$0xff] %v208_v14  ;;  %v214_v17 = vld [vmem:[%s5981_s7 + $0x108] sm:$0xff]  ;;  %211 = vst [vmem:[%s5986_s8 + $0x78] sm:$0xff] %v210_v15  ;;  %v216_v18 = vld [vmem:[%s5981_s7 + $0x110] sm:$0xff] }
  0x21   : > { %213 = vst [vmem:[%s5986_s8 + $0x80] sm:$0xff] %v212_v16  ;;  %215 = vst [vmem:[%s5986_s8 + $0x88] sm:$0xff] %v214_v17  ;;  %v218_v19 = vld [vmem:[%s5981_s7 + $0x118] sm:$0xff]  ;;  %v220_v20 = vld [vmem:[%s5981_s7 + $0x140] sm:$0xff] }
  0x22   : > { %217 = vst [vmem:[%s5986_s8 + $0x90] sm:$0xff] %v216_v18  ;;  %219 = vst [vmem:[%s5986_s8 + $0x98] sm:$0xff] %v218_v19  ;;  %v222_v21 = vld [vmem:[%s5981_s7 + $0x148] sm:$0xff]  ;;  %v224_v22 = vld [vmem:[%s5981_s7 + $0x150] sm:$0xff] }
  0x23   : > { %221 = vst [vmem:[%s5986_s8 + $0xa0] sm:$0xff] %v220_v20  ;;  %v226_v23 = vld [vmem:[%s5981_s7 + $0x158] sm:$0xff]  ;;  %223 = vst [vmem:[%s5986_s8 + $0xa8] sm:$0xff] %v222_v21  ;;  %v228_v24 = vld [vmem:[%s5981_s7 + $0x180] sm:$0xff] }
  0x24   : > { %225 = vst [vmem:[%s5986_s8 + $0xb0] sm:$0xff] %v224_v22  ;;  %227 = vst [vmem:[%s5986_s8 + $0xb8] sm:$0xff] %v226_v23  ;;  %v230_v25 = vld [vmem:[%s5981_s7 + $0x188] sm:$0xff]  ;;  %v232_v26 = vld [vmem:[%s5981_s7 + $0x190] sm:$0xff] }
  0x25   : > { %229 = vst [vmem:[%s5986_s8 + $0xc0] sm:$0xff] %v228_v24  ;;  %231 = vst [vmem:[%s5986_s8 + $0xc8] sm:$0xff] %v230_v25  ;;  %v234_v27 = vld [vmem:[%s5981_s7 + $0x198] sm:$0xff]  ;;  %v236_v28 = vld [vmem:[%s5981_s7 + $0x1c0] sm:$0xff] }
  0x26   : > { %233 = vst [vmem:[%s5986_s8 + $0xd0] sm:$0xff] %v232_v26  ;;  %v238_v29 = vld [vmem:[%s5981_s7 + $0x1c8] sm:$0xff]  ;;  %235 = vst [vmem:[%s5986_s8 + $0xd8] sm:$0xff] %v234_v27  ;;  %v240_v30 = vld [vmem:[%s5981_s7 + $0x1d0] sm:$0xff] }
  0x27   : > { %237 = vst [vmem:[%s5986_s8 + $0xe0] sm:$0xff] %v236_v28  ;;  %239 = vst [vmem:[%s5986_s8 + $0xe8] sm:$0xff] %v238_v29  ;;  %v242_v31 = vld [vmem:[%s5981_s7 + $0x1d8] sm:$0xff]  ;;  %v244_v32 = vld [vmem:[%s5981_s7 + $0x200] sm:$0xff] }
  0x28   : > { %241 = vst [vmem:[%s5986_s8 + $0xf0] sm:$0xff] %v240_v30  ;;  %243 = vst [vmem:[%s5986_s8 + $0xf8] sm:$0xff] %v242_v31  ;;  %v246_v33 = vld [vmem:[%s5981_s7 + $0x208] sm:$0xff]  ;;  %v248_v34 = vld [vmem:[%s5981_s7 + $0x210] sm:$0xff] }
  0x29   : > { %245 = vst [vmem:[%s5986_s8 + $0x100] sm:$0xff] %v244_v32  ;;  %v250_v35 = vld [vmem:[%s5981_s7 + $0x218] sm:$0xff]  ;;  %247 = vst [vmem:[%s5986_s8 + $0x108] sm:$0xff] %v246_v33  ;;  %v252_v36 = vld [vmem:[%s5981_s7 + $0x240] sm:$0xff] }
  0x2a   : > { %249 = vst [vmem:[%s5986_s8 + $0x110] sm:$0xff] %v248_v34  ;;  %251 = vst [vmem:[%s5986_s8 + $0x118] sm:$0xff] %v250_v35  ;;  %v254_v37 = vld [vmem:[%s5981_s7 + $0x248] sm:$0xff]  ;;  %v256_v38 = vld [vmem:[%s5981_s7 + $0x250] sm:$0xff] }
  0x2b   : > { %253 = vst [vmem:[%s5986_s8 + $0x120] sm:$0xff] %v252_v36  ;;  %255 = vst [vmem:[%s5986_s8 + $0x128] sm:$0xff] %v254_v37  ;;  %v258_v39 = vld [vmem:[%s5981_s7 + $0x258] sm:$0xff]  ;;  %v260_v40 = vld [vmem:[%s5981_s7 + $0x280] sm:$0xff] }
  0x2c   : > { %257 = vst [vmem:[%s5986_s8 + $0x130] sm:$0xff] %v256_v38  ;;  %v262_v41 = vld [vmem:[%s5981_s7 + $0x288] sm:$0xff]  ;;  %259 = vst [vmem:[%s5986_s8 + $0x138] sm:$0xff] %v258_v39  ;;  %v264_v42 = vld [vmem:[%s5981_s7 + $0x290] sm:$0xff] }
  0x2d   : > { %261 = vst [vmem:[%s5986_s8 + $0x140] sm:$0xff] %v260_v40  ;;  %263 = vst [vmem:[%s5986_s8 + $0x148] sm:$0xff] %v262_v41  ;;  %v266_v43 = vld [vmem:[%s5981_s7 + $0x298] sm:$0xff]  ;;  %v268_v44 = vld [vmem:[%s5981_s7 + $0x2c0] sm:$0xff] }
  0x2e   : > { %265 = vst [vmem:[%s5986_s8 + $0x150] sm:$0xff] %v264_v42  ;;  %267 = vst [vmem:[%s5986_s8 + $0x158] sm:$0xff] %v266_v43  ;;  %v270_v45 = vld [vmem:[%s5981_s7 + $0x2c8] sm:$0xff]  ;;  %v272_v46 = vld [vmem:[%s5981_s7 + $0x2d0] sm:$0xff] }
  0x2f   : > { %269 = vst [vmem:[%s5986_s8 + $0x160] sm:$0xff] %v268_v44  ;;  %v274_v47 = vld [vmem:[%s5981_s7 + $0x2d8] sm:$0xff]  ;;  %271 = vst [vmem:[%s5986_s8 + $0x168] sm:$0xff] %v270_v45  ;;  %v276_v48 = vld [vmem:[%s5981_s7 + $0x300] sm:$0xff] }
  0x30   : > { %273 = vst [vmem:[%s5986_s8 + $0x170] sm:$0xff] %v272_v46  ;;  %275 = vst [vmem:[%s5986_s8 + $0x178] sm:$0xff] %v274_v47  ;;  %v278_v49 = vld [vmem:[%s5981_s7 + $0x308] sm:$0xff]  ;;  %v280_v50 = vld [vmem:[%s5981_s7 + $0x310] sm:$0xff] }
  0x31   : > { %277 = vst [vmem:[%s5986_s8 + $0x180] sm:$0xff] %v276_v48  ;;  %279 = vst [vmem:[%s5986_s8 + $0x188] sm:$0xff] %v278_v49  ;;  %v282_v51 = vld [vmem:[%s5981_s7 + $0x318] sm:$0xff]  ;;  %v284_v52 = vld [vmem:[%s5981_s7 + $0x340] sm:$0xff] }
  0x32   : > { %281 = vst [vmem:[%s5986_s8 + $0x190] sm:$0xff] %v280_v50  ;;  %v286_v53 = vld [vmem:[%s5981_s7 + $0x348] sm:$0xff]  ;;  %283 = vst [vmem:[%s5986_s8 + $0x198] sm:$0xff] %v282_v51  ;;  %v288_v54 = vld [vmem:[%s5981_s7 + $0x350] sm:$0xff] }
  0x33   : > { %285 = vst [vmem:[%s5986_s8 + $0x1a0] sm:$0xff] %v284_v52  ;;  %287 = vst [vmem:[%s5986_s8 + $0x1a8] sm:$0xff] %v286_v53  ;;  %v290_v55 = vld [vmem:[%s5981_s7 + $0x358] sm:$0xff]  ;;  %v292_v56 = vld [vmem:[%s5981_s7 + $0x380] sm:$0xff] }
  0x34   : > { %289 = vst [vmem:[%s5986_s8 + $0x1b0] sm:$0xff] %v288_v54  ;;  %291 = vst [vmem:[%s5986_s8 + $0x1b8] sm:$0xff] %v290_v55  ;;  %v294_v57 = vld [vmem:[%s5981_s7 + $0x388] sm:$0xff]  ;;  %v296_v58 = vld [vmem:[%s5981_s7 + $0x390] sm:$0xff] }
  0x35   : > { %293 = vst [vmem:[%s5986_s8 + $0x1c0] sm:$0xff] %v292_v56  ;;  %v298_v59 = vld [vmem:[%s5981_s7 + $0x398] sm:$0xff]  ;;  %295 = vst [vmem:[%s5986_s8 + $0x1c8] sm:$0xff] %v294_v57  ;;  %v300_v60 = vld [vmem:[%s5981_s7 + $0x3c0] sm:$0xff] }
  0x36   : > { %297 = vst [vmem:[%s5986_s8 + $0x1d0] sm:$0xff] %v296_v58  ;;  %299 = vst [vmem:[%s5986_s8 + $0x1d8] sm:$0xff] %v298_v59  ;;  %v302_v61 = vld [vmem:[%s5981_s7 + $0x3c8] sm:$0xff]  ;;  %v304_v62 = vld [vmem:[%s5981_s7 + $0x3d0] sm:$0xff] }
  0x37   : > { %301 = vst [vmem:[%s5986_s8 + $0x1e0] sm:$0xff] %v300_v60  ;;  %303 = vst [vmem:[%s5986_s8 + $0x1e8] sm:$0xff] %v302_v61  ;;  %v306_v63 = vld [vmem:[%s5981_s7 + $0x3d8] sm:$0xff]  ;;  %v308_v0 = vld [vmem:[%s5981_s7 + $0x400] sm:$0xff] }
  0x38   : > { %305 = vst [vmem:[%s5986_s8 + $0x1f0] sm:$0xff] %v304_v62  ;;  %v310_v1 = vld [vmem:[%s5981_s7 + $0x408] sm:$0xff]  ;;  %307 = vst [vmem:[%s5986_s8 + $0x1f8] sm:$0xff] %v306_v63  ;;  %v312_v2 = vld [vmem:[%s5981_s7 + $0x410] sm:$0xff] }
  0x39   : > { %309 = vst [vmem:[%s5986_s8 + $0x200] sm:$0xff] %v308_v0  ;;  %311 = vst [vmem:[%s5986_s8 + $0x208] sm:$0xff] %v310_v1  ;;  %v314_v3 = vld [vmem:[%s5981_s7 + $0x418] sm:$0xff]  ;;  %v316_v4 = vld [vmem:[%s5981_s7 + $0x440] sm:$0xff] }
  0x3a   : > { %313 = vst [vmem:[%s5986_s8 + $0x210] sm:$0xff] %v312_v2  ;;  %315 = vst [vmem:[%s5986_s8 + $0x218] sm:$0xff] %v314_v3  ;;  %v318_v5 = vld [vmem:[%s5981_s7 + $0x448] sm:$0xff]  ;;  %v320_v6 = vld [vmem:[%s5981_s7 + $0x450] sm:$0xff] }
  0x3b   : > { %317 = vst [vmem:[%s5986_s8 + $0x220] sm:$0xff] %v316_v4  ;;  %v322_v7 = vld [vmem:[%s5981_s7 + $0x458] sm:$0xff]  ;;  %319 = vst [vmem:[%s5986_s8 + $0x228] sm:$0xff] %v318_v5  ;;  %v324_v8 = vld [vmem:[%s5981_s7 + $0x480] sm:$0xff] }
  0x3c   : > { %321 = vst [vmem:[%s5986_s8 + $0x230] sm:$0xff] %v320_v6  ;;  %323 = vst [vmem:[%s5986_s8 + $0x238] sm:$0xff] %v322_v7  ;;  %v326_v9 = vld [vmem:[%s5981_s7 + $0x488] sm:$0xff]  ;;  %v328_v10 = vld [vmem:[%s5981_s7 + $0x490] sm:$0xff] }
  0x3d   : > { %325 = vst [vmem:[%s5986_s8 + $0x240] sm:$0xff] %v324_v8  ;;  %327 = vst [vmem:[%s5986_s8 + $0x248] sm:$0xff] %v326_v9  ;;  %v330_v11 = vld [vmem:[%s5981_s7 + $0x498] sm:$0xff]  ;;  %v332_v12 = vld [vmem:[%s5981_s7 + $0x4c0] sm:$0xff] }
  0x3e   : > { %329 = vst [vmem:[%s5986_s8 + $0x250] sm:$0xff] %v328_v10  ;;  %v334_v13 = vld [vmem:[%s5981_s7 + $0x4c8] sm:$0xff]  ;;  %331 = vst [vmem:[%s5986_s8 + $0x258] sm:$0xff] %v330_v11  ;;  %v336_v14 = vld [vmem:[%s5981_s7 + $0x4d0] sm:$0xff] }
  0x3f   : > { %333 = vst [vmem:[%s5986_s8 + $0x260] sm:$0xff] %v332_v12  ;;  %335 = vst [vmem:[%s5986_s8 + $0x268] sm:$0xff] %v334_v13  ;;  %v338_v15 = vld [vmem:[%s5981_s7 + $0x4d8] sm:$0xff]  ;;  %v340_v16 = vld [vmem:[%s5981_s7 + $0x500] sm:$0xff] }
  0x40   : > { %337 = vst [vmem:[%s5986_s8 + $0x270] sm:$0xff] %v336_v14  ;;  %339 = vst [vmem:[%s5986_s8 + $0x278] sm:$0xff] %v338_v15  ;;  %v342_v17 = vld [vmem:[%s5981_s7 + $0x508] sm:$0xff]  ;;  %v344_v18 = vld [vmem:[%s5981_s7 + $0x510] sm:$0xff] }
  0x41   : > { %341 = vst [vmem:[%s5986_s8 + $0x280] sm:$0xff] %v340_v16  ;;  %v346_v19 = vld [vmem:[%s5981_s7 + $0x518] sm:$0xff]  ;;  %343 = vst [vmem:[%s5986_s8 + $0x288] sm:$0xff] %v342_v17  ;;  %v348_v20 = vld [vmem:[%s5981_s7 + $0x540] sm:$0xff] }
  0x42   : > { %345 = vst [vmem:[%s5986_s8 + $0x290] sm:$0xff] %v344_v18  ;;  %347 = vst [vmem:[%s5986_s8 + $0x298] sm:$0xff] %v346_v19  ;;  %v350_v21 = vld [vmem:[%s5981_s7 + $0x548] sm:$0xff]  ;;  %v352_v22 = vld [vmem:[%s5981_s7 + $0x550] sm:$0xff] }
  0x43   : > { %349 = vst [vmem:[%s5986_s8 + $0x2a0] sm:$0xff] %v348_v20  ;;  %351 = vst [vmem:[%s5986_s8 + $0x2a8] sm:$0xff] %v350_v21  ;;  %v354_v23 = vld [vmem:[%s5981_s7 + $0x558] sm:$0xff]  ;;  %v356_v24 = vld [vmem:[%s5981_s7 + $0x580] sm:$0xff] }
  0x44   : > { %353 = vst [vmem:[%s5986_s8 + $0x2b0] sm:$0xff] %v352_v22  ;;  %v358_v25 = vld [vmem:[%s5981_s7 + $0x588] sm:$0xff]  ;;  %355 = vst [vmem:[%s5986_s8 + $0x2b8] sm:$0xff] %v354_v23  ;;  %v360_v26 = vld [vmem:[%s5981_s7 + $0x590] sm:$0xff] }
  0x45   : > { %357 = vst [vmem:[%s5986_s8 + $0x2c0] sm:$0xff] %v356_v24  ;;  %359 = vst [vmem:[%s5986_s8 + $0x2c8] sm:$0xff] %v358_v25  ;;  %v362_v27 = vld [vmem:[%s5981_s7 + $0x598] sm:$0xff]  ;;  %v364_v28 = vld [vmem:[%s5981_s7 + $0x5c0] sm:$0xff] }
  0x46   : > { %361 = vst [vmem:[%s5986_s8 + $0x2d0] sm:$0xff] %v360_v26  ;;  %363 = vst [vmem:[%s5986_s8 + $0x2d8] sm:$0xff] %v362_v27  ;;  %v366_v29 = vld [vmem:[%s5981_s7 + $0x5c8] sm:$0xff]  ;;  %v368_v30 = vld [vmem:[%s5981_s7 + $0x5d0] sm:$0xff] }
  0x47   : > { %365 = vst [vmem:[%s5986_s8 + $0x2e0] sm:$0xff] %v364_v28  ;;  %v370_v31 = vld [vmem:[%s5981_s7 + $0x5d8] sm:$0xff]  ;;  %367 = vst [vmem:[%s5986_s8 + $0x2e8] sm:$0xff] %v366_v29  ;;  %v372_v32 = vld [vmem:[%s5981_s7 + $0x600] sm:$0xff] }
  0x48   : > { %369 = vst [vmem:[%s5986_s8 + $0x2f0] sm:$0xff] %v368_v30  ;;  %371 = vst [vmem:[%s5986_s8 + $0x2f8] sm:$0xff] %v370_v31  ;;  %v374_v33 = vld [vmem:[%s5981_s7 + $0x608] sm:$0xff]  ;;  %v376_v34 = vld [vmem:[%s5981_s7 + $0x610] sm:$0xff] }
  0x49   : > { %373 = vst [vmem:[%s5986_s8 + $0x300] sm:$0xff] %v372_v32  ;;  %375 = vst [vmem:[%s5986_s8 + $0x308] sm:$0xff] %v374_v33  ;;  %v378_v35 = vld [vmem:[%s5981_s7 + $0x618] sm:$0xff]  ;;  %v380_v36 = vld [vmem:[%s5981_s7 + $0x640] sm:$0xff] }
  0x4a   : > { %377 = vst [vmem:[%s5986_s8 + $0x310] sm:$0xff] %v376_v34  ;;  %v382_v37 = vld [vmem:[%s5981_s7 + $0x648] sm:$0xff]  ;;  %379 = vst [vmem:[%s5986_s8 + $0x318] sm:$0xff] %v378_v35  ;;  %v384_v38 = vld [vmem:[%s5981_s7 + $0x650] sm:$0xff] }
  0x4b   : > { %381 = vst [vmem:[%s5986_s8 + $0x320] sm:$0xff] %v380_v36  ;;  %383 = vst [vmem:[%s5986_s8 + $0x328] sm:$0xff] %v382_v37  ;;  %v386_v39 = vld [vmem:[%s5981_s7 + $0x658] sm:$0xff]  ;;  %v388_v40 = vld [vmem:[%s5981_s7 + $0x680] sm:$0xff] }
  0x4c   : > { %385 = vst [vmem:[%s5986_s8 + $0x330] sm:$0xff] %v384_v38  ;;  %387 = vst [vmem:[%s5986_s8 + $0x338] sm:$0xff] %v386_v39  ;;  %v390_v41 = vld [vmem:[%s5981_s7 + $0x688] sm:$0xff]  ;;  %v392_v42 = vld [vmem:[%s5981_s7 + $0x690] sm:$0xff] }
  0x4d   : > { %389 = vst [vmem:[%s5986_s8 + $0x340] sm:$0xff] %v388_v40  ;;  %v394_v43 = vld [vmem:[%s5981_s7 + $0x698] sm:$0xff]  ;;  %391 = vst [vmem:[%s5986_s8 + $0x348] sm:$0xff] %v390_v41  ;;  %v396_v44 = vld [vmem:[%s5981_s7 + $0x6c0] sm:$0xff] }
  0x4e   : > { %393 = vst [vmem:[%s5986_s8 + $0x350] sm:$0xff] %v392_v42  ;;  %395 = vst [vmem:[%s5986_s8 + $0x358] sm:$0xff] %v394_v43  ;;  %v398_v45 = vld [vmem:[%s5981_s7 + $0x6c8] sm:$0xff]  ;;  %v400_v46 = vld [vmem:[%s5981_s7 + $0x6d0] sm:$0xff] }
  0x4f   : > { %397 = vst [vmem:[%s5986_s8 + $0x360] sm:$0xff] %v396_v44  ;;  %399 = vst [vmem:[%s5986_s8 + $0x368] sm:$0xff] %v398_v45  ;;  %v402_v47 = vld [vmem:[%s5981_s7 + $0x6d8] sm:$0xff]  ;;  %v404_v48 = vld [vmem:[%s5981_s7 + $0x700] sm:$0xff] }
  0x50   : > { %401 = vst [vmem:[%s5986_s8 + $0x370] sm:$0xff] %v400_v46  ;;  %v406_v49 = vld [vmem:[%s5981_s7 + $0x708] sm:$0xff]  ;;  %403 = vst [vmem:[%s5986_s8 + $0x378] sm:$0xff] %v402_v47  ;;  %v408_v50 = vld [vmem:[%s5981_s7 + $0x710] sm:$0xff] }
  0x51   : > { %405 = vst [vmem:[%s5986_s8 + $0x380] sm:$0xff] %v404_v48  ;;  %407 = vst [vmem:[%s5986_s8 + $0x388] sm:$0xff] %v406_v49  ;;  %v410_v51 = vld [vmem:[%s5981_s7 + $0x718] sm:$0xff]  ;;  %v412_v52 = vld [vmem:[%s5981_s7 + $0x740] sm:$0xff] }
  0x52   : > { %409 = vst [vmem:[%s5986_s8 + $0x390] sm:$0xff] %v408_v50  ;;  %411 = vst [vmem:[%s5986_s8 + $0x398] sm:$0xff] %v410_v51  ;;  %v414_v53 = vld [vmem:[%s5981_s7 + $0x748] sm:$0xff]  ;;  %v416_v54 = vld [vmem:[%s5981_s7 + $0x750] sm:$0xff] }
  0x53   : > { %413 = vst [vmem:[%s5986_s8 + $0x3a0] sm:$0xff] %v412_v52  ;;  %v418_v55 = vld [vmem:[%s5981_s7 + $0x758] sm:$0xff]  ;;  %415 = vst [vmem:[%s5986_s8 + $0x3a8] sm:$0xff] %v414_v53  ;;  %v420_v56 = vld [vmem:[%s5981_s7 + $0x780] sm:$0xff] }
  0x54   : > { %417 = vst [vmem:[%s5986_s8 + $0x3b0] sm:$0xff] %v416_v54  ;;  %419 = vst [vmem:[%s5986_s8 + $0x3b8] sm:$0xff] %v418_v55  ;;  %v422_v57 = vld [vmem:[%s5981_s7 + $0x788] sm:$0xff]  ;;  %v424_v58 = vld [vmem:[%s5981_s7 + $0x790] sm:$0xff] }
  0x55   : > { %421 = vst [vmem:[%s5986_s8 + $0x3c0] sm:$0xff] %v420_v56  ;;  %423 = vst [vmem:[%s5986_s8 + $0x3c8] sm:$0xff] %v422_v57  ;;  %v426_v59 = vld [vmem:[%s5981_s7 + $0x798] sm:$0xff]  ;;  %v428_v60 = vld [vmem:[%s5981_s7 + $0x7c0] sm:$0xff] }
  0x56   : > { %425 = vst [vmem:[%s5986_s8 + $0x3d0] sm:$0xff] %v424_v58  ;;  %v430_v61 = vld [vmem:[%s5981_s7 + $0x7c8] sm:$0xff]  ;;  %427 = vst [vmem:[%s5986_s8 + $0x3d8] sm:$0xff] %v426_v59  ;;  %v432_v62 = vld [vmem:[%s5981_s7 + $0x7d0] sm:$0xff] }
  0x57   : > { %429 = vst [vmem:[%s5986_s8 + $0x3e0] sm:$0xff] %v428_v60  ;;  %431 = vst [vmem:[%s5986_s8 + $0x3e8] sm:$0xff] %v430_v61  ;;  %v434_v63 = vld [vmem:[%s5981_s7 + $0x7d8] sm:$0xff]  ;;  %v436_v0 = vld [vmem:[%s5981_s7 + $0x800] sm:$0xff] }
  0x58   : > { %433 = vst [vmem:[%s5986_s8 + $0x3f0] sm:$0xff] %v432_v62  ;;  %435 = vst [vmem:[%s5986_s8 + $0x3f8] sm:$0xff] %v434_v63  ;;  %v438_v1 = vld [vmem:[%s5981_s7 + $0x808] sm:$0xff]  ;;  %v440_v2 = vld [vmem:[%s5981_s7 + $0x810] sm:$0xff] }
  0x59   : > { %437 = vst [vmem:[%s5986_s8 + $0x400] sm:$0xff] %v436_v0  ;;  %v442_v3 = vld [vmem:[%s5981_s7 + $0x818] sm:$0xff]  ;;  %439 = vst [vmem:[%s5986_s8 + $0x408] sm:$0xff] %v438_v1  ;;  %v444_v4 = vld [vmem:[%s5981_s7 + $0x840] sm:$0xff] }
  0x5a   : > { %441 = vst [vmem:[%s5986_s8 + $0x410] sm:$0xff] %v440_v2  ;;  %443 = vst [vmem:[%s5986_s8 + $0x418] sm:$0xff] %v442_v3  ;;  %v446_v5 = vld [vmem:[%s5981_s7 + $0x848] sm:$0xff]  ;;  %v448_v6 = vld [vmem:[%s5981_s7 + $0x850] sm:$0xff] }
  0x5b   : > { %445 = vst [vmem:[%s5986_s8 + $0x420] sm:$0xff] %v444_v4  ;;  %447 = vst [vmem:[%s5986_s8 + $0x428] sm:$0xff] %v446_v5  ;;  %v450_v7 = vld [vmem:[%s5981_s7 + $0x858] sm:$0xff]  ;;  %v452_v8 = vld [vmem:[%s5981_s7 + $0x880] sm:$0xff] }
  0x5c   : > { %449 = vst [vmem:[%s5986_s8 + $0x430] sm:$0xff] %v448_v6  ;;  %v454_v9 = vld [vmem:[%s5981_s7 + $0x888] sm:$0xff]  ;;  %451 = vst [vmem:[%s5986_s8 + $0x438] sm:$0xff] %v450_v7  ;;  %v456_v10 = vld [vmem:[%s5981_s7 + $0x890] sm:$0xff] }
  0x5d   : > { %453 = vst [vmem:[%s5986_s8 + $0x440] sm:$0xff] %v452_v8  ;;  %455 = vst [vmem:[%s5986_s8 + $0x448] sm:$0xff] %v454_v9  ;;  %v458_v11 = vld [vmem:[%s5981_s7 + $0x898] sm:$0xff]  ;;  %v460_v12 = vld [vmem:[%s5981_s7 + $0x8c0] sm:$0xff] }
  0x5e   : > { %457 = vst [vmem:[%s5986_s8 + $0x450] sm:$0xff] %v456_v10  ;;  %459 = vst [vmem:[%s5986_s8 + $0x458] sm:$0xff] %v458_v11  ;;  %v462_v13 = vld [vmem:[%s5981_s7 + $0x8c8] sm:$0xff]  ;;  %v464_v14 = vld [vmem:[%s5981_s7 + $0x8d0] sm:$0xff] }
  0x5f   : > { %461 = vst [vmem:[%s5986_s8 + $0x460] sm:$0xff] %v460_v12  ;;  %v466_v15 = vld [vmem:[%s5981_s7 + $0x8d8] sm:$0xff]  ;;  %463 = vst [vmem:[%s5986_s8 + $0x468] sm:$0xff] %v462_v13  ;;  %v468_v16 = vld [vmem:[%s5981_s7 + $0x900] sm:$0xff] }
  0x60   : > { %465 = vst [vmem:[%s5986_s8 + $0x470] sm:$0xff] %v464_v14  ;;  %467 = vst [vmem:[%s5986_s8 + $0x478] sm:$0xff] %v466_v15  ;;  %v470_v17 = vld [vmem:[%s5981_s7 + $0x908] sm:$0xff]  ;;  %v472_v18 = vld [vmem:[%s5981_s7 + $0x910] sm:$0xff] }
  0x61   : > { %469 = vst [vmem:[%s5986_s8 + $0x480] sm:$0xff] %v468_v16  ;;  %471 = vst [vmem:[%s5986_s8 + $0x488] sm:$0xff] %v470_v17  ;;  %v474_v19 = vld [vmem:[%s5981_s7 + $0x918] sm:$0xff]  ;;  %v476_v20 = vld [vmem:[%s5981_s7 + $0x940] sm:$0xff] }
  0x62   : > { %473 = vst [vmem:[%s5986_s8 + $0x490] sm:$0xff] %v472_v18  ;;  %v478_v21 = vld [vmem:[%s5981_s7 + $0x948] sm:$0xff]  ;;  %475 = vst [vmem:[%s5986_s8 + $0x498] sm:$0xff] %v474_v19  ;;  %v480_v22 = vld [vmem:[%s5981_s7 + $0x950] sm:$0xff] }
  0x63   : > { %477 = vst [vmem:[%s5986_s8 + $0x4a0] sm:$0xff] %v476_v20  ;;  %479 = vst [vmem:[%s5986_s8 + $0x4a8] sm:$0xff] %v478_v21  ;;  %v482_v23 = vld [vmem:[%s5981_s7 + $0x958] sm:$0xff]  ;;  %v484_v24 = vld [vmem:[%s5981_s7 + $0x980] sm:$0xff] }
  0x64   : > { %481 = vst [vmem:[%s5986_s8 + $0x4b0] sm:$0xff] %v480_v22  ;;  %483 = vst [vmem:[%s5986_s8 + $0x4b8] sm:$0xff] %v482_v23  ;;  %v486_v25 = vld [vmem:[%s5981_s7 + $0x988] sm:$0xff]  ;;  %v488_v26 = vld [vmem:[%s5981_s7 + $0x990] sm:$0xff] }
  0x65   : > { %485 = vst [vmem:[%s5986_s8 + $0x4c0] sm:$0xff] %v484_v24  ;;  %v490_v27 = vld [vmem:[%s5981_s7 + $0x998] sm:$0xff]  ;;  %487 = vst [vmem:[%s5986_s8 + $0x4c8] sm:$0xff] %v486_v25  ;;  %v492_v28 = vld [vmem:[%s5981_s7 + $0x9c0] sm:$0xff] }
  0x66   : > { %489 = vst [vmem:[%s5986_s8 + $0x4d0] sm:$0xff] %v488_v26  ;;  %491 = vst [vmem:[%s5986_s8 + $0x4d8] sm:$0xff] %v490_v27  ;;  %v494_v29 = vld [vmem:[%s5981_s7 + $0x9c8] sm:$0xff]  ;;  %v496_v30 = vld [vmem:[%s5981_s7 + $0x9d0] sm:$0xff] }
  0x67   : > { %493 = vst [vmem:[%s5986_s8 + $0x4e0] sm:$0xff] %v492_v28  ;;  %495 = vst [vmem:[%s5986_s8 + $0x4e8] sm:$0xff] %v494_v29  ;;  %v498_v31 = vld [vmem:[%s5981_s7 + $0x9d8] sm:$0xff]  ;;  %v500_v32 = vld [vmem:[%s5981_s7 + $0xa00] sm:$0xff] }
  0x68   : > { %497 = vst [vmem:[%s5986_s8 + $0x4f0] sm:$0xff] %v496_v30  ;;  %v502_v33 = vld [vmem:[%s5981_s7 + $0xa08] sm:$0xff]  ;;  %499 = vst [vmem:[%s5986_s8 + $0x4f8] sm:$0xff] %v498_v31  ;;  %v504_v34 = vld [vmem:[%s5981_s7 + $0xa10] sm:$0xff] }
  0x69   : > { %501 = vst [vmem:[%s5986_s8 + $0x500] sm:$0xff] %v500_v32  ;;  %503 = vst [vmem:[%s5986_s8 + $0x508] sm:$0xff] %v502_v33  ;;  %v506_v35 = vld [vmem:[%s5981_s7 + $0xa18] sm:$0xff]  ;;  %v508_v36 = vld [vmem:[%s5981_s7 + $0xa40] sm:$0xff] }
  0x6a   : > { %505 = vst [vmem:[%s5986_s8 + $0x510] sm:$0xff] %v504_v34  ;;  %507 = vst [vmem:[%s5986_s8 + $0x518] sm:$0xff] %v506_v35  ;;  %v510_v37 = vld [vmem:[%s5981_s7 + $0xa48] sm:$0xff]  ;;  %v512_v38 = vld [vmem:[%s5981_s7 + $0xa50] sm:$0xff] }
  0x6b   : > { %509 = vst [vmem:[%s5986_s8 + $0x520] sm:$0xff] %v508_v36  ;;  %v514_v39 = vld [vmem:[%s5981_s7 + $0xa58] sm:$0xff]  ;;  %511 = vst [vmem:[%s5986_s8 + $0x528] sm:$0xff] %v510_v37  ;;  %v516_v40 = vld [vmem:[%s5981_s7 + $0xa80] sm:$0xff] }
  0x6c   : > { %513 = vst [vmem:[%s5986_s8 + $0x530] sm:$0xff] %v512_v38  ;;  %515 = vst [vmem:[%s5986_s8 + $0x538] sm:$0xff] %v514_v39  ;;  %v518_v41 = vld [vmem:[%s5981_s7 + $0xa88] sm:$0xff]  ;;  %v520_v42 = vld [vmem:[%s5981_s7 + $0xa90] sm:$0xff] }
  0x6d   : > { %517 = vst [vmem:[%s5986_s8 + $0x540] sm:$0xff] %v516_v40  ;;  %519 = vst [vmem:[%s5986_s8 + $0x548] sm:$0xff] %v518_v41  ;;  %v522_v43 = vld [vmem:[%s5981_s7 + $0xa98] sm:$0xff]  ;;  %v524_v44 = vld [vmem:[%s5981_s7 + $0xac0] sm:$0xff] }
  0x6e   : > { %521 = vst [vmem:[%s5986_s8 + $0x550] sm:$0xff] %v520_v42  ;;  %v526_v45 = vld [vmem:[%s5981_s7 + $0xac8] sm:$0xff]  ;;  %523 = vst [vmem:[%s5986_s8 + $0x558] sm:$0xff] %v522_v43  ;;  %v528_v46 = vld [vmem:[%s5981_s7 + $0xad0] sm:$0xff] }
  0x6f   : > { %525 = vst [vmem:[%s5986_s8 + $0x560] sm:$0xff] %v524_v44  ;;  %527 = vst [vmem:[%s5986_s8 + $0x568] sm:$0xff] %v526_v45  ;;  %v530_v47 = vld [vmem:[%s5981_s7 + $0xad8] sm:$0xff]  ;;  %v532_v48 = vld [vmem:[%s5981_s7 + $0xb00] sm:$0xff] }
  0x70   : > { %529 = vst [vmem:[%s5986_s8 + $0x570] sm:$0xff] %v528_v46  ;;  %531 = vst [vmem:[%s5986_s8 + $0x578] sm:$0xff] %v530_v47  ;;  %v534_v49 = vld [vmem:[%s5981_s7 + $0xb08] sm:$0xff]  ;;  %v536_v50 = vld [vmem:[%s5981_s7 + $0xb10] sm:$0xff] }
  0x71   : > { %533 = vst [vmem:[%s5986_s8 + $0x580] sm:$0xff] %v532_v48  ;;  %v538_v51 = vld [vmem:[%s5981_s7 + $0xb18] sm:$0xff]  ;;  %535 = vst [vmem:[%s5986_s8 + $0x588] sm:$0xff] %v534_v49  ;;  %v540_v52 = vld [vmem:[%s5981_s7 + $0xb40] sm:$0xff] }
  0x72   : > { %537 = vst [vmem:[%s5986_s8 + $0x590] sm:$0xff] %v536_v50  ;;  %539 = vst [vmem:[%s5986_s8 + $0x598] sm:$0xff] %v538_v51  ;;  %v542_v53 = vld [vmem:[%s5981_s7 + $0xb48] sm:$0xff]  ;;  %v544_v54 = vld [vmem:[%s5981_s7 + $0xb50] sm:$0xff] }
  0x73   : > { %541 = vst [vmem:[%s5986_s8 + $0x5a0] sm:$0xff] %v540_v52  ;;  %543 = vst [vmem:[%s5986_s8 + $0x5a8] sm:$0xff] %v542_v53  ;;  %v546_v55 = vld [vmem:[%s5981_s7 + $0xb58] sm:$0xff]  ;;  %v548_v56 = vld [vmem:[%s5981_s7 + $0xb80] sm:$0xff] }
  0x74   : > { %545 = vst [vmem:[%s5986_s8 + $0x5b0] sm:$0xff] %v544_v54  ;;  %v550_v57 = vld [vmem:[%s5981_s7 + $0xb88] sm:$0xff]  ;;  %547 = vst [vmem:[%s5986_s8 + $0x5b8] sm:$0xff] %v546_v55  ;;  %v552_v58 = vld [vmem:[%s5981_s7 + $0xb90] sm:$0xff] }
  0x75   : > { %549 = vst [vmem:[%s5986_s8 + $0x5c0] sm:$0xff] %v548_v56  ;;  %551 = vst [vmem:[%s5986_s8 + $0x5c8] sm:$0xff] %v550_v57  ;;  %v554_v59 = vld [vmem:[%s5981_s7 + $0xb98] sm:$0xff]  ;;  %v556_v60 = vld [vmem:[%s5981_s7 + $0xbc0] sm:$0xff] }
  0x76   : > { %553 = vst [vmem:[%s5986_s8 + $0x5d0] sm:$0xff] %v552_v58  ;;  %555 = vst [vmem:[%s5986_s8 + $0x5d8] sm:$0xff] %v554_v59  ;;  %v558_v61 = vld [vmem:[%s5981_s7 + $0xbc8] sm:$0xff]  ;;  %v560_v62 = vld [vmem:[%s5981_s7 + $0xbd0] sm:$0xff] }
  0x77   : > { %557 = vst [vmem:[%s5986_s8 + $0x5e0] sm:$0xff] %v556_v60  ;;  %v562_v63 = vld [vmem:[%s5981_s7 + $0xbd8] sm:$0xff]  ;;  %559 = vst [vmem:[%s5986_s8 + $0x5e8] sm:$0xff] %v558_v61  ;;  %v564_v0 = vld [vmem:[%s5981_s7 + $0xc00] sm:$0xff] }
  0x78   : > { %561 = vst [vmem:[%s5986_s8 + $0x5f0] sm:$0xff] %v560_v62  ;;  %563 = vst [vmem:[%s5986_s8 + $0x5f8] sm:$0xff] %v562_v63  ;;  %v566_v1 = vld [vmem:[%s5981_s7 + $0xc08] sm:$0xff]  ;;  %v568_v2 = vld [vmem:[%s5981_s7 + $0xc10] sm:$0xff] }
  0x79   : > { %565 = vst [vmem:[%s5986_s8 + $0x600] sm:$0xff] %v564_v0  ;;  %567 = vst [vmem:[%s5986_s8 + $0x608] sm:$0xff] %v566_v1  ;;  %v570_v3 = vld [vmem:[%s5981_s7 + $0xc18] sm:$0xff]  ;;  %v572_v4 = vld [vmem:[%s5981_s7 + $0xc40] sm:$0xff] }
  0x7a   : > { %569 = vst [vmem:[%s5986_s8 + $0x610] sm:$0xff] %v568_v2  ;;  %v574_v5 = vld [vmem:[%s5981_s7 + $0xc48] sm:$0xff]  ;;  %571 = vst [vmem:[%s5986_s8 + $0x618] sm:$0xff] %v570_v3  ;;  %v576_v6 = vld [vmem:[%s5981_s7 + $0xc50] sm:$0xff] }
  0x7b   : > { %573 = vst [vmem:[%s5986_s8 + $0x620] sm:$0xff] %v572_v4  ;;  %575 = vst [vmem:[%s5986_s8 + $0x628] sm:$0xff] %v574_v5  ;;  %v578_v7 = vld [vmem:[%s5981_s7 + $0xc58] sm:$0xff]  ;;  %v580_v8 = vld [vmem:[%s5981_s7 + $0xc80] sm:$0xff] }
  0x7c   : > { %577 = vst [vmem:[%s5986_s8 + $0x630] sm:$0xff] %v576_v6  ;;  %579 = vst [vmem:[%s5986_s8 + $0x638] sm:$0xff] %v578_v7  ;;  %v582_v9 = vld [vmem:[%s5981_s7 + $0xc88] sm:$0xff]  ;;  %v584_v10 = vld [vmem:[%s5981_s7 + $0xc90] sm:$0xff] }
  0x7d   : > { %581 = vst [vmem:[%s5986_s8 + $0x640] sm:$0xff] %v580_v8  ;;  %v586_v11 = vld [vmem:[%s5981_s7 + $0xc98] sm:$0xff]  ;;  %583 = vst [vmem:[%s5986_s8 + $0x648] sm:$0xff] %v582_v9  ;;  %v588_v12 = vld [vmem:[%s5981_s7 + $0xcc0] sm:$0xff] }
  0x7e   : > { %585 = vst [vmem:[%s5986_s8 + $0x650] sm:$0xff] %v584_v10  ;;  %587 = vst [vmem:[%s5986_s8 + $0x658] sm:$0xff] %v586_v11  ;;  %v590_v13 = vld [vmem:[%s5981_s7 + $0xcc8] sm:$0xff]  ;;  %v592_v14 = vld [vmem:[%s5981_s7 + $0xcd0] sm:$0xff] }
  0x7f   : > { %589 = vst [vmem:[%s5986_s8 + $0x660] sm:$0xff] %v588_v12  ;;  %591 = vst [vmem:[%s5986_s8 + $0x668] sm:$0xff] %v590_v13  ;;  %v594_v15 = vld [vmem:[%s5981_s7 + $0xcd8] sm:$0xff]  ;;  %v596_v16 = vld [vmem:[%s5981_s7 + $0xd00] sm:$0xff] }
  0x80   : > { %593 = vst [vmem:[%s5986_s8 + $0x670] sm:$0xff] %v592_v14  ;;  %v598_v17 = vld [vmem:[%s5981_s7 + $0xd08] sm:$0xff]  ;;  %595 = vst [vmem:[%s5986_s8 + $0x678] sm:$0xff] %v594_v15  ;;  %v600_v18 = vld [vmem:[%s5981_s7 + $0xd10] sm:$0xff] }
  0x81   : > { %597 = vst [vmem:[%s5986_s8 + $0x680] sm:$0xff] %v596_v16  ;;  %599 = vst [vmem:[%s5986_s8 + $0x688] sm:$0xff] %v598_v17  ;;  %v602_v19 = vld [vmem:[%s5981_s7 + $0xd18] sm:$0xff]  ;;  %v604_v20 = vld [vmem:[%s5981_s7 + $0xd40] sm:$0xff] }
  0x82   : > { %601 = vst [vmem:[%s5986_s8 + $0x690] sm:$0xff] %v600_v18  ;;  %603 = vst [vmem:[%s5986_s8 + $0x698] sm:$0xff] %v602_v19  ;;  %v606_v21 = vld [vmem:[%s5981_s7 + $0xd48] sm:$0xff]  ;;  %v608_v22 = vld [vmem:[%s5981_s7 + $0xd50] sm:$0xff] }
  0x83   : > { %605 = vst [vmem:[%s5986_s8 + $0x6a0] sm:$0xff] %v604_v20  ;;  %v610_v23 = vld [vmem:[%s5981_s7 + $0xd58] sm:$0xff]  ;;  %607 = vst [vmem:[%s5986_s8 + $0x6a8] sm:$0xff] %v606_v21  ;;  %v612_v24 = vld [vmem:[%s5981_s7 + $0xd80] sm:$0xff] }
  0x84   : > { %609 = vst [vmem:[%s5986_s8 + $0x6b0] sm:$0xff] %v608_v22  ;;  %611 = vst [vmem:[%s5986_s8 + $0x6b8] sm:$0xff] %v610_v23  ;;  %v614_v25 = vld [vmem:[%s5981_s7 + $0xd88] sm:$0xff]  ;;  %v616_v26 = vld [vmem:[%s5981_s7 + $0xd90] sm:$0xff] }
  0x85   : > { %613 = vst [vmem:[%s5986_s8 + $0x6c0] sm:$0xff] %v612_v24  ;;  %615 = vst [vmem:[%s5986_s8 + $0x6c8] sm:$0xff] %v614_v25  ;;  %v618_v27 = vld [vmem:[%s5981_s7 + $0xd98] sm:$0xff]  ;;  %v620_v28 = vld [vmem:[%s5981_s7 + $0xdc0] sm:$0xff] }
  0x86   : > { %617 = vst [vmem:[%s5986_s8 + $0x6d0] sm:$0xff] %v616_v26  ;;  %v622_v29 = vld [vmem:[%s5981_s7 + $0xdc8] sm:$0xff]  ;;  %619 = vst [vmem:[%s5986_s8 + $0x6d8] sm:$0xff] %v618_v27  ;;  %v624_v30 = vld [vmem:[%s5981_s7 + $0xdd0] sm:$0xff] }
  0x87   : > { %621 = vst [vmem:[%s5986_s8 + $0x6e0] sm:$0xff] %v620_v28  ;;  %623 = vst [vmem:[%s5986_s8 + $0x6e8] sm:$0xff] %v622_v29  ;;  %v626_v31 = vld [vmem:[%s5981_s7 + $0xdd8] sm:$0xff]  ;;  %v628_v32 = vld [vmem:[%s5981_s7 + $0xe00] sm:$0xff] }
  0x88   : > { %625 = vst [vmem:[%s5986_s8 + $0x6f0] sm:$0xff] %v624_v30  ;;  %627 = vst [vmem:[%s5986_s8 + $0x6f8] sm:$0xff] %v626_v31  ;;  %v630_v33 = vld [vmem:[%s5981_s7 + $0xe08] sm:$0xff]  ;;  %v632_v34 = vld [vmem:[%s5981_s7 + $0xe10] sm:$0xff] }
  0x89   : > { %629 = vst [vmem:[%s5986_s8 + $0x700] sm:$0xff] %v628_v32  ;;  %v634_v35 = vld [vmem:[%s5981_s7 + $0xe18] sm:$0xff]  ;;  %631 = vst [vmem:[%s5986_s8 + $0x708] sm:$0xff] %v630_v33  ;;  %v636_v36 = vld [vmem:[%s5981_s7 + $0xe40] sm:$0xff] }
  0x8a   : > { %633 = vst [vmem:[%s5986_s8 + $0x710] sm:$0xff] %v632_v34  ;;  %635 = vst [vmem:[%s5986_s8 + $0x718] sm:$0xff] %v634_v35  ;;  %v638_v37 = vld [vmem:[%s5981_s7 + $0xe48] sm:$0xff]  ;;  %v640_v38 = vld [vmem:[%s5981_s7 + $0xe50] sm:$0xff] }
  0x8b   : > { %637 = vst [vmem:[%s5986_s8 + $0x720] sm:$0xff] %v636_v36  ;;  %639 = vst [vmem:[%s5986_s8 + $0x728] sm:$0xff] %v638_v37  ;;  %v642_v39 = vld [vmem:[%s5981_s7 + $0xe58] sm:$0xff]  ;;  %v644_v40 = vld [vmem:[%s5981_s7 + $0xe80] sm:$0xff] }
  0x8c   : > { %641 = vst [vmem:[%s5986_s8 + $0x730] sm:$0xff] %v640_v38  ;;  %v646_v41 = vld [vmem:[%s5981_s7 + $0xe88] sm:$0xff]  ;;  %643 = vst [vmem:[%s5986_s8 + $0x738] sm:$0xff] %v642_v39  ;;  %v648_v42 = vld [vmem:[%s5981_s7 + $0xe90] sm:$0xff] }
  0x8d   : > { %645 = vst [vmem:[%s5986_s8 + $0x740] sm:$0xff] %v644_v40  ;;  %647 = vst [vmem:[%s5986_s8 + $0x748] sm:$0xff] %v646_v41  ;;  %v650_v43 = vld [vmem:[%s5981_s7 + $0xe98] sm:$0xff]  ;;  %v652_v44 = vld [vmem:[%s5981_s7 + $0xec0] sm:$0xff] }
  0x8e   : > { %649 = vst [vmem:[%s5986_s8 + $0x750] sm:$0xff] %v648_v42  ;;  %651 = vst [vmem:[%s5986_s8 + $0x758] sm:$0xff] %v650_v43  ;;  %v654_v45 = vld [vmem:[%s5981_s7 + $0xec8] sm:$0xff]  ;;  %v656_v46 = vld [vmem:[%s5981_s7 + $0xed0] sm:$0xff] }
  0x8f   : > { %653 = vst [vmem:[%s5986_s8 + $0x760] sm:$0xff] %v652_v44  ;;  %v658_v47 = vld [vmem:[%s5981_s7 + $0xed8] sm:$0xff]  ;;  %655 = vst [vmem:[%s5986_s8 + $0x768] sm:$0xff] %v654_v45  ;;  %v660_v48 = vld [vmem:[%s5981_s7 + $0xf00] sm:$0xff] }
  0x90   : > { %657 = vst [vmem:[%s5986_s8 + $0x770] sm:$0xff] %v656_v46  ;;  %659 = vst [vmem:[%s5986_s8 + $0x778] sm:$0xff] %v658_v47  ;;  %v662_v49 = vld [vmem:[%s5981_s7 + $0xf08] sm:$0xff]  ;;  %v664_v50 = vld [vmem:[%s5981_s7 + $0xf10] sm:$0xff] }
  0x91   : > { %661 = vst [vmem:[%s5986_s8 + $0x780] sm:$0xff] %v660_v48  ;;  %663 = vst [vmem:[%s5986_s8 + $0x788] sm:$0xff] %v662_v49  ;;  %v666_v51 = vld [vmem:[%s5981_s7 + $0xf18] sm:$0xff]  ;;  %v668_v52 = vld [vmem:[%s5981_s7 + $0xf40] sm:$0xff] }
  0x92   : > { %665 = vst [vmem:[%s5986_s8 + $0x790] sm:$0xff] %v664_v50  ;;  %v670_v53 = vld [vmem:[%s5981_s7 + $0xf48] sm:$0xff]  ;;  %667 = vst [vmem:[%s5986_s8 + $0x798] sm:$0xff] %v666_v51  ;;  %v672_v54 = vld [vmem:[%s5981_s7 + $0xf50] sm:$0xff] }
  0x93   : > { %669 = vst [vmem:[%s5986_s8 + $0x7a0] sm:$0xff] %v668_v52  ;;  %671 = vst [vmem:[%s5986_s8 + $0x7a8] sm:$0xff] %v670_v53  ;;  %v674_v55 = vld [vmem:[%s5981_s7 + $0xf58] sm:$0xff]  ;;  %v676_v56 = vld [vmem:[%s5981_s7 + $0xf80] sm:$0xff] }
  0x94   : > { %673 = vst [vmem:[%s5986_s8 + $0x7b0] sm:$0xff] %v672_v54  ;;  %675 = vst [vmem:[%s5986_s8 + $0x7b8] sm:$0xff] %v674_v55  ;;  %v678_v57 = vld [vmem:[%s5981_s7 + $0xf88] sm:$0xff]  ;;  %v680_v58 = vld [vmem:[%s5981_s7 + $0xf90] sm:$0xff] }
  0x95   : > { %677 = vst [vmem:[%s5986_s8 + $0x7c0] sm:$0xff] %v676_v56  ;;  %v682_v59 = vld [vmem:[%s5981_s7 + $0xf98] sm:$0xff]  ;;  %679 = vst [vmem:[%s5986_s8 + $0x7c8] sm:$0xff] %v678_v57  ;;  %v684_v60 = vld [vmem:[%s5981_s7 + $0xfc0] sm:$0xff] }
  0x96   : > { %681 = vst [vmem:[%s5986_s8 + $0x7d0] sm:$0xff] %v680_v58  ;;  %683 = vst [vmem:[%s5986_s8 + $0x7d8] sm:$0xff] %v682_v59  ;;  %v686_v61 = vld [vmem:[%s5981_s7 + $0xfc8] sm:$0xff]  ;;  %v688_v62 = vld [vmem:[%s5981_s7 + $0xfd0] sm:$0xff] }
  0x97   : > { %685 = vst [vmem:[%s5986_s8 + $0x7e0] sm:$0xff] %v684_v60  ;;  %687 = vst [vmem:[%s5986_s8 + $0x7e8] sm:$0xff] %v686_v61  ;;  %v690_v63 = vld [vmem:[%s5981_s7 + $0xfd8] sm:$0xff]  ;;  %v692_v0 = vld [vmem:[%s5981_s7 + $0x1000] sm:$0xff] }
  0x98   : > { %689 = vst [vmem:[%s5986_s8 + $0x7f0] sm:$0xff] %v688_v62  ;;  %v694_v1 = vld [vmem:[%s5981_s7 + $0x1008] sm:$0xff]  ;;  %691 = vst [vmem:[%s5986_s8 + $0x7f8] sm:$0xff] %v690_v63  ;;  %v696_v2 = vld [vmem:[%s5981_s7 + $0x1010] sm:$0xff] }
  0x99   : > { %693 = vst [vmem:[%s5986_s8 + $0x800] sm:$0xff] %v692_v0  ;;  %695 = vst [vmem:[%s5986_s8 + $0x808] sm:$0xff] %v694_v1  ;;  %v698_v3 = vld [vmem:[%s5981_s7 + $0x1018] sm:$0xff]  ;;  %v700_v4 = vld [vmem:[%s5981_s7 + $0x1040] sm:$0xff] }
  0x9a   : > { %697 = vst [vmem:[%s5986_s8 + $0x810] sm:$0xff] %v696_v2  ;;  %699 = vst [vmem:[%s5986_s8 + $0x818] sm:$0xff] %v698_v3  ;;  %v702_v5 = vld [vmem:[%s5981_s7 + $0x1048] sm:$0xff]  ;;  %v704_v6 = vld [vmem:[%s5981_s7 + $0x1050] sm:$0xff] }
  0x9b   : > { %701 = vst [vmem:[%s5986_s8 + $0x820] sm:$0xff] %v700_v4  ;;  %v706_v7 = vld [vmem:[%s5981_s7 + $0x1058] sm:$0xff]  ;;  %703 = vst [vmem:[%s5986_s8 + $0x828] sm:$0xff] %v702_v5  ;;  %v708_v8 = vld [vmem:[%s5981_s7 + $0x1080] sm:$0xff] }
  0x9c   : > { %705 = vst [vmem:[%s5986_s8 + $0x830] sm:$0xff] %v704_v6  ;;  %707 = vst [vmem:[%s5986_s8 + $0x838] sm:$0xff] %v706_v7  ;;  %v710_v9 = vld [vmem:[%s5981_s7 + $0x1088] sm:$0xff]  ;;  %v712_v10 = vld [vmem:[%s5981_s7 + $0x1090] sm:$0xff] }
  0x9d   : > { %709 = vst [vmem:[%s5986_s8 + $0x840] sm:$0xff] %v708_v8  ;;  %711 = vst [vmem:[%s5986_s8 + $0x848] sm:$0xff] %v710_v9  ;;  %v714_v11 = vld [vmem:[%s5981_s7 + $0x1098] sm:$0xff]  ;;  %v716_v12 = vld [vmem:[%s5981_s7 + $0x10c0] sm:$0xff] }
  0x9e   : > { %713 = vst [vmem:[%s5986_s8 + $0x850] sm:$0xff] %v712_v10  ;;  %v718_v13 = vld [vmem:[%s5981_s7 + $0x10c8] sm:$0xff]  ;;  %715 = vst [vmem:[%s5986_s8 + $0x858] sm:$0xff] %v714_v11  ;;  %v720_v14 = vld [vmem:[%s5981_s7 + $0x10d0] sm:$0xff] }
  0x9f   : > { %717 = vst [vmem:[%s5986_s8 + $0x860] sm:$0xff] %v716_v12  ;;  %719 = vst [vmem:[%s5986_s8 + $0x868] sm:$0xff] %v718_v13  ;;  %v722_v15 = vld [vmem:[%s5981_s7 + $0x10d8] sm:$0xff]  ;;  %v724_v16 = vld [vmem:[%s5981_s7 + $0x1100] sm:$0xff] }
  0xa0   : > { %721 = vst [vmem:[%s5986_s8 + $0x870] sm:$0xff] %v720_v14  ;;  %723 = vst [vmem:[%s5986_s8 + $0x878] sm:$0xff] %v722_v15  ;;  %v726_v17 = vld [vmem:[%s5981_s7 + $0x1108] sm:$0xff]  ;;  %v728_v18 = vld [vmem:[%s5981_s7 + $0x1110] sm:$0xff] }
  0xa1   : > { %725 = vst [vmem:[%s5986_s8 + $0x880] sm:$0xff] %v724_v16  ;;  %v730_v19 = vld [vmem:[%s5981_s7 + $0x1118] sm:$0xff]  ;;  %727 = vst [vmem:[%s5986_s8 + $0x888] sm:$0xff] %v726_v17  ;;  %v732_v20 = vld [vmem:[%s5981_s7 + $0x1140] sm:$0xff] }
  0xa2   : > { %729 = vst [vmem:[%s5986_s8 + $0x890] sm:$0xff] %v728_v18  ;;  %731 = vst [vmem:[%s5986_s8 + $0x898] sm:$0xff] %v730_v19  ;;  %v734_v21 = vld [vmem:[%s5981_s7 + $0x1148] sm:$0xff]  ;;  %v736_v22 = vld [vmem:[%s5981_s7 + $0x1150] sm:$0xff] }
  0xa3   : > { %733 = vst [vmem:[%s5986_s8 + $0x8a0] sm:$0xff] %v732_v20  ;;  %735 = vst [vmem:[%s5986_s8 + $0x8a8] sm:$0xff] %v734_v21  ;;  %v738_v23 = vld [vmem:[%s5981_s7 + $0x1158] sm:$0xff]  ;;  %v740_v24 = vld [vmem:[%s5981_s7 + $0x1180] sm:$0xff] }
  0xa4   : > { %737 = vst [vmem:[%s5986_s8 + $0x8b0] sm:$0xff] %v736_v22  ;;  %v742_v25 = vld [vmem:[%s5981_s7 + $0x1188] sm:$0xff]  ;;  %739 = vst [vmem:[%s5986_s8 + $0x8b8] sm:$0xff] %v738_v23  ;;  %v744_v26 = vld [vmem:[%s5981_s7 + $0x1190] sm:$0xff] }
  0xa5   : > { %741 = vst [vmem:[%s5986_s8 + $0x8c0] sm:$0xff] %v740_v24  ;;  %743 = vst [vmem:[%s5986_s8 + $0x8c8] sm:$0xff] %v742_v25  ;;  %v746_v27 = vld [vmem:[%s5981_s7 + $0x1198] sm:$0xff]  ;;  %v748_v28 = vld [vmem:[%s5981_s7 + $0x11c0] sm:$0xff] }
  0xa6   : > { %745 = vst [vmem:[%s5986_s8 + $0x8d0] sm:$0xff] %v744_v26  ;;  %747 = vst [vmem:[%s5986_s8 + $0x8d8] sm:$0xff] %v746_v27  ;;  %v750_v29 = vld [vmem:[%s5981_s7 + $0x11c8] sm:$0xff]  ;;  %v752_v30 = vld [vmem:[%s5981_s7 + $0x11d0] sm:$0xff] }
  0xa7   : > { %749 = vst [vmem:[%s5986_s8 + $0x8e0] sm:$0xff] %v748_v28  ;;  %v754_v31 = vld [vmem:[%s5981_s7 + $0x11d8] sm:$0xff]  ;;  %751 = vst [vmem:[%s5986_s8 + $0x8e8] sm:$0xff] %v750_v29  ;;  %v756_v32 = vld [vmem:[%s5981_s7 + $0x1200] sm:$0xff] }
  0xa8   : > { %753 = vst [vmem:[%s5986_s8 + $0x8f0] sm:$0xff] %v752_v30  ;;  %755 = vst [vmem:[%s5986_s8 + $0x8f8] sm:$0xff] %v754_v31  ;;  %v758_v33 = vld [vmem:[%s5981_s7 + $0x1208] sm:$0xff]  ;;  %v760_v34 = vld [vmem:[%s5981_s7 + $0x1210] sm:$0xff] }
  0xa9   : > { %757 = vst [vmem:[%s5986_s8 + $0x900] sm:$0xff] %v756_v32  ;;  %759 = vst [vmem:[%s5986_s8 + $0x908] sm:$0xff] %v758_v33  ;;  %v762_v35 = vld [vmem:[%s5981_s7 + $0x1218] sm:$0xff]  ;;  %v764_v36 = vld [vmem:[%s5981_s7 + $0x1240] sm:$0xff] }
  0xaa   : > { %761 = vst [vmem:[%s5986_s8 + $0x910] sm:$0xff] %v760_v34  ;;  %v766_v37 = vld [vmem:[%s5981_s7 + $0x1248] sm:$0xff]  ;;  %763 = vst [vmem:[%s5986_s8 + $0x918] sm:$0xff] %v762_v35  ;;  %v768_v38 = vld [vmem:[%s5981_s7 + $0x1250] sm:$0xff] }
  0xab   : > { %765 = vst [vmem:[%s5986_s8 + $0x920] sm:$0xff] %v764_v36  ;;  %767 = vst [vmem:[%s5986_s8 + $0x928] sm:$0xff] %v766_v37  ;;  %v770_v39 = vld [vmem:[%s5981_s7 + $0x1258] sm:$0xff]  ;;  %v772_v40 = vld [vmem:[%s5981_s7 + $0x1280] sm:$0xff] }
  0xac   : > { %769 = vst [vmem:[%s5986_s8 + $0x930] sm:$0xff] %v768_v38  ;;  %771 = vst [vmem:[%s5986_s8 + $0x938] sm:$0xff] %v770_v39  ;;  %v774_v41 = vld [vmem:[%s5981_s7 + $0x1288] sm:$0xff]  ;;  %v776_v42 = vld [vmem:[%s5981_s7 + $0x1290] sm:$0xff] }
  0xad   : > { %773 = vst [vmem:[%s5986_s8 + $0x940] sm:$0xff] %v772_v40  ;;  %v778_v43 = vld [vmem:[%s5981_s7 + $0x1298] sm:$0xff]  ;;  %775 = vst [vmem:[%s5986_s8 + $0x948] sm:$0xff] %v774_v41  ;;  %v780_v44 = vld [vmem:[%s5981_s7 + $0x12c0] sm:$0xff] }
  0xae   : > { %777 = vst [vmem:[%s5986_s8 + $0x950] sm:$0xff] %v776_v42  ;;  %779 = vst [vmem:[%s5986_s8 + $0x958] sm:$0xff] %v778_v43  ;;  %v782_v45 = vld [vmem:[%s5981_s7 + $0x12c8] sm:$0xff]  ;;  %v784_v46 = vld [vmem:[%s5981_s7 + $0x12d0] sm:$0xff] }
  0xaf   : > { %781 = vst [vmem:[%s5986_s8 + $0x960] sm:$0xff] %v780_v44  ;;  %783 = vst [vmem:[%s5986_s8 + $0x968] sm:$0xff] %v782_v45  ;;  %v786_v47 = vld [vmem:[%s5981_s7 + $0x12d8] sm:$0xff]  ;;  %v788_v48 = vld [vmem:[%s5981_s7 + $0x1300] sm:$0xff] }
  0xb0   : > { %785 = vst [vmem:[%s5986_s8 + $0x970] sm:$0xff] %v784_v46  ;;  %v790_v49 = vld [vmem:[%s5981_s7 + $0x1308] sm:$0xff]  ;;  %787 = vst [vmem:[%s5986_s8 + $0x978] sm:$0xff] %v786_v47  ;;  %v792_v50 = vld [vmem:[%s5981_s7 + $0x1310] sm:$0xff] }
  0xb1   : > { %789 = vst [vmem:[%s5986_s8 + $0x980] sm:$0xff] %v788_v48  ;;  %791 = vst [vmem:[%s5986_s8 + $0x988] sm:$0xff] %v790_v49  ;;  %v794_v51 = vld [vmem:[%s5981_s7 + $0x1318] sm:$0xff]  ;;  %v796_v52 = vld [vmem:[%s5981_s7 + $0x1340] sm:$0xff] }
  0xb2   : > { %793 = vst [vmem:[%s5986_s8 + $0x990] sm:$0xff] %v792_v50  ;;  %795 = vst [vmem:[%s5986_s8 + $0x998] sm:$0xff] %v794_v51  ;;  %v798_v53 = vld [vmem:[%s5981_s7 + $0x1348] sm:$0xff]  ;;  %v800_v54 = vld [vmem:[%s5981_s7 + $0x1350] sm:$0xff] }
  0xb3   : > { %797 = vst [vmem:[%s5986_s8 + $0x9a0] sm:$0xff] %v796_v52  ;;  %v802_v55 = vld [vmem:[%s5981_s7 + $0x1358] sm:$0xff]  ;;  %799 = vst [vmem:[%s5986_s8 + $0x9a8] sm:$0xff] %v798_v53  ;;  %v804_v56 = vld [vmem:[%s5981_s7 + $0x1380] sm:$0xff] }
  0xb4   : > { %801 = vst [vmem:[%s5986_s8 + $0x9b0] sm:$0xff] %v800_v54  ;;  %803 = vst [vmem:[%s5986_s8 + $0x9b8] sm:$0xff] %v802_v55  ;;  %v806_v57 = vld [vmem:[%s5981_s7 + $0x1388] sm:$0xff]  ;;  %v808_v58 = vld [vmem:[%s5981_s7 + $0x1390] sm:$0xff] }
  0xb5   : > { %805 = vst [vmem:[%s5986_s8 + $0x9c0] sm:$0xff] %v804_v56  ;;  %807 = vst [vmem:[%s5986_s8 + $0x9c8] sm:$0xff] %v806_v57  ;;  %v810_v59 = vld [vmem:[%s5981_s7 + $0x1398] sm:$0xff]  ;;  %v812_v60 = vld [vmem:[%s5981_s7 + $0x13c0] sm:$0xff] }
  0xb6   : > { %809 = vst [vmem:[%s5986_s8 + $0x9d0] sm:$0xff] %v808_v58  ;;  %v814_v61 = vld [vmem:[%s5981_s7 + $0x13c8] sm:$0xff]  ;;  %811 = vst [vmem:[%s5986_s8 + $0x9d8] sm:$0xff] %v810_v59  ;;  %v816_v62 = vld [vmem:[%s5981_s7 + $0x13d0] sm:$0xff] }
  0xb7   : > { %813 = vst [vmem:[%s5986_s8 + $0x9e0] sm:$0xff] %v812_v60  ;;  %815 = vst [vmem:[%s5986_s8 + $0x9e8] sm:$0xff] %v814_v61  ;;  %v818_v63 = vld [vmem:[%s5981_s7 + $0x13d8] sm:$0xff]  ;;  %v820_v0 = vld [vmem:[%s5981_s7 + $0x1400] sm:$0xff] }
  0xb8   : > { %817 = vst [vmem:[%s5986_s8 + $0x9f0] sm:$0xff] %v816_v62  ;;  %819 = vst [vmem:[%s5986_s8 + $0x9f8] sm:$0xff] %v818_v63  ;;  %v822_v1 = vld [vmem:[%s5981_s7 + $0x1408] sm:$0xff]  ;;  %v824_v2 = vld [vmem:[%s5981_s7 + $0x1410] sm:$0xff] }
  0xb9   : > { %821 = vst [vmem:[%s5986_s8 + $0xa00] sm:$0xff] %v820_v0  ;;  %v826_v3 = vld [vmem:[%s5981_s7 + $0x1418] sm:$0xff]  ;;  %823 = vst [vmem:[%s5986_s8 + $0xa08] sm:$0xff] %v822_v1  ;;  %v828_v4 = vld [vmem:[%s5981_s7 + $0x1440] sm:$0xff] }
  0xba   : > { %825 = vst [vmem:[%s5986_s8 + $0xa10] sm:$0xff] %v824_v2  ;;  %827 = vst [vmem:[%s5986_s8 + $0xa18] sm:$0xff] %v826_v3  ;;  %v830_v5 = vld [vmem:[%s5981_s7 + $0x1448] sm:$0xff]  ;;  %v832_v6 = vld [vmem:[%s5981_s7 + $0x1450] sm:$0xff] }
  0xbb   : > { %829 = vst [vmem:[%s5986_s8 + $0xa20] sm:$0xff] %v828_v4  ;;  %831 = vst [vmem:[%s5986_s8 + $0xa28] sm:$0xff] %v830_v5  ;;  %v834_v7 = vld [vmem:[%s5981_s7 + $0x1458] sm:$0xff]  ;;  %v836_v8 = vld [vmem:[%s5981_s7 + $0x1480] sm:$0xff] }
  0xbc   : > { %833 = vst [vmem:[%s5986_s8 + $0xa30] sm:$0xff] %v832_v6  ;;  %v838_v9 = vld [vmem:[%s5981_s7 + $0x1488] sm:$0xff]  ;;  %835 = vst [vmem:[%s5986_s8 + $0xa38] sm:$0xff] %v834_v7  ;;  %v840_v10 = vld [vmem:[%s5981_s7 + $0x1490] sm:$0xff] }
  0xbd   : > { %837 = vst [vmem:[%s5986_s8 + $0xa40] sm:$0xff] %v836_v8  ;;  %839 = vst [vmem:[%s5986_s8 + $0xa48] sm:$0xff] %v838_v9  ;;  %v842_v11 = vld [vmem:[%s5981_s7 + $0x1498] sm:$0xff]  ;;  %v844_v12 = vld [vmem:[%s5981_s7 + $0x14c0] sm:$0xff] }
  0xbe   : > { %841 = vst [vmem:[%s5986_s8 + $0xa50] sm:$0xff] %v840_v10  ;;  %843 = vst [vmem:[%s5986_s8 + $0xa58] sm:$0xff] %v842_v11  ;;  %v846_v13 = vld [vmem:[%s5981_s7 + $0x14c8] sm:$0xff]  ;;  %v848_v14 = vld [vmem:[%s5981_s7 + $0x14d0] sm:$0xff] }
  0xbf   : > { %845 = vst [vmem:[%s5986_s8 + $0xa60] sm:$0xff] %v844_v12  ;;  %v850_v15 = vld [vmem:[%s5981_s7 + $0x14d8] sm:$0xff]  ;;  %847 = vst [vmem:[%s5986_s8 + $0xa68] sm:$0xff] %v846_v13  ;;  %v852_v16 = vld [vmem:[%s5981_s7 + $0x1500] sm:$0xff] }
  0xc0   : > { %849 = vst [vmem:[%s5986_s8 + $0xa70] sm:$0xff] %v848_v14  ;;  %851 = vst [vmem:[%s5986_s8 + $0xa78] sm:$0xff] %v850_v15  ;;  %v854_v17 = vld [vmem:[%s5981_s7 + $0x1508] sm:$0xff]  ;;  %v856_v18 = vld [vmem:[%s5981_s7 + $0x1510] sm:$0xff] }
  0xc1   : > { %853 = vst [vmem:[%s5986_s8 + $0xa80] sm:$0xff] %v852_v16  ;;  %855 = vst [vmem:[%s5986_s8 + $0xa88] sm:$0xff] %v854_v17  ;;  %v858_v19 = vld [vmem:[%s5981_s7 + $0x1518] sm:$0xff]  ;;  %v860_v20 = vld [vmem:[%s5981_s7 + $0x1540] sm:$0xff] }
  0xc2   : > { %857 = vst [vmem:[%s5986_s8 + $0xa90] sm:$0xff] %v856_v18  ;;  %v862_v21 = vld [vmem:[%s5981_s7 + $0x1548] sm:$0xff]  ;;  %859 = vst [vmem:[%s5986_s8 + $0xa98] sm:$0xff] %v858_v19  ;;  %v864_v22 = vld [vmem:[%s5981_s7 + $0x1550] sm:$0xff] }
  0xc3   : > { %861 = vst [vmem:[%s5986_s8 + $0xaa0] sm:$0xff] %v860_v20  ;;  %863 = vst [vmem:[%s5986_s8 + $0xaa8] sm:$0xff] %v862_v21  ;;  %v866_v23 = vld [vmem:[%s5981_s7 + $0x1558] sm:$0xff]  ;;  %v868_v24 = vld [vmem:[%s5981_s7 + $0x1580] sm:$0xff] }
  0xc4   : > { %865 = vst [vmem:[%s5986_s8 + $0xab0] sm:$0xff] %v864_v22  ;;  %867 = vst [vmem:[%s5986_s8 + $0xab8] sm:$0xff] %v866_v23  ;;  %v870_v25 = vld [vmem:[%s5981_s7 + $0x1588] sm:$0xff]  ;;  %v872_v26 = vld [vmem:[%s5981_s7 + $0x1590] sm:$0xff] }
  0xc5   : > { %869 = vst [vmem:[%s5986_s8 + $0xac0] sm:$0xff] %v868_v24  ;;  %v874_v27 = vld [vmem:[%s5981_s7 + $0x1598] sm:$0xff]  ;;  %871 = vst [vmem:[%s5986_s8 + $0xac8] sm:$0xff] %v870_v25  ;;  %v876_v28 = vld [vmem:[%s5981_s7 + $0x15c0] sm:$0xff] }
  0xc6   : > { %873 = vst [vmem:[%s5986_s8 + $0xad0] sm:$0xff] %v872_v26  ;;  %875 = vst [vmem:[%s5986_s8 + $0xad8] sm:$0xff] %v874_v27  ;;  %v878_v29 = vld [vmem:[%s5981_s7 + $0x15c8] sm:$0xff]  ;;  %v880_v30 = vld [vmem:[%s5981_s7 + $0x15d0] sm:$0xff] }
  0xc7   : > { %877 = vst [vmem:[%s5986_s8 + $0xae0] sm:$0xff] %v876_v28  ;;  %879 = vst [vmem:[%s5986_s8 + $0xae8] sm:$0xff] %v878_v29  ;;  %v882_v31 = vld [vmem:[%s5981_s7 + $0x15d8] sm:$0xff]  ;;  %v884_v32 = vld [vmem:[%s5981_s7 + $0x1600] sm:$0xff] }
  0xc8   : > { %881 = vst [vmem:[%s5986_s8 + $0xaf0] sm:$0xff] %v880_v30  ;;  %v886_v33 = vld [vmem:[%s5981_s7 + $0x1608] sm:$0xff]  ;;  %883 = vst [vmem:[%s5986_s8 + $0xaf8] sm:$0xff] %v882_v31  ;;  %v888_v34 = vld [vmem:[%s5981_s7 + $0x1610] sm:$0xff] }
  0xc9   : > { %885 = vst [vmem:[%s5986_s8 + $0xb00] sm:$0xff] %v884_v32  ;;  %887 = vst [vmem:[%s5986_s8 + $0xb08] sm:$0xff] %v886_v33  ;;  %v890_v35 = vld [vmem:[%s5981_s7 + $0x1618] sm:$0xff]  ;;  %v892_v36 = vld [vmem:[%s5981_s7 + $0x1640] sm:$0xff] }
  0xca   : > { %889 = vst [vmem:[%s5986_s8 + $0xb10] sm:$0xff] %v888_v34  ;;  %891 = vst [vmem:[%s5986_s8 + $0xb18] sm:$0xff] %v890_v35  ;;  %v894_v37 = vld [vmem:[%s5981_s7 + $0x1648] sm:$0xff]  ;;  %v896_v38 = vld [vmem:[%s5981_s7 + $0x1650] sm:$0xff] }
  0xcb   : > { %893 = vst [vmem:[%s5986_s8 + $0xb20] sm:$0xff] %v892_v36  ;;  %v898_v39 = vld [vmem:[%s5981_s7 + $0x1658] sm:$0xff]  ;;  %895 = vst [vmem:[%s5986_s8 + $0xb28] sm:$0xff] %v894_v37  ;;  %v900_v40 = vld [vmem:[%s5981_s7 + $0x1680] sm:$0xff] }
  0xcc   : > { %897 = vst [vmem:[%s5986_s8 + $0xb30] sm:$0xff] %v896_v38  ;;  %899 = vst [vmem:[%s5986_s8 + $0xb38] sm:$0xff] %v898_v39  ;;  %v902_v41 = vld [vmem:[%s5981_s7 + $0x1688] sm:$0xff]  ;;  %v904_v42 = vld [vmem:[%s5981_s7 + $0x1690] sm:$0xff] }
  0xcd   : > { %901 = vst [vmem:[%s5986_s8 + $0xb40] sm:$0xff] %v900_v40  ;;  %903 = vst [vmem:[%s5986_s8 + $0xb48] sm:$0xff] %v902_v41  ;;  %v906_v43 = vld [vmem:[%s5981_s7 + $0x1698] sm:$0xff]  ;;  %v908_v44 = vld [vmem:[%s5981_s7 + $0x16c0] sm:$0xff] }
  0xce   : > { %905 = vst [vmem:[%s5986_s8 + $0xb50] sm:$0xff] %v904_v42  ;;  %v910_v45 = vld [vmem:[%s5981_s7 + $0x16c8] sm:$0xff]  ;;  %907 = vst [vmem:[%s5986_s8 + $0xb58] sm:$0xff] %v906_v43  ;;  %v912_v46 = vld [vmem:[%s5981_s7 + $0x16d0] sm:$0xff] }
  0xcf   : > { %909 = vst [vmem:[%s5986_s8 + $0xb60] sm:$0xff] %v908_v44  ;;  %911 = vst [vmem:[%s5986_s8 + $0xb68] sm:$0xff] %v910_v45  ;;  %v914_v47 = vld [vmem:[%s5981_s7 + $0x16d8] sm:$0xff]  ;;  %v916_v48 = vld [vmem:[%s5981_s7 + $0x1700] sm:$0xff] }
  0xd0   : > { %913 = vst [vmem:[%s5986_s8 + $0xb70] sm:$0xff] %v912_v46  ;;  %915 = vst [vmem:[%s5986_s8 + $0xb78] sm:$0xff] %v914_v47  ;;  %v918_v49 = vld [vmem:[%s5981_s7 + $0x1708] sm:$0xff]  ;;  %v920_v50 = vld [vmem:[%s5981_s7 + $0x1710] sm:$0xff] }
  0xd1   : > { %917 = vst [vmem:[%s5986_s8 + $0xb80] sm:$0xff] %v916_v48  ;;  %v922_v51 = vld [vmem:[%s5981_s7 + $0x1718] sm:$0xff]  ;;  %919 = vst [vmem:[%s5986_s8 + $0xb88] sm:$0xff] %v918_v49  ;;  %v924_v52 = vld [vmem:[%s5981_s7 + $0x1740] sm:$0xff] }
  0xd2   : > { %921 = vst [vmem:[%s5986_s8 + $0xb90] sm:$0xff] %v920_v50  ;;  %923 = vst [vmem:[%s5986_s8 + $0xb98] sm:$0xff] %v922_v51  ;;  %v926_v53 = vld [vmem:[%s5981_s7 + $0x1748] sm:$0xff]  ;;  %v928_v54 = vld [vmem:[%s5981_s7 + $0x1750] sm:$0xff] }
  0xd3   : > { %925 = vst [vmem:[%s5986_s8 + $0xba0] sm:$0xff] %v924_v52  ;;  %927 = vst [vmem:[%s5986_s8 + $0xba8] sm:$0xff] %v926_v53  ;;  %v930_v55 = vld [vmem:[%s5981_s7 + $0x1758] sm:$0xff]  ;;  %v932_v56 = vld [vmem:[%s5981_s7 + $0x1780] sm:$0xff] }
  0xd4   : > { %929 = vst [vmem:[%s5986_s8 + $0xbb0] sm:$0xff] %v928_v54  ;;  %v934_v57 = vld [vmem:[%s5981_s7 + $0x1788] sm:$0xff]  ;;  %931 = vst [vmem:[%s5986_s8 + $0xbb8] sm:$0xff] %v930_v55  ;;  %v936_v58 = vld [vmem:[%s5981_s7 + $0x1790] sm:$0xff] }
  0xd5   : > { %933 = vst [vmem:[%s5986_s8 + $0xbc0] sm:$0xff] %v932_v56  ;;  %935 = vst [vmem:[%s5986_s8 + $0xbc8] sm:$0xff] %v934_v57  ;;  %v938_v59 = vld [vmem:[%s5981_s7 + $0x1798] sm:$0xff]  ;;  %v940_v60 = vld [vmem:[%s5981_s7 + $0x17c0] sm:$0xff] }
  0xd6   : > { %937 = vst [vmem:[%s5986_s8 + $0xbd0] sm:$0xff] %v936_v58  ;;  %939 = vst [vmem:[%s5986_s8 + $0xbd8] sm:$0xff] %v938_v59  ;;  %v942_v61 = vld [vmem:[%s5981_s7 + $0x17c8] sm:$0xff]  ;;  %v944_v62 = vld [vmem:[%s5981_s7 + $0x17d0] sm:$0xff] }
  0xd7   : > { %941 = vst [vmem:[%s5986_s8 + $0xbe0] sm:$0xff] %v940_v60  ;;  %v946_v63 = vld [vmem:[%s5981_s7 + $0x17d8] sm:$0xff]  ;;  %943 = vst [vmem:[%s5986_s8 + $0xbe8] sm:$0xff] %v942_v61  ;;  %v948_v0 = vld [vmem:[%s5981_s7 + $0x1800] sm:$0xff] }
  0xd8   : > { %945 = vst [vmem:[%s5986_s8 + $0xbf0] sm:$0xff] %v944_v62  ;;  %947 = vst [vmem:[%s5986_s8 + $0xbf8] sm:$0xff] %v946_v63  ;;  %v950_v1 = vld [vmem:[%s5981_s7 + $0x1808] sm:$0xff]  ;;  %v952_v2 = vld [vmem:[%s5981_s7 + $0x1810] sm:$0xff] }
  0xd9   : > { %949 = vst [vmem:[%s5986_s8 + $0xc00] sm:$0xff] %v948_v0  ;;  %951 = vst [vmem:[%s5986_s8 + $0xc08] sm:$0xff] %v950_v1  ;;  %v954_v3 = vld [vmem:[%s5981_s7 + $0x1818] sm:$0xff]  ;;  %v956_v4 = vld [vmem:[%s5981_s7 + $0x1840] sm:$0xff] }
  0xda   : > { %953 = vst [vmem:[%s5986_s8 + $0xc10] sm:$0xff] %v952_v2  ;;  %v958_v5 = vld [vmem:[%s5981_s7 + $0x1848] sm:$0xff]  ;;  %955 = vst [vmem:[%s5986_s8 + $0xc18] sm:$0xff] %v954_v3  ;;  %v960_v6 = vld [vmem:[%s5981_s7 + $0x1850] sm:$0xff] }
  0xdb   : > { %957 = vst [vmem:[%s5986_s8 + $0xc20] sm:$0xff] %v956_v4  ;;  %959 = vst [vmem:[%s5986_s8 + $0xc28] sm:$0xff] %v958_v5  ;;  %v962_v7 = vld [vmem:[%s5981_s7 + $0x1858] sm:$0xff]  ;;  %v964_v8 = vld [vmem:[%s5981_s7 + $0x1880] sm:$0xff] }
  0xdc   : > { %961 = vst [vmem:[%s5986_s8 + $0xc30] sm:$0xff] %v960_v6  ;;  %963 = vst [vmem:[%s5986_s8 + $0xc38] sm:$0xff] %v962_v7  ;;  %v966_v9 = vld [vmem:[%s5981_s7 + $0x1888] sm:$0xff]  ;;  %v968_v10 = vld [vmem:[%s5981_s7 + $0x1890] sm:$0xff] }
  0xdd   : > { %965 = vst [vmem:[%s5986_s8 + $0xc40] sm:$0xff] %v964_v8  ;;  %v970_v11 = vld [vmem:[%s5981_s7 + $0x1898] sm:$0xff]  ;;  %967 = vst [vmem:[%s5986_s8 + $0xc48] sm:$0xff] %v966_v9  ;;  %v972_v12 = vld [vmem:[%s5981_s7 + $0x18c0] sm:$0xff] }
  0xde   : > { %969 = vst [vmem:[%s5986_s8 + $0xc50] sm:$0xff] %v968_v10  ;;  %971 = vst [vmem:[%s5986_s8 + $0xc58] sm:$0xff] %v970_v11  ;;  %v974_v13 = vld [vmem:[%s5981_s7 + $0x18c8] sm:$0xff]  ;;  %v976_v14 = vld [vmem:[%s5981_s7 + $0x18d0] sm:$0xff] }
  0xdf   : > { %973 = vst [vmem:[%s5986_s8 + $0xc60] sm:$0xff] %v972_v12  ;;  %975 = vst [vmem:[%s5986_s8 + $0xc68] sm:$0xff] %v974_v13  ;;  %v978_v15 = vld [vmem:[%s5981_s7 + $0x18d8] sm:$0xff]  ;;  %v980_v16 = vld [vmem:[%s5981_s7 + $0x1900] sm:$0xff] }
  0xe0   : > { %977 = vst [vmem:[%s5986_s8 + $0xc70] sm:$0xff] %v976_v14  ;;  %v982_v17 = vld [vmem:[%s5981_s7 + $0x1908] sm:$0xff]  ;;  %979 = vst [vmem:[%s5986_s8 + $0xc78] sm:$0xff] %v978_v15  ;;  %v984_v18 = vld [vmem:[%s5981_s7 + $0x1910] sm:$0xff] }
  0xe1   : > { %981 = vst [vmem:[%s5986_s8 + $0xc80] sm:$0xff] %v980_v16  ;;  %983 = vst [vmem:[%s5986_s8 + $0xc88] sm:$0xff] %v982_v17  ;;  %v986_v19 = vld [vmem:[%s5981_s7 + $0x1918] sm:$0xff]  ;;  %v988_v20 = vld [vmem:[%s5981_s7 + $0x1940] sm:$0xff] }
  0xe2   : > { %985 = vst [vmem:[%s5986_s8 + $0xc90] sm:$0xff] %v984_v18  ;;  %987 = vst [vmem:[%s5986_s8 + $0xc98] sm:$0xff] %v986_v19  ;;  %v990_v21 = vld [vmem:[%s5981_s7 + $0x1948] sm:$0xff]  ;;  %v992_v22 = vld [vmem:[%s5981_s7 + $0x1950] sm:$0xff] }
  0xe3   : > { %989 = vst [vmem:[%s5986_s8 + $0xca0] sm:$0xff] %v988_v20  ;;  %v994_v23 = vld [vmem:[%s5981_s7 + $0x1958] sm:$0xff]  ;;  %991 = vst [vmem:[%s5986_s8 + $0xca8] sm:$0xff] %v990_v21  ;;  %v996_v24 = vld [vmem:[%s5981_s7 + $0x1980] sm:$0xff] }
  0xe4   : > { %993 = vst [vmem:[%s5986_s8 + $0xcb0] sm:$0xff] %v992_v22  ;;  %995 = vst [vmem:[%s5986_s8 + $0xcb8] sm:$0xff] %v994_v23  ;;  %v998_v25 = vld [vmem:[%s5981_s7 + $0x1988] sm:$0xff]  ;;  %v1000_v26 = vld [vmem:[%s5981_s7 + $0x1990] sm:$0xff] }
  0xe5   : > { %997 = vst [vmem:[%s5986_s8 + $0xcc0] sm:$0xff] %v996_v24  ;;  %999 = vst [vmem:[%s5986_s8 + $0xcc8] sm:$0xff] %v998_v25  ;;  %v1002_v27 = vld [vmem:[%s5981_s7 + $0x1998] sm:$0xff]  ;;  %v1004_v28 = vld [vmem:[%s5981_s7 + $0x19c0] sm:$0xff] }
  0xe6   : > { %1001 = vst [vmem:[%s5986_s8 + $0xcd0] sm:$0xff] %v1000_v26  ;;  %v1006_v29 = vld [vmem:[%s5981_s7 + $0x19c8] sm:$0xff]  ;;  %1003 = vst [vmem:[%s5986_s8 + $0xcd8] sm:$0xff] %v1002_v27  ;;  %v1008_v30 = vld [vmem:[%s5981_s7 + $0x19d0] sm:$0xff] }
  0xe7   : > { %1005 = vst [vmem:[%s5986_s8 + $0xce0] sm:$0xff] %v1004_v28  ;;  %1007 = vst [vmem:[%s5986_s8 + $0xce8] sm:$0xff] %v1006_v29  ;;  %v1010_v31 = vld [vmem:[%s5981_s7 + $0x19d8] sm:$0xff]  ;;  %v1012_v32 = vld [vmem:[%s5981_s7 + $0x1a00] sm:$0xff] }
  0xe8   : > { %1009 = vst [vmem:[%s5986_s8 + $0xcf0] sm:$0xff] %v1008_v30  ;;  %1011 = vst [vmem:[%s5986_s8 + $0xcf8] sm:$0xff] %v1010_v31  ;;  %v1014_v33 = vld [vmem:[%s5981_s7 + $0x1a08] sm:$0xff]  ;;  %v1016_v34 = vld [vmem:[%s5981_s7 + $0x1a10] sm:$0xff] }
  0xe9   : > { %1013 = vst [vmem:[%s5986_s8 + $0xd00] sm:$0xff] %v1012_v32  ;;  %v1018_v35 = vld [vmem:[%s5981_s7 + $0x1a18] sm:$0xff]  ;;  %1015 = vst [vmem:[%s5986_s8 + $0xd08] sm:$0xff] %v1014_v33  ;;  %v1020_v36 = vld [vmem:[%s5981_s7 + $0x1a40] sm:$0xff] }
  0xea   : > { %1017 = vst [vmem:[%s5986_s8 + $0xd10] sm:$0xff] %v1016_v34  ;;  %1019 = vst [vmem:[%s5986_s8 + $0xd18] sm:$0xff] %v1018_v35  ;;  %v1022_v37 = vld [vmem:[%s5981_s7 + $0x1a48] sm:$0xff]  ;;  %v1024_v38 = vld [vmem:[%s5981_s7 + $0x1a50] sm:$0xff] }
  0xeb   : > { %1021 = vst [vmem:[%s5986_s8 + $0xd20] sm:$0xff] %v1020_v36  ;;  %1023 = vst [vmem:[%s5986_s8 + $0xd28] sm:$0xff] %v1022_v37  ;;  %v1026_v39 = vld [vmem:[%s5981_s7 + $0x1a58] sm:$0xff]  ;;  %v1028_v40 = vld [vmem:[%s5981_s7 + $0x1a80] sm:$0xff] }
  0xec   : > { %1025 = vst [vmem:[%s5986_s8 + $0xd30] sm:$0xff] %v1024_v38  ;;  %v1030_v41 = vld [vmem:[%s5981_s7 + $0x1a88] sm:$0xff]  ;;  %1027 = vst [vmem:[%s5986_s8 + $0xd38] sm:$0xff] %v1026_v39  ;;  %v1032_v42 = vld [vmem:[%s5981_s7 + $0x1a90] sm:$0xff] }
  0xed   : > { %1029 = vst [vmem:[%s5986_s8 + $0xd40] sm:$0xff] %v1028_v40  ;;  %1031 = vst [vmem:[%s5986_s8 + $0xd48] sm:$0xff] %v1030_v41  ;;  %v1034_v43 = vld [vmem:[%s5981_s7 + $0x1a98] sm:$0xff]  ;;  %v1036_v44 = vld [vmem:[%s5981_s7 + $0x1ac0] sm:$0xff] }
  0xee   : > { %1033 = vst [vmem:[%s5986_s8 + $0xd50] sm:$0xff] %v1032_v42  ;;  %1035 = vst [vmem:[%s5986_s8 + $0xd58] sm:$0xff] %v1034_v43  ;;  %v1038_v45 = vld [vmem:[%s5981_s7 + $0x1ac8] sm:$0xff]  ;;  %v1040_v46 = vld [vmem:[%s5981_s7 + $0x1ad0] sm:$0xff] }
  0xef   : > { %1037 = vst [vmem:[%s5986_s8 + $0xd60] sm:$0xff] %v1036_v44  ;;  %v1042_v47 = vld [vmem:[%s5981_s7 + $0x1ad8] sm:$0xff]  ;;  %1039 = vst [vmem:[%s5986_s8 + $0xd68] sm:$0xff] %v1038_v45  ;;  %v1044_v48 = vld [vmem:[%s5981_s7 + $0x1b00] sm:$0xff] }
  0xf0   : > { %1041 = vst [vmem:[%s5986_s8 + $0xd70] sm:$0xff] %v1040_v46  ;;  %1043 = vst [vmem:[%s5986_s8 + $0xd78] sm:$0xff] %v1042_v47  ;;  %v1046_v49 = vld [vmem:[%s5981_s7 + $0x1b08] sm:$0xff]  ;;  %v1048_v50 = vld [vmem:[%s5981_s7 + $0x1b10] sm:$0xff] }
  0xf1   : > { %1045 = vst [vmem:[%s5986_s8 + $0xd80] sm:$0xff] %v1044_v48  ;;  %1047 = vst [vmem:[%s5986_s8 + $0xd88] sm:$0xff] %v1046_v49  ;;  %v1050_v51 = vld [vmem:[%s5981_s7 + $0x1b18] sm:$0xff]  ;;  %v1052_v52 = vld [vmem:[%s5981_s7 + $0x1b40] sm:$0xff] }
  0xf2   : > { %1049 = vst [vmem:[%s5986_s8 + $0xd90] sm:$0xff] %v1048_v50  ;;  %v1054_v53 = vld [vmem:[%s5981_s7 + $0x1b48] sm:$0xff]  ;;  %1051 = vst [vmem:[%s5986_s8 + $0xd98] sm:$0xff] %v1050_v51  ;;  %v1056_v54 = vld [vmem:[%s5981_s7 + $0x1b50] sm:$0xff] }
  0xf3   : > { %1053 = vst [vmem:[%s5986_s8 + $0xda0] sm:$0xff] %v1052_v52  ;;  %1055 = vst [vmem:[%s5986_s8 + $0xda8] sm:$0xff] %v1054_v53  ;;  %v1058_v55 = vld [vmem:[%s5981_s7 + $0x1b58] sm:$0xff]  ;;  %v1060_v56 = vld [vmem:[%s5981_s7 + $0x1b80] sm:$0xff] }
  0xf4   : > { %1057 = vst [vmem:[%s5986_s8 + $0xdb0] sm:$0xff] %v1056_v54  ;;  %1059 = vst [vmem:[%s5986_s8 + $0xdb8] sm:$0xff] %v1058_v55  ;;  %v1062_v57 = vld [vmem:[%s5981_s7 + $0x1b88] sm:$0xff]  ;;  %v1064_v58 = vld [vmem:[%s5981_s7 + $0x1b90] sm:$0xff] }
  0xf5   : > { %1061 = vst [vmem:[%s5986_s8 + $0xdc0] sm:$0xff] %v1060_v56  ;;  %v1066_v59 = vld [vmem:[%s5981_s7 + $0x1b98] sm:$0xff]  ;;  %1063 = vst [vmem:[%s5986_s8 + $0xdc8] sm:$0xff] %v1062_v57  ;;  %v1068_v60 = vld [vmem:[%s5981_s7 + $0x1bc0] sm:$0xff] }
  0xf6   : > { %1065 = vst [vmem:[%s5986_s8 + $0xdd0] sm:$0xff] %v1064_v58  ;;  %1067 = vst [vmem:[%s5986_s8 + $0xdd8] sm:$0xff] %v1066_v59  ;;  %v1070_v61 = vld [vmem:[%s5981_s7 + $0x1bc8] sm:$0xff]  ;;  %v1072_v62 = vld [vmem:[%s5981_s7 + $0x1bd0] sm:$0xff] }
  0xf7   : > { %1069 = vst [vmem:[%s5986_s8 + $0xde0] sm:$0xff] %v1068_v60  ;;  %1071 = vst [vmem:[%s5986_s8 + $0xde8] sm:$0xff] %v1070_v61  ;;  %v1074_v63 = vld [vmem:[%s5981_s7 + $0x1bd8] sm:$0xff]  ;;  %v1076_v0 = vld [vmem:[%s5981_s7 + $0x1c00] sm:$0xff] }
  0xf8   : > { %1073 = vst [vmem:[%s5986_s8 + $0xdf0] sm:$0xff] %v1072_v62  ;;  %v1078_v1 = vld [vmem:[%s5981_s7 + $0x1c08] sm:$0xff]  ;;  %1075 = vst [vmem:[%s5986_s8 + $0xdf8] sm:$0xff] %v1074_v63  ;;  %v1080_v2 = vld [vmem:[%s5981_s7 + $0x1c10] sm:$0xff] }
  0xf9   : > { %1077 = vst [vmem:[%s5986_s8 + $0xe00] sm:$0xff] %v1076_v0  ;;  %1079 = vst [vmem:[%s5986_s8 + $0xe08] sm:$0xff] %v1078_v1  ;;  %v1082_v3 = vld [vmem:[%s5981_s7 + $0x1c18] sm:$0xff]  ;;  %v1084_v4 = vld [vmem:[%s5981_s7 + $0x1c40] sm:$0xff] }
  0xfa   : > { %1081 = vst [vmem:[%s5986_s8 + $0xe10] sm:$0xff] %v1080_v2  ;;  %1083 = vst [vmem:[%s5986_s8 + $0xe18] sm:$0xff] %v1082_v3  ;;  %v1086_v5 = vld [vmem:[%s5981_s7 + $0x1c48] sm:$0xff]  ;;  %v1088_v6 = vld [vmem:[%s5981_s7 + $0x1c50] sm:$0xff] }
  0xfb   : > { %1085 = vst [vmem:[%s5986_s8 + $0xe20] sm:$0xff] %v1084_v4  ;;  %v1090_v7 = vld [vmem:[%s5981_s7 + $0x1c58] sm:$0xff]  ;;  %1087 = vst [vmem:[%s5986_s8 + $0xe28] sm:$0xff] %v1086_v5  ;;  %v1092_v8 = vld [vmem:[%s5981_s7 + $0x1c80] sm:$0xff] }
  0xfc   : > { %1089 = vst [vmem:[%s5986_s8 + $0xe30] sm:$0xff] %v1088_v6  ;;  %1091 = vst [vmem:[%s5986_s8 + $0xe38] sm:$0xff] %v1090_v7  ;;  %v1094_v9 = vld [vmem:[%s5981_s7 + $0x1c88] sm:$0xff]  ;;  %v1096_v10 = vld [vmem:[%s5981_s7 + $0x1c90] sm:$0xff] }
  0xfd   : > { %1093 = vst [vmem:[%s5986_s8 + $0xe40] sm:$0xff] %v1092_v8  ;;  %1095 = vst [vmem:[%s5986_s8 + $0xe48] sm:$0xff] %v1094_v9  ;;  %v1098_v11 = vld [vmem:[%s5981_s7 + $0x1c98] sm:$0xff]  ;;  %v1100_v12 = vld [vmem:[%s5981_s7 + $0x1cc0] sm:$0xff] }
  0xfe   : > { %1097 = vst [vmem:[%s5986_s8 + $0xe50] sm:$0xff] %v1096_v10  ;;  %v1102_v13 = vld [vmem:[%s5981_s7 + $0x1cc8] sm:$0xff]  ;;  %1099 = vst [vmem:[%s5986_s8 + $0xe58] sm:$0xff] %v1098_v11  ;;  %v1104_v14 = vld [vmem:[%s5981_s7 + $0x1cd0] sm:$0xff] }
  0xff   : > { %1101 = vst [vmem:[%s5986_s8 + $0xe60] sm:$0xff] %v1100_v12  ;;  %1103 = vst [vmem:[%s5986_s8 + $0xe68] sm:$0xff] %v1102_v13  ;;  %v1106_v15 = vld [vmem:[%s5981_s7 + $0x1cd8] sm:$0xff]  ;;  %v1108_v16 = vld [vmem:[%s5981_s7 + $0x1d00] sm:$0xff] }
 0x100   : > { %1105 = vst [vmem:[%s5986_s8 + $0xe70] sm:$0xff] %v1104_v14  ;;  %1107 = vst [vmem:[%s5986_s8 + $0xe78] sm:$0xff] %v1106_v15  ;;  %v1110_v17 = vld [vmem:[%s5981_s7 + $0x1d08] sm:$0xff]  ;;  %v1112_v18 = vld [vmem:[%s5981_s7 + $0x1d10] sm:$0xff] }
 0x101   : > { %1109 = vst [vmem:[%s5986_s8 + $0xe80] sm:$0xff] %v1108_v16  ;;  %v1114_v19 = vld [vmem:[%s5981_s7 + $0x1d18] sm:$0xff]  ;;  %1111 = vst [vmem:[%s5986_s8 + $0xe88] sm:$0xff] %v1110_v17  ;;  %v1116_v20 = vld [vmem:[%s5981_s7 + $0x1d40] sm:$0xff] }
 0x102   : > { %1113 = vst [vmem:[%s5986_s8 + $0xe90] sm:$0xff] %v1112_v18  ;;  %1115 = vst [vmem:[%s5986_s8 + $0xe98] sm:$0xff] %v1114_v19  ;;  %v1118_v21 = vld [vmem:[%s5981_s7 + $0x1d48] sm:$0xff]  ;;  %v1120_v22 = vld [vmem:[%s5981_s7 + $0x1d50] sm:$0xff] }
 0x103   : > { %1117 = vst [vmem:[%s5986_s8 + $0xea0] sm:$0xff] %v1116_v20  ;;  %1119 = vst [vmem:[%s5986_s8 + $0xea8] sm:$0xff] %v1118_v21  ;;  %v1122_v23 = vld [vmem:[%s5981_s7 + $0x1d58] sm:$0xff]  ;;  %v1124_v24 = vld [vmem:[%s5981_s7 + $0x1d80] sm:$0xff] }
 0x104   : > { %1121 = vst [vmem:[%s5986_s8 + $0xeb0] sm:$0xff] %v1120_v22  ;;  %v1126_v25 = vld [vmem:[%s5981_s7 + $0x1d88] sm:$0xff]  ;;  %1123 = vst [vmem:[%s5986_s8 + $0xeb8] sm:$0xff] %v1122_v23  ;;  %v1128_v26 = vld [vmem:[%s5981_s7 + $0x1d90] sm:$0xff] }
 0x105   : > { %1125 = vst [vmem:[%s5986_s8 + $0xec0] sm:$0xff] %v1124_v24  ;;  %1127 = vst [vmem:[%s5986_s8 + $0xec8] sm:$0xff] %v1126_v25  ;;  %v1130_v27 = vld [vmem:[%s5981_s7 + $0x1d98] sm:$0xff]  ;;  %v1132_v28 = vld [vmem:[%s5981_s7 + $0x1dc0] sm:$0xff] }
 0x106   : > { %1129 = vst [vmem:[%s5986_s8 + $0xed0] sm:$0xff] %v1128_v26  ;;  %1131 = vst [vmem:[%s5986_s8 + $0xed8] sm:$0xff] %v1130_v27  ;;  %v1134_v29 = vld [vmem:[%s5981_s7 + $0x1dc8] sm:$0xff]  ;;  %v1136_v30 = vld [vmem:[%s5981_s7 + $0x1dd0] sm:$0xff] }
 0x107   : > { %1133 = vst [vmem:[%s5986_s8 + $0xee0] sm:$0xff] %v1132_v28  ;;  %v1138_v31 = vld [vmem:[%s5981_s7 + $0x1dd8] sm:$0xff]  ;;  %1135 = vst [vmem:[%s5986_s8 + $0xee8] sm:$0xff] %v1134_v29  ;;  %v1140_v32 = vld [vmem:[%s5981_s7 + $0x1e00] sm:$0xff] }
 0x108   : > { %1137 = vst [vmem:[%s5986_s8 + $0xef0] sm:$0xff] %v1136_v30  ;;  %1139 = vst [vmem:[%s5986_s8 + $0xef8] sm:$0xff] %v1138_v31  ;;  %v1142_v33 = vld [vmem:[%s5981_s7 + $0x1e08] sm:$0xff]  ;;  %v1144_v34 = vld [vmem:[%s5981_s7 + $0x1e10] sm:$0xff] }
 0x109   : > { %1141 = vst [vmem:[%s5986_s8 + $0xf00] sm:$0xff] %v1140_v32  ;;  %1143 = vst [vmem:[%s5986_s8 + $0xf08] sm:$0xff] %v1142_v33  ;;  %v1146_v35 = vld [vmem:[%s5981_s7 + $0x1e18] sm:$0xff]  ;;  %v1148_v36 = vld [vmem:[%s5981_s7 + $0x1e40] sm:$0xff] }
 0x10a   : > { %1145 = vst [vmem:[%s5986_s8 + $0xf10] sm:$0xff] %v1144_v34  ;;  %v1150_v37 = vld [vmem:[%s5981_s7 + $0x1e48] sm:$0xff]  ;;  %1147 = vst [vmem:[%s5986_s8 + $0xf18] sm:$0xff] %v1146_v35  ;;  %v1152_v38 = vld [vmem:[%s5981_s7 + $0x1e50] sm:$0xff] }
 0x10b   : > { %1149 = vst [vmem:[%s5986_s8 + $0xf20] sm:$0xff] %v1148_v36  ;;  %1151 = vst [vmem:[%s5986_s8 + $0xf28] sm:$0xff] %v1150_v37  ;;  %v1154_v39 = vld [vmem:[%s5981_s7 + $0x1e58] sm:$0xff]  ;;  %v1156_v40 = vld [vmem:[%s5981_s7 + $0x1e80] sm:$0xff] }
 0x10c   : > { %1153 = vst [vmem:[%s5986_s8 + $0xf30] sm:$0xff] %v1152_v38  ;;  %1155 = vst [vmem:[%s5986_s8 + $0xf38] sm:$0xff] %v1154_v39  ;;  %v1158_v41 = vld [vmem:[%s5981_s7 + $0x1e88] sm:$0xff]  ;;  %v1160_v42 = vld [vmem:[%s5981_s7 + $0x1e90] sm:$0xff] }
 0x10d   : > { %1157 = vst [vmem:[%s5986_s8 + $0xf40] sm:$0xff] %v1156_v40  ;;  %v1162_v43 = vld [vmem:[%s5981_s7 + $0x1e98] sm:$0xff]  ;;  %1159 = vst [vmem:[%s5986_s8 + $0xf48] sm:$0xff] %v1158_v41  ;;  %v1164_v44 = vld [vmem:[%s5981_s7 + $0x1ec0] sm:$0xff] }
 0x10e   : > { %1161 = vst [vmem:[%s5986_s8 + $0xf50] sm:$0xff] %v1160_v42  ;;  %1163 = vst [vmem:[%s5986_s8 + $0xf58] sm:$0xff] %v1162_v43  ;;  %v1166_v45 = vld [vmem:[%s5981_s7 + $0x1ec8] sm:$0xff]  ;;  %v1168_v46 = vld [vmem:[%s5981_s7 + $0x1ed0] sm:$0xff] }
 0x10f   : > { %1165 = vst [vmem:[%s5986_s8 + $0xf60] sm:$0xff] %v1164_v44  ;;  %1167 = vst [vmem:[%s5986_s8 + $0xf68] sm:$0xff] %v1166_v45  ;;  %v1170_v47 = vld [vmem:[%s5981_s7 + $0x1ed8] sm:$0xff]  ;;  %v1172_v48 = vld [vmem:[%s5981_s7 + $0x1f00] sm:$0xff] }
 0x110   : > { %1169 = vst [vmem:[%s5986_s8 + $0xf70] sm:$0xff] %v1168_v46  ;;  %v1174_v49 = vld [vmem:[%s5981_s7 + $0x1f08] sm:$0xff]  ;;  %1171 = vst [vmem:[%s5986_s8 + $0xf78] sm:$0xff] %v1170_v47  ;;  %v1176_v50 = vld [vmem:[%s5981_s7 + $0x1f10] sm:$0xff] }
 0x111   : > { %1173 = vst [vmem:[%s5986_s8 + $0xf80] sm:$0xff] %v1172_v48  ;;  %1175 = vst [vmem:[%s5986_s8 + $0xf88] sm:$0xff] %v1174_v49  ;;  %v1178_v51 = vld [vmem:[%s5981_s7 + $0x1f18] sm:$0xff]  ;;  %v1180_v52 = vld [vmem:[%s5981_s7 + $0x1f40] sm:$0xff] }
 0x112   : > { %1177 = vst [vmem:[%s5986_s8 + $0xf90] sm:$0xff] %v1176_v50  ;;  %1179 = vst [vmem:[%s5986_s8 + $0xf98] sm:$0xff] %v1178_v51  ;;  %v1182_v53 = vld [vmem:[%s5981_s7 + $0x1f48] sm:$0xff]  ;;  %v1184_v54 = vld [vmem:[%s5981_s7 + $0x1f50] sm:$0xff] }
 0x113   : > { %1181 = vst [vmem:[%s5986_s8 + $0xfa0] sm:$0xff] %v1180_v52  ;;  %v1186_v55 = vld [vmem:[%s5981_s7 + $0x1f58] sm:$0xff]  ;;  %1183 = vst [vmem:[%s5986_s8 + $0xfa8] sm:$0xff] %v1182_v53  ;;  %v1188_v56 = vld [vmem:[%s5981_s7 + $0x1f80] sm:$0xff] }
 0x114   : > { %1185 = vst [vmem:[%s5986_s8 + $0xfb0] sm:$0xff] %v1184_v54  ;;  %1187 = vst [vmem:[%s5986_s8 + $0xfb8] sm:$0xff] %v1186_v55  ;;  %v1190_v57 = vld [vmem:[%s5981_s7 + $0x1f88] sm:$0xff]  ;;  %v1192_v58 = vld [vmem:[%s5981_s7 + $0x1f90] sm:$0xff] }
 0x115   : > { %1189 = vst [vmem:[%s5986_s8 + $0xfc0] sm:$0xff] %v1188_v56  ;;  %1191 = vst [vmem:[%s5986_s8 + $0xfc8] sm:$0xff] %v1190_v57  ;;  %v1194_v59 = vld [vmem:[%s5981_s7 + $0x1f98] sm:$0xff]  ;;  %v1196_v60 = vld [vmem:[%s5981_s7 + $0x1fc0] sm:$0xff] }
 0x116   : > { %1193 = vst [vmem:[%s5986_s8 + $0xfd0] sm:$0xff] %v1192_v58  ;;  %v1198_v61 = vld [vmem:[%s5981_s7 + $0x1fc8] sm:$0xff]  ;;  %1195 = vst [vmem:[%s5986_s8 + $0xfd8] sm:$0xff] %v1194_v59  ;;  %v1200_v62 = vld [vmem:[%s5981_s7 + $0x1fd0] sm:$0xff] }
 0x117   : > { %1197 = vst [vmem:[%s5986_s8 + $0xfe0] sm:$0xff] %v1196_v60  ;;  %1199 = vst [vmem:[%s5986_s8 + $0xfe8] sm:$0xff] %v1198_v61  ;;  %v1202_v63 = vld [vmem:[%s5981_s7 + $0x1fd8] sm:$0xff] }
 0x118   : > { %1201 = vst [vmem:[%s5986_s8 + $0xff0] sm:$0xff] %v1200_v62  ;;  %1203 = vst [vmem:[%s5986_s8 + $0xff8] sm:$0xff] %v1202_v63 }
 0x119 PF: > { %p5247_p7 = scmp.ge.s32.totalorder %s5898_s18, 1  ;;  %p1216_p8 = scmp.lt.s32.totalorder %s5898_s18, 7 }
 0x11b   : > { %p1217_p9 = pnand %p5247_p7, %p1216_p8 }
 0x11c   : > { %s1223_s9 = sand.u32 (!%p1217_p9), 1, %s5874_s12   ;;  %s5249_s10 = sshll.u32 (!%p1217_p9), %s5882_s14, 3 }
 0x11d   : > { %1220 = sbr.rel (%p1217_p9) target bundleno = 1049 (0x419), region = 51  ;;  %s5248_s11 = sshll.u32 (!%p1217_p9), %s1223_s9, 12 }
 0x11e   : > { %p1256_p10 = scmp.lt.s32.totalorder (!%p1217_p9), %s5249_s10, 23  ;;  %s5251_s21 = sshll.u32 (!%p1217_p9), %s5886_s15, 3 }
 0x11f   : > { %p1264_p11 = scmp.lt.s32.totalorder (!%p1217_p9), %s5251_s21, 15  ;;  %s7031_s5 = scalar_lea.vmem (!%p1217_p9), [#allocation3], %s5248_s11 }
 0x120   : > { %p5254_p12 = scmp.ne.s32.totalorder (!%p1217_p9), %s5882_s14, 0 }
 0x124   : > { %s7686_s10 = smov (!%p1256_p10, %s5249_s10), 23  ;;  %s7688_s21 = smov (!%p1264_p11, %s5251_s21), 15 }
 0x125   : > { %s5250_s22 = sshll.u32 %s7686_s10, 2  ;;  %s1266_s12 = scalar_lea.vmem %s7671_s2, %s7688_s21  ;;  %v5900_v0 = vmov (!%p5254_p12), 0.0  }
 0x126   : > { %s7017_s26 = scalar_lea.vmem %s7669_s0, %s5250_s22  ;;  %s5253_s29 = sshll.u32 %s7688_s21, 3  ;;  %1278 = vst [vmem:[#allocation2] sm:$0xff] (!%p5254_p12), %v5900_v0  ;;  %1279 = vst [vmem:[#allocation2 + $0x8] sm:$0xff] (!%p5254_p12), %v5900_v0 }
 0x127   : > { %s7029_s15 = scalar_lea.vmem %s7672_s3, %s5253_s29  ;;  %1277 = sbr.rel (%p5254_p12) target bundleno = 302 (0x12e), region = 59  ;;  %1280 = vst [vmem:[#allocation2 + $0x10] sm:$0xff] (!%p5254_p12), %v5900_v0  ;;  %1281 = vst [vmem:[#allocation2 + $0x18] sm:$0xff] (!%p5254_p12), %v5900_v0 }
 0x128   : > { %1282 = vst [vmem:[#allocation2 + $0x20] sm:$0xff] (!%p5254_p12), %v5900_v0  ;;  %1283 = vst [vmem:[#allocation2 + $0x28] sm:$0xff] (!%p5254_p12), %v5900_v0 }
 0x129   : > { %1284 = vst [vmem:[#allocation2 + $0x30] sm:$0xff] (!%p5254_p12), %v5900_v0  ;;  %1285 = vst [vmem:[#allocation2 + $0x38] sm:$0xff] (!%p5254_p12), %v5900_v0 }
 0x12e PF: > { %v1298_v1 = vld [vmem:[%s7031_s5] sm:$0xff]  ;;  %v7066_v55 = vld [vmem:[%s7017_s26 + $0x8] sm:$0xff]  ;;  %p5775_p13 = scmp.ne.s32.totalorder %s5882_s14, 2 }
 0x12f   : > { %v1302_v2 = vld [vmem:[%s7031_s5 + $0x20] sm:$0xff]  ;;  %v7076_v60 = vcombine.high %v7066_v55, %v7066_v55 }
 0x130   : > { %v1426_v3 = vld [vmem:[%s7031_s5 + $0x400] sm:$0xff]  ;;  %v5264_v4 = vcombine.high %v1298_v1, %v1302_v2  ;;  %v5263_v6 = vcombine.low %v1298_v1, %v1302_v2 }
 0x131   : > { %v1430_v5 = vld [vmem:[%s7031_s5 + $0x420] sm:$0xff]  ;;  %4471 = vmatprep.mubr.bf16.mxu1 %v7076_v60 }
 0x132   : > { %v1306_v7 = vld [vmem:[%s7031_s5 + $0x40] sm:$0xff]  ;;  %v5392_v9 = vcombine.high %v1426_v3, %v1430_v5  ;;  %v5391_v10 = vcombine.low %v1426_v3, %v1430_v5  ;;  %4398 = vmatprep.subr.bf16.mxu0 %v5264_v4 }
 0x133   : > { %v1310_v8 = vld [vmem:[%s7031_s5 + $0x60] sm:$0xff]  ;;  %4399 = vmatpush1.bf16.msra.mxu0 %v5263_v6 }
 0x134   : > { %v5272_v11 = vcombine.high %v1306_v7, %v1310_v8  ;;  %v1434_v12 = vld [vmem:[%s7031_s5 + $0x440] sm:$0xff]  ;;  %4439 = vmatprep.subr.bf16.mxu1 %v5392_v9  ;;  %v5271_v19 = vcombine.low %v1306_v7, %v1310_v8 }
 0x135   : > { %v1438_v13 = vld [vmem:[%s7031_s5 + $0x460] sm:$0xff]  ;;  %4440 = vmatpush1.bf16.msra.mxu1 %v5391_v10 }
 0x136   : > { %v1314_v14 = vld [vmem:[%s7031_s5 + $0x80] sm:$0xff]  ;;  %v5400_v15 = vcombine.high %v1434_v12, %v1438_v13  ;;  %4400 = vmatprep.subr.bf16.mxu0 %v5272_v11  ;;  %v5399_v20 = vcombine.low %v1434_v12, %v1438_v13 }
 0x137   : > { %v1318_v16 = vld [vmem:[%s7031_s5 + $0xa0] sm:$0xff]  ;;  %4401 = vmatpush1.bf16.msra.mxu0 %v5271_v19 }
 0x138   : > { %v1442_v17 = vld [vmem:[%s7031_s5 + $0x480] sm:$0xff]  ;;  %v5280_v21 = vcombine.high %v1314_v14, %v1318_v16  ;;  %4441 = vmatprep.subr.bf16.mxu1 %v5400_v15  ;;  %v5279_v27 = vcombine.low %v1314_v14, %v1318_v16 }
 0x139   : > { %v1446_v18 = vld [vmem:[%s7031_s5 + $0x4a0] sm:$0xff]  ;;  %4442 = vmatpush1.bf16.msra.mxu1 %v5399_v20 }
 0x13a   : > { %v5408_v22 = vcombine.high %v1442_v17, %v1446_v18  ;;  %v1322_v23 = vld [vmem:[%s7031_s5 + $0xc0] sm:$0xff]  ;;  %4402 = vmatprep.subr.bf16.mxu0 %v5280_v21  ;;  %v5407_v28 = vcombine.low %v1442_v17, %v1446_v18 }
 0x13b   : > { %v1326_v24 = vld [vmem:[%s7031_s5 + $0xe0] sm:$0xff]  ;;  %4403 = vmatpush1.bf16.msra.mxu0 %v5279_v27 }
 0x13c   : > { %v1450_v25 = vld [vmem:[%s7031_s5 + $0x4c0] sm:$0xff]  ;;  %v5288_v29 = vcombine.high %v1322_v23, %v1326_v24  ;;  %4443 = vmatprep.subr.bf16.mxu1 %v5408_v22  ;;  %v5287_v35 = vcombine.low %v1322_v23, %v1326_v24 }
 0x13d   : > { %v1454_v26 = vld [vmem:[%s7031_s5 + $0x4e0] sm:$0xff]  ;;  %4444 = vmatpush1.bf16.msra.mxu1 %v5407_v28 }
 0x13e   : > { %v5416_v30 = vcombine.high %v1450_v25, %v1454_v26  ;;  %v1330_v31 = vld [vmem:[%s7031_s5 + $0x100] sm:$0xff]  ;;  %4404 = vmatprep.subr.bf16.mxu0 %v5288_v29  ;;  %v5415_v36 = vcombine.low %v1450_v25, %v1454_v26 }
 0x13f   : > { %v1334_v32 = vld [vmem:[%s7031_s5 + $0x120] sm:$0xff]  ;;  %4405 = vmatpush1.bf16.msra.mxu0 %v5287_v35 }
 0x140   : > { %v1458_v33 = vld [vmem:[%s7031_s5 + $0x500] sm:$0xff]  ;;  %v5296_v37 = vcombine.high %v1330_v31, %v1334_v32  ;;  %4445 = vmatprep.subr.bf16.mxu1 %v5416_v30  ;;  %v5295_v43 = vcombine.low %v1330_v31, %v1334_v32 }
 0x141   : > { %v1462_v34 = vld [vmem:[%s7031_s5 + $0x520] sm:$0xff]  ;;  %4446 = vmatpush1.bf16.msra.mxu1 %v5415_v36 }
 0x142   : > { %v5424_v38 = vcombine.high %v1458_v33, %v1462_v34  ;;  %v1338_v39 = vld [vmem:[%s7031_s5 + $0x140] sm:$0xff]  ;;  %4406 = vmatprep.subr.bf16.mxu0 %v5296_v37  ;;  %v5423_v44 = vcombine.low %v1458_v33, %v1462_v34 }
 0x143   : > { %v1342_v40 = vld [vmem:[%s7031_s5 + $0x160] sm:$0xff]  ;;  %4407 = vmatpush1.bf16.msra.mxu0 %v5295_v43 }
 0x144   : > { %v1466_v41 = vld [vmem:[%s7031_s5 + $0x540] sm:$0xff]  ;;  %v5304_v45 = vcombine.high %v1338_v39, %v1342_v40  ;;  %4447 = vmatprep.subr.bf16.mxu1 %v5424_v38  ;;  %v5303_v51 = vcombine.low %v1338_v39, %v1342_v40 }
 0x145   : > { %v1470_v42 = vld [vmem:[%s7031_s5 + $0x560] sm:$0xff]  ;;  %4448 = vmatpush1.bf16.msra.mxu1 %v5423_v44 }
 0x146   : > { %v5432_v46 = vcombine.high %v1466_v41, %v1470_v42  ;;  %v1346_v47 = vld [vmem:[%s7031_s5 + $0x180] sm:$0xff]  ;;  %4408 = vmatprep.subr.bf16.mxu0 %v5304_v45  ;;  %v5431_v52 = vcombine.low %v1466_v41, %v1470_v42 }
 0x147   : > { %v1350_v48 = vld [vmem:[%s7031_s5 + $0x1a0] sm:$0xff]  ;;  %4409 = vmatpush1.bf16.msra.mxu0 %v5303_v51 }
 0x148   : > { %v1474_v49 = vld [vmem:[%s7031_s5 + $0x580] sm:$0xff]  ;;  %v5312_v53 = vcombine.high %v1346_v47, %v1350_v48  ;;  %4449 = vmatprep.subr.bf16.mxu1 %v5432_v46  ;;  %v5311_v63 = vcombine.low %v1346_v47, %v1350_v48 }
 0x149   : > { %v1478_v50 = vld [vmem:[%s7031_s5 + $0x5a0] sm:$0xff]  ;;  %4450 = vmatpush1.bf16.msra.mxu1 %v5431_v52 }
 0x14a   : > { %v7063_v54 = vld [vmem:[%s7017_s26] sm:$0xff]  ;;  %v5440_v56 = vcombine.high %v1474_v49, %v1478_v50  ;;  %4410 = vmatprep.subr.bf16.mxu0 %v5312_v53  ;;  %v5439_v0 = vcombine.low %v1474_v49, %v1478_v50 }
 0x14b   : > { %v1354_v57 = vld [vmem:[%s7031_s5 + $0x1c0] sm:$0xff]  ;;  %v7072_v59 = vcombine.high %v7063_v54, %v7063_v54  ;;  %4411 = vmatpush1.bf16.msra.mxu0 %v5311_v63 }
 0x14c   : > { %v1358_v58 = vld [vmem:[%s7031_s5 + $0x1e0] sm:$0xff]  ;;  %4451 = vmatprep.subr.bf16.mxu1 %v5440_v56 }
 0x14d   : > { %v1482_v61 = vld [vmem:[%s7031_s5 + $0x5c0] sm:$0xff]  ;;  %4430 = vmatprep.mubr.bf16.mxu0 %v7072_v59  ;;  %v5320_v1 = vcombine.high %v1354_v57, %v1358_v58  ;;  %v5319_v7 = vcombine.low %v1354_v57, %v1358_v58  ;;  %4452 = vmatpush1.bf16.msra.mxu1 %v5439_v0 }
 0x14e   : > { %v1486_v62 = vld [vmem:[%s7031_s5 + $0x5e0] sm:$0xff] }
 0x14f   : > { %v5448_v2 = vcombine.high %v1482_v61, %v1486_v62  ;;  %v1362_v3 = vld [vmem:[%s7031_s5 + $0x200] sm:$0xff]  ;;  %4412 = vmatprep.subr.bf16.mxu0 %v5320_v1  ;;  %v5447_v8 = vcombine.low %v1482_v61, %v1486_v62 }
 0x150   : > { %v1366_v4 = vld [vmem:[%s7031_s5 + $0x220] sm:$0xff]  ;;  %4413 = vmatpush1.bf16.msra.mxu0 %v5319_v7 }
 0x151   : > { %v1490_v5 = vld [vmem:[%s7031_s5 + $0x600] sm:$0xff]  ;;  %v5328_v9 = vcombine.high %v1362_v3, %v1366_v4  ;;  %4453 = vmatprep.subr.bf16.mxu1 %v5448_v2  ;;  %v5327_v15 = vcombine.low %v1362_v3, %v1366_v4 }
 0x152   : > { %v1494_v6 = vld [vmem:[%s7031_s5 + $0x620] sm:$0xff]  ;;  %4454 = vmatpush1.bf16.msra.mxu1 %v5447_v8 }
 0x153   : > { %v5456_v10 = vcombine.high %v1490_v5, %v1494_v6  ;;  %v1370_v11 = vld [vmem:[%s7031_s5 + $0x240] sm:$0xff]  ;;  %4414 = vmatprep.subr.bf16.mxu0 %v5328_v9  ;;  %v5455_v16 = vcombine.low %v1490_v5, %v1494_v6 }
 0x154   : > { %v1374_v12 = vld [vmem:[%s7031_s5 + $0x260] sm:$0xff]  ;;  %4415 = vmatpush1.bf16.msra.mxu0 %v5327_v15 }
 0x155   : > { %v1498_v13 = vld [vmem:[%s7031_s5 + $0x640] sm:$0xff]  ;;  %v5336_v17 = vcombine.high %v1370_v11, %v1374_v12  ;;  %4455 = vmatprep.subr.bf16.mxu1 %v5456_v10  ;;  %v5335_v23 = vcombine.low %v1370_v11, %v1374_v12 }
 0x156   : > { %v1502_v14 = vld [vmem:[%s7031_s5 + $0x660] sm:$0xff]  ;;  %4456 = vmatpush1.bf16.msra.mxu1 %v5455_v16 }
 0x157   : > { %v5464_v18 = vcombine.high %v1498_v13, %v1502_v14  ;;  %v1378_v19 = vld [vmem:[%s7031_s5 + $0x280] sm:$0xff]  ;;  %4416 = vmatprep.subr.bf16.mxu0 %v5336_v17  ;;  %v5463_v24 = vcombine.low %v1498_v13, %v1502_v14  ;;  %v7122_v17 = vcombine.low %v7063_v54, %v7063_v54 }
 0x158   : > { %v1382_v20 = vld [vmem:[%s7031_s5 + $0x2a0] sm:$0xff]  ;;  %4417 = vmatpush1.bf16.msra.mxu0 %v5335_v23  ;;  %v7134_v23 = vld [vmem:[%s7017_s26 + $0x18] sm:$0xff] }
 0x159   : > { %v1506_v21 = vld [vmem:[%s7031_s5 + $0x680] sm:$0xff]  ;;  %v5344_v25 = vcombine.high %v1378_v19, %v1382_v20  ;;  %4457 = vmatprep.subr.bf16.mxu1 %v5464_v18  ;;  %v5343_v31 = vcombine.low %v1378_v19, %v1382_v20  ;;  %v7127_v20 = vld [vmem:[%s7017_s26 + $0x10] sm:$0xff] }
 0x15a   : > { %v1510_v22 = vld [vmem:[%s7031_s5 + $0x6a0] sm:$0xff]  ;;  %4458 = vmatpush1.bf16.msra.mxu1 %v5463_v24 }
 0x15b   : > { %v5472_v26 = vcombine.high %v1506_v21, %v1510_v22  ;;  %v1386_v27 = vld [vmem:[%s7031_s5 + $0x2c0] sm:$0xff]  ;;  %4418 = vmatprep.subr.bf16.mxu0 %v5344_v25  ;;  %v5471_v32 = vcombine.low %v1506_v21, %v1510_v22  ;;  %v7131_v21 = vcombine.low %v7066_v55, %v7066_v55 }
 0x15c   : > { %v1390_v28 = vld [vmem:[%s7031_s5 + $0x2e0] sm:$0xff]  ;;  %4419 = vmatpush1.bf16.msra.mxu0 %v5343_v31 }
 0x15d   : > { %v1514_v29 = vld [vmem:[%s7031_s5 + $0x6c0] sm:$0xff]  ;;  %v5352_v33 = vcombine.high %v1386_v27, %v1390_v28  ;;  %4459 = vmatprep.subr.bf16.mxu1 %v5472_v26  ;;  %v5351_v39 = vcombine.low %v1386_v27, %v1390_v28  ;;  %v7140_v28 = vcombine.high %v7127_v20, %v7127_v20 }
 0x15e   : > { %v1518_v30 = vld [vmem:[%s7031_s5 + $0x6e0] sm:$0xff]  ;;  %4460 = vmatpush1.bf16.msra.mxu1 %v5471_v32 }
 0x15f   : > { %v5480_v34 = vcombine.high %v1514_v29, %v1518_v30  ;;  %v1394_v35 = vld [vmem:[%s7031_s5 + $0x300] sm:$0xff]  ;;  %4420 = vmatprep.subr.bf16.mxu0 %v5352_v33  ;;  %v5479_v40 = vcombine.low %v1514_v29, %v1518_v30  ;;  %v7147_v30 = vcombine.high %v7134_v23, %v7134_v23 }
 0x160   : > { %v1398_v36 = vld [vmem:[%s7031_s5 + $0x320] sm:$0xff]  ;;  %4421 = vmatpush1.bf16.msra.mxu0 %v5351_v39 }
 0x161   : > { %v1522_v37 = vld [vmem:[%s7031_s5 + $0x700] sm:$0xff]  ;;  %v5360_v41 = vcombine.high %v1394_v35, %v1398_v36  ;;  %4461 = vmatprep.subr.bf16.mxu1 %v5480_v34  ;;  %v5359_v47 = vcombine.low %v1394_v35, %v1398_v36 }
 0x162   : > { %v1526_v38 = vld [vmem:[%s7031_s5 + $0x720] sm:$0xff]  ;;  %4462 = vmatpush1.bf16.msra.mxu1 %v5479_v40 }
 0x163   : > { %v5488_v42 = vcombine.high %v1522_v37, %v1526_v38  ;;  %v1402_v43 = vld [vmem:[%s7031_s5 + $0x340] sm:$0xff]  ;;  %4422 = vmatprep.subr.bf16.mxu0 %v5360_v41  ;;  %v5487_v48 = vcombine.low %v1522_v37, %v1526_v38 }
 0x164   : > { %v1406_v44 = vld [vmem:[%s7031_s5 + $0x360] sm:$0xff]  ;;  %4423 = vmatpush1.bf16.msra.mxu0 %v5359_v47 }
 0x165   : > { %v1530_v45 = vld [vmem:[%s7031_s5 + $0x740] sm:$0xff]  ;;  %v5368_v49 = vcombine.high %v1402_v43, %v1406_v44  ;;  %4463 = vmatprep.subr.bf16.mxu1 %v5488_v42  ;;  %v5367_v57 = vcombine.low %v1402_v43, %v1406_v44 }
 0x166   : > { %v1534_v46 = vld [vmem:[%s7031_s5 + $0x760] sm:$0xff]  ;;  %4464 = vmatpush1.bf16.msra.mxu1 %v5487_v48 }
 0x167   : > { %v5496_v50 = vcombine.high %v1530_v45, %v1534_v46  ;;  %v1410_v51 = vld [vmem:[%s7031_s5 + $0x380] sm:$0xff]  ;;  %4424 = vmatprep.subr.bf16.mxu0 %v5368_v49  ;;  %v5495_v58 = vcombine.low %v1530_v45, %v1534_v46 }
 0x168   : > { %v1414_v52 = vld [vmem:[%s7031_s5 + $0x3a0] sm:$0xff]  ;;  %4425 = vmatpush1.bf16.msra.mxu0 %v5367_v57 }
 0x169   : > { %v1538_v53 = vld [vmem:[%s7031_s5 + $0x780] sm:$0xff]  ;;  %v5376_v61 = vcombine.high %v1410_v51, %v1414_v52  ;;  %4465 = vmatprep.subr.bf16.mxu1 %v5496_v50  ;;  %v5375_v3 = vcombine.low %v1410_v51, %v1414_v52 }
 0x16a   : > { %v1542_v56 = vld [vmem:[%s7031_s5 + $0x7a0] sm:$0xff]  ;;  %4466 = vmatpush1.bf16.msra.mxu1 %v5495_v58 }
 0x16b   : > { %v5504_v62 = vcombine.high %v1538_v53, %v1542_v56  ;;  %v1418_v63 = vld [vmem:[%s7031_s5 + $0x3c0] sm:$0xff]  ;;  %4426 = vmatprep.subr.bf16.mxu0 %v5376_v61  ;;  %v5503_v4 = vcombine.low %v1538_v53, %v1542_v56 }
 0x16c   : > { %v1422_v0 = vld [vmem:[%s7031_s5 + $0x3e0] sm:$0xff]  ;;  %4427 = vmatpush1.bf16.msra.mxu0 %v5375_v3 }
 0x16d   : > { %v1546_v1 = vld [vmem:[%s7031_s5 + $0x7c0] sm:$0xff]  ;;  %v5384_v5 = vcombine.high %v1418_v63, %v1422_v0  ;;  %4467 = vmatprep.subr.bf16.mxu1 %v5504_v62  ;;  %v5383_v11 = vcombine.low %v1418_v63, %v1422_v0 }
 0x16e   : > { %v1550_v2 = vld [vmem:[%s7031_s5 + $0x7e0] sm:$0xff]  ;;  %4468 = vmatpush1.bf16.msra.mxu1 %v5503_v4 }
 0x16f   : > { %v5512_v6 = vcombine.high %v1546_v1, %v1550_v2  ;;  %v1554_v7 = vld [vmem:[%s7031_s5 + $0x800] sm:$0xff]  ;;  %4428 = vmatprep.subr.bf16.mxu0 %v5384_v5  ;;  %v5511_v12 = vcombine.low %v1546_v1, %v1550_v2 }
 0x170   : > { %v1558_v8 = vld [vmem:[%s7031_s5 + $0x820] sm:$0xff]  ;;  %4429 = vmatpush1.bf16.msra.mxu0 %v5383_v11 }
 0x171   : > { %v1682_v9 = vld [vmem:[%s7031_s5 + $0xc00] sm:$0xff]  ;;  %v5520_v13 = vcombine.high %v1554_v7, %v1558_v8  ;;  %4469 = vmatprep.subr.bf16.mxu1 %v5512_v6  ;;  %v5519_v22 = vcombine.low %v1554_v7, %v1558_v8 }
 0x172   : > { %v1686_v10 = vld [vmem:[%s7031_s5 + $0xc20] sm:$0xff]  ;;  %4470 = vmatpush1.bf16.msra.mxu1 %v5511_v12 }
 0x173   : > { %v5648_v14 = vcombine.high %v1682_v9, %v1686_v10  ;;  %v1562_v15 = vld [vmem:[%s7031_s5 + $0x840] sm:$0xff]  ;;  %4480 = vmatprep.subr.bf16.mxu0 %v5520_v13  ;;  %v5647_v24 = vcombine.low %v1682_v9, %v1686_v10  ;;  %4431 = vmatmul.mubr.bf16.vlgmr.msra.gmra.mrb[0].mxu0 %v7122_v17 }
 0x174   : > { %v1566_v16 = vld [vmem:[%s7031_s5 + $0x860] sm:$0xff]  ;;  %4481 = vmatpush1.bf16.msra.mxu0 %v5519_v22  ;;  %4512 = vmatprep.mubr.bf16.mxu0 %v7140_v28 }
 0x175   : > { %v1690_v18 = vld [vmem:[%s7031_s5 + $0xc40] sm:$0xff]  ;;  %v5528_v25 = vcombine.high %v1562_v15, %v1566_v16  ;;  %4521 = vmatprep.subr.bf16.mxu1 %v5648_v14  ;;  %4472 = vmatmul.mubr.bf16.vlgmr.msra.gmra.mrb[0].mxu1 %v7131_v21  ;;  %v5527_v31 = vcombine.low %v1562_v15, %v1566_v16 }
 0x176   : > { %v1694_v19 = vld [vmem:[%s7031_s5 + $0xc60] sm:$0xff]  ;;  %4522 = vmatpush1.bf16.msra.mxu1 %v5647_v24  ;;  %4553 = vmatprep.mubr.bf16.mxu1 %v7147_v30 }
 0x177   : > { %v5656_v54 = vcombine.high %v1690_v18, %v1694_v19  ;;  %v1570_v26 = vld [vmem:[%s7031_s5 + $0x880] sm:$0xff]  ;;  %4482 = vmatprep.subr.bf16.mxu0 %v5528_v25  ;;  %v5655_v32 = vcombine.low %v1690_v18, %v1694_v19 }
 0x178   : > { %v1574_v27 = vld [vmem:[%s7031_s5 + $0x8a0] sm:$0xff]  ;;  %4483 = vmatpush1.bf16.msra.mxu0 %v5527_v31 }
 0x179   : > { %v1698_v55 = vld [vmem:[%s7031_s5 + $0xc80] sm:$0xff]  ;;  %v5536_v33 = vcombine.high %v1570_v26, %v1574_v27  ;;  %4523 = vmatprep.subr.bf16.mxu1 %v5656_v54  ;;  %v5535_v39 = vcombine.low %v1570_v26, %v1574_v27 }
 0x17a   : > { %v1702_v29 = vld [vmem:[%s7031_s5 + $0xca0] sm:$0xff]  ;;  %4524 = vmatpush1.bf16.msra.mxu1 %v5655_v32 }
 0x17b   : > { %v5664_v34 = vcombine.high %v1698_v55, %v1702_v29  ;;  %v1578_v35 = vld [vmem:[%s7031_s5 + $0x8c0] sm:$0xff]  ;;  %4484 = vmatprep.subr.bf16.mxu0 %v5536_v33  ;;  %v5663_v40 = vcombine.low %v1698_v55, %v1702_v29 }
 0x17c   : > { %v1582_v36 = vld [vmem:[%s7031_s5 + $0x8e0] sm:$0xff]  ;;  %4485 = vmatpush1.bf16.msra.mxu0 %v5535_v39 }
 0x17d   : > { %v1706_v37 = vld [vmem:[%s7031_s5 + $0xcc0] sm:$0xff]  ;;  %v5544_v41 = vcombine.high %v1578_v35, %v1582_v36  ;;  %4525 = vmatprep.subr.bf16.mxu1 %v5664_v34  ;;  %v5543_v47 = vcombine.low %v1578_v35, %v1582_v36 }
 0x17e   : > { %v1710_v38 = vld [vmem:[%s7031_s5 + $0xce0] sm:$0xff]  ;;  %4526 = vmatpush1.bf16.msra.mxu1 %v5663_v40 }
 0x17f   : > { %v5672_v42 = vcombine.high %v1706_v37, %v1710_v38  ;;  %v1586_v43 = vld [vmem:[%s7031_s5 + $0x900] sm:$0xff]  ;;  %4486 = vmatprep.subr.bf16.mxu0 %v5544_v41  ;;  %v5671_v48 = vcombine.low %v1706_v37, %v1710_v38 }
 0x180   : > { %v1590_v44 = vld [vmem:[%s7031_s5 + $0x920] sm:$0xff]  ;;  %4487 = vmatpush1.bf16.msra.mxu0 %v5543_v47 }
 0x181   : > { %v1714_v45 = vld [vmem:[%s7031_s5 + $0xd00] sm:$0xff]  ;;  %v5552_v49 = vcombine.high %v1586_v43, %v1590_v44  ;;  %4527 = vmatprep.subr.bf16.mxu1 %v5672_v42  ;;  %v5551_v57 = vcombine.low %v1586_v43, %v1590_v44 }
 0x182   : > { %v1718_v46 = vld [vmem:[%s7031_s5 + $0xd20] sm:$0xff]  ;;  %4528 = vmatpush1.bf16.msra.mxu1 %v5671_v48 }
 0x183   : > { %v5680_v50 = vcombine.high %v1714_v45, %v1718_v46  ;;  %v1594_v51 = vld [vmem:[%s7031_s5 + $0x940] sm:$0xff]  ;;  %4488 = vmatprep.subr.bf16.mxu0 %v5552_v49  ;;  %v5679_v58 = vcombine.low %v1714_v45, %v1718_v46 }
 0x184   : > { %v1598_v52 = vld [vmem:[%s7031_s5 + $0x960] sm:$0xff]  ;;  %4489 = vmatpush1.bf16.msra.mxu0 %v5551_v57 }
 0x185   : > { %v1722_v53 = vld [vmem:[%s7031_s5 + $0xd40] sm:$0xff]  ;;  %v5560_v61 = vcombine.high %v1594_v51, %v1598_v52  ;;  %4529 = vmatprep.subr.bf16.mxu1 %v5680_v50  ;;  %v5559_v3 = vcombine.low %v1594_v51, %v1598_v52 }
 0x186   : > { %v1726_v56 = vld [vmem:[%s7031_s5 + $0xd60] sm:$0xff]  ;;  %4530 = vmatpush1.bf16.msra.mxu1 %v5679_v58 }
 0x187   : > { %v5688_v62 = vcombine.high %v1722_v53, %v1726_v56  ;;  %v1602_v63 = vld [vmem:[%s7031_s5 + $0x980] sm:$0xff]  ;;  %4490 = vmatprep.subr.bf16.mxu0 %v5560_v61  ;;  %v5687_v4 = vcombine.low %v1722_v53, %v1726_v56 }
 0x188   : > { %v1606_v0 = vld [vmem:[%s7031_s5 + $0x9a0] sm:$0xff]  ;;  %4491 = vmatpush1.bf16.msra.mxu0 %v5559_v3 }
 0x189   : > { %v1730_v1 = vld [vmem:[%s7031_s5 + $0xd80] sm:$0xff]  ;;  %v5568_v5 = vcombine.high %v1602_v63, %v1606_v0  ;;  %4531 = vmatprep.subr.bf16.mxu1 %v5688_v62  ;;  %v5567_v11 = vcombine.low %v1602_v63, %v1606_v0 }
 0x18a   : > { %v1734_v2 = vld [vmem:[%s7031_s5 + $0xda0] sm:$0xff]  ;;  %4532 = vmatpush1.bf16.msra.mxu1 %v5687_v4 }
 0x18b   : > { %v5696_v6 = vcombine.high %v1730_v1, %v1734_v2  ;;  %v1610_v7 = vld [vmem:[%s7031_s5 + $0x9c0] sm:$0xff]  ;;  %4492 = vmatprep.subr.bf16.mxu0 %v5568_v5  ;;  %v5695_v12 = vcombine.low %v1730_v1, %v1734_v2 }
 0x18c   : > { %v1614_v8 = vld [vmem:[%s7031_s5 + $0x9e0] sm:$0xff]  ;;  %4493 = vmatpush1.bf16.msra.mxu0 %v5567_v11 }
 0x18d   : > { %v1738_v9 = vld [vmem:[%s7031_s5 + $0xdc0] sm:$0xff]  ;;  %v5576_v13 = vcombine.high %v1610_v7, %v1614_v8  ;;  %4533 = vmatprep.subr.bf16.mxu1 %v5696_v6  ;;  %v5575_v22 = vcombine.low %v1610_v7, %v1614_v8 }
 0x18e   : > { %v1742_v10 = vld [vmem:[%s7031_s5 + $0xde0] sm:$0xff]  ;;  %4534 = vmatpush1.bf16.msra.mxu1 %v5695_v12 }
 0x18f   : > { %v5704_v14 = vcombine.high %v1738_v9, %v1742_v10  ;;  %v1618_v15 = vld [vmem:[%s7031_s5 + $0xa00] sm:$0xff]  ;;  %4494 = vmatprep.subr.bf16.mxu0 %v5576_v13  ;;  %v5703_v24 = vcombine.low %v1738_v9, %v1742_v10 }
 0x190   : > { %v1622_v16 = vld [vmem:[%s7031_s5 + $0xa20] sm:$0xff]  ;;  %4495 = vmatpush1.bf16.msra.mxu0 %v5575_v22 }
 0x191   : > { %v1746_v18 = vld [vmem:[%s7031_s5 + $0xe00] sm:$0xff]  ;;  %v5584_v25 = vcombine.high %v1618_v15, %v1622_v16  ;;  %4535 = vmatprep.subr.bf16.mxu1 %v5704_v14  ;;  %v5583_v31 = vcombine.low %v1618_v15, %v1622_v16 }
 0x192   : > { %v1750_v19 = vld [vmem:[%s7031_s5 + $0xe20] sm:$0xff]  ;;  %4536 = vmatpush1.bf16.msra.mxu1 %v5703_v24 }
 0x193   : > { %v5712_v54 = vcombine.high %v1746_v18, %v1750_v19  ;;  %v1626_v26 = vld [vmem:[%s7031_s5 + $0xa40] sm:$0xff]  ;;  %4496 = vmatprep.subr.bf16.mxu0 %v5584_v25  ;;  %v5711_v32 = vcombine.low %v1746_v18, %v1750_v19 }
 0x194   : > { %v1630_v27 = vld [vmem:[%s7031_s5 + $0xa60] sm:$0xff]  ;;  %4497 = vmatpush1.bf16.msra.mxu0 %v5583_v31 }
 0x195   : > { %v1754_v55 = vld [vmem:[%s7031_s5 + $0xe40] sm:$0xff]  ;;  %v5592_v33 = vcombine.high %v1626_v26, %v1630_v27  ;;  %4537 = vmatprep.subr.bf16.mxu1 %v5712_v54  ;;  %v5591_v39 = vcombine.low %v1626_v26, %v1630_v27  ;;  %v1299_v26 = vld [vmem:[%s7031_s5 + $0x8] sm:$0xff] }
 0x196   : > { %v1758_v29 = vld [vmem:[%s7031_s5 + $0xe60] sm:$0xff]  ;;  %4538 = vmatpush1.bf16.msra.mxu1 %v5711_v32  ;;  %v1303_v27 = vld [vmem:[%s7031_s5 + $0x28] sm:$0xff] }
 0x197   : > { %v5720_v34 = vcombine.high %v1754_v55, %v1758_v29  ;;  %v1634_v35 = vld [vmem:[%s7031_s5 + $0xa80] sm:$0xff]  ;;  %4498 = vmatprep.subr.bf16.mxu0 %v5592_v33  ;;  %v5719_v40 = vcombine.low %v1754_v55, %v1758_v29  ;;  %v1427_v55 = vld [vmem:[%s7031_s5 + $0x408] sm:$0xff]  ;;  %v5266_v33 = vcombine.high %v1299_v26, %v1303_v27 }
 0x198   : > { %v1638_v36 = vld [vmem:[%s7031_s5 + $0xaa0] sm:$0xff]  ;;  %4499 = vmatpush1.bf16.msra.mxu0 %v5591_v39  ;;  %v1431_v29 = vld [vmem:[%s7031_s5 + $0x428] sm:$0xff] }
 0x199   : > { %v1762_v37 = vld [vmem:[%s7031_s5 + $0xe80] sm:$0xff]  ;;  %v5600_v41 = vcombine.high %v1634_v35, %v1638_v36  ;;  %4539 = vmatprep.subr.bf16.mxu1 %v5720_v34  ;;  %v5599_v47 = vcombine.low %v1634_v35, %v1638_v36  ;;  %v5394_v34 = vcombine.high %v1427_v55, %v1431_v29  ;;  %v1307_v35 = vld [vmem:[%s7031_s5 + $0x48] sm:$0xff] }
 0x19a   : > { %v1766_v38 = vld [vmem:[%s7031_s5 + $0xea0] sm:$0xff]  ;;  %4540 = vmatpush1.bf16.msra.mxu1 %v5719_v40  ;;  %v1311_v36 = vld [vmem:[%s7031_s5 + $0x68] sm:$0xff]  ;;  %v7218_v40 = vcombine.low %v7134_v23, %v7134_v23 }
 0x19b   : > { %v5728_v42 = vcombine.high %v1762_v37, %v1766_v38  ;;  %v1642_v43 = vld [vmem:[%s7031_s5 + $0xac0] sm:$0xff]  ;;  %4500 = vmatprep.subr.bf16.mxu0 %v5600_v41  ;;  %v5727_v48 = vcombine.low %v1762_v37, %v1766_v38  ;;  %v7212_v37 = vcombine.low %v7127_v20, %v7127_v20  ;;  %v1435_v38 = vld [vmem:[%s7031_s5 + $0x448] sm:$0xff]  ;;  %v5265_v41 = vcombine.low %v1299_v26, %v1303_v27 }
 0x19c   : > { %v1646_v44 = vld [vmem:[%s7031_s5 + $0xae0] sm:$0xff]  ;;  %4501 = vmatpush1.bf16.msra.mxu0 %v5599_v47  ;;  %v1439_v39 = vld [vmem:[%s7031_s5 + $0x468] sm:$0xff]  ;;  %v5273_v23 = vcombine.low %v1307_v35, %v1311_v36 }
 0x19d   : > { %v1770_v45 = vld [vmem:[%s7031_s5 + $0xec0] sm:$0xff]  ;;  %v5608_v49 = vcombine.high %v1642_v43, %v1646_v44  ;;  %4541 = vmatprep.subr.bf16.mxu1 %v5728_v42  ;;  %v5607_v57 = vcombine.low %v1642_v43, %v1646_v44  ;;  %v5393_v42 = vcombine.low %v1427_v55, %v1431_v29  ;;  %v5274_v43 = vcombine.high %v1307_v35, %v1311_v36  ;;  %v1319_v20 = vld [vmem:[%s7031_s5 + $0xa8] sm:$0xff] }
 0x19e   : > { %v1774_v46 = vld [vmem:[%s7031_s5 + $0xee0] sm:$0xff]  ;;  %4542 = vmatpush1.bf16.msra.mxu1 %v5727_v48  ;;  %v5402_v44 = vcombine.high %v1435_v38, %v1439_v39  ;;  %v1447_v47 = vld [vmem:[%s7031_s5 + $0x4a8] sm:$0xff]  ;;  %v5401_v48 = vcombine.low %v1435_v38, %v1439_v39 }
 0x19f   : > { %v5736_v50 = vcombine.high %v1770_v45, %v1774_v46  ;;  %v1650_v51 = vld [vmem:[%s7031_s5 + $0xb00] sm:$0xff]  ;;  %4502 = vmatprep.subr.bf16.mxu0 %v5608_v49  ;;  %v5735_v58 = vcombine.low %v1770_v45, %v1774_v46  ;;  %v1315_v45 = vld [vmem:[%s7031_s5 + $0x88] sm:$0xff] }
 0x1a0   : > { %v1654_v52 = vld [vmem:[%s7031_s5 + $0xb20] sm:$0xff]  ;;  %4503 = vmatpush1.bf16.msra.mxu0 %v5607_v57  ;;  %v1443_v46 = vld [vmem:[%s7031_s5 + $0x488] sm:$0xff]  ;;  %v5282_v49 = vcombine.high %v1315_v45, %v1319_v20  ;;  %v5281_v57 = vcombine.low %v1315_v45, %v1319_v20 }
 0x1a1   : > { %v1778_v53 = vld [vmem:[%s7031_s5 + $0xf00] sm:$0xff]  ;;  %v5616_v61 = vcombine.high %v1650_v51, %v1654_v52  ;;  %4543 = vmatprep.subr.bf16.mxu1 %v5736_v50  ;;  %v5615_v3 = vcombine.low %v1650_v51, %v1654_v52  ;;  %v5410_v50 = vcombine.high %v1443_v46, %v1447_v47  ;;  %v1323_v51 = vld [vmem:[%s7031_s5 + $0xc8] sm:$0xff] }
 0x1a2   : > { %v1782_v56 = vld [vmem:[%s7031_s5 + $0xf20] sm:$0xff]  ;;  %4544 = vmatpush1.bf16.msra.mxu1 %v5735_v58  ;;  %v1327_v52 = vld [vmem:[%s7031_s5 + $0xe8] sm:$0xff]  ;;  %v5409_v58 = vcombine.low %v1443_v46, %v1447_v47 }
 0x1a3   : > { %v5744_v62 = vcombine.high %v1778_v53, %v1782_v56  ;;  %v1658_v63 = vld [vmem:[%s7031_s5 + $0xb40] sm:$0xff]  ;;  %4504 = vmatprep.subr.bf16.mxu0 %v5616_v61  ;;  %v5743_v4 = vcombine.low %v1778_v53, %v1782_v56  ;;  %v1451_v53 = vld [vmem:[%s7031_s5 + $0x4c8] sm:$0xff]  ;;  %v5290_v61 = vcombine.high %v1323_v51, %v1327_v52 }
 0x1a4   : > { %v1662_v0 = vld [vmem:[%s7031_s5 + $0xb60] sm:$0xff]  ;;  %4505 = vmatpush1.bf16.msra.mxu0 %v5615_v3  ;;  %v1455_v56 = vld [vmem:[%s7031_s5 + $0x4e8] sm:$0xff]  ;;  %v5289_v3 = vcombine.low %v1323_v51, %v1327_v52 }
 0x1a5   : > { %v1786_v1 = vld [vmem:[%s7031_s5 + $0xf40] sm:$0xff]  ;;  %v5624_v5 = vcombine.high %v1658_v63, %v1662_v0  ;;  %4545 = vmatprep.subr.bf16.mxu1 %v5744_v62  ;;  %v5623_v11 = vcombine.low %v1658_v63, %v1662_v0  ;;  %v5418_v62 = vcombine.high %v1451_v53, %v1455_v56  ;;  %v1331_v63 = vld [vmem:[%s7031_s5 + $0x108] sm:$0xff] }
 0x1a6   : > { %v1790_v2 = vld [vmem:[%s7031_s5 + $0xf60] sm:$0xff]  ;;  %4546 = vmatpush1.bf16.msra.mxu1 %v5743_v4  ;;  %v1335_v0 = vld [vmem:[%s7031_s5 + $0x128] sm:$0xff]  ;;  %v5417_v4 = vcombine.low %v1451_v53, %v1455_v56 }
 0x1a7   : > { %v5752_v6 = vcombine.high %v1786_v1, %v1790_v2  ;;  %v1666_v7 = vld [vmem:[%s7031_s5 + $0xb80] sm:$0xff]  ;;  %4506 = vmatprep.subr.bf16.mxu0 %v5624_v5  ;;  %v5751_v12 = vcombine.low %v1786_v1, %v1790_v2  ;;  %v1459_v1 = vld [vmem:[%s7031_s5 + $0x508] sm:$0xff]  ;;  %v5298_v5 = vcombine.high %v1331_v63, %v1335_v0 }
 0x1a8   : > { %v1670_v8 = vld [vmem:[%s7031_s5 + $0xba0] sm:$0xff]  ;;  %4507 = vmatpush1.bf16.msra.mxu0 %v5623_v11  ;;  %v1463_v2 = vld [vmem:[%s7031_s5 + $0x528] sm:$0xff]  ;;  %v5297_v11 = vcombine.low %v1331_v63, %v1335_v0 }
 0x1a9   : > { %v1794_v9 = vld [vmem:[%s7031_s5 + $0xf80] sm:$0xff]  ;;  %v5632_v13 = vcombine.high %v1666_v7, %v1670_v8  ;;  %4547 = vmatprep.subr.bf16.mxu1 %v5752_v6  ;;  %v5631_v22 = vcombine.low %v1666_v7, %v1670_v8  ;;  %v5426_v6 = vcombine.high %v1459_v1, %v1463_v2  ;;  %v1339_v7 = vld [vmem:[%s7031_s5 + $0x148] sm:$0xff] }
 0x1aa   : > { %v1798_v10 = vld [vmem:[%s7031_s5 + $0xfa0] sm:$0xff]  ;;  %4548 = vmatpush1.bf16.msra.mxu1 %v5751_v12  ;;  %v1343_v8 = vld [vmem:[%s7031_s5 + $0x168] sm:$0xff]  ;;  %v5425_v12 = vcombine.low %v1459_v1, %v1463_v2 }
 0x1ab   : > { %v5760_v14 = vcombine.high %v1794_v9, %v1798_v10  ;;  %v1674_v15 = vld [vmem:[%s7031_s5 + $0xbc0] sm:$0xff]  ;;  %4508 = vmatprep.subr.bf16.mxu0 %v5632_v13  ;;  %v5759_v24 = vcombine.low %v1794_v9, %v1798_v10  ;;  %v1467_v9 = vld [vmem:[%s7031_s5 + $0x548] sm:$0xff]  ;;  %v5306_v13 = vcombine.high %v1339_v7, %v1343_v8 }
 0x1ac   : > { %v1678_v16 = vld [vmem:[%s7031_s5 + $0xbe0] sm:$0xff]  ;;  %4509 = vmatpush1.bf16.msra.mxu0 %v5631_v22  ;;  %v1471_v10 = vld [vmem:[%s7031_s5 + $0x568] sm:$0xff]  ;;  %v5305_v22 = vcombine.low %v1339_v7, %v1343_v8 }
 0x1ad   : > { %v1802_v18 = vld [vmem:[%s7031_s5 + $0xfc0] sm:$0xff]  ;;  %v5640_v25 = vcombine.high %v1674_v15, %v1678_v16  ;;  %4549 = vmatprep.subr.bf16.mxu1 %v5760_v14  ;;  %v5639_v31 = vcombine.low %v1674_v15, %v1678_v16  ;;  %v5434_v14 = vcombine.high %v1467_v9, %v1471_v10  ;;  %v1347_v15 = vld [vmem:[%s7031_s5 + $0x188] sm:$0xff] }
 0x1ae   : > { %v1806_v19 = vld [vmem:[%s7031_s5 + $0xfe0] sm:$0xff]  ;;  %4550 = vmatpush1.bf16.msra.mxu1 %v5759_v24  ;;  %v1351_v16 = vld [vmem:[%s7031_s5 + $0x1a8] sm:$0xff]  ;;  %v5433_v24 = vcombine.low %v1467_v9, %v1471_v10 }
 0x1af   : > { %v5768_v54 = vcombine.high %v1802_v18, %v1806_v19  ;;  %4510 = vmatprep.subr.bf16.mxu0 %v5640_v25  ;;  %v5767_v32 = vcombine.low %v1802_v18, %v1806_v19  ;;  %v1475_v18 = vld [vmem:[%s7031_s5 + $0x588] sm:$0xff]  ;;  %v5314_v25 = vcombine.high %v1347_v15, %v1351_v16 }
 0x1b0   : > { %4511 = vmatpush1.bf16.msra.mxu0 %v5639_v31  ;;  %v1479_v19 = vld [vmem:[%s7031_s5 + $0x5a8] sm:$0xff]  ;;  %v5313_v31 = vcombine.low %v1347_v15, %v1351_v16 }
 0x1b1   : > { %4551 = vmatprep.subr.bf16.mxu1 %v5768_v54  ;;  %4562 = vmatprep.subr.bf16.mxu0 %v5266_v33  ;;  %v5442_v54 = vcombine.high %v1475_v18, %v1479_v19  ;;  %v1355_v26 = vld [vmem:[%s7031_s5 + $0x1c8] sm:$0xff] }
 0x1b2   : > { %4552 = vmatpush1.bf16.msra.mxu1 %v5767_v32  ;;  %v1359_v27 = vld [vmem:[%s7031_s5 + $0x1e8] sm:$0xff]  ;;  %v5441_v32 = vcombine.low %v1475_v18, %v1479_v19 }
 0x1b3   : > { %4603 = vmatprep.subr.bf16.mxu1 %v5394_v34  ;;  %4513 = vmatmul.mubr.bf16.vlgmr.msra.gmra.mrb[4].mxu0 %v7212_v37  ;;  %v1483_v55 = vld [vmem:[%s7031_s5 + $0x5c8] sm:$0xff]  ;;  %v5322_v33 = vcombine.high %v1355_v26, %v1359_v27 }
 0x1b4   : > { %4563 = vmatpush1.bf16.msra.mxu0 %v5265_v41  ;;  %4594 = vmatprep.mubr.bf16.mxu0 %v7072_v59  ;;  %v1487_v29 = vld [vmem:[%s7031_s5 + $0x5e8] sm:$0xff]  ;;  %v5321_v41 = vcombine.low %v1355_v26, %v1359_v27 }
 0x1b5   : > { %4554 = vmatmul.mubr.bf16.vlgmr.msra.gmra.mrb[4].mxu1 %v7218_v40  ;;  %4564 = vmatprep.subr.bf16.mxu0 %v5274_v43  ;;  %v5450_v34 = vcombine.high %v1483_v55, %v1487_v29  ;;  %v1363_v35 = vld [vmem:[%s7031_s5 + $0x208] sm:$0xff] }
 0x1b6   : > { %4604 = vmatpush1.bf16.msra.mxu1 %v5393_v42  ;;  %4635 = vmatprep.mubr.bf16.mxu1 %v7076_v60  ;;  %v1367_v36 = vld [vmem:[%s7031_s5 + $0x228] sm:$0xff]  ;;  %v5449_v42 = vcombine.low %v1483_v55, %v1487_v29 }
 0x1b7   : > { %4605 = vmatprep.subr.bf16.mxu1 %v5402_v44  ;;  %v1491_v38 = vld [vmem:[%s7031_s5 + $0x608] sm:$0xff]  ;;  %v5330_v43 = vcombine.high %v1363_v35, %v1367_v36 }
 0x1b8   : > { %4565 = vmatpush1.bf16.msra.mxu0 %v5273_v23  ;;  %v1495_v39 = vld [vmem:[%s7031_s5 + $0x628] sm:$0xff]  ;;  %v5329_v23 = vcombine.low %v1363_v35, %v1367_v36 }
 0x1b9   : > { %4566 = vmatprep.subr.bf16.mxu0 %v5282_v49  ;;  %v5458_v44 = vcombine.high %v1491_v38, %v1495_v39  ;;  %v1371_v45 = vld [vmem:[%s7031_s5 + $0x248] sm:$0xff] }
 0x1ba   : > { %4606 = vmatpush1.bf16.msra.mxu1 %v5401_v48  ;;  %v1375_v20 = vld [vmem:[%s7031_s5 + $0x268] sm:$0xff]  ;;  %v5457_v48 = vcombine.low %v1491_v38, %v1495_v39 }
 0x1bb   : > { %4607 = vmatprep.subr.bf16.mxu1 %v5410_v50  ;;  %v1499_v46 = vld [vmem:[%s7031_s5 + $0x648] sm:$0xff]  ;;  %v5338_v49 = vcombine.high %v1371_v45, %v1375_v20 }
 0x1bc   : > { %4567 = vmatpush1.bf16.msra.mxu0 %v5281_v57  ;;  %v1503_v47 = vld [vmem:[%s7031_s5 + $0x668] sm:$0xff]  ;;  %v5337_v57 = vcombine.low %v1371_v45, %v1375_v20 }
 0x1bd   : > { %4568 = vmatprep.subr.bf16.mxu0 %v5290_v61  ;;  %v5466_v50 = vcombine.high %v1499_v46, %v1503_v47  ;;  %v1379_v51 = vld [vmem:[%s7031_s5 + $0x288] sm:$0xff] }
 0x1be   : > { %4608 = vmatpush1.bf16.msra.mxu1 %v5409_v58  ;;  %v1383_v52 = vld [vmem:[%s7031_s5 + $0x2a8] sm:$0xff]  ;;  %v5465_v58 = vcombine.low %v1499_v46, %v1503_v47 }
 0x1bf   : > { %4609 = vmatprep.subr.bf16.mxu1 %v5418_v62  ;;  %v1507_v53 = vld [vmem:[%s7031_s5 + $0x688] sm:$0xff]  ;;  %v5346_v61 = vcombine.high %v1379_v51, %v1383_v52 }
 0x1c0   : > { %4569 = vmatpush1.bf16.msra.mxu0 %v5289_v3  ;;  %v1511_v56 = vld [vmem:[%s7031_s5 + $0x6a8] sm:$0xff]  ;;  %v5345_v3 = vcombine.low %v1379_v51, %v1383_v52 }
 0x1c1   : > { %4570 = vmatprep.subr.bf16.mxu0 %v5298_v5  ;;  %v5474_v62 = vcombine.high %v1507_v53, %v1511_v56  ;;  %v1387_v63 = vld [vmem:[%s7031_s5 + $0x2c8] sm:$0xff] }
 0x1c2   : > { %4610 = vmatpush1.bf16.msra.mxu1 %v5417_v4  ;;  %v1391_v0 = vld [vmem:[%s7031_s5 + $0x2e8] sm:$0xff]  ;;  %v5473_v4 = vcombine.low %v1507_v53, %v1511_v56 }
 0x1c3   : > { %4611 = vmatprep.subr.bf16.mxu1 %v5426_v6  ;;  %v1515_v1 = vld [vmem:[%s7031_s5 + $0x6c8] sm:$0xff]  ;;  %v5354_v5 = vcombine.high %v1387_v63, %v1391_v0 }
 0x1c4   : > { %4571 = vmatpush1.bf16.msra.mxu0 %v5297_v11  ;;  %v1519_v2 = vld [vmem:[%s7031_s5 + $0x6e8] sm:$0xff]  ;;  %v5353_v11 = vcombine.low %v1387_v63, %v1391_v0 }
 0x1c5   : > { %4572 = vmatprep.subr.bf16.mxu0 %v5306_v13  ;;  %v5482_v6 = vcombine.high %v1515_v1, %v1519_v2  ;;  %v1395_v7 = vld [vmem:[%s7031_s5 + $0x308] sm:$0xff] }
 0x1c6   : > { %4612 = vmatpush1.bf16.msra.mxu1 %v5425_v12  ;;  %v1399_v8 = vld [vmem:[%s7031_s5 + $0x328] sm:$0xff]  ;;  %v5481_v12 = vcombine.low %v1515_v1, %v1519_v2 }
 0x1c7   : > { %4613 = vmatprep.subr.bf16.mxu1 %v5434_v14  ;;  %v1523_v9 = vld [vmem:[%s7031_s5 + $0x708] sm:$0xff]  ;;  %v5362_v13 = vcombine.high %v1395_v7, %v1399_v8 }
 0x1c8   : > { %4573 = vmatpush1.bf16.msra.mxu0 %v5305_v22  ;;  %v1527_v10 = vld [vmem:[%s7031_s5 + $0x728] sm:$0xff]  ;;  %v5361_v22 = vcombine.low %v1395_v7, %v1399_v8 }
 0x1c9   : > { %4574 = vmatprep.subr.bf16.mxu0 %v5314_v25  ;;  %v5490_v14 = vcombine.high %v1523_v9, %v1527_v10  ;;  %v1403_v15 = vld [vmem:[%s7031_s5 + $0x348] sm:$0xff] }
 0x1ca   : > { %4614 = vmatpush1.bf16.msra.mxu1 %v5433_v24  ;;  %v1407_v16 = vld [vmem:[%s7031_s5 + $0x368] sm:$0xff]  ;;  %v5489_v24 = vcombine.low %v1523_v9, %v1527_v10 }
 0x1cb   : > { %4615 = vmatprep.subr.bf16.mxu1 %v5442_v54  ;;  %v1531_v18 = vld [vmem:[%s7031_s5 + $0x748] sm:$0xff]  ;;  %v5370_v25 = vcombine.high %v1403_v15, %v1407_v16 }
 0x1cc   : > { %4575 = vmatpush1.bf16.msra.mxu0 %v5313_v31  ;;  %v1535_v19 = vld [vmem:[%s7031_s5 + $0x768] sm:$0xff]  ;;  %v5369_v31 = vcombine.low %v1403_v15, %v1407_v16 }
 0x1cd   : > { %4576 = vmatprep.subr.bf16.mxu0 %v5322_v33  ;;  %v5498_v54 = vcombine.high %v1531_v18, %v1535_v19  ;;  %v1411_v26 = vld [vmem:[%s7031_s5 + $0x388] sm:$0xff] }
 0x1ce   : > { %4616 = vmatpush1.bf16.msra.mxu1 %v5441_v32  ;;  %v1415_v27 = vld [vmem:[%s7031_s5 + $0x3a8] sm:$0xff]  ;;  %v5497_v32 = vcombine.low %v1531_v18, %v1535_v19 }
 0x1cf   : > { %4617 = vmatprep.subr.bf16.mxu1 %v5450_v34  ;;  %v1539_v55 = vld [vmem:[%s7031_s5 + $0x788] sm:$0xff]  ;;  %v5378_v33 = vcombine.high %v1411_v26, %v1415_v27 }
 0x1d0   : > { %4577 = vmatpush1.bf16.msra.mxu0 %v5321_v41  ;;  %v1543_v29 = vld [vmem:[%s7031_s5 + $0x7a8] sm:$0xff]  ;;  %v5377_v41 = vcombine.low %v1411_v26, %v1415_v27 }
 0x1d1   : > { %4578 = vmatprep.subr.bf16.mxu0 %v5330_v43  ;;  %v5506_v34 = vcombine.high %v1539_v55, %v1543_v29  ;;  %v1419_v35 = vld [vmem:[%s7031_s5 + $0x3c8] sm:$0xff] }
 0x1d2   : > { %4618 = vmatpush1.bf16.msra.mxu1 %v5449_v42  ;;  %v1423_v36 = vld [vmem:[%s7031_s5 + $0x3e8] sm:$0xff]  ;;  %v5505_v42 = vcombine.low %v1539_v55, %v1543_v29 }
 0x1d3   : > { %4619 = vmatprep.subr.bf16.mxu1 %v5458_v44  ;;  %v1547_v38 = vld [vmem:[%s7031_s5 + $0x7c8] sm:$0xff]  ;;  %v5386_v43 = vcombine.high %v1419_v35, %v1423_v36 }
 0x1d4   : > { %4579 = vmatpush1.bf16.msra.mxu0 %v5329_v23  ;;  %v1551_v39 = vld [vmem:[%s7031_s5 + $0x7e8] sm:$0xff]  ;;  %v5385_v23 = vcombine.low %v1419_v35, %v1423_v36 }
 0x1d5   : > { %4580 = vmatprep.subr.bf16.mxu0 %v5338_v49  ;;  %v5514_v44 = vcombine.high %v1547_v38, %v1551_v39  ;;  %v1555_v45 = vld [vmem:[%s7031_s5 + $0x808] sm:$0xff] }
 0x1d6   : > { %4620 = vmatpush1.bf16.msra.mxu1 %v5457_v48  ;;  %v1559_v20 = vld [vmem:[%s7031_s5 + $0x828] sm:$0xff]  ;;  %v5513_v48 = vcombine.low %v1547_v38, %v1551_v39 }
 0x1d7   : > { %4621 = vmatprep.subr.bf16.mxu1 %v5466_v50  ;;  %v1683_v46 = vld [vmem:[%s7031_s5 + $0xc08] sm:$0xff]  ;;  %v5522_v49 = vcombine.high %v1555_v45, %v1559_v20 }
 0x1d8   : > { %4581 = vmatpush1.bf16.msra.mxu0 %v5337_v57  ;;  %v1687_v47 = vld [vmem:[%s7031_s5 + $0xc28] sm:$0xff]  ;;  %v5521_v57 = vcombine.low %v1555_v45, %v1559_v20 }
 0x1d9   : > { %4582 = vmatprep.subr.bf16.mxu0 %v5346_v61  ;;  %v5650_v50 = vcombine.high %v1683_v46, %v1687_v47  ;;  %v1563_v51 = vld [vmem:[%s7031_s5 + $0x848] sm:$0xff] }
 0x1da   : > { %4622 = vmatpush1.bf16.msra.mxu1 %v5465_v58  ;;  %v1567_v52 = vld [vmem:[%s7031_s5 + $0x868] sm:$0xff]  ;;  %v5649_v58 = vcombine.low %v1683_v46, %v1687_v47 }
 0x1db   : > { %4623 = vmatprep.subr.bf16.mxu1 %v5474_v62  ;;  %v1691_v53 = vld [vmem:[%s7031_s5 + $0xc48] sm:$0xff]  ;;  %v5530_v61 = vcombine.high %v1563_v51, %v1567_v52 }
 0x1dc   : > { %4583 = vmatpush1.bf16.msra.mxu0 %v5345_v3  ;;  %v1695_v56 = vld [vmem:[%s7031_s5 + $0xc68] sm:$0xff]  ;;  %v5529_v3 = vcombine.low %v1563_v51, %v1567_v52 }
 0x1dd   : > { %4584 = vmatprep.subr.bf16.mxu0 %v5354_v5  ;;  %v5658_v62 = vcombine.high %v1691_v53, %v1695_v56  ;;  %v1571_v63 = vld [vmem:[%s7031_s5 + $0x888] sm:$0xff] }
 0x1de   : > { %4624 = vmatpush1.bf16.msra.mxu1 %v5473_v4  ;;  %v1575_v0 = vld [vmem:[%s7031_s5 + $0x8a8] sm:$0xff]  ;;  %v5657_v4 = vcombine.low %v1691_v53, %v1695_v56 }
 0x1df   : > { %4625 = vmatprep.subr.bf16.mxu1 %v5482_v6  ;;  %v1699_v1 = vld [vmem:[%s7031_s5 + $0xc88] sm:$0xff]  ;;  %v5538_v5 = vcombine.high %v1571_v63, %v1575_v0 }
 0x1e0   : > { %4585 = vmatpush1.bf16.msra.mxu0 %v5353_v11  ;;  %v1703_v2 = vld [vmem:[%s7031_s5 + $0xca8] sm:$0xff]  ;;  %v5537_v11 = vcombine.low %v1571_v63, %v1575_v0 }
 0x1e1   : > { %4586 = vmatprep.subr.bf16.mxu0 %v5362_v13  ;;  %v5666_v6 = vcombine.high %v1699_v1, %v1703_v2  ;;  %v1579_v7 = vld [vmem:[%s7031_s5 + $0x8c8] sm:$0xff] }
 0x1e2   : > { %4626 = vmatpush1.bf16.msra.mxu1 %v5481_v12  ;;  %v1583_v8 = vld [vmem:[%s7031_s5 + $0x8e8] sm:$0xff]  ;;  %v5665_v12 = vcombine.low %v1699_v1, %v1703_v2 }
 0x1e3   : > { %4627 = vmatprep.subr.bf16.mxu1 %v5490_v14  ;;  %v1707_v9 = vld [vmem:[%s7031_s5 + $0xcc8] sm:$0xff]  ;;  %v5546_v13 = vcombine.high %v1579_v7, %v1583_v8 }
 0x1e4   : > { %4587 = vmatpush1.bf16.msra.mxu0 %v5361_v22  ;;  %v1711_v10 = vld [vmem:[%s7031_s5 + $0xce8] sm:$0xff]  ;;  %v5545_v22 = vcombine.low %v1579_v7, %v1583_v8 }
 0x1e5   : > { %4588 = vmatprep.subr.bf16.mxu0 %v5370_v25  ;;  %v5674_v14 = vcombine.high %v1707_v9, %v1711_v10  ;;  %v1587_v15 = vld [vmem:[%s7031_s5 + $0x908] sm:$0xff] }
 0x1e6   : > { %4628 = vmatpush1.bf16.msra.mxu1 %v5489_v24  ;;  %v1591_v16 = vld [vmem:[%s7031_s5 + $0x928] sm:$0xff]  ;;  %v5673_v24 = vcombine.low %v1707_v9, %v1711_v10 }
 0x1e7   : > { %4629 = vmatprep.subr.bf16.mxu1 %v5498_v54  ;;  %v1715_v18 = vld [vmem:[%s7031_s5 + $0xd08] sm:$0xff]  ;;  %v5554_v25 = vcombine.high %v1587_v15, %v1591_v16 }
 0x1e8   : > { %4589 = vmatpush1.bf16.msra.mxu0 %v5369_v31  ;;  %v1719_v19 = vld [vmem:[%s7031_s5 + $0xd28] sm:$0xff]  ;;  %v5553_v31 = vcombine.low %v1587_v15, %v1591_v16 }
 0x1e9   : > { %4590 = vmatprep.subr.bf16.mxu0 %v5378_v33  ;;  %v5682_v54 = vcombine.high %v1715_v18, %v1719_v19  ;;  %v1595_v26 = vld [vmem:[%s7031_s5 + $0x948] sm:$0xff] }
 0x1ea   : > { %4630 = vmatpush1.bf16.msra.mxu1 %v5497_v32  ;;  %v1599_v27 = vld [vmem:[%s7031_s5 + $0x968] sm:$0xff]  ;;  %v5681_v32 = vcombine.low %v1715_v18, %v1719_v19 }
 0x1eb   : > { %4631 = vmatprep.subr.bf16.mxu1 %v5506_v34  ;;  %v1723_v55 = vld [vmem:[%s7031_s5 + $0xd48] sm:$0xff]  ;;  %v5562_v33 = vcombine.high %v1595_v26, %v1599_v27 }
 0x1ec   : > { %4591 = vmatpush1.bf16.msra.mxu0 %v5377_v41  ;;  %v1727_v29 = vld [vmem:[%s7031_s5 + $0xd68] sm:$0xff]  ;;  %v5561_v41 = vcombine.low %v1595_v26, %v1599_v27 }
 0x1ed   : > { %4592 = vmatprep.subr.bf16.mxu0 %v5386_v43  ;;  %v5690_v34 = vcombine.high %v1723_v55, %v1727_v29  ;;  %v1603_v35 = vld [vmem:[%s7031_s5 + $0x988] sm:$0xff] }
 0x1ee   : > { %4632 = vmatpush1.bf16.msra.mxu1 %v5505_v42  ;;  %v1607_v36 = vld [vmem:[%s7031_s5 + $0x9a8] sm:$0xff]  ;;  %v5689_v42 = vcombine.low %v1723_v55, %v1727_v29 }
 0x1ef   : > { %4633 = vmatprep.subr.bf16.mxu1 %v5514_v44  ;;  %v1731_v38 = vld [vmem:[%s7031_s5 + $0xd88] sm:$0xff]  ;;  %v5570_v43 = vcombine.high %v1603_v35, %v1607_v36 }
 0x1f0   : > { %4593 = vmatpush1.bf16.msra.mxu0 %v5385_v23  ;;  %v1735_v39 = vld [vmem:[%s7031_s5 + $0xda8] sm:$0xff]  ;;  %v5569_v23 = vcombine.low %v1603_v35, %v1607_v36 }
 0x1f1   : > { %4644 = vmatprep.subr.bf16.mxu0 %v5522_v49  ;;  %v5698_v44 = vcombine.high %v1731_v38, %v1735_v39  ;;  %v1611_v45 = vld [vmem:[%s7031_s5 + $0x9c8] sm:$0xff] }
 0x1f2   : > { %4634 = vmatpush1.bf16.msra.mxu1 %v5513_v48  ;;  %v1615_v20 = vld [vmem:[%s7031_s5 + $0x9e8] sm:$0xff]  ;;  %v5697_v48 = vcombine.low %v1731_v38, %v1735_v39 }
 0x1f3   : > { %4685 = vmatprep.subr.bf16.mxu1 %v5650_v50  ;;  %4595 = vmatmul.mubr.bf16.vlgmr.msra.gmra.mrb[8].mxu0 %v7122_v17  ;;  %v1739_v46 = vld [vmem:[%s7031_s5 + $0xdc8] sm:$0xff]  ;;  %v5578_v49 = vcombine.high %v1611_v45, %v1615_v20 }
 0x1f4   : > { %4645 = vmatpush1.bf16.msra.mxu0 %v5521_v57  ;;  %4676 = vmatprep.mubr.bf16.mxu0 %v7140_v28  ;;  %v1743_v47 = vld [vmem:[%s7031_s5 + $0xde8] sm:$0xff]  ;;  %v5577_v57 = vcombine.low %v1611_v45, %v1615_v20 }
 0x1f5   : > { %4636 = vmatmul.mubr.bf16.vlgmr.msra.gmra.mrb[8].mxu1 %v7131_v21  ;;  %4646 = vmatprep.subr.bf16.mxu0 %v5530_v61  ;;  %v5706_v50 = vcombine.high %v1739_v46, %v1743_v47  ;;  %v1619_v51 = vld [vmem:[%s7031_s5 + $0xa08] sm:$0xff] }
 0x1f6   : > { %4686 = vmatpush1.bf16.msra.mxu1 %v5649_v58  ;;  %4717 = vmatprep.mubr.bf16.mxu1 %v7147_v30  ;;  %v1623_v52 = vld [vmem:[%s7031_s5 + $0xa28] sm:$0xff]  ;;  %v5705_v58 = vcombine.low %v1739_v46, %v1743_v47 }
 0x1f7   : > { %4687 = vmatprep.subr.bf16.mxu1 %v5658_v62  ;;  %v1747_v53 = vld [vmem:[%s7031_s5 + $0xe08] sm:$0xff]  ;;  %v5586_v61 = vcombine.high %v1619_v51, %v1623_v52 }
 0x1f8   : > { %4647 = vmatpush1.bf16.msra.mxu0 %v5529_v3  ;;  %v1751_v56 = vld [vmem:[%s7031_s5 + $0xe28] sm:$0xff]  ;;  %v5585_v3 = vcombine.low %v1619_v51, %v1623_v52 }
 0x1f9   : > { %4648 = vmatprep.subr.bf16.mxu0 %v5538_v5  ;;  %v5714_v62 = vcombine.high %v1747_v53, %v1751_v56  ;;  %v1627_v63 = vld [vmem:[%s7031_s5 + $0xa48] sm:$0xff] }
 0x1fa   : > { %4688 = vmatpush1.bf16.msra.mxu1 %v5657_v4  ;;  %v1631_v0 = vld [vmem:[%s7031_s5 + $0xa68] sm:$0xff]  ;;  %v5713_v4 = vcombine.low %v1747_v53, %v1751_v56 }
 0x1fb   : > { %4689 = vmatprep.subr.bf16.mxu1 %v5666_v6  ;;  %v1755_v1 = vld [vmem:[%s7031_s5 + $0xe48] sm:$0xff]  ;;  %v5594_v5 = vcombine.high %v1627_v63, %v1631_v0 }
 0x1fc   : > { %4649 = vmatpush1.bf16.msra.mxu0 %v5537_v11  ;;  %v1759_v2 = vld [vmem:[%s7031_s5 + $0xe68] sm:$0xff]  ;;  %v5593_v11 = vcombine.low %v1627_v63, %v1631_v0  ;;  %v1300_v63 = vld [vmem:[%s7031_s5 + $0x10] sm:$0xff] }
 0x1fd   : > { %4650 = vmatprep.subr.bf16.mxu0 %v5546_v13  ;;  %v5722_v6 = vcombine.high %v1755_v1, %v1759_v2  ;;  %v1635_v7 = vld [vmem:[%s7031_s5 + $0xa88] sm:$0xff]  ;;  %v1304_v0 = vld [vmem:[%s7031_s5 + $0x30] sm:$0xff] }
 0x1fe   : > { %4690 = vmatpush1.bf16.msra.mxu1 %v5665_v12  ;;  %v1639_v8 = vld [vmem:[%s7031_s5 + $0xaa8] sm:$0xff]  ;;  %v5721_v12 = vcombine.low %v1755_v1, %v1759_v2  ;;  %v1428_v1 = vld [vmem:[%s7031_s5 + $0x410] sm:$0xff] }
 0x1ff   : > { %4691 = vmatprep.subr.bf16.mxu1 %v5674_v14  ;;  %v1763_v9 = vld [vmem:[%s7031_s5 + $0xe88] sm:$0xff]  ;;  %v5602_v13 = vcombine.high %v1635_v7, %v1639_v8  ;;  %v1432_v2 = vld [vmem:[%s7031_s5 + $0x430] sm:$0xff] }
 0x200   : > { %4651 = vmatpush1.bf16.msra.mxu0 %v5545_v22  ;;  %v1767_v10 = vld [vmem:[%s7031_s5 + $0xea8] sm:$0xff]  ;;  %v5601_v22 = vcombine.low %v1635_v7, %v1639_v8  ;;  %v1308_v7 = vld [vmem:[%s7031_s5 + $0x50] sm:$0xff] }
 0x201   : > { %4652 = vmatprep.subr.bf16.mxu0 %v5554_v25  ;;  %v5730_v14 = vcombine.high %v1763_v9, %v1767_v10  ;;  %v1643_v15 = vld [vmem:[%s7031_s5 + $0xac8] sm:$0xff]  ;;  %v1312_v8 = vld [vmem:[%s7031_s5 + $0x70] sm:$0xff] }
 0x202   : > { %4692 = vmatpush1.bf16.msra.mxu1 %v5673_v24  ;;  %v1647_v16 = vld [vmem:[%s7031_s5 + $0xae8] sm:$0xff]  ;;  %v5729_v24 = vcombine.low %v1763_v9, %v1767_v10  ;;  %v1436_v9 = vld [vmem:[%s7031_s5 + $0x450] sm:$0xff] }
 0x203   : > { %4693 = vmatprep.subr.bf16.mxu1 %v5682_v54  ;;  %v1771_v18 = vld [vmem:[%s7031_s5 + $0xec8] sm:$0xff]  ;;  %v5610_v25 = vcombine.high %v1643_v15, %v1647_v16  ;;  %v1440_v10 = vld [vmem:[%s7031_s5 + $0x470] sm:$0xff] }
 0x204   : > { %4653 = vmatpush1.bf16.msra.mxu0 %v5553_v31  ;;  %v1775_v19 = vld [vmem:[%s7031_s5 + $0xee8] sm:$0xff]  ;;  %v5609_v31 = vcombine.low %v1643_v15, %v1647_v16  ;;  %v1316_v15 = vld [vmem:[%s7031_s5 + $0x90] sm:$0xff] }
 0x205   : > { %4654 = vmatprep.subr.bf16.mxu0 %v5562_v33  ;;  %v5738_v54 = vcombine.high %v1771_v18, %v1775_v19  ;;  %v1651_v26 = vld [vmem:[%s7031_s5 + $0xb08] sm:$0xff]  ;;  %v1320_v16 = vld [vmem:[%s7031_s5 + $0xb0] sm:$0xff] }
 0x206   : > { %4694 = vmatpush1.bf16.msra.mxu1 %v5681_v32  ;;  %v1655_v27 = vld [vmem:[%s7031_s5 + $0xb28] sm:$0xff]  ;;  %v5737_v32 = vcombine.low %v1771_v18, %v1775_v19  ;;  %v1444_v18 = vld [vmem:[%s7031_s5 + $0x490] sm:$0xff] }
 0x207   : > { %4695 = vmatprep.subr.bf16.mxu1 %v5690_v34  ;;  %v1779_v55 = vld [vmem:[%s7031_s5 + $0xf08] sm:$0xff]  ;;  %v5618_v33 = vcombine.high %v1651_v26, %v1655_v27  ;;  %v1448_v19 = vld [vmem:[%s7031_s5 + $0x4b0] sm:$0xff] }
 0x208   : > { %4655 = vmatpush1.bf16.msra.mxu0 %v5561_v41  ;;  %v1783_v29 = vld [vmem:[%s7031_s5 + $0xf28] sm:$0xff]  ;;  %v5617_v41 = vcombine.low %v1651_v26, %v1655_v27  ;;  %v1324_v26 = vld [vmem:[%s7031_s5 + $0xd0] sm:$0xff] }
 0x209   : > { %4656 = vmatprep.subr.bf16.mxu0 %v5570_v43  ;;  %v5746_v34 = vcombine.high %v1779_v55, %v1783_v29  ;;  %v1659_v35 = vld [vmem:[%s7031_s5 + $0xb48] sm:$0xff]  ;;  %v1328_v27 = vld [vmem:[%s7031_s5 + $0xf0] sm:$0xff] }
 0x20a   : > { %4696 = vmatpush1.bf16.msra.mxu1 %v5689_v42  ;;  %v1663_v36 = vld [vmem:[%s7031_s5 + $0xb68] sm:$0xff]  ;;  %v5745_v42 = vcombine.low %v1779_v55, %v1783_v29  ;;  %v1452_v55 = vld [vmem:[%s7031_s5 + $0x4d0] sm:$0xff] }
 0x20b   : > { %4697 = vmatprep.subr.bf16.mxu1 %v5698_v44  ;;  %v1787_v38 = vld [vmem:[%s7031_s5 + $0xf48] sm:$0xff]  ;;  %v5626_v43 = vcombine.high %v1659_v35, %v1663_v36  ;;  %v1456_v29 = vld [vmem:[%s7031_s5 + $0x4f0] sm:$0xff] }
 0x20c   : > { %4657 = vmatpush1.bf16.msra.mxu0 %v5569_v23  ;;  %v1791_v39 = vld [vmem:[%s7031_s5 + $0xf68] sm:$0xff]  ;;  %v5625_v23 = vcombine.low %v1659_v35, %v1663_v36  ;;  %v1332_v35 = vld [vmem:[%s7031_s5 + $0x110] sm:$0xff] }
 0x20d   : > { %4658 = vmatprep.subr.bf16.mxu0 %v5578_v49  ;;  %v5754_v44 = vcombine.high %v1787_v38, %v1791_v39  ;;  %v1667_v45 = vld [vmem:[%s7031_s5 + $0xb88] sm:$0xff]  ;;  %v1336_v36 = vld [vmem:[%s7031_s5 + $0x130] sm:$0xff] }
 0x20e   : > { %4698 = vmatpush1.bf16.msra.mxu1 %v5697_v48  ;;  %v1671_v20 = vld [vmem:[%s7031_s5 + $0xba8] sm:$0xff]  ;;  %v5753_v48 = vcombine.low %v1787_v38, %v1791_v39  ;;  %v1460_v38 = vld [vmem:[%s7031_s5 + $0x510] sm:$0xff] }
 0x20f   : > { %4699 = vmatprep.subr.bf16.mxu1 %v5706_v50  ;;  %v1795_v46 = vld [vmem:[%s7031_s5 + $0xf88] sm:$0xff]  ;;  %v5634_v49 = vcombine.high %v1667_v45, %v1671_v20  ;;  %v1464_v39 = vld [vmem:[%s7031_s5 + $0x530] sm:$0xff] }
 0x210   : > { %4659 = vmatpush1.bf16.msra.mxu0 %v5577_v57  ;;  %v1799_v47 = vld [vmem:[%s7031_s5 + $0xfa8] sm:$0xff]  ;;  %v5633_v57 = vcombine.low %v1667_v45, %v1671_v20  ;;  %v1340_v45 = vld [vmem:[%s7031_s5 + $0x150] sm:$0xff] }
 0x211   : > { %4660 = vmatprep.subr.bf16.mxu0 %v5586_v61  ;;  %v5762_v50 = vcombine.high %v1795_v46, %v1799_v47  ;;  %v1675_v51 = vld [vmem:[%s7031_s5 + $0xbc8] sm:$0xff]  ;;  %v1344_v20 = vld [vmem:[%s7031_s5 + $0x170] sm:$0xff] }
 0x212   : > { %4700 = vmatpush1.bf16.msra.mxu1 %v5705_v58  ;;  %v1679_v52 = vld [vmem:[%s7031_s5 + $0xbe8] sm:$0xff]  ;;  %v5761_v58 = vcombine.low %v1795_v46, %v1799_v47  ;;  %v1468_v46 = vld [vmem:[%s7031_s5 + $0x550] sm:$0xff] }
 0x213   : > { %4701 = vmatprep.subr.bf16.mxu1 %v5714_v62  ;;  %v1803_v53 = vld [vmem:[%s7031_s5 + $0xfc8] sm:$0xff]  ;;  %v5642_v61 = vcombine.high %v1675_v51, %v1679_v52  ;;  %v1472_v47 = vld [vmem:[%s7031_s5 + $0x570] sm:$0xff] }
 0x214   : > { %4661 = vmatpush1.bf16.msra.mxu0 %v5585_v3  ;;  %v1807_v56 = vld [vmem:[%s7031_s5 + $0xfe8] sm:$0xff]  ;;  %v5641_v3 = vcombine.low %v1675_v51, %v1679_v52  ;;  %v1348_v51 = vld [vmem:[%s7031_s5 + $0x190] sm:$0xff] }
 0x215   : > { %4662 = vmatprep.subr.bf16.mxu0 %v5594_v5  ;;  %v5770_v62 = vcombine.high %v1803_v53, %v1807_v56  ;;  %v5268_v5 = vcombine.high %v1300_v63, %v1304_v0  ;;  %v1352_v52 = vld [vmem:[%s7031_s5 + $0x1b0] sm:$0xff] }
 0x216   : > { %4702 = vmatpush1.bf16.msra.mxu1 %v5713_v4  ;;  %v5769_v4 = vcombine.low %v1803_v53, %v1807_v56  ;;  %v1476_v53 = vld [vmem:[%s7031_s5 + $0x590] sm:$0xff] }
 0x217   : > { %4703 = vmatprep.subr.bf16.mxu1 %v5722_v6  ;;  %v5396_v6 = vcombine.high %v1428_v1, %v1432_v2  ;;  %v1480_v56 = vld [vmem:[%s7031_s5 + $0x5b0] sm:$0xff] }
 0x218   : > { %4663 = vmatpush1.bf16.msra.mxu0 %v5593_v11  ;;  %v5267_v11 = vcombine.low %v1300_v63, %v1304_v0  ;;  %v5444_v63 = vcombine.high %v1476_v53, %v1480_v56  ;;  %v1356_v0 = vld [vmem:[%s7031_s5 + $0x1d0] sm:$0xff] }
 0x219   : > { %4664 = vmatprep.subr.bf16.mxu0 %v5602_v13  ;;  %v5276_v13 = vcombine.high %v1308_v7, %v1312_v8 }
 0x21a   : > { %4704 = vmatpush1.bf16.msra.mxu1 %v5721_v12  ;;  %v5395_v12 = vcombine.low %v1428_v1, %v1432_v2  ;;  %v1360_v1 = vld [vmem:[%s7031_s5 + $0x1f0] sm:$0xff] }
 0x21b   : > { %4705 = vmatprep.subr.bf16.mxu1 %v5730_v14  ;;  %v5404_v14 = vcombine.high %v1436_v9, %v1440_v10 }
 0x21c   : > { %4665 = vmatpush1.bf16.msra.mxu0 %v5601_v22  ;;  %v5275_v22 = vcombine.low %v1308_v7, %v1312_v8 }
 0x21d   : > { %4666 = vmatprep.subr.bf16.mxu0 %v5610_v25  ;;  %v5284_v25 = vcombine.high %v1316_v15, %v1320_v16 }
 0x21e   : > { %4706 = vmatpush1.bf16.msra.mxu1 %v5729_v24  ;;  %v5403_v24 = vcombine.low %v1436_v9, %v1440_v10  ;;  %v5315_v9 = vcombine.low %v1348_v51, %v1352_v52 }
 0x21f   : > { %4707 = vmatprep.subr.bf16.mxu1 %v5738_v54  ;;  %v5412_v54 = vcombine.high %v1444_v18, %v1448_v19 }
 0x220   : > { %4667 = vmatpush1.bf16.msra.mxu0 %v5609_v31  ;;  %v5283_v31 = vcombine.low %v1316_v15, %v1320_v16 }
 0x221   : > { %4668 = vmatprep.subr.bf16.mxu0 %v5618_v33  ;;  %v5292_v33 = vcombine.high %v1324_v26, %v1328_v27 }
 0x222   : > { %4708 = vmatpush1.bf16.msra.mxu1 %v5737_v32  ;;  %v5411_v32 = vcombine.low %v1444_v18, %v1448_v19  ;;  %v1364_v18 = vld [vmem:[%s7031_s5 + $0x210] sm:$0xff] }
 0x223   : > { %4709 = vmatprep.subr.bf16.mxu1 %v5746_v34  ;;  %v5420_v34 = vcombine.high %v1452_v55, %v1456_v29  ;;  %v1368_v19 = vld [vmem:[%s7031_s5 + $0x230] sm:$0xff] }
 0x224   : > { %4669 = vmatpush1.bf16.msra.mxu0 %v5617_v41  ;;  %v5291_v41 = vcombine.low %v1324_v26, %v1328_v27  ;;  %v5332_v26 = vcombine.high %v1364_v18, %v1368_v19 }
 0x225   : > { %4670 = vmatprep.subr.bf16.mxu0 %v5626_v43  ;;  %v5300_v43 = vcombine.high %v1332_v35, %v1336_v36 }
 0x226   : > { %4710 = vmatpush1.bf16.msra.mxu1 %v5745_v42  ;;  %v5419_v42 = vcombine.low %v1452_v55, %v1456_v29  ;;  %v1372_v55 = vld [vmem:[%s7031_s5 + $0x250] sm:$0xff] }
 0x227   : > { %4711 = vmatprep.subr.bf16.mxu1 %v5754_v44  ;;  %v5428_v44 = vcombine.high %v1460_v38, %v1464_v39  ;;  %v1376_v29 = vld [vmem:[%s7031_s5 + $0x270] sm:$0xff] }
 0x228   : > { %4671 = vmatpush1.bf16.msra.mxu0 %v5625_v23  ;;  %v5299_v23 = vcombine.low %v1332_v35, %v1336_v36  ;;  %v5340_v35 = vcombine.high %v1372_v55, %v1376_v29 }
 0x229   : > { %4672 = vmatprep.subr.bf16.mxu0 %v5634_v49  ;;  %v5308_v49 = vcombine.high %v1340_v45, %v1344_v20 }
 0x22a   : > { %4712 = vmatpush1.bf16.msra.mxu1 %v5753_v48  ;;  %v5427_v48 = vcombine.low %v1460_v38, %v1464_v39  ;;  %v1380_v38 = vld [vmem:[%s7031_s5 + $0x290] sm:$0xff] }
 0x22b   : > { %4713 = vmatprep.subr.bf16.mxu1 %v5762_v50  ;;  %v5436_v50 = vcombine.high %v1468_v46, %v1472_v47  ;;  %v1384_v39 = vld [vmem:[%s7031_s5 + $0x2b0] sm:$0xff] }
 0x22c   : > { %4673 = vmatpush1.bf16.msra.mxu0 %v5633_v57  ;;  %v5307_v57 = vcombine.low %v1340_v45, %v1344_v20  ;;  %v5348_v45 = vcombine.high %v1380_v38, %v1384_v39 }
 0x22d   : > { %4674 = vmatprep.subr.bf16.mxu0 %v5642_v61  ;;  %v5316_v61 = vcombine.high %v1348_v51, %v1352_v52 }
 0x22e   : > { %4714 = vmatpush1.bf16.msra.mxu1 %v5761_v58  ;;  %v5435_v58 = vcombine.low %v1468_v46, %v1472_v47  ;;  %v1388_v46 = vld [vmem:[%s7031_s5 + $0x2d0] sm:$0xff] }
 0x22f   : > { %4715 = vmatprep.subr.bf16.mxu1 %v5770_v62  ;;  %v1392_v47 = vld [vmem:[%s7031_s5 + $0x2f0] sm:$0xff] }
 0x230   : > { %4675 = vmatpush1.bf16.msra.mxu0 %v5641_v3  ;;  %v5356_v51 = vcombine.high %v1388_v46, %v1392_v47 }
 0x231   : > { %4726 = vmatprep.subr.bf16.mxu0 %v5268_v5  ;;  %v1488_v5 = vld [vmem:[%s7031_s5 + $0x5f0] sm:$0xff] }
 0x232   : > { %4716 = vmatpush1.bf16.msra.mxu1 %v5769_v4  ;;  %v1484_v4 = vld [vmem:[%s7031_s5 + $0x5d0] sm:$0xff] }
 0x233   : > { %4767 = vmatprep.subr.bf16.mxu1 %v5396_v6  ;;  %4677 = vmatmul.mubr.bf16.vlgmr.msra.gmra.mrb[12].mxu0 %v7212_v37  ;;  %v5452_v16 = vcombine.high %v1484_v4, %v1488_v5 }
 0x234   : > { %4727 = vmatpush1.bf16.msra.mxu0 %v5267_v11  ;;  %4758 = vmatprep.mubr.bf16.mxu0 %v7072_v59 }
 0x235   : > { %4718 = vmatmul.mubr.bf16.vlgmr.msra.gmra.mrb[12].mxu1 %v7218_v40  ;;  %4728 = vmatprep.subr.bf16.mxu0 %v5276_v13  ;;  %v5443_v13 = vcombine.low %v1476_v53, %v1480_v56  ;;  %v1396_v53 = vld [vmem:[%s7031_s5 + $0x310] sm:$0xff] }
 0x236   : > { %4768 = vmatpush1.bf16.msra.mxu1 %v5395_v12  ;;  %4799 = vmatprep.mubr.bf16.mxu1 %v7076_v60  ;;  %v1400_v56 = vld [vmem:[%s7031_s5 + $0x330] sm:$0xff] }
 0x237   : > { %4769 = vmatprep.subr.bf16.mxu1 %v5404_v14  ;;  %v5324_v14 = vcombine.high %v1356_v0, %v1360_v1 }
 0x238   : > { %4729 = vmatpush1.bf16.msra.mxu0 %v5275_v22  ;;  %v1492_v22 = vld [vmem:[%s7031_s5 + $0x610] sm:$0xff] }
 0x239   : > { %4730 = vmatprep.subr.bf16.mxu0 %v5284_v25  ;;  %v5323_v25 = vcombine.low %v1356_v0, %v1360_v1  ;;  %v1404_v1 = vld [vmem:[%s7031_s5 + $0x350] sm:$0xff] }
 0x23a   : > { %4770 = vmatpush1.bf16.msra.mxu1 %v5403_v24  ;;  %v1496_v24 = vld [vmem:[%s7031_s5 + $0x630] sm:$0xff] }
 0x23b   : > { %4771 = vmatprep.subr.bf16.mxu1 %v5412_v54  ;;  %v5451_v54 = vcombine.low %v1484_v4, %v1488_v5  ;;  %v5460_v27 = vcombine.high %v1492_v22, %v1496_v24  ;;  %v1536_v4 = vld [vmem:[%s7031_s5 + $0x770] sm:$0xff]  ;;  %v5363_v5 = vcombine.low %v1396_v53, %v1400_v56 }
 0x23c   : > { %4731 = vmatpush1.bf16.msra.mxu0 %v5283_v31  ;;  %v1500_v31 = vld [vmem:[%s7031_s5 + $0x650] sm:$0xff] }
 0x23d   : > { %4732 = vmatprep.subr.bf16.mxu0 %v5292_v33  ;;  %v5331_v33 = vcombine.low %v1364_v18, %v1368_v19 }
 0x23e   : > { %4772 = vmatpush1.bf16.msra.mxu1 %v5411_v32  ;;  %v1504_v32 = vld [vmem:[%s7031_s5 + $0x670] sm:$0xff] }
 0x23f   : > { %4773 = vmatprep.subr.bf16.mxu1 %v5420_v34  ;;  %v5459_v34 = vcombine.low %v1492_v22, %v1496_v24  ;;  %v5468_v36 = vcombine.high %v1500_v31, %v1504_v32  ;;  %v1420_v22 = vld [vmem:[%s7031_s5 + $0x3d0] sm:$0xff] }
 0x240   : > { %4733 = vmatpush1.bf16.msra.mxu0 %v5291_v41  ;;  %v1508_v41 = vld [vmem:[%s7031_s5 + $0x690] sm:$0xff] }
 0x241   : > { %4734 = vmatprep.subr.bf16.mxu0 %v5300_v43  ;;  %v5339_v43 = vcombine.low %v1372_v55, %v1376_v29  ;;  %v1424_v24 = vld [vmem:[%s7031_s5 + $0x3f0] sm:$0xff] }
 0x242   : > { %4774 = vmatpush1.bf16.msra.mxu1 %v5419_v42  ;;  %v1512_v42 = vld [vmem:[%s7031_s5 + $0x6b0] sm:$0xff]  ;;  %v5388_v55 = vcombine.high %v1420_v22, %v1424_v24 }
 0x243   : > { %4775 = vmatprep.subr.bf16.mxu1 %v5428_v44  ;;  %v5467_v44 = vcombine.low %v1500_v31, %v1504_v32  ;;  %v5476_v20 = vcombine.high %v1508_v41, %v1512_v42  ;;  %v1556_v31 = vld [vmem:[%s7031_s5 + $0x810] sm:$0xff] }
 0x244   : > { %4735 = vmatpush1.bf16.msra.mxu0 %v5299_v23  ;;  %v1516_v23 = vld [vmem:[%s7031_s5 + $0x6d0] sm:$0xff] }
 0x245   : > { %4736 = vmatprep.subr.bf16.mxu0 %v5308_v49  ;;  %v5347_v49 = vcombine.low %v1380_v38, %v1384_v39  ;;  %v1560_v32 = vld [vmem:[%s7031_s5 + $0x830] sm:$0xff] }
 0x246   : > { %4776 = vmatpush1.bf16.msra.mxu1 %v5427_v48  ;;  %v4432_v62 = vpop.f32.mrb[0].mxu0  ;;  %v1520_v48 = vld [vmem:[%s7031_s5 + $0x6f0] sm:$0xff]  ;;  %v5524_v38 = vcombine.high %v1556_v31, %v1560_v32 }
 0x247   : > { %4777 = vmatprep.subr.bf16.mxu1 %v5436_v50  ;;  %v4434_v3 = vpop.f32.mrb[1].mxu0  ;;  %v5475_v50 = vcombine.low %v1508_v41, %v1512_v42  ;;  %v5484_v52 = vcombine.high %v1516_v23, %v1520_v48  ;;  %v1564_v41 = vld [vmem:[%s7031_s5 + $0x850] sm:$0xff] }
 0x248   : > { %v4473_v2 = vpop.f32.mrb[0].mxu1  ;;  %v4436_v8 = vpop.f32.mrb[2].mxu0  ;;  %4737 = vmatpush1.bf16.msra.mxu0 %v5307_v57  ;;  %v1524_v57 = vld [vmem:[%s7031_s5 + $0x710] sm:$0xff] }
 0x249   : > { %v7384_v6 = vadd.f32 %v4473_v2, %v4432_v62  ;;  %v4475_v7 = vpop.f32.mrb[1].mxu1  ;;  %v4437_v12 = vpop.f32.mrb[3].mxu0  ;;  %4738 = vmatprep.subr.bf16.mxu0 %v5316_v61  ;;  %v5355_v61 = vcombine.low %v1388_v46, %v1392_v47  ;;  %v5483_v62 = vcombine.low %v1516_v23, %v1520_v48  ;;  %v1408_v2 = vld [vmem:[%s7031_s5 + $0x370] sm:$0xff] }
 0x24a   : > { %v7386_v10 = vadd.f32 %v4475_v7, %v4434_v3  ;;  %v4477_v11 = vpop.f32.mrb[2].mxu1  ;;  %4778 = vmatpush1.bf16.msra.mxu1 %v5435_v58  ;;  %v1528_v58 = vld [vmem:[%s7031_s5 + $0x730] sm:$0xff]  ;;  %v5372_v8 = vcombine.high %v1404_v1, %v1408_v2 }
 0x24b   : > { %v4478_v15 = vpop.f32.mrb[3].mxu1  ;;  %4779 = vmatprep.subr.bf16.mxu1 %v5444_v63  ;;  %v5364_v63 = vcombine.high %v1396_v53, %v1400_v56  ;;  %v5492_v0 = vcombine.high %v1524_v57, %v1528_v58  ;;  %v1532_v3 = vld [vmem:[%s7031_s5 + $0x750] sm:$0xff]  ;;  %v5491_v7 = vcombine.low %v1524_v57, %v1528_v58 }
 0x24c   : > { %4739 = vmatpush1.bf16.msra.mxu0 %v5315_v9  ;;  %v5500_v9 = vcombine.high %v1532_v3, %v1536_v4  ;;  %v1412_v11 = vld [vmem:[%s7031_s5 + $0x390] sm:$0xff]  ;;  %v5371_v15 = vcombine.low %v1404_v1, %v1408_v2 }
 0x24d   : > { %4740 = vmatprep.subr.bf16.mxu0 %v5324_v14  ;;  %v1416_v12 = vld [vmem:[%s7031_s5 + $0x3b0] sm:$0xff] }
 0x24e   : > { %4780 = vmatpush1.bf16.msra.mxu1 %v5443_v13  ;;  %v1540_v13 = vld [vmem:[%s7031_s5 + $0x790] sm:$0xff]  ;;  %v5380_v18 = vcombine.high %v1412_v11, %v1416_v12 }
 0x24f   : > { %4781 = vmatprep.subr.bf16.mxu1 %v5452_v16  ;;  %v1544_v14 = vld [vmem:[%s7031_s5 + $0x7b0] sm:$0xff]  ;;  %v5499_v16 = vcombine.low %v1532_v3, %v1536_v4 }
 0x250   : > { %4741 = vmatpush1.bf16.msra.mxu0 %v5323_v25  ;;  %v5508_v19 = vcombine.high %v1540_v13, %v1544_v14  ;;  %v1548_v25 = vld [vmem:[%s7031_s5 + $0x7d0] sm:$0xff] }
 0x251   : > { %4742 = vmatprep.subr.bf16.mxu0 %v5332_v26  ;;  %v5379_v26 = vcombine.low %v1412_v11, %v1416_v12  ;;  %v1568_v42 = vld [vmem:[%s7031_s5 + $0x870] sm:$0xff] }
 0x252   : > { %4782 = vmatpush1.bf16.msra.mxu1 %v5451_v54  ;;  %v1552_v54 = vld [vmem:[%s7031_s5 + $0x7f0] sm:$0xff]  ;;  %v5532_v46 = vcombine.high %v1564_v41, %v1568_v42 }
 0x253   : > { %4783 = vmatprep.subr.bf16.mxu1 %v5460_v27  ;;  %v5507_v27 = vcombine.low %v1540_v13, %v1544_v14  ;;  %v5516_v29 = vcombine.high %v1548_v25, %v1552_v54  ;;  %v1572_v23 = vld [vmem:[%s7031_s5 + $0x890] sm:$0xff] }
 0x254   : > { %4743 = vmatpush1.bf16.msra.mxu0 %v5331_v33  ;;  %v1684_v33 = vld [vmem:[%s7031_s5 + $0xc10] sm:$0xff] }
 0x255   : > { %4744 = vmatprep.subr.bf16.mxu0 %v5340_v35  ;;  %v5387_v35 = vcombine.low %v1420_v22, %v1424_v24  ;;  %v1576_v48 = vld [vmem:[%s7031_s5 + $0x8b0] sm:$0xff] }
 0x256   : > { %4784 = vmatpush1.bf16.msra.mxu1 %v5459_v34  ;;  %v1688_v34 = vld [vmem:[%s7031_s5 + $0xc30] sm:$0xff]  ;;  %v5540_v53 = vcombine.high %v1572_v23, %v1576_v48 }
 0x257   : > { %4785 = vmatprep.subr.bf16.mxu1 %v5468_v36  ;;  %v5515_v36 = vcombine.low %v1548_v25, %v1552_v54  ;;  %v5652_v39 = vcombine.high %v1684_v33, %v1688_v34  ;;  %v1580_v57 = vld [vmem:[%s7031_s5 + $0x8d0] sm:$0xff] }
 0x258   : > { %4745 = vmatpush1.bf16.msra.mxu0 %v5339_v43  ;;  %v1692_v43 = vld [vmem:[%s7031_s5 + $0xc50] sm:$0xff] }
 0x259   : > { %4746 = vmatprep.subr.bf16.mxu0 %v5348_v45  ;;  %v5523_v45 = vcombine.low %v1556_v31, %v1560_v32  ;;  %v1584_v58 = vld [vmem:[%s7031_s5 + $0x8f0] sm:$0xff] }
 0x25a   : > { %4786 = vmatpush1.bf16.msra.mxu1 %v5467_v44  ;;  %v1696_v44 = vld [vmem:[%s7031_s5 + $0xc70] sm:$0xff]  ;;  %v5548_v1 = vcombine.high %v1580_v57, %v1584_v58 }
 0x25b   : > { %4787 = vmatprep.subr.bf16.mxu1 %v5476_v20  ;;  %v5651_v20 = vcombine.low %v1684_v33, %v1688_v34  ;;  %v5660_v47 = vcombine.high %v1692_v43, %v1696_v44  ;;  %v1588_v3 = vld [vmem:[%s7031_s5 + $0x910] sm:$0xff] }
 0x25c   : > { %4747 = vmatpush1.bf16.msra.mxu0 %v5347_v49  ;;  %v1700_v49 = vld [vmem:[%s7031_s5 + $0xc90] sm:$0xff] }
 0x25d   : > { %4748 = vmatprep.subr.bf16.mxu0 %v5356_v51  ;;  %v5531_v51 = vcombine.low %v1564_v41, %v1568_v42  ;;  %v1592_v4 = vld [vmem:[%s7031_s5 + $0x930] sm:$0xff] }
 0x25e   : > { %4788 = vmatpush1.bf16.msra.mxu1 %v5475_v50  ;;  %v1704_v50 = vld [vmem:[%s7031_s5 + $0xcb0] sm:$0xff]  ;;  %v5556_v11 = vcombine.high %v1588_v3, %v1592_v4 }
 0x25f   : > { %4789 = vmatprep.subr.bf16.mxu1 %v5484_v52  ;;  %v5659_v52 = vcombine.low %v1692_v43, %v1696_v44  ;;  %v5668_v56 = vcombine.high %v1700_v49, %v1704_v50  ;;  %v1596_v13 = vld [vmem:[%s7031_s5 + $0x950] sm:$0xff]  ;;  %v1286_v43 = vld [vmem:[#allocation2] sm:$0xff] }
 0x260   : > { %4749 = vmatpush1.bf16.msra.mxu0 %v5355_v61  ;;  %v1708_v61 = vld [vmem:[%s7031_s5 + $0xcd0] sm:$0xff] }
 0x261   : > { %4750 = vmatprep.subr.bf16.mxu0 %v5364_v63  ;;  %v5539_v63 = vcombine.low %v1572_v23, %v1576_v48  ;;  %v1600_v14 = vld [vmem:[%s7031_s5 + $0x970] sm:$0xff]  ;;  %v1287_v23 = vld [vmem:[#allocation2 + $0x8] sm:$0xff] }
 0x262   : > { %4790 = vmatpush1.bf16.msra.mxu1 %v5483_v62  ;;  %v1712_v62 = vld [vmem:[%s7031_s5 + $0xcf0] sm:$0xff]  ;;  %v5564_v22 = vcombine.high %v1596_v13, %v1600_v14 }
 0x263   : > { %4791 = vmatprep.subr.bf16.mxu1 %v5492_v0  ;;  %v5667_v0 = vcombine.low %v1700_v49, %v1704_v50  ;;  %v5676_v2 = vcombine.high %v1708_v61, %v1712_v62  ;;  %v1604_v25 = vld [vmem:[%s7031_s5 + $0x990] sm:$0xff] }
 0x264   : > { %4751 = vmatpush1.bf16.msra.mxu0 %v5363_v5  ;;  %v1716_v5 = vld [vmem:[%s7031_s5 + $0xd10] sm:$0xff] }
 0x265   : > { %4752 = vmatprep.subr.bf16.mxu0 %v5372_v8  ;;  %v5547_v8 = vcombine.low %v1580_v57, %v1584_v58  ;;  %v1608_v54 = vld [vmem:[%s7031_s5 + $0x9b0] sm:$0xff] }
 0x266   : > { %4792 = vmatpush1.bf16.msra.mxu1 %v5491_v7  ;;  %v1720_v7 = vld [vmem:[%s7031_s5 + $0xd30] sm:$0xff]  ;;  %v5572_v31 = vcombine.high %v1604_v25, %v1608_v54 }
 0x267   : > { %4793 = vmatprep.subr.bf16.mxu1 %v5500_v9  ;;  %v5675_v9 = vcombine.low %v1708_v61, %v1712_v62  ;;  %v5684_v12 = vcombine.high %v1716_v5, %v1720_v7  ;;  %v1612_v34 = vld [vmem:[%s7031_s5 + $0x9d0] sm:$0xff] }
 0x268   : > { %4753 = vmatpush1.bf16.msra.mxu0 %v5371_v15  ;;  %v1724_v15 = vld [vmem:[%s7031_s5 + $0xd50] sm:$0xff] }
 0x269   : > { %4754 = vmatprep.subr.bf16.mxu0 %v5380_v18  ;;  %v5555_v18 = vcombine.low %v1588_v3, %v1592_v4  ;;  %v1740_v41 = vld [vmem:[%s7031_s5 + $0xdd0] sm:$0xff] }
 0x26a   : > { %4794 = vmatpush1.bf16.msra.mxu1 %v5499_v16  ;;  %v1728_v16 = vld [vmem:[%s7031_s5 + $0xd70] sm:$0xff] }
 0x26b   : > { %4795 = vmatprep.subr.bf16.mxu1 %v5508_v19  ;;  %v5683_v19 = vcombine.low %v1716_v5, %v1720_v7  ;;  %v5692_v24 = vcombine.high %v1724_v15, %v1728_v16  ;;  %v1744_v42 = vld [vmem:[%s7031_s5 + $0xdf0] sm:$0xff] }
 0x26c   : > { %4755 = vmatpush1.bf16.msra.mxu0 %v5379_v26  ;;  %v1732_v26 = vld [vmem:[%s7031_s5 + $0xd90] sm:$0xff] }
 0x26d   : > { %4756 = vmatprep.subr.bf16.mxu0 %v5388_v55  ;;  %v5563_v55 = vcombine.low %v1596_v13, %v1600_v14  ;;  %v1748_v58 = vld [vmem:[%s7031_s5 + $0xe10] sm:$0xff] }
 0x26e   : > { %4796 = vmatpush1.bf16.msra.mxu1 %v5507_v27  ;;  %v1736_v27 = vld [vmem:[%s7031_s5 + $0xdb0] sm:$0xff] }
 0x26f   : > { %4797 = vmatprep.subr.bf16.mxu1 %v5516_v29  ;;  %v5691_v29 = vcombine.low %v1724_v15, %v1728_v16  ;;  %v5700_v33 = vcombine.high %v1732_v26, %v1736_v27  ;;  %v5699_v49 = vcombine.low %v1732_v26, %v1736_v27  ;;  %v1752_v61 = vld [vmem:[%s7031_s5 + $0xe30] sm:$0xff] }
 0x270   : > { %4757 = vmatpush1.bf16.msra.mxu0 %v5387_v35  ;;  %v1616_v35 = vld [vmem:[%s7031_s5 + $0x9f0] sm:$0xff] }
 0x271   : > { %4808 = vmatprep.subr.bf16.mxu0 %v5524_v38  ;;  %v5580_v50 = vcombine.high %v1612_v34, %v1616_v35  ;;  %v1628_v3 = vld [vmem:[%s7031_s5 + $0xa50] sm:$0xff] }
 0x272   : > { %4798 = vmatpush1.bf16.msra.mxu1 %v5515_v36  ;;  %v1632_v4 = vld [vmem:[%s7031_s5 + $0xa70] sm:$0xff] }
 0x273   : > { %4849 = vmatprep.subr.bf16.mxu1 %v5652_v39  ;;  %4759 = vmatmul.mubr.bf16.vlgmr.msra.gmra.mrb[16].mxu0 %v7122_v17  ;;  %v1756_v5 = vld [vmem:[%s7031_s5 + $0xe50] sm:$0xff] }
 0x274   : > { %4809 = vmatpush1.bf16.msra.mxu0 %v5523_v45  ;;  %4840 = vmatprep.mubr.bf16.mxu0 %v7140_v28  ;;  %v1760_v7 = vld [vmem:[%s7031_s5 + $0xe70] sm:$0xff] }
 0x275   : > { %4800 = vmatmul.mubr.bf16.vlgmr.msra.gmra.mrb[16].mxu1 %v7131_v21  ;;  %4810 = vmatprep.subr.bf16.mxu0 %v5532_v46  ;;  %v5571_v46 = vcombine.low %v1604_v25, %v1608_v54  ;;  %v1636_v13 = vld [vmem:[%s7031_s5 + $0xa90] sm:$0xff] }
 0x276   : > { %4850 = vmatpush1.bf16.msra.mxu1 %v5651_v20  ;;  %4881 = vmatprep.mubr.bf16.mxu1 %v7147_v30  ;;  %v1640_v14 = vld [vmem:[%s7031_s5 + $0xab0] sm:$0xff] }
 0x277   : > { %4851 = vmatprep.subr.bf16.mxu1 %v5660_v47  ;;  %v1764_v15 = vld [vmem:[%s7031_s5 + $0xe90] sm:$0xff] }
 0x278   : > { %4811 = vmatpush1.bf16.msra.mxu0 %v5531_v51  ;;  %v1768_v16 = vld [vmem:[%s7031_s5 + $0xeb0] sm:$0xff] }
 0x279   : > { %4812 = vmatprep.subr.bf16.mxu0 %v5540_v53  ;;  %v1620_v53 = vld [vmem:[%s7031_s5 + $0xa10] sm:$0xff] }
 0x27a   : > { %4852 = vmatpush1.bf16.msra.mxu1 %v5659_v52  ;;  %v1644_v25 = vld [vmem:[%s7031_s5 + $0xad0] sm:$0xff] }
 0x27b   : > { %4853 = vmatprep.subr.bf16.mxu1 %v5668_v56  ;;  %v1624_v56 = vld [vmem:[%s7031_s5 + $0xa30] sm:$0xff] }
 0x27c   : > { %4813 = vmatpush1.bf16.msra.mxu0 %v5539_v63  ;;  %v5579_v63 = vcombine.low %v1612_v34, %v1616_v35  ;;  %v1648_v54 = vld [vmem:[%s7031_s5 + $0xaf0] sm:$0xff] }
 0x27d   : > { %4814 = vmatprep.subr.bf16.mxu0 %v5548_v1  ;;  %v5588_v1 = vcombine.high %v1620_v53, %v1624_v56  ;;  %v1772_v26 = vld [vmem:[%s7031_s5 + $0xed0] sm:$0xff] }
 0x27e   : > { %4854 = vmatpush1.bf16.msra.mxu1 %v5667_v0  ;;  %v5707_v0 = vcombine.low %v1740_v41, %v1744_v42  ;;  %v1776_v27 = vld [vmem:[%s7031_s5 + $0xef0] sm:$0xff] }
 0x27f   : > { %4855 = vmatprep.subr.bf16.mxu1 %v5676_v2  ;;  %v5716_v2 = vcombine.high %v1748_v58, %v1752_v61  ;;  %v1656_v34 = vld [vmem:[%s7031_s5 + $0xb30] sm:$0xff] }
 0x280   : > { %4815 = vmatpush1.bf16.msra.mxu0 %v5547_v8  ;;  %v5587_v8 = vcombine.low %v1620_v53, %v1624_v56  ;;  %v1780_v35 = vld [vmem:[%s7031_s5 + $0xf10] sm:$0xff] }
 0x281   : > { %4816 = vmatprep.subr.bf16.mxu0 %v5556_v11  ;;  %v5596_v11 = vcombine.high %v1628_v3, %v1632_v4 }
 0x282   : > { %4856 = vmatpush1.bf16.msra.mxu1 %v5675_v9  ;;  %v5715_v9 = vcombine.low %v1748_v58, %v1752_v61  ;;  %v1680_v58 = vld [vmem:[%s7031_s5 + $0xbf0] sm:$0xff] }
 0x283   : > { %4857 = vmatprep.subr.bf16.mxu1 %v5684_v12  ;;  %v5724_v12 = vcombine.high %v1756_v5, %v1760_v7  ;;  %v1804_v61 = vld [vmem:[%s7031_s5 + $0xfd0] sm:$0xff] }
 0x284   : > { %4817 = vmatpush1.bf16.msra.mxu0 %v5555_v18  ;;  %v5595_v18 = vcombine.low %v1628_v3, %v1632_v4  ;;  %v1301_v3 = vld [vmem:[%s7031_s5 + $0x18] sm:$0xff] }
 0x285   : > { %4818 = vmatprep.subr.bf16.mxu0 %v5564_v22  ;;  %v5604_v22 = vcombine.high %v1636_v13, %v1640_v14  ;;  %v1305_v4 = vld [vmem:[%s7031_s5 + $0x38] sm:$0xff] }
 0x286   : > { %4858 = vmatpush1.bf16.msra.mxu1 %v5683_v19  ;;  %v4514_v32 = vpop.f32.mrb[4].mxu0  ;;  %v5723_v19 = vcombine.low %v1756_v5, %v1760_v7  ;;  %v1429_v5 = vld [vmem:[%s7031_s5 + $0x418] sm:$0xff] }
 0x287   : > { %4859 = vmatprep.subr.bf16.mxu1 %v5692_v24  ;;  %v4515_v36 = vadd.f32 %v4514_v32, %v7384_v6  ;;  %v4516_v39 = vpop.f32.mrb[5].mxu0  ;;  %v5732_v24 = vcombine.high %v1764_v15, %v1768_v16  ;;  %v5740_v32 = vcombine.high %v1772_v26, %v1776_v27  ;;  %v1433_v7 = vld [vmem:[%s7031_s5 + $0x438] sm:$0xff] }
 0x288   : > { %v4555_v38 = vpop.f32.mrb[4].mxu1  ;;  %v4517_v44 = vadd.f32 %v4516_v39, %v7386_v10  ;;  %v4518_v20 = vpop.f32.mrb[6].mxu0  ;;  %4819 = vmatpush1.bf16.msra.mxu0 %v5563_v55  ;;  %v5708_v10 = vcombine.high %v1740_v41, %v1744_v42  ;;  %v5603_v55 = vcombine.low %v1636_v13, %v1640_v14  ;;  %v5739_v39 = vcombine.low %v1772_v26, %v1776_v27  ;;  %v1309_v13 = vld [vmem:[%s7031_s5 + $0x58] sm:$0xff] }
 0x289   : > { %v4557_v45 = vpop.f32.mrb[5].mxu1  ;;  %v4556_v47 = vadd.f32 %v4555_v38, %v4515_v36  ;;  %v4519_v6 = vpop.f32.mrb[7].mxu0  ;;  %4820 = vmatprep.subr.bf16.mxu0 %v5572_v31  ;;  %v5612_v31 = vcombine.high %v1644_v25, %v1648_v54  ;;  %v1784_v36 = vld [vmem:[%s7031_s5 + $0xf30] sm:$0xff]  ;;  %v5611_v38 = vcombine.low %v1644_v25, %v1648_v54  ;;  %v1313_v14 = vld [vmem:[%s7031_s5 + $0x78] sm:$0xff] }
 0x28a   : > { %v4559_v48 = vpop.f32.mrb[6].mxu1  ;;  %4860 = vmatpush1.bf16.msra.mxu1 %v5691_v29  ;;  %v4558_v51 = vadd.f32 %v4557_v45, %v4517_v44  ;;  %v5731_v29 = vcombine.low %v1764_v15, %v1768_v16  ;;  %v5748_v42 = vcombine.high %v1780_v35, %v1784_v36  ;;  %v1664_v44 = vld [vmem:[%s7031_s5 + $0xb70] sm:$0xff]  ;;  %v1437_v15 = vld [vmem:[%s7031_s5 + $0x458] sm:$0xff] }
 0x28b   : > { %v4560_v52 = vpop.f32.mrb[7].mxu1  ;;  %4861 = vmatprep.subr.bf16.mxu1 %v5700_v33  ;;  %v5054_v57 = vadd.f32 %v4556_v47, %v1286_v43  ;;  %v1652_v33 = vld [vmem:[%s7031_s5 + $0xb10] sm:$0xff]  ;;  %v5747_v47 = vcombine.low %v1780_v35, %v1784_v36  ;;  %v1441_v16 = vld [vmem:[%s7031_s5 + $0x478] sm:$0xff] }
 0x28c   : > { %v5055_v62 = vadd.f32 %v4558_v51, %v1287_v23  ;;  %4821 = vmatpush1.bf16.msra.mxu0 %v5571_v46  ;;  %v5620_v41 = vcombine.high %v1652_v33, %v1656_v34  ;;  %v1660_v43 = vld [vmem:[%s7031_s5 + $0xb50] sm:$0xff]  ;;  %v5619_v46 = vcombine.low %v1652_v33, %v1656_v34  ;;  %v1317_v25 = vld [vmem:[%s7031_s5 + $0x98] sm:$0xff] }
 0x28d   : > { %5062 = vst [vmem:[#allocation2] sm:$0xff] %v5054_v57  ;;  %4822 = vmatprep.subr.bf16.mxu0 %v5580_v50  ;;  %v1788_v45 = vld [vmem:[%s7031_s5 + $0xf50] sm:$0xff]  ;;  %v5628_v23 = vcombine.high %v1660_v43, %v1664_v44  ;;  %v5627_v52 = vcombine.low %v1660_v43, %v1664_v44  ;;  %v1321_v54 = vld [vmem:[%s7031_s5 + $0xb8] sm:$0xff] }
 0x28e   : > { %4862 = vmatpush1.bf16.msra.mxu1 %v5699_v49  ;;  %5063 = vst [vmem:[#allocation2 + $0x8] sm:$0xff] %v5055_v62  ;;  %v1792_v20 = vld [vmem:[%s7031_s5 + $0xf70] sm:$0xff]  ;;  %v1445_v26 = vld [vmem:[%s7031_s5 + $0x498] sm:$0xff] }
 0x28f   : > { %4863 = vmatprep.subr.bf16.mxu1 %v5708_v10  ;;  %v5756_v48 = vcombine.high %v1788_v45, %v1792_v20  ;;  %v1668_v6 = vld [vmem:[%s7031_s5 + $0xb90] sm:$0xff]  ;;  %v5755_v10 = vcombine.low %v1788_v45, %v1792_v20  ;;  %v1449_v27 = vld [vmem:[%s7031_s5 + $0x4b8] sm:$0xff] }
 0x290   : > { %4823 = vmatpush1.bf16.msra.mxu0 %v5579_v63  ;;  %v1672_v49 = vld [vmem:[%s7031_s5 + $0xbb0] sm:$0xff]  ;;  %v1325_v33 = vld [vmem:[%s7031_s5 + $0xd8] sm:$0xff] }
 0x291   : > { %4824 = vmatprep.subr.bf16.mxu0 %v5588_v1  ;;  %v1796_v50 = vld [vmem:[%s7031_s5 + $0xf90] sm:$0xff]  ;;  %v5636_v53 = vcombine.high %v1668_v6, %v1672_v49  ;;  %v5635_v63 = vcombine.low %v1668_v6, %v1672_v49  ;;  %v1329_v34 = vld [vmem:[%s7031_s5 + $0xf8] sm:$0xff] }
 0x292   : > { %4864 = vmatpush1.bf16.msra.mxu1 %v5707_v0  ;;  %v1800_v51 = vld [vmem:[%s7031_s5 + $0xfb0] sm:$0xff]  ;;  %v1453_v35 = vld [vmem:[%s7031_s5 + $0x4d8] sm:$0xff]  ;;  %v5293_v20 = vcombine.low %v1325_v33, %v1329_v34 }
 0x293   : > { %4865 = vmatprep.subr.bf16.mxu1 %v5716_v2  ;;  %v5764_v56 = vcombine.high %v1796_v50, %v1800_v51  ;;  %v1676_v57 = vld [vmem:[%s7031_s5 + $0xbd0] sm:$0xff]  ;;  %v5763_v0 = vcombine.low %v1796_v50, %v1800_v51  ;;  %v1457_v36 = vld [vmem:[%s7031_s5 + $0x4f8] sm:$0xff] }
 0x294   : > { %4825 = vmatpush1.bf16.msra.mxu0 %v5587_v8  ;;  %v1808_v62 = vld [vmem:[%s7031_s5 + $0xff0] sm:$0xff]  ;;  %v5644_v1 = vcombine.high %v1676_v57, %v1680_v58  ;;  %v5643_v8 = vcombine.low %v1676_v57, %v1680_v58  ;;  %v1333_v43 = vld [vmem:[%s7031_s5 + $0x118] sm:$0xff] }
 0x295   : > { %4826 = vmatprep.subr.bf16.mxu0 %v5596_v11  ;;  %v5772_v2 = vcombine.high %v1804_v61, %v1808_v62  ;;  %v5270_v11 = vcombine.high %v1301_v3, %v1305_v4  ;;  %v1337_v44 = vld [vmem:[%s7031_s5 + $0x138] sm:$0xff] }
 0x296   : > { %4866 = vmatpush1.bf16.msra.mxu1 %v5715_v9  ;;  %v5771_v9 = vcombine.low %v1804_v61, %v1808_v62  ;;  %v1461_v45 = vld [vmem:[%s7031_s5 + $0x518] sm:$0xff]  ;;  %v5301_v50 = vcombine.low %v1333_v43, %v1337_v44 }
 0x297   : > { %4867 = vmatprep.subr.bf16.mxu1 %v5724_v12  ;;  %v5398_v12 = vcombine.high %v1429_v5, %v1433_v7  ;;  %v1469_v6 = vld [vmem:[%s7031_s5 + $0x558] sm:$0xff] }
 0x298   : > { %4827 = vmatpush1.bf16.msra.mxu0 %v5595_v18  ;;  %v5269_v18 = vcombine.low %v1301_v3, %v1305_v4  ;;  %v1473_v49 = vld [vmem:[%s7031_s5 + $0x578] sm:$0xff] }
 0x299   : > { %4828 = vmatprep.subr.bf16.mxu0 %v5604_v22  ;;  %v5278_v22 = vcombine.high %v1309_v13, %v1313_v14  ;;  %v1477_v57 = vld [vmem:[%s7031_s5 + $0x598] sm:$0xff]  ;;  %v5437_v62 = vcombine.low %v1469_v6, %v1473_v49 }
 0x29a   : > { %4868 = vmatpush1.bf16.msra.mxu1 %v5723_v19  ;;  %v5397_v19 = vcombine.low %v1429_v5, %v1433_v7  ;;  %v1481_v58 = vld [vmem:[%s7031_s5 + $0x5b8] sm:$0xff] }
 0x29b   : > { %4869 = vmatprep.subr.bf16.mxu1 %v5732_v24  ;;  %v5406_v24 = vcombine.high %v1437_v15, %v1441_v16  ;;  %v1361_v3 = vld [vmem:[%s7031_s5 + $0x1f8] sm:$0xff] }
 0x29c   : > { %4829 = vmatpush1.bf16.msra.mxu0 %v5603_v55  ;;  %v5277_v55 = vcombine.low %v1309_v13, %v1313_v14  ;;  %v1485_v7 = vld [vmem:[%s7031_s5 + $0x5d8] sm:$0xff] }
 0x29d   : > { %4830 = vmatprep.subr.bf16.mxu0 %v5612_v31  ;;  %v5286_v31 = vcombine.high %v1317_v25, %v1321_v54 }
 0x29e   : > { %4870 = vmatpush1.bf16.msra.mxu1 %v5731_v29  ;;  %v5405_v29 = vcombine.low %v1437_v15, %v1441_v16 }
 0x29f   : > { %4871 = vmatprep.subr.bf16.mxu1 %v5740_v32  ;;  %v5414_v32 = vcombine.high %v1445_v26, %v1449_v27 }
 0x2a0   : > { %4831 = vmatpush1.bf16.msra.mxu0 %v5611_v38  ;;  %v5285_v38 = vcombine.low %v1317_v25, %v1321_v54  ;;  %v1365_v25 = vld [vmem:[%s7031_s5 + $0x218] sm:$0xff] }
 0x2a1   : > { %4832 = vmatprep.subr.bf16.mxu0 %v5620_v41  ;;  %v5294_v41 = vcombine.high %v1325_v33, %v1329_v34  ;;  %v1369_v54 = vld [vmem:[%s7031_s5 + $0x238] sm:$0xff] }
 0x2a2   : > { %4872 = vmatpush1.bf16.msra.mxu1 %v5739_v39  ;;  %v5413_v39 = vcombine.low %v1445_v26, %v1449_v27  ;;  %v1493_v26 = vld [vmem:[%s7031_s5 + $0x618] sm:$0xff] }
 0x2a3   : > { %4873 = vmatprep.subr.bf16.mxu1 %v5748_v42  ;;  %v5422_v42 = vcombine.high %v1453_v35, %v1457_v36  ;;  %v1497_v27 = vld [vmem:[%s7031_s5 + $0x638] sm:$0xff] }
 0x2a4   : > { %4833 = vmatpush1.bf16.msra.mxu0 %v5619_v46  ;;  %v5302_v46 = vcombine.high %v1333_v43, %v1337_v44  ;;  %v1373_v33 = vld [vmem:[%s7031_s5 + $0x258] sm:$0xff] }
 0x2a5   : > { %4834 = vmatprep.subr.bf16.mxu0 %v5628_v23  ;;  %v1341_v23 = vld [vmem:[%s7031_s5 + $0x158] sm:$0xff] }
 0x2a6   : > { %4874 = vmatpush1.bf16.msra.mxu1 %v5747_v47  ;;  %v1377_v34 = vld [vmem:[%s7031_s5 + $0x278] sm:$0xff] }
 0x2a7   : > { %4875 = vmatprep.subr.bf16.mxu1 %v5756_v48  ;;  %v1345_v48 = vld [vmem:[%s7031_s5 + $0x178] sm:$0xff] }
 0x2a8   : > { %4835 = vmatpush1.bf16.msra.mxu0 %v5627_v52  ;;  %v5310_v52 = vcombine.high %v1341_v23, %v1345_v48  ;;  %v5309_v61 = vcombine.low %v1341_v23, %v1345_v48  ;;  %v1381_v43 = vld [vmem:[%s7031_s5 + $0x298] sm:$0xff] }
 0x2a9   : > { %4836 = vmatprep.subr.bf16.mxu0 %v5636_v53  ;;  %v1349_v53 = vld [vmem:[%s7031_s5 + $0x198] sm:$0xff] }
 0x2aa   : > { %4876 = vmatpush1.bf16.msra.mxu1 %v5755_v10  ;;  %v5438_v10 = vcombine.high %v1469_v6, %v1473_v49  ;;  %v1385_v44 = vld [vmem:[%s7031_s5 + $0x2b8] sm:$0xff] }
 0x2ab   : > { %4877 = vmatprep.subr.bf16.mxu1 %v5764_v56  ;;  %v1353_v56 = vld [vmem:[%s7031_s5 + $0x1b8] sm:$0xff] }
 0x2ac   : > { %4837 = vmatpush1.bf16.msra.mxu0 %v5635_v63  ;;  %v5318_v63 = vcombine.high %v1349_v53, %v1353_v56  ;;  %v5317_v13 = vcombine.low %v1349_v53, %v1353_v56  ;;  %v1389_v23 = vld [vmem:[%s7031_s5 + $0x2d8] sm:$0xff] }
 0x2ad   : > { %4838 = vmatprep.subr.bf16.mxu0 %v5644_v1  ;;  %v5446_v1 = vcombine.high %v1477_v57, %v1481_v58  ;;  %v1393_v48 = vld [vmem:[%s7031_s5 + $0x2f8] sm:$0xff] }
 0x2ae   : > { %4878 = vmatpush1.bf16.msra.mxu1 %v5763_v0  ;;  %v1517_v6 = vld [vmem:[%s7031_s5 + $0x6d8] sm:$0xff] }
 0x2af   : > { %4879 = vmatprep.subr.bf16.mxu1 %v5772_v2  ;;  %v1357_v2 = vld [vmem:[%s7031_s5 + $0x1d8] sm:$0xff] }
 0x2b0   : > { %4839 = vmatpush1.bf16.msra.mxu0 %v5643_v8  ;;  %v1489_v8 = vld [vmem:[%s7031_s5 + $0x5f8] sm:$0xff] }
 0x2b1   : > { %4890 = vmatprep.subr.bf16.mxu0 %v5270_v11  ;;  %v1521_v49 = vld [vmem:[%s7031_s5 + $0x6f8] sm:$0xff] }
 0x2b2   : > { %4880 = vmatpush1.bf16.msra.mxu1 %v5771_v9  ;;  %v1397_v53 = vld [vmem:[%s7031_s5 + $0x318] sm:$0xff] }
 0x2b3   : > { %4931 = vmatprep.subr.bf16.mxu1 %v5398_v12  ;;  %4841 = vmatmul.mubr.bf16.vlgmr.msra.gmra.mrb[20].mxu0 %v7212_v37  ;;  %v1401_v56 = vld [vmem:[%s7031_s5 + $0x338] sm:$0xff] }
 0x2b4   : > { %4891 = vmatpush1.bf16.msra.mxu0 %v5269_v18  ;;  %4922 = vmatprep.mubr.bf16.mxu0 %v7072_v59  ;;  %v1465_v59 = vld [vmem:[%s7031_s5 + $0x538] sm:$0xff]  ;;  %v5445_v18 = vcombine.low %v1477_v57, %v1481_v58 }
 0x2b5   : > { %4882 = vmatmul.mubr.bf16.vlgmr.msra.gmra.mrb[20].mxu1 %v7218_v40  ;;  %4892 = vmatprep.subr.bf16.mxu0 %v5278_v22  ;;  %v5430_v47 = vcombine.high %v1461_v45, %v1465_v59  ;;  %v5429_v51 = vcombine.low %v1461_v45, %v1465_v59  ;;  %v1509_v45 = vld [vmem:[%s7031_s5 + $0x698] sm:$0xff] }
 0x2b6   : > { %4932 = vmatpush1.bf16.msra.mxu1 %v5397_v19  ;;  %4963 = vmatprep.mubr.bf16.mxu1 %v7076_v60  ;;  %v5421_v60 = vcombine.low %v1453_v35, %v1457_v36  ;;  %v5326_v19 = vcombine.high %v1357_v2, %v1361_v3  ;;  %v1501_v35 = vld [vmem:[%s7031_s5 + $0x658] sm:$0xff] }
 0x2b7   : > { %4933 = vmatprep.subr.bf16.mxu1 %v5406_v24  ;;  %v5454_v24 = vcombine.high %v1485_v7, %v1489_v8  ;;  %v1505_v36 = vld [vmem:[%s7031_s5 + $0x678] sm:$0xff] }
 0x2b8   : > { %4893 = vmatpush1.bf16.msra.mxu0 %v5277_v55  ;;  %v5325_v55 = vcombine.low %v1357_v2, %v1361_v3  ;;  %v1513_v59 = vld [vmem:[%s7031_s5 + $0x6b8] sm:$0xff] }
 0x2b9   : > { %4894 = vmatprep.subr.bf16.mxu0 %v5286_v31  ;;  %v5334_v31 = vcombine.high %v1365_v25, %v1369_v54  ;;  %v1525_v57 = vld [vmem:[%s7031_s5 + $0x718] sm:$0xff] }
 0x2ba   : > { %4934 = vmatpush1.bf16.msra.mxu1 %v5405_v29  ;;  %v5453_v29 = vcombine.low %v1485_v7, %v1489_v8  ;;  %v1529_v58 = vld [vmem:[%s7031_s5 + $0x738] sm:$0xff] }
 0x2bb   : > { %4935 = vmatprep.subr.bf16.mxu1 %v5414_v32  ;;  %v5462_v32 = vcombine.high %v1493_v26, %v1497_v27  ;;  %v1409_v2 = vld [vmem:[%s7031_s5 + $0x378] sm:$0xff]  ;;  %v5493_v7 = vcombine.low %v1525_v57, %v1529_v58 }
 0x2bc   : > { %4895 = vmatpush1.bf16.msra.mxu0 %v5285_v38  ;;  %v5333_v38 = vcombine.low %v1365_v25, %v1369_v54  ;;  %v1533_v3 = vld [vmem:[%s7031_s5 + $0x758] sm:$0xff] }
 0x2bd   : > { %4896 = vmatprep.subr.bf16.mxu0 %v5294_v41  ;;  %v5342_v41 = vcombine.high %v1373_v33, %v1377_v34  ;;  %v1421_v25 = vld [vmem:[%s7031_s5 + $0x3d8] sm:$0xff] }
 0x2be   : > { %4936 = vmatpush1.bf16.msra.mxu1 %v5413_v39  ;;  %v5461_v39 = vcombine.low %v1493_v26, %v1497_v27  ;;  %v1425_v54 = vld [vmem:[%s7031_s5 + $0x3f8] sm:$0xff] }
 0x2bf   : > { %4937 = vmatprep.subr.bf16.mxu1 %v5422_v42  ;;  %v5470_v42 = vcombine.high %v1501_v35, %v1505_v36  ;;  %v1549_v26 = vld [vmem:[%s7031_s5 + $0x7d8] sm:$0xff] }
 0x2c0   : > { %4897 = vmatpush1.bf16.msra.mxu0 %v5293_v20  ;;  %v5341_v20 = vcombine.low %v1373_v33, %v1377_v34  ;;  %v1553_v27 = vld [vmem:[%s7031_s5 + $0x7f8] sm:$0xff] }
 0x2c1   : > { %4898 = vmatprep.subr.bf16.mxu0 %v5302_v46  ;;  %v5350_v46 = vcombine.high %v1381_v43, %v1385_v44  ;;  %v1557_v33 = vld [vmem:[%s7031_s5 + $0x818] sm:$0xff] }
 0x2c2   : > { %4938 = vmatpush1.bf16.msra.mxu1 %v5421_v60  ;;  %v5469_v60 = vcombine.low %v1501_v35, %v1505_v36  ;;  %v1561_v34 = vld [vmem:[%s7031_s5 + $0x838] sm:$0xff] }
 0x2c3   : > { %4939 = vmatprep.subr.bf16.mxu1 %v5430_v47  ;;  %v5478_v47 = vcombine.high %v1509_v45, %v1513_v59  ;;  %v1685_v35 = vld [vmem:[%s7031_s5 + $0xc18] sm:$0xff] }
 0x2c4   : > { %4899 = vmatpush1.bf16.msra.mxu0 %v5301_v50  ;;  %v5349_v50 = vcombine.low %v1381_v43, %v1385_v44  ;;  %v1689_v36 = vld [vmem:[%s7031_s5 + $0xc38] sm:$0xff] }
 0x2c5   : > { %4900 = vmatprep.subr.bf16.mxu0 %v5310_v52  ;;  %v5358_v52 = vcombine.high %v1389_v23, %v1393_v48  ;;  %v1565_v43 = vld [vmem:[%s7031_s5 + $0x858] sm:$0xff] }
 0x2c6   : > { %4940 = vmatpush1.bf16.msra.mxu1 %v5429_v51  ;;  %v4596_v0 = vpop.f32.mrb[8].mxu0  ;;  %v5477_v51 = vcombine.low %v1509_v45, %v1513_v59  ;;  %v1569_v44 = vld [vmem:[%s7031_s5 + $0x878] sm:$0xff] }
 0x2c7   : > { %4941 = vmatprep.subr.bf16.mxu1 %v5438_v10  ;;  %v4598_v5 = vpop.f32.mrb[9].mxu0  ;;  %v5486_v10 = vcombine.high %v1517_v6, %v1521_v49  ;;  %v1693_v45 = vld [vmem:[%s7031_s5 + $0xc58] sm:$0xff] }
 0x2c8   : > { %v4637_v4 = vpop.f32.mrb[8].mxu1  ;;  %v4600_v12 = vpop.f32.mrb[10].mxu0  ;;  %4901 = vmatpush1.bf16.msra.mxu0 %v5309_v61  ;;  %v5357_v61 = vcombine.low %v1389_v23, %v1393_v48  ;;  %v1697_v59 = vld [vmem:[%s7031_s5 + $0xc78] sm:$0xff] }
 0x2c9   : > { %v7526_v9 = vadd.f32 %v4637_v4, %v4596_v0  ;;  %v4639_v11 = vpop.f32.mrb[9].mxu1  ;;  %v4601_v16 = vpop.f32.mrb[11].mxu0  ;;  %4902 = vmatprep.subr.bf16.mxu0 %v5318_v63  ;;  %v5366_v63 = vcombine.high %v1397_v53, %v1401_v56  ;;  %v5494_v0 = vcombine.high %v1525_v57, %v1529_v58  ;;  %v1537_v4 = vld [vmem:[%s7031_s5 + $0x778] sm:$0xff] }
 0x2ca   : > { %v7528_v14 = vadd.f32 %v4639_v11, %v4598_v5  ;;  %v4641_v15 = vpop.f32.mrb[10].mxu1  ;;  %4942 = vmatpush1.bf16.msra.mxu1 %v5437_v62  ;;  %v5485_v62 = vcombine.low %v1517_v6, %v1521_v49  ;;  %v5365_v5 = vcombine.low %v1397_v53, %v1401_v56  ;;  %v5502_v11 = vcombine.high %v1533_v3, %v1537_v4  ;;  %v1413_v12 = vld [vmem:[%s7031_s5 + $0x398] sm:$0xff] }
 0x2cb   : > { %v4642_v22 = vpop.f32.mrb[11].mxu1  ;;  %4943 = vmatprep.subr.bf16.mxu1 %v5446_v1  ;;  %v1405_v1 = vld [vmem:[%s7031_s5 + $0x358] sm:$0xff] }
 0x2cc   : > { %4903 = vmatpush1.bf16.msra.mxu0 %v5317_v13  ;;  %v5374_v8 = vcombine.high %v1405_v1, %v1409_v2  ;;  %v1417_v13 = vld [vmem:[%s7031_s5 + $0x3b8] sm:$0xff] }
 0x2cd   : > { %4904 = vmatprep.subr.bf16.mxu0 %v5326_v19  ;;  %v1541_v15 = vld [vmem:[%s7031_s5 + $0x798] sm:$0xff]  ;;  %v5501_v19 = vcombine.low %v1533_v3, %v1537_v4  ;;  %v5382_v22 = vcombine.high %v1413_v12, %v1417_v13 }
 0x2ce   : > { %4944 = vmatpush1.bf16.msra.mxu1 %v5445_v18  ;;  %v1545_v16 = vld [vmem:[%s7031_s5 + $0x7b8] sm:$0xff]  ;;  %v5373_v18 = vcombine.low %v1405_v1, %v1409_v2 }
 0x2cf   : > { %4945 = vmatprep.subr.bf16.mxu1 %v5454_v24  ;;  %v5510_v24 = vcombine.high %v1541_v15, %v1545_v16  ;;  %v1573_v23 = vld [vmem:[%s7031_s5 + $0x898] sm:$0xff] }
 0x2d0   : > { %4905 = vmatpush1.bf16.msra.mxu0 %v5325_v55  ;;  %v5381_v55 = vcombine.low %v1413_v12, %v1417_v13  ;;  %v1577_v48 = vld [vmem:[%s7031_s5 + $0x8b8] sm:$0xff] }
 0x2d1   : > { %4906 = vmatprep.subr.bf16.mxu0 %v5334_v31  ;;  %v5390_v31 = vcombine.high %v1421_v25, %v1425_v54  ;;  %v1701_v6 = vld [vmem:[%s7031_s5 + $0xc98] sm:$0xff] }
 0x2d2   : > { %4946 = vmatpush1.bf16.msra.mxu1 %v5453_v29  ;;  %v5509_v29 = vcombine.low %v1541_v15, %v1545_v16  ;;  %v1705_v49 = vld [vmem:[%s7031_s5 + $0xcb8] sm:$0xff] }
 0x2d3   : > { %4947 = vmatprep.subr.bf16.mxu1 %v5462_v32  ;;  %v5518_v32 = vcombine.high %v1549_v26, %v1553_v27  ;;  %v1581_v53 = vld [vmem:[%s7031_s5 + $0x8d8] sm:$0xff]  ;;  %v5669_v58 = vcombine.low %v1701_v6, %v1705_v49 }
 0x2d4   : > { %4907 = vmatpush1.bf16.msra.mxu0 %v5333_v38  ;;  %v5389_v38 = vcombine.low %v1421_v25, %v1425_v54  ;;  %v1585_v56 = vld [vmem:[%s7031_s5 + $0x8f8] sm:$0xff] }
 0x2d5   : > { %4908 = vmatprep.subr.bf16.mxu0 %v5342_v41  ;;  %v5526_v41 = vcombine.high %v1557_v33, %v1561_v34  ;;  %v1713_v57 = vld [vmem:[%s7031_s5 + $0xcf8] sm:$0xff]  ;;  %v5549_v2 = vcombine.low %v1581_v53, %v1585_v56 }
 0x2d6   : > { %4948 = vmatpush1.bf16.msra.mxu1 %v5461_v39  ;;  %v5517_v39 = vcombine.low %v1549_v26, %v1553_v27  ;;  %v1717_v1 = vld [vmem:[%s7031_s5 + $0xd18] sm:$0xff] }
 0x2d7   : > { %4949 = vmatprep.subr.bf16.mxu1 %v5470_v42  ;;  %v5654_v42 = vcombine.high %v1685_v35, %v1689_v36 }
 0x2d8   : > { %4909 = vmatpush1.bf16.msra.mxu0 %v5341_v20  ;;  %v5525_v20 = vcombine.low %v1557_v33, %v1561_v34 }
 0x2d9   : > { %4910 = vmatprep.subr.bf16.mxu0 %v5350_v46  ;;  %v5534_v46 = vcombine.high %v1565_v43, %v1569_v44 }
 0x2da   : > { %4950 = vmatpush1.bf16.msra.mxu1 %v5469_v60  ;;  %v5653_v60 = vcombine.low %v1685_v35, %v1689_v36  ;;  %v1741_v35 = vld [vmem:[%s7031_s5 + $0xdd8] sm:$0xff] }
 0x2db   : > { %4951 = vmatprep.subr.bf16.mxu1 %v5478_v47  ;;  %v5662_v47 = vcombine.high %v1693_v45, %v1697_v59  ;;  %v1745_v36 = vld [vmem:[%s7031_s5 + $0xdf8] sm:$0xff] }
 0x2dc   : > { %4911 = vmatpush1.bf16.msra.mxu0 %v5349_v50  ;;  %v5533_v50 = vcombine.low %v1565_v43, %v1569_v44 }
 0x2dd   : > { %4912 = vmatprep.subr.bf16.mxu0 %v5358_v52  ;;  %v5542_v52 = vcombine.high %v1573_v23, %v1577_v48 }
 0x2de   : > { %4952 = vmatpush1.bf16.msra.mxu1 %v5477_v51  ;;  %v5661_v51 = vcombine.low %v1693_v45, %v1697_v59  ;;  %v1289_v45 = vld [vmem:[#allocation2 + $0x18] sm:$0xff] }
 0x2df   : > { %4953 = vmatprep.subr.bf16.mxu1 %v5486_v10  ;;  %v5670_v10 = vcombine.high %v1701_v6, %v1705_v49  ;;  %v1749_v49 = vld [vmem:[%s7031_s5 + $0xe18] sm:$0xff] }
 0x2e0   : > { %4913 = vmatpush1.bf16.msra.mxu0 %v5357_v61  ;;  %v5550_v61 = vcombine.high %v1581_v53, %v1585_v56 }
 0x2e1   : > { %4914 = vmatprep.subr.bf16.mxu0 %v5366_v63  ;;  %v1589_v63 = vld [vmem:[%s7031_s5 + $0x918] sm:$0xff] }
 0x2e2   : > { %4954 = vmatpush1.bf16.msra.mxu1 %v5485_v62 }
 0x2e3   : > { %4955 = vmatprep.subr.bf16.mxu1 %v5494_v0  ;;  %v1593_v0 = vld [vmem:[%s7031_s5 + $0x938] sm:$0xff] }
 0x2e4   : > { %4915 = vmatpush1.bf16.msra.mxu0 %v5365_v5  ;;  %v5558_v3 = vcombine.high %v1589_v63, %v1593_v0  ;;  %v1597_v5 = vld [vmem:[%s7031_s5 + $0x958] sm:$0xff]  ;;  %v5557_v12 = vcombine.low %v1589_v63, %v1593_v0 }
 0x2e5   : > { %4916 = vmatprep.subr.bf16.mxu0 %v5374_v8  ;;  %v1725_v8 = vld [vmem:[%s7031_s5 + $0xd58] sm:$0xff] }
 0x2e6   : > { %4956 = vmatpush1.bf16.msra.mxu1 %v5493_v7  ;;  %v1601_v7 = vld [vmem:[%s7031_s5 + $0x978] sm:$0xff] }
 0x2e7   : > { %4957 = vmatprep.subr.bf16.mxu1 %v5502_v11  ;;  %v1729_v11 = vld [vmem:[%s7031_s5 + $0xd78] sm:$0xff]  ;;  %v5566_v15 = vcombine.high %v1597_v5, %v1601_v7  ;;  %v5565_v25 = vcombine.low %v1597_v5, %v1601_v7 }
 0x2e8   : > { %4917 = vmatpush1.bf16.msra.mxu0 %v5373_v18  ;;  %v5694_v16 = vcombine.high %v1725_v8, %v1729_v11  ;;  %v1605_v18 = vld [vmem:[%s7031_s5 + $0x998] sm:$0xff]  ;;  %v5693_v54 = vcombine.low %v1725_v8, %v1729_v11 }
 0x2e9   : > { %4918 = vmatprep.subr.bf16.mxu0 %v5382_v22  ;;  %v1733_v22 = vld [vmem:[%s7031_s5 + $0xd98] sm:$0xff] }
 0x2ea   : > { %4958 = vmatpush1.bf16.msra.mxu1 %v5501_v19  ;;  %v1609_v19 = vld [vmem:[%s7031_s5 + $0x9b8] sm:$0xff] }
 0x2eb   : > { %4959 = vmatprep.subr.bf16.mxu1 %v5510_v24  ;;  %v1737_v24 = vld [vmem:[%s7031_s5 + $0xdb8] sm:$0xff]  ;;  %v5574_v26 = vcombine.high %v1605_v18, %v1609_v19  ;;  %v5573_v43 = vcombine.low %v1605_v18, %v1609_v19 }
 0x2ec   : > { %4919 = vmatpush1.bf16.msra.mxu0 %v5381_v55  ;;  %v5702_v55 = vcombine.high %v1733_v22, %v1737_v24  ;;  %v1645_v8 = vld [vmem:[%s7031_s5 + $0xad8] sm:$0xff] }
 0x2ed   : > { %4920 = vmatprep.subr.bf16.mxu0 %v5390_v31  ;;  %v1617_v31 = vld [vmem:[%s7031_s5 + $0x9f8] sm:$0xff] }
 0x2ee   : > { %4960 = vmatpush1.bf16.msra.mxu1 %v5509_v29  ;;  %v1613_v29 = vld [vmem:[%s7031_s5 + $0x9d8] sm:$0xff] }
 0x2ef   : > { %4961 = vmatprep.subr.bf16.mxu1 %v5518_v32  ;;  %v1649_v11 = vld [vmem:[%s7031_s5 + $0xaf8] sm:$0xff] }
 0x2f0   : > { %4921 = vmatpush1.bf16.msra.mxu0 %v5389_v38  ;;  %v1288_v38 = vld [vmem:[#allocation2 + $0x10] sm:$0xff]  ;;  %v5614_v18 = vcombine.high %v1645_v8, %v1649_v11 }
 0x2f1   : > { %4972 = vmatprep.subr.bf16.mxu0 %v5526_v41 }
 0x2f2   : > { %4962 = vmatpush1.bf16.msra.mxu1 %v5517_v39 }
 0x2f3   : > { %5013 = vmatprep.subr.bf16.mxu1 %v5654_v42  ;;  %4923 = vmatmul.mubr.bf16.vlgmr.msra.gmra.mrb[24].mxu0 %v7122_v17  ;;  %v1709_v17 = vld [vmem:[%s7031_s5 + $0xcd8] sm:$0xff] }
 0x2f4   : > { %4973 = vmatpush1.bf16.msra.mxu0 %v5525_v20  ;;  %5004 = vmatprep.mubr.bf16.mxu0 %v7140_v28  ;;  %v5678_v62 = vcombine.high %v1709_v17, %v1713_v57  ;;  %v1721_v28 = vld [vmem:[%s7031_s5 + $0xd38] sm:$0xff]  ;;  %v5701_v20 = vcombine.low %v1733_v22, %v1737_v24 }
 0x2f5   : > { %4964 = vmatmul.mubr.bf16.vlgmr.msra.gmra.mrb[24].mxu1 %v7131_v21  ;;  %4974 = vmatprep.subr.bf16.mxu0 %v5534_v46  ;;  %v5541_v21 = vcombine.low %v1573_v23, %v1577_v48  ;;  %v5686_v4 = vcombine.high %v1717_v1, %v1721_v28  ;;  %v5685_v13 = vcombine.low %v1717_v1, %v1721_v28  ;;  %v1621_v23 = vld [vmem:[%s7031_s5 + $0xa18] sm:$0xff] }
 0x2f6   : > { %5014 = vmatpush1.bf16.msra.mxu1 %v5653_v60  ;;  %5045 = vmatprep.mubr.bf16.mxu1 %v7147_v30  ;;  %v5677_v30 = vcombine.low %v1709_v17, %v1713_v57  ;;  %v5582_v60 = vcombine.high %v1613_v29, %v1617_v31  ;;  %v1625_v48 = vld [vmem:[%s7031_s5 + $0xa38] sm:$0xff] }
 0x2f7   : > { %5015 = vmatprep.subr.bf16.mxu1 %v5662_v47  ;;  %v5590_v53 = vcombine.high %v1621_v23, %v1625_v48  ;;  %v1629_v17 = vld [vmem:[%s7031_s5 + $0xa58] sm:$0xff] }
 0x2f8   : > { %4975 = vmatpush1.bf16.msra.mxu0 %v5533_v50  ;;  %v1753_v50 = vld [vmem:[%s7031_s5 + $0xe38] sm:$0xff] }
 0x2f9   : > { %4976 = vmatprep.subr.bf16.mxu0 %v5542_v52  ;;  %v5581_v52 = vcombine.low %v1613_v29, %v1617_v31  ;;  %v5718_v56 = vcombine.high %v1749_v49, %v1753_v50  ;;  %v1633_v57 = vld [vmem:[%s7031_s5 + $0xa78] sm:$0xff] }
 0x2fa   : > { %5016 = vmatpush1.bf16.msra.mxu1 %v5661_v51  ;;  %v5598_v63 = vcombine.high %v1629_v17, %v1633_v57  ;;  %v1637_v1 = vld [vmem:[%s7031_s5 + $0xa98] sm:$0xff] }
 0x2fb   : > { %5017 = vmatprep.subr.bf16.mxu1 %v5670_v10  ;;  %v5709_v10 = vcombine.low %v1741_v35, %v1745_v36  ;;  %v1641_v28 = vld [vmem:[%s7031_s5 + $0xab8] sm:$0xff] }
 0x2fc   : > { %4977 = vmatpush1.bf16.msra.mxu0 %v5541_v21  ;;  %v1757_v21 = vld [vmem:[%s7031_s5 + $0xe58] sm:$0xff]  ;;  %v5606_v5 = vcombine.high %v1637_v1, %v1641_v28 }
 0x2fd   : > { %4978 = vmatprep.subr.bf16.mxu0 %v5550_v61  ;;  %v5589_v61 = vcombine.low %v1621_v23, %v1625_v48  ;;  %v1653_v22 = vld [vmem:[%s7031_s5 + $0xb18] sm:$0xff] }
 0x2fe   : > { %5018 = vmatpush1.bf16.msra.mxu1 %v5669_v58  ;;  %v1761_v58 = vld [vmem:[%s7031_s5 + $0xe78] sm:$0xff] }
 0x2ff   : > { %5019 = vmatprep.subr.bf16.mxu1 %v5678_v62  ;;  %v5717_v62 = vcombine.low %v1749_v49, %v1753_v50  ;;  %v5726_v0 = vcombine.high %v1757_v21, %v1761_v58  ;;  %v1657_v24 = vld [vmem:[%s7031_s5 + $0xb38] sm:$0xff] }
 0x300   : > { %4979 = vmatpush1.bf16.msra.mxu0 %v5549_v2  ;;  %v1765_v2 = vld [vmem:[%s7031_s5 + $0xe98] sm:$0xff] }
 0x301   : > { %4980 = vmatprep.subr.bf16.mxu0 %v5558_v3  ;;  %v5597_v3 = vcombine.low %v1629_v17, %v1633_v57  ;;  %v1661_v31 = vld [vmem:[%s7031_s5 + $0xb58] sm:$0xff] }
 0x302   : > { %5020 = vmatpush1.bf16.msra.mxu1 %v5677_v30  ;;  %v1769_v30 = vld [vmem:[%s7031_s5 + $0xeb8] sm:$0xff] }
 0x303   : > { %5021 = vmatprep.subr.bf16.mxu1 %v5686_v4  ;;  %v5725_v4 = vcombine.low %v1757_v21, %v1761_v58  ;;  %v5734_v7 = vcombine.high %v1765_v2, %v1769_v30 }
 0x304   : > { %4981 = vmatpush1.bf16.msra.mxu0 %v5557_v12  ;;  %v1773_v12 = vld [vmem:[%s7031_s5 + $0xed8] sm:$0xff] }
 0x305   : > { %4982 = vmatprep.subr.bf16.mxu0 %v5566_v15  ;;  %v5605_v15 = vcombine.low %v1637_v1, %v1641_v28 }
 0x306   : > { %5022 = vmatpush1.bf16.msra.mxu1 %v5685_v13  ;;  %v4678_v27 = vpop.f32.mrb[12].mxu0  ;;  %v1777_v13 = vld [vmem:[%s7031_s5 + $0xef8] sm:$0xff] }
 0x307   : > { %5023 = vmatprep.subr.bf16.mxu1 %v5694_v16  ;;  %v4679_v32 = vadd.f32 %v4678_v27, %v7526_v9  ;;  %v4680_v34 = vpop.f32.mrb[13].mxu0  ;;  %v5733_v16 = vcombine.low %v1765_v2, %v1769_v30  ;;  %v5742_v19 = vcombine.high %v1773_v12, %v1777_v13  ;;  %v5741_v27 = vcombine.low %v1773_v12, %v1777_v13  ;;  %v1290_v2 = vld [vmem:[#allocation2 + $0x20] sm:$0xff] }
 0x308   : > { %v4719_v33 = vpop.f32.mrb[12].mxu1  ;;  %v4681_v39 = vadd.f32 %v4680_v34, %v7528_v14  ;;  %v4682_v42 = vpop.f32.mrb[14].mxu0  ;;  %4983 = vmatpush1.bf16.msra.mxu0 %v5565_v25  ;;  %v5710_v14 = vcombine.high %v1741_v35, %v1745_v36  ;;  %v1781_v25 = vld [vmem:[%s7031_s5 + $0xf18] sm:$0xff]  ;;  %v5621_v35 = vcombine.low %v1653_v22, %v1657_v24 }
 0x309   : > { %v4721_v41 = vpop.f32.mrb[13].mxu1  ;;  %v4720_v44 = vadd.f32 %v4719_v33, %v4679_v32  ;;  %v4683_v9 = vpop.f32.mrb[15].mxu0  ;;  %4984 = vmatprep.subr.bf16.mxu0 %v5574_v26  ;;  %v5613_v26 = vcombine.low %v1645_v8, %v1649_v11  ;;  %v1665_v32 = vld [vmem:[%s7031_s5 + $0xb78] sm:$0xff] }
 0x30a   : > { %v4723_v59 = vpop.f32.mrb[14].mxu1  ;;  %5024 = vmatpush1.bf16.msra.mxu1 %v5693_v54  ;;  %v4722_v46 = vadd.f32 %v4721_v41, %v4681_v39  ;;  %v1785_v54 = vld [vmem:[%s7031_s5 + $0xf38] sm:$0xff] }
 0x30b   : > { %v4724_v47 = vpop.f32.mrb[15].mxu1  ;;  %5025 = vmatprep.subr.bf16.mxu1 %v5702_v55  ;;  %v5056_v6 = vadd.f32 %v4720_v44, %v1288_v38  ;;  %v5622_v55 = vcombine.high %v1653_v22, %v1657_v24  ;;  %v5750_v29 = vcombine.high %v1781_v25, %v1785_v54  ;;  %v1789_v33 = vld [vmem:[%s7031_s5 + $0xf58] sm:$0xff]  ;;  %v5749_v36 = vcombine.low %v1781_v25, %v1785_v54 }
 0x30c   : > { %v5057_v51 = vadd.f32 %v4722_v46, %v1289_v45  ;;  %4985 = vmatpush1.bf16.msra.mxu0 %v5573_v43  ;;  %v1793_v34 = vld [vmem:[%s7031_s5 + $0xf78] sm:$0xff]  ;;  %v5630_v38 = vcombine.high %v1661_v31, %v1665_v32  ;;  %v5629_v45 = vcombine.low %v1661_v31, %v1665_v32 }
 0x30d   : > { %5064 = vst [vmem:[#allocation2 + $0x10] sm:$0xff] %v5056_v6  ;;  %4986 = vmatprep.subr.bf16.mxu0 %v5582_v60  ;;  %v5758_v39 = vcombine.high %v1789_v33, %v1793_v34  ;;  %v1669_v41 = vld [vmem:[%s7031_s5 + $0xb98] sm:$0xff]  ;;  %v5757_v59 = vcombine.low %v1789_v33, %v1793_v34  ;;  %v1292_v33 = vld [vmem:[#allocation2 + $0x30] sm:$0xff] }
 0x30e   : > { %5026 = vmatpush1.bf16.msra.mxu1 %v5701_v20  ;;  %5065 = vst [vmem:[#allocation2 + $0x18] sm:$0xff] %v5057_v51  ;;  %v1673_v42 = vld [vmem:[%s7031_s5 + $0xbb8] sm:$0xff] }
 0x30f   : > { %5027 = vmatprep.subr.bf16.mxu1 %v5710_v14  ;;  %v1797_v43 = vld [vmem:[%s7031_s5 + $0xf98] sm:$0xff]  ;;  %v5638_v9 = vcombine.high %v1669_v41, %v1673_v42  ;;  %v5637_v23 = vcombine.low %v1669_v41, %v1673_v42 }
 0x310   : > { %4987 = vmatpush1.bf16.msra.mxu0 %v5581_v52  ;;  %v1801_v44 = vld [vmem:[%s7031_s5 + $0xfb8] sm:$0xff] }
 0x311   : > { %4988 = vmatprep.subr.bf16.mxu0 %v5590_v53  ;;  %v5766_v20 = vcombine.high %v1797_v43, %v1801_v44  ;;  %v1677_v60 = vld [vmem:[%s7031_s5 + $0xbd8] sm:$0xff]  ;;  %v5765_v48 = vcombine.low %v1797_v43, %v1801_v44 }
 0x312   : > { %5028 = vmatpush1.bf16.msra.mxu1 %v5709_v10  ;;  %v1681_v46 = vld [vmem:[%s7031_s5 + $0xbf8] sm:$0xff] }
 0x313   : > { %5029 = vmatprep.subr.bf16.mxu1 %v5718_v56  ;;  %v1805_v47 = vld [vmem:[%s7031_s5 + $0xfd8] sm:$0xff]  ;;  %v5646_v6 = vcombine.high %v1677_v60, %v1681_v46  ;;  %v5645_v50 = vcombine.low %v1677_v60, %v1681_v46  ;;  %v5074_v60 = vld [vmem:[#allocation2] sm:$0xff] (!%p5775_p13) }
 0x314   : > { %4989 = vmatpush1.bf16.msra.mxu0 %v5589_v61  ;;  %v1809_v14 = vld [vmem:[%s7031_s5 + $0xff8] sm:$0xff]  ;;  %v5082_v46 = vld [vmem:[%s1266_s12] sm:$0xff] (!%p5775_p13) }
 0x315   : > { %4990 = vmatprep.subr.bf16.mxu0 %v5598_v63  ;;  %v5774_v49 = vcombine.high %v1805_v47, %v1809_v14  ;;  %v5773_v51 = vcombine.low %v1805_v47, %v1809_v14  ;;  %v5075_v14 = vld [vmem:[#allocation2 + $0x8] sm:$0xff] (!%p5775_p13) }
 0x316   : > { %5030 = vmatpush1.bf16.msra.mxu1 %v5717_v62 }
 0x317   : > { %5031 = vmatprep.subr.bf16.mxu1 %v5726_v0 }
 0x318   : > { %4991 = vmatpush1.bf16.msra.mxu0 %v5597_v3 }
 0x319   : > { %4992 = vmatprep.subr.bf16.mxu0 %v5606_v5 }
 0x31a   : > { %5032 = vmatpush1.bf16.msra.mxu1 %v5725_v4 }
 0x31b   : > { %5033 = vmatprep.subr.bf16.mxu1 %v5734_v7 }
 0x31c   : > { %4993 = vmatpush1.bf16.msra.mxu0 %v5605_v15 }
 0x31d   : > { %4994 = vmatprep.subr.bf16.mxu0 %v5614_v18 }
 0x31e   : > { %5034 = vmatpush1.bf16.msra.mxu1 %v5733_v16 }
 0x31f   : > { %5035 = vmatprep.subr.bf16.mxu1 %v5742_v19 }
 0x320   : > { %4995 = vmatpush1.bf16.msra.mxu0 %v5613_v26 }
 0x321   : > { %4996 = vmatprep.subr.bf16.mxu0 %v5622_v55 }
 0x322   : > { %5036 = vmatpush1.bf16.msra.mxu1 %v5741_v27 }
 0x323   : > { %5037 = vmatprep.subr.bf16.mxu1 %v5750_v29 }
 0x324   : > { %4997 = vmatpush1.bf16.msra.mxu0 %v5621_v35 }
 0x325   : > { %4998 = vmatprep.subr.bf16.mxu0 %v5630_v38 }
 0x326   : > { %5038 = vmatpush1.bf16.msra.mxu1 %v5749_v36 }
 0x327   : > { %5039 = vmatprep.subr.bf16.mxu1 %v5758_v39  ;;  %v1293_v39 = vld [vmem:[#allocation2 + $0x38] sm:$0xff] }
 0x328   : > { %4999 = vmatpush1.bf16.msra.mxu0 %v5629_v45 }
 0x329   : > { %5000 = vmatprep.subr.bf16.mxu0 %v5638_v9  ;;  %v5084_v9 = vlaneseq (!%p5775_p13) }
 0x32a   : > { %5040 = vmatpush1.bf16.msra.mxu1 %v5757_v59 }
 0x32b   : > { %5041 = vmatprep.subr.bf16.mxu1 %v5766_v20  ;;  %v5085_v20 = vshrl.u32 (!%p5775_p13), %v5084_v9, 7 }
 0x32c   : > { %5001 = vmatpush1.bf16.msra.mxu0 %v5637_v23 }
 0x32d   : > { %5002 = vmatprep.subr.bf16.mxu0 %v5646_v6  ;;  %v5086_v47 = vsub.s32 (!%p5775_p13), 0, %v5085_v20  ;;  %v5090_v23 = vsub.s32 (!%p5775_p13), 1, %v5085_v20  ;;  %v5094_v6 = vsub.s32 (!%p5775_p13), 2, %v5085_v20 }
 0x32e   : > { %5042 = vmatpush1.bf16.msra.mxu1 %v5765_v48  ;;  %v5076_v48 = vld [vmem:[#allocation2 + $0x10] sm:$0xff] (!%p5775_p13) }
 0x32f   : > { %5043 = vmatprep.subr.bf16.mxu1 %v5774_v49  ;;  %v5098_v49 = vsub.s32 (!%p5775_p13), 3, %v5085_v20 }
 0x330   : > { %5003 = vmatpush1.bf16.msra.mxu0 %v5645_v50  ;;  %v5077_v50 = vld [vmem:[#allocation2 + $0x18] sm:$0xff] (!%p5775_p13) }
 0x332   : > { %5044 = vmatpush1.bf16.msra.mxu1 %v5773_v51 }
 0x333   : > { %5005 = vmatmul.mubr.bf16.vlgmr.msra.gmra.mrb[28].mxu0 %v7212_v37 }
 0x335   : > { %5046 = vmatmul.mubr.bf16.vlgmr.msra.gmra.mrb[28].mxu1 %v7218_v40  ;;  %v1291_v40 = vld [vmem:[#allocation2 + $0x28] sm:$0xff] }
 0x346   : > { %v4760_v52 = vpop.f32.mrb[16].mxu0 }
 0x347   : > { %v4762_v53 = vpop.f32.mrb[17].mxu0 }
 0x348   : > { %v4801_v10 = vpop.f32.mrb[16].mxu1  ;;  %v4764_v57 = vpop.f32.mrb[18].mxu0 }
 0x349   : > { %v4802_v56 = vadd.f32 %v4801_v10, %v4760_v52  ;;  %v4803_v17 = vpop.f32.mrb[17].mxu1  ;;  %v4765_v61 = vpop.f32.mrb[19].mxu0  ;;  %v5102_v52 = vsub.s32 (!%p5775_p13), 4, %v5085_v20  ;;  %v5106_v10 = vsub.s32 (!%p5775_p13), 5, %v5085_v20  ;;  %v5091_v57 = vrot.slane (!%p5775_p13), %v5082_v46, %v5090_v23 }
 0x34a   : > { %v4804_v21 = vadd.f32 %v4803_v17, %v4762_v53  ;;  %v4805_v58 = vpop.f32.mrb[18].mxu1  ;;  %v5110_v53 = vsub.s32 (!%p5775_p13), 6, %v5085_v20  ;;  %v5087_v17 = vrot.slane (!%p5775_p13), %v5082_v46, %v5086_v47 }
 0x34b   : > { %v4806_v62 = vpop.f32.mrb[19].mxu1  ;;  %v5099_v58 = vrot.slane (!%p5775_p13), %v5082_v46, %v5098_v49 }
 0x386   : > { %v4842_v63 = vpop.f32.mrb[20].mxu0 }
 0x387   : > { %v4843_v0 = vadd.f32 %v4842_v63, %v4802_v56  ;;  %v4844_v28 = vpop.f32.mrb[21].mxu0  ;;  %v5114_v56 = vsub.s32 (!%p5775_p13), 7, %v5085_v20 }
 0x388   : > { %v4883_v1 = vpop.f32.mrb[20].mxu1  ;;  %v4845_v30 = vadd.f32 %v4844_v28, %v4804_v21  ;;  %v4846_v37 = vpop.f32.mrb[22].mxu0  ;;  %v5095_v21 = vrot.slane (!%p5775_p13), %v5082_v46, %v5094_v6  ;;  %v5111_v28 = vrot.slane (!%p5775_p13), %v5082_v46, %v5110_v53 }
 0x389   : > { %v4885_v3 = vpop.f32.mrb[21].mxu1  ;;  %v4884_v4 = vadd.f32 %v4883_v1, %v4843_v0  ;;  %v4847_v7 = vpop.f32.mrb[23].mxu0  ;;  %v5103_v0 = vrot.slane (!%p5775_p13), %v5082_v46, %v5102_v52  ;;  %v5107_v1 = vrot.slane (!%p5775_p13), %v5082_v46, %v5106_v10 }
 0x38a   : > { %v4887_v5 = vpop.f32.mrb[22].mxu1  ;;  %v4886_v8 = vadd.f32 %v4885_v3, %v4845_v30  ;;  %v5124_v30 = vadd.f32 (!%p5775_p13), %v5087_v17, %v5074_v60  ;;  %v5125_v3 = vadd.f32 (!%p5775_p13), %v5091_v57, %v5075_v14  ;;  %v5126_v37 = vadd.f32 (!%p5775_p13), %v5095_v21, %v5076_v48 }
 0x38b   : > { %v4888_v11 = vpop.f32.mrb[23].mxu1  ;;  %v5058_v12 = vadd.f32 %v4884_v4, %v1290_v2  ;;  %v5115_v2 = vrot.slane (!%p5775_p13), %v5082_v46, %v5114_v56  ;;  %v5127_v4 = vadd.f32 (!%p5775_p13), %v5099_v58, %v5077_v50 }
 0x38c   : > { %v5059_v13 = vadd.f32 %v4886_v8, %v1291_v40  ;;  %5132 = vst [vmem:[%s7029_s15] sm:$0xff] (!%p5775_p13), %v5124_v30  ;;  %5133 = vst [vmem:[%s7029_s15 + $0x8] sm:$0xff] (!%p5775_p13), %v5125_v3 }
 0x38d   : > { %5066 = vst [vmem:[#allocation2 + $0x20] sm:$0xff] %v5058_v12  ;;  %5134 = vst [vmem:[%s7029_s15 + $0x10] sm:$0xff] (!%p5775_p13), %v5126_v37 }
 0x38e   : > { %5067 = vst [vmem:[#allocation2 + $0x28] sm:$0xff] %v5059_v13  ;;  %5135 = vst [vmem:[%s7029_s15 + $0x18] sm:$0xff] (!%p5775_p13), %v5127_v4 }
 0x394   : > { %v5078_v51 = vld [vmem:[#allocation2 + $0x20] sm:$0xff] (!%p5775_p13) }
 0x395   : > { %v5079_v61 = vld [vmem:[#allocation2 + $0x28] sm:$0xff] (!%p5775_p13)  ;;  %v5128_v40 = vadd.f32 (!%p5775_p13), %v5103_v0, %v5078_v51 }
 0x396   : > { %v5129_v5 = vadd.f32 (!%p5775_p13), %v5107_v1, %v5079_v61 }
 0x397   : > { %5136 = vst [vmem:[%s7029_s15 + $0x20] sm:$0xff] (!%p5775_p13), %v5128_v40 }
 0x398   : > { %5137 = vst [vmem:[%s7029_s15 + $0x28] sm:$0xff] (!%p5775_p13), %v5129_v5 }
 0x3c6   : > { %v4924_v15 = vpop.f32.mrb[24].mxu0 }
 0x3c7   : > { %v4926_v18 = vpop.f32.mrb[25].mxu0 }
 0x3c8   : > { %v4965_v16 = vpop.f32.mrb[24].mxu1  ;;  %v4928_v24 = vpop.f32.mrb[26].mxu0 }
 0x3c9   : > { %v4966_v19 = vadd.f32 %v4965_v16, %v4924_v15  ;;  %v4967_v22 = vpop.f32.mrb[25].mxu1  ;;  %v4929_v26 = vpop.f32.mrb[27].mxu0 }
 0x3ca   : > { %v4968_v25 = vadd.f32 %v4967_v22, %v4926_v18  ;;  %v4969_v54 = vpop.f32.mrb[26].mxu1 }
 0x3cb   : > { %v4970_v27 = vpop.f32.mrb[27].mxu1 }
 0x406   : > { %v5006_v55 = vpop.f32.mrb[28].mxu0 }
 0x407   : > { %v5007_v29 = vadd.f32 %v5006_v55, %v4966_v19  ;;  %v5008_v32 = vpop.f32.mrb[29].mxu0 }
 0x408   : > { %v5047_v31 = vpop.f32.mrb[28].mxu1  ;;  %v5009_v34 = vadd.f32 %v5008_v32, %v4968_v25  ;;  %v5010_v36 = vpop.f32.mrb[30].mxu0  ;;  %5073 = sbr.rel (%p5775_p13) target bundleno = 1049 (0x419), region = 63 }
 0x409   : > { %v5049_v35 = vpop.f32.mrb[29].mxu1  ;;  %v5048_v38 = vadd.f32 %v5047_v31, %v5007_v29  ;;  %v5011_v42 = vpop.f32.mrb[31].mxu0 }
 0x40a   : > { %v5051_v41 = vpop.f32.mrb[30].mxu1  ;;  %v5050_v43 = vadd.f32 %v5049_v35, %v5009_v34 }
 0x40b   : > { %v5052_v44 = vpop.f32.mrb[31].mxu1  ;;  %v5060_v45 = vadd.f32 %v5048_v38, %v1292_v33 }
 0x40c   : > { %v5061_v59 = vadd.f32 %v5050_v43, %v1293_v39 }
 0x40d   : > { %5068 = vst [vmem:[#allocation2 + $0x30] sm:$0xff] %v5060_v45 }
 0x40e   : > { %5069 = vst [vmem:[#allocation2 + $0x38] sm:$0xff] %v5061_v59 }
 0x414   : > { %v5080_v62 = vld [vmem:[#allocation2 + $0x30] sm:$0xff] }
 0x415   : > { %v5081_v63 = vld [vmem:[#allocation2 + $0x38] sm:$0xff]  ;;  %v5130_v7 = vadd.f32 %v5111_v28, %v5080_v62 }
 0x416   : > { %v5131_v8 = vadd.f32 %v5115_v2, %v5081_v63 }
 0x417   : > { %5138 = vst [vmem:[%s7029_s15 + $0x30] sm:$0xff] %v5130_v7 }
 0x418   : > { %5139 = vst [vmem:[%s7029_s15 + $0x38] sm:$0xff] %v5131_v8 }
 0x419 PF: > { %s13_s18 = sadd.s32 1, %s5898_s18   ;;  %s7673_s12 = smov %s5878_s13 }
 0x41a   : > { %p10_p0 = scmp.ge.s32.totalorder %s13_s18, 8   ;;  %s7674_s13 = smov %s5972_s25 }
 0x41b   : > { %s7675_s14 = smov %s5890_s16  ;;  %s7676_s15 = smov %s5894_s17 }
 0x41c   : > { %s7677_s16 = smov %s7680_s19  ;;  %s7678_s17 = smov %s7684_s20 }
 0x41d   :  { %12 = sbr.rel (!%p10_p0) target bundleno = 4 (0x4), region = 104 }

// kernel: afnet_forward.8
= control target key start
LH: loop header
LB: loop body
LE: loop exit
PB: predicated region body
PF: predicated region fallthrough
CT: control target
= control target key end

     0   :  { %s2604_s9 = smov 0   ;;  %s2950_s0 = inlined_call_operand.vmem [shape: f32[2,4,2048], index: 0, kind: input, shape index: {}]   ;;  %s2951_s1 = inlined_call_operand.vmem [shape: f32[2,4,2048], index: 1, kind: input, shape index: {}]   ;;  %s2952_s2 = inlined_call_operand.vmem [shape: f32[2,4,2048], index: 2, kind: output, shape index: {}]  }
   0x1 LB: > { %s2411_s10 = sadd.s32 4294967295, %s2585_s9   ;;  %p2415_p0 = scmp.ge.s32.totalorder %s2585_s9, 1  ;;  %s2585_s9 = sphi %s2604_s9, %s12_s9  }
   0x2   : > { %p122_p1 = scmp.lt.s32.totalorder %s2585_s9, 3 }
   0x4   : > { %p123_p2 = pnand %p2415_p0, %p122_p1 }
   0x5   : > { %p149_p3 = scmp.lt.s32.totalorder (!%p123_p2), %s2411_s10, 1  ;;  %vm212_vm0 = vcmask (!%p123_p2), 1043456   ;;  %vm971_vm5 = vcmask (!%p123_p2), 27648   ;;  %vm1041_vm6 = vcmask (!%p123_p2), 31744  }
   0x6   : > { %126 = sbr.rel (%p123_p2) target bundleno = 1077 (0x435), region = 28 }
   0xd   : > { %s2954_s10 = smov (!%p149_p3, %s2411_s10), 1 }
   0xe   : > { %s2612_s11 = sshll.u32 %s2954_s10, 6 }
   0xf   : > { %s2618_s14 = scalar_lea.vmem %s2951_s1, %s2612_s11  ;;  %s2642_s17 = scalar_lea.vmem %s2950_s0, %s2612_s11 }
  0x10   : > { %v2621_v0 = vld [vmem:[%s2618_s14] sm:$0xff]  ;;  %v2624_v1 = vld [vmem:[%s2618_s14 + $0x8] sm:$0xff]  ;;  %v2627_v2 = vld [vmem:[%s2618_s14 + $0x10] sm:$0xff]  ;;  %s2917_s20 = scalar_lea.vmem %s2952_s2, %s2612_s11 }
  0x11   : > { %v272_v3 = vmul.f32 %v2621_v0, %v2621_v0  ;;  %v273_v4 = vmul.f32 %v2624_v1, %v2624_v1  ;;  %v274_v5 = vmul.f32 %v2627_v2, %v2627_v2  ;;  %v2636_v8 = vld [vmem:[%s2618_s14 + $0x18] sm:$0xff]  ;;  %v2651_v16 = vld [vmem:[%s2642_s17] sm:$0xff]  ;;  %v2654_v17 = vld [vmem:[%s2642_s17 + $0x8] sm:$0xff] }
  0x12   : > { %v275_v13 = vmul.f32 %v2636_v8, %v2636_v8  ;;  %v2657_v18 = vld [vmem:[%s2618_s14 + $0x20] sm:$0xff]  ;;  %v2661_v22 = vld [vmem:[%s2642_s17 + $0x10] sm:$0xff]  ;;  %v180_v23 = vmul.f32 %v2651_v16, %v2651_v16  ;;  %v181_v24 = vmul.f32 %v2654_v17, %v2654_v17  ;;  %v2668_v25 = vld [vmem:[%s2618_s14 + $0x28] sm:$0xff] }
  0x13   : > { %v288_v6 = vcombine.high %v272_v3, %v272_v3  ;;  %v289_v7 = vcombine.high %v273_v4, %v273_v4  ;;  %v304_v9 = vsel %vm212_vm0, %v272_v3, 0.0  ;;  %v307_v12 = vsel %vm212_vm0, %v273_v4, 0.0  ;;  %v2679_v36 = vld [vmem:[%s2642_s17 + $0x18] sm:$0xff]  ;;  %v2686_v42 = vld [vmem:[%s2618_s14 + $0x30] sm:$0xff]  ;;  %v2693_v50 = vld [vmem:[%s2642_s17 + $0x20] sm:$0xff] }
  0x14   : > { %v290_v14 = vcombine.high %v274_v5, %v274_v5  ;;  %v311_v20 = vsel %vm212_vm0, %v274_v5, 0.0  ;;  %v276_v26 = vmul.f32 %v2657_v18, %v2657_v18  ;;  %v291_v27 = vcombine.high %v275_v13, %v275_v13  ;;  %v2700_v56 = vld [vmem:[%s2618_s14 + $0x38] sm:$0xff]  ;;  %v2707_v3 = vld [vmem:[%s2642_s17 + $0x28] sm:$0xff] }
  0x15   : > { %v305_v10 = vsel %vm212_vm0, %v288_v6, 0.0  ;;  %v309_v15 = vsel %vm212_vm0, %v289_v7, 0.0  ;;  %v196_v30 = vcombine.high %v180_v23, %v180_v23  ;;  %v315_v31 = vsel %vm212_vm0, %v275_v13, 0.0 }
  0x16   : > { %v306_v11 = vadd.f32 %v305_v10, %v304_v9  ;;  %v313_v28 = vsel %vm212_vm0, %v290_v14, 0.0  ;;  %v182_v32 = vmul.f32 %v2661_v22, %v2661_v22  ;;  %v197_v33 = vcombine.high %v181_v24, %v181_v24 }
  0x17   : > { %v277_v34 = vmul.f32 %v2668_v25, %v2668_v25  ;;  %v213_v37 = vsel %vm212_vm0, %v180_v23, 0.0  ;;  %v292_v38 = vcombine.high %v276_v26, %v276_v26  ;;  %v317_v39 = vsel %vm212_vm0, %v291_v27, 0.0 }
  0x18   : > { %v308_v19 = vadd.f32 %v307_v12, %v306_v11  ;;  %v214_v40 = vsel %vm212_vm0, %v196_v30, 0.0  ;;  %v216_v41 = vsel %vm212_vm0, %v181_v24, 0.0  ;;  %v319_v45 = vsel %vm212_vm0, %v276_v26, 0.0 }
  0x19   : > { %v215_v44 = vadd.f32 %v214_v40, %v213_v37  ;;  %v183_v46 = vmul.f32 %v2679_v36, %v2679_v36  ;;  %v198_v47 = vcombine.high %v182_v32, %v182_v32  ;;  %v218_v48 = vsel %vm212_vm0, %v197_v33, 0.0 }
  0x1a   : > { %v310_v21 = vadd.f32 %v309_v15, %v308_v19  ;;  %v278_v52 = vmul.f32 %v2686_v42, %v2686_v42  ;;  %v293_v53 = vcombine.high %v277_v34, %v277_v34  ;;  %v321_v54 = vsel %vm212_vm0, %v292_v38, 0.0 }
  0x1b   : > { %v217_v51 = vadd.f32 %v216_v41, %v215_v44  ;;  %v220_v55 = vsel %vm212_vm0, %v182_v32, 0.0  ;;  %v323_v59 = vsel %vm212_vm0, %v277_v34, 0.0  ;;  %v184_v60 = vmul.f32 %v2693_v50, %v2693_v50  ;;  %v2727_v34 = vld [vmem:[%s2642_s17 + $0x38] sm:$0xff] }
  0x1c   : > { %v312_v29 = vadd.f32 %v311_v20, %v310_v21  ;;  %v199_v61 = vcombine.high %v183_v46, %v183_v46  ;;  %v222_v62 = vsel %vm212_vm0, %v198_v47, 0.0  ;;  %v279_v5 = vmul.f32 %v2700_v56, %v2700_v56  ;;  %v2718_v20 = vld [vmem:[%s2642_s17 + $0x30] sm:$0xff] }
  0x1d   : > { %v219_v58 = vadd.f32 %v218_v48, %v217_v51  ;;  %v294_v6 = vcombine.high %v278_v52, %v278_v52  ;;  %v325_v7 = vsel %vm212_vm0, %v293_v53, 0.0  ;;  %v224_v9 = vsel %vm212_vm0, %v183_v46, 0.0 }
  0x1e   : > { %v314_v35 = vadd.f32 %v313_v28, %v312_v29  ;;  %v327_v12 = vsel %vm212_vm0, %v278_v52, 0.0  ;;  %v185_v13 = vmul.f32 %v2707_v3, %v2707_v3  ;;  %v200_v14 = vcombine.high %v184_v60, %v184_v60 }
  0x1f   : > { %v221_v4 = vadd.f32 %v220_v55, %v219_v58  ;;  %v226_v15 = vsel %vm212_vm0, %v199_v61, 0.0  ;;  %v295_v23 = vcombine.high %v279_v5, %v279_v5  ;;  %v329_v24 = vsel %vm212_vm0, %v294_v6, 0.0 }
  0x20   : > { %v316_v43 = vadd.f32 %v315_v31, %v314_v35  ;;  %v228_v26 = vsel %vm212_vm0, %v184_v60, 0.0  ;;  %v331_v29 = vsel %vm212_vm0, %v279_v5, 0.0  ;;  %v186_v30 = vmul.f32 %v2718_v20, %v2718_v20 }
  0x21   : > { %v223_v11 = vadd.f32 %v222_v62, %v221_v4  ;;  %v201_v31 = vcombine.high %v185_v13, %v185_v13  ;;  %v230_v32 = vsel %vm212_vm0, %v200_v14, 0.0  ;;  %v333_v37 = vsel %vm212_vm0, %v295_v23, 0.0 }
  0x22   : > { %v318_v49 = vadd.f32 %v317_v39, %v316_v43  ;;  %v232_v38 = vsel %vm212_vm0, %v185_v13, 0.0  ;;  %v187_v41 = vmul.f32 %v2727_v34, %v2727_v34  ;;  %v202_v43 = vcombine.high %v186_v30, %v186_v30 }
  0x23   : > { %v225_v21 = vadd.f32 %v224_v9, %v223_v11  ;;  %v234_v44 = vsel %vm212_vm0, %v201_v31, 0.0  ;;  %v236_v47 = vsel %vm212_vm0, %v186_v30, 0.0  ;;  %v2587_v60 = vmov 839922192  }
  0x24   : > { %v320_v57 = vadd.f32 %v319_v45, %v318_v49  ;;  %v203_v49 = vcombine.high %v187_v41, %v187_v41  ;;  %v238_v51 = vsel %vm212_vm0, %v202_v43, 0.0  ;;  %v240_v53 = vsel %vm212_vm0, %v187_v41, 0.0 }
  0x25   : > { %v227_v28 = vadd.f32 %v226_v15, %v225_v21  ;;  %v256_v61 = vunpack.c.l.s4 %v2587_v60  ;;  %v258_v62 = vlaneseq }
  0x26   : > { %v322_v63 = vadd.f32 %v321_v54, %v320_v57  ;;  %v242_v55 = vsel %vm212_vm0, %v203_v49, 0.0 }
  0x27   : > { %v229_v35 = vadd.f32 %v228_v26, %v227_v28  ;;  %v259_v4 = vshrl.u32 %v258_v62, 7 }
  0x28   : > { %v324_v10 = vadd.f32 %v323_v59, %v322_v63  ;;  %v257_v63 = vunpack.c.0.s8 %v256_v61 }
  0x29   : > { %v231_v40 = vadd.f32 %v230_v32, %v229_v35 }
  0x2a   : > { %v326_v19 = vadd.f32 %v325_v7, %v324_v10  ;;  %v260_v10 = vsub.s32 %v257_v63, %v259_v4 }
  0x2b   : > { %v233_v46 = vadd.f32 %v232_v38, %v231_v40 }
  0x2c   : > { %v328_v27 = vadd.f32 %v327_v12, %v326_v19 }
  0x2d   : > { %v235_v48 = vadd.f32 %v234_v44, %v233_v46 }
  0x2e   : > { %v330_v33 = vadd.f32 %v329_v24, %v328_v27 }
  0x2f   : > { %v237_v52 = vadd.f32 %v236_v47, %v235_v48 }
  0x30   : > { %v332_v39 = vadd.f32 %v331_v29, %v330_v33 }
  0x31   : > { %v239_v54 = vadd.f32 %v238_v51, %v237_v52 }
  0x32   : > { %v334_v45 = vadd.f32 %v333_v37, %v332_v39 }
  0x33   : > { %v241_v57 = vadd.f32 %v240_v53, %v239_v54 }
  0x34   : > { %335 = vadd.xlane.f32.xlu0 %v334_v45 }
  0x35   : > { %v243_v58 = vadd.f32 %v242_v55, %v241_v57 }
  0x38   : > { %244 = vadd.xlane.f32.xlu0 %v243_v58 }
  0xc1   : > { %v336_v59 = vpop.xlane.xlu0 %335 }
  0xc2   : > { %2563 = vrsqrt.f32 %v336_v59  ;;  %vm339_vm1 = vcmp.eq.f32.partialorder %v336_v59, inf  ;;  %v342_v9 = vand.u32 2147483648, %v336_v59  ;;  %vm341_vm2 = vcmp.eq.f32.partialorder %v336_v59, 0.0 }
  0xc5   : > { %v245_v5 = vpop.xlane.xlu0 %244 }
  0xc6   : > { %2565 = vrsqrt.f32 %v245_v5  ;;  %vm248_vm3 = vcmp.eq.f32.partialorder %v245_v5, inf  ;;  %v251_v21 = vand.u32 2147483648, %v245_v5  ;;  %vm250_vm4 = vcmp.eq.f32.partialorder %v245_v5, 0.0 }
  0xcc   : > { %v2564_v6 = vpop.eup %2563 }
  0xcd   : > { %v338_v7 = vmul.f32 %v2564_v6, %v336_v59 }
  0xcf   : > { %v340_v11 = vsel %vm339_vm1, %v336_v59, %v338_v7 }
  0xd0   : > { %v343_v12 = vsel %vm341_vm2, %v342_v9, %v340_v11  ;;  %v2566_v15 = vpop.eup %2565 }
  0xd1   : > { %v344_v13 = vmax.f32 %v343_v12, 1e-12  ;;  %v247_v19 = vmul.f32 %v2566_v15, %v245_v5 }
  0xd3   : > { %v352_v14 = vrot.slane %v344_v13, %v260_v10  ;;  %v249_v23 = vsel %vm248_vm3, %v245_v5, %v247_v19 }
  0xd4   : > { %v252_v24 = vsel %vm250_vm4, %v251_v21, %v249_v23 }
  0xd5   : > { %2567 = vrcp.f32 %v352_v14  ;;  %v253_v26 = vmax.f32 %v252_v24, 1e-12 }
  0xd7   : > { %v261_v27 = vrot.slane %v253_v26, %v260_v10 }
  0xd9   : > { %2569 = vrcp.f32 %v261_v27 }
  0xdf   : > { %v2568_v28 = vpop.eup %2567 }
  0xe0   : > { %v355_v29 = vmul.f32 %v2568_v28, %v2621_v0  ;;  %v356_v30 = vmul.f32 %v2568_v28, %v2624_v1  ;;  %v357_v38 = vmul.f32 %v2568_v28, %v2627_v2  ;;  %v358_v44 = vmul.f32 %v2568_v28, %v2636_v8 }
  0xe1   : > { %v359_v48 = vmul.f32 %v2568_v28, %v2657_v18  ;;  %v360_v53 = vmul.f32 %v2568_v28, %v2668_v25  ;;  %v361_v58 = vmul.f32 %v2568_v28, %v2686_v42  ;;  %v362_v62 = vmul.f32 %v2568_v28, %v2700_v56 }
  0xe2   : > { %v395_v31 = vcombine.high %v355_v29, %v355_v29  ;;  %v396_v32 = vcombine.high %v356_v30, %v356_v30  ;;  %v397_v41 = vcombine.high %v357_v38, %v357_v38  ;;  %v398_v46 = vcombine.high %v358_v44, %v358_v44 }
  0xe3   : > { %v2570_v33 = vpop.eup %2569  ;;  %v399_v51 = vcombine.high %v359_v48, %v359_v48  ;;  %v400_v55 = vcombine.high %v360_v53, %v360_v53  ;;  %v401_v60 = vcombine.high %v361_v58, %v361_v58  ;;  %v402_v4 = vcombine.high %v362_v62, %v362_v62 }
  0xe4   : > { %411 = vmatprep.subr.mxu0 %v395_v31  ;;  %v264_v35 = vmul.f32 %v2570_v33, %v2651_v16  ;;  %v265_v37 = vmul.f32 %v2570_v33, %v2654_v17  ;;  %v266_v43 = vmul.f32 %v2570_v33, %v2661_v22  ;;  %v267_v47 = vmul.f32 %v2570_v33, %v2679_v36 }
  0xe5   : > { %412 = vmatpush1.xpose.msra.mxu0 %v355_v29  ;;  %v268_v52 = vmul.f32 %v2570_v33, %v2693_v50  ;;  %v269_v57 = vmul.f32 %v2570_v33, %v2707_v3  ;;  %v270_v61 = vmul.f32 %v2570_v33, %v2718_v20  ;;  %v271_v5 = vmul.f32 %v2570_v33, %v2727_v34 }
  0xe6   : > { %481 = vmatprep.subr.mxu0 %v396_v32  ;;  %v371_v39 = vcombine.high %v264_v35, %v264_v35  ;;  %v372_v40 = vcombine.high %v265_v37, %v265_v37  ;;  %v373_v45 = vcombine.high %v266_v43, %v266_v43  ;;  %v374_v49 = vcombine.high %v267_v47, %v267_v47 }
  0xe7   : > { %v375_v54 = vcombine.high %v268_v52, %v268_v52  ;;  %v376_v59 = vcombine.high %v269_v57, %v269_v57  ;;  %v377_v63 = vcombine.high %v270_v61, %v270_v61  ;;  %v378_v6 = vcombine.high %v271_v5, %v271_v5 }
  0xe8   : > { %475 = vmatprep.mubr.f32.mxu0 %v371_v39 }
  0xe9   : > { %476 = vmatmul.mubr.f32.vlgmr.msra.gmra.mrb[0].mxu0 %v264_v35 }
  0xea   : > { %482 = vmatpush1.xpose.msra.mxu0 %v356_v30  ;;  %545 = vmatprep.mubr.f32.mxu0 %v372_v40 }
  0xeb   : > { %551 = vmatprep.subr.mxu0 %v397_v41 }
  0xf1   : > { %546 = vmatmul.mubr.f32.vlgmr.msra.gmra.mrb[0].mxu0 %v265_v37 }
  0xf2   : > { %552 = vmatpush1.xpose.msra.mxu0 %v357_v38  ;;  %615 = vmatprep.mubr.f32.mxu0 %v373_v45  ;;  %v2767_v45 = vcombine.high %v2668_v25, %v2668_v25 }
  0xf3   : > { %621 = vmatprep.subr.mxu0 %v398_v46  ;;  %v2588_v46 = vmov 0.0  }
  0xf4   : > { %1425 = vmatprep.mubr.f32.mxu1 %v2588_v46 }
  0xf9   : > { %616 = vmatmul.mubr.f32.vlgmr.msra.gmra.mrb[0].mxu0 %v266_v43  ;;  %v2759_v43 = vcombine.high %v2657_v18, %v2657_v18 }
  0xfa   : > { %622 = vmatpush1.xpose.msra.mxu0 %v358_v44  ;;  %685 = vmatprep.mubr.f32.mxu0 %v374_v49  ;;  %v2763_v44 = vcombine.high %v2621_v0, %v2621_v0 }
  0xfb   : > { %691 = vmatprep.subr.mxu0 %v399_v51  ;;  %2434 = vmatprep.subr.msk.mxu1 %vm212_vm0, %v2759_v43 }
  0xfc   : > { %2435 = vmatpush1.msk.msra.mxu1 %vm212_vm0, %v2657_v18 }
  0xfd   : > { %2437 = vmatprep.subr.msk.mxu1 %vm212_vm0, %v2767_v45 }
 0x101   : > { %686 = vmatmul.mubr.f32.vlgmr.msra.gmra.mrb[0].mxu0 %v267_v47  ;;  %v2781_v47 = vcombine.high %v2624_v1, %v2624_v1 }
 0x102   : > { %692 = vmatpush1.xpose.msra.mxu0 %v359_v48  ;;  %755 = vmatprep.mubr.f32.mxu0 %v375_v54  ;;  %v2809_v54 = vcombine.high %v2700_v56, %v2700_v56 }
 0x103   : > { %761 = vmatprep.subr.mxu0 %v400_v55  ;;  %v2813_v55 = vcombine.high %v2636_v8, %v2636_v8 }
 0x109   : > { %756 = vmatmul.mubr.f32.vlgmr.msra.gmra.mrb[0].mxu0 %v268_v52  ;;  %v2789_v52 = vcombine.high %v2686_v42, %v2686_v42 }
 0x10a   : > { %762 = vmatpush1.xpose.msra.mxu0 %v360_v53  ;;  %825 = vmatprep.mubr.f32.mxu0 %v376_v59  ;;  %v2793_v53 = vcombine.high %v2627_v2, %v2627_v2 }
 0x10b   : > { %831 = vmatprep.subr.mxu0 %v401_v60  ;;  %v1027_v60 = vcombine.high %v2661_v22, %v2661_v22 }
 0x111   : > { %826 = vmatmul.mubr.f32.vlgmr.msra.gmra.mrb[0].mxu0 %v269_v57  ;;  %v1025_v57 = vcombine.high %v2651_v16, %v2651_v16 }
 0x112   : > { %832 = vmatpush1.xpose.msra.mxu0 %v361_v58  ;;  %895 = vmatprep.mubr.f32.mxu0 %v377_v63  ;;  %v1026_v58 = vcombine.high %v2654_v17, %v2654_v17  ;;  %v2872_v63 = vcombine.high %v2707_v3, %v2707_v3 }
 0x113   : > { %901 = vmatprep.subr.mxu0 %v402_v4  ;;  %v2882_v4 = vcombine.high %v2718_v20, %v2718_v20 }
 0x119   : > { %896 = vmatmul.mubr.f32.vlgmr.msra.gmra.mrb[0].mxu0 %v270_v61  ;;  %v1028_v61 = vcombine.high %v2679_v36, %v2679_v36 }
 0x11a   : > { %902 = vmatpush1.xpose.msra.mxu0 %v362_v62  ;;  %965 = vmatprep.mubr.f32.mxu0 %v378_v6  ;;  %v2862_v62 = vcombine.high %v2693_v50, %v2693_v50 }
 0x11b   : > { %2422 = vmatprep.subr.msk.mxu0 %vm212_vm0, %v2763_v44 }
 0x121   : > { %966 = vmatmul.mubr.f32.vlgmr.msra.gmra.mrb[0].mxu0 %v271_v5  ;;  %v2892_v5 = vcombine.high %v2727_v34, %v2727_v34 }
 0x122   : > { %2423 = vmatpush1.msk.msra.mxu0 %vm212_vm0, %v2621_v0  ;;  %1141 = vmatprep.mubr.f32.mxu0 %v2588_v46 }
 0x123   : > { %2425 = vmatprep.subr.msk.mxu0 %vm212_vm0, %v2781_v47 }
 0x1f4   : > { %v967_v7 = vpop.f32.mrb[0].mxu0 }
 0x1f5   : > { %v969_v9 = vpop.f32.mrb[1].mxu0  ;;  %v972_v10 = vsel %vm971_vm5, %v967_v7, -inf }
 0x1f6   : > { %973 = vmax.xlane.f32.xlu1 %v972_v10  ;;  %v983_v11 = vrot.slane %v972_v10, 4 }
 0x1f8   : > { %v984_v12 = vmax.f32 %v972_v10, %v983_v11 }
 0x1fa   : > { %v985_v13 = vrot.slane %v984_v12, 2 }
 0x1fc   : > { %v986_v14 = vmax.f32 %v984_v12, %v985_v13  ;;  %v2475_v13 = vadd.f32 %v2621_v0, %v2651_v16 }
 0x1fe   : > { %v987_v15 = vrot.slane %v986_v14, 1 }
 0x200   : > { %v988_v19 = vmax.f32 %v986_v14, %v987_v15  ;;  %v2478_v14 = vadd.f32 %v1025_v57, %v2763_v44 }
 0x202   : > { %v989_v21 = vsub.f32 %v967_v7, %v988_v19 }
 0x204   : > { %v990_v23 = vmul.f32 1.442695, %v989_v21 }
 0x206   : > { %2571 = vpow2.f32 %v990_v23  ;;  %v2481_v23 = vadd.f32 %v2624_v1, %v2654_v17 }
 0x210   : > { %v2572_v24 = vpop.eup %2571 }
 0x211   : > { %v992_v26 = vsel %vm971_vm5, %v2572_v24, 0.0 }
 0x212   : > { %v993_v27 = vrot.slane %v992_v26, 4 }
 0x214   : > { %v994_v28 = vadd.f32 %v993_v27, %v992_v26  ;;  %v2484_v26 = vadd.f32 %v1026_v58, %v2781_v47 }
 0x216   : > { %v995_v29 = vrot.slane %v994_v28, 2 }
 0x218   : > { %v996_v30 = vadd.f32 %v995_v29, %v994_v28 }
 0x21a   : > { %v997_v31 = vrot.slane %v996_v30, 1 }
 0x21c   : > { %v998_v32 = vadd.f32 %v997_v31, %v996_v30 }
 0x21e   : > { %2573 = vrcp.f32 %v998_v32  ;;  %v2487_v32 = vadd.f32 %v2627_v2, %v2661_v22 }
 0x228   : > { %v2574_v33 = vpop.eup %2573 }
 0x229   : > { %v1000_v35 = vmul.f32 %v2574_v33, %v2572_v24 }
 0x22b   : > { %1645 = vxpose.xlu0.b32.start.end [1/1] (short) (narrow) %v1000_v35, 8 }
 0x283   : > { %v974_v37 = vpop.xlane.xlu1 %973 }
 0x284   : > { %v975_v38 = vsub.f32 %v967_v7, %v974_v37 }
 0x286   : > { %v976_v39 = vmul.f32 1.442695, %v975_v38 }
 0x288   : > { %2575 = vpow2.f32 %v976_v39  ;;  %v2496_v39 = vadd.f32 %v1028_v61, %v2813_v55 }
 0x292   : > { %v2576_v40 = vpop.eup %2575 }
 0x293   : > { %v978_v41 = vsel %vm971_vm5, %v2576_v40, 0.0 }
 0x294   : > { %979 = vadd.xlane.f32.xlu1 %v978_v41 }
 0x2ab   : > { %v1661_v59 = vpop.trf.xlu0 }
 0x321   : > { %v980_v48 = vpop.xlane.xlu1 %979 }
 0x322   : > { %2577 = vrcp.f32 %v980_v48 }
 0x32c   : > { %v2578_v49 = vpop.eup %2577 }
 0x32d   : > { %v982_v51 = vmul.f32 %v2578_v49, %v2576_v40 }
 0x32f   : > { %2424 = vmatmul.mubr.msk.f32.vlgmr.msra.gmra.mrb[2].mxu0 %vm1041_vm6, %v982_v51  ;;  %2436 = vmatmul.mubr.msk.f32.vlgmr.msra.gmra.mrb[0].mxu1 %vm1041_vm6, %v982_v51 }
 0x330   : > { %2438 = vmatpush1.msk.msra.mxu1 %vm212_vm0, %v2668_v25  ;;  %2426 = vmatpush1.msk.msra.mxu0 %vm212_vm0, %v2624_v1  ;;  %v2490_v1 = vadd.f32 %v1027_v60, %v2793_v53 }
 0x331   : > { %1212 = vmatprep.mubr.f32.mxu0 %v2588_v46  ;;  %1496 = vmatprep.mubr.f32.mxu1 %v2588_v46 }
 0x332   : > { %2440 = vmatprep.subr.msk.mxu1 %vm212_vm0, %v2789_v52  ;;  %2428 = vmatprep.subr.msk.mxu0 %vm212_vm0, %v2793_v53 }
 0x333   : > { %2427 = vmatmul.mubr.msk.f32.vlgmr.msra.gmra.mrb[4].mxu0 %vm1041_vm6, %v982_v51  ;;  %2439 = vmatmul.mubr.msk.f32.vlgmr.msra.gmra.mrb[2].mxu1 %vm1041_vm6, %v982_v51 }
 0x334   : > { %2441 = vmatpush1.msk.msra.mxu1 %vm212_vm0, %v2686_v42  ;;  %2429 = vmatpush1.msk.msra.mxu0 %vm212_vm0, %v2627_v2  ;;  %v2493_v2 = vadd.f32 %v2636_v8, %v2679_v36 }
 0x335   : > { %1283 = vmatprep.mubr.f32.mxu0 %v2588_v46  ;;  %1567 = vmatprep.mubr.f32.mxu1 %v2588_v46 }
 0x336   : > { %2443 = vmatprep.subr.msk.mxu1 %vm212_vm0, %v2809_v54  ;;  %2431 = vmatprep.subr.msk.mxu0 %vm212_vm0, %v2813_v55  ;;  %v2501_v55 = vadd.f32 %v2862_v62, %v2759_v43  ;;  %v2507_v43 = vadd.f32 %v2686_v42, %v2718_v20 }
 0x337   : > { %2430 = vmatmul.mubr.msk.f32.vlgmr.msra.gmra.mrb[6].mxu0 %vm1041_vm6, %v982_v51  ;;  %2442 = vmatmul.mubr.msk.f32.vlgmr.msra.gmra.mrb[4].mxu1 %vm1041_vm6, %v982_v51 }
 0x338   : > { %2444 = vmatpush1.msk.msra.mxu1 %vm212_vm0, %v2700_v56  ;;  %2432 = vmatpush1.msk.msra.mxu0 %vm212_vm0, %v2636_v8  ;;  %v2499_v8 = vadd.f32 %v2657_v18, %v2693_v50 }
 0x339   : > { %1354 = vmatprep.mubr.f32.mxu0 %v2588_v46  ;;  %1638 = vmatprep.mubr.f32.mxu1 %v2588_v46 }
 0x33a   : > { %2446 = vmatprep.subr.msk.mxu1 %vm212_vm0, %v1025_v57 }
 0x33b   : > { %2433 = vmatmul.mubr.msk.f32.vlgmr.msra.gmra.mrb[8].mxu0 %vm1041_vm6, %v982_v51  ;;  %2445 = vmatmul.mubr.msk.f32.vlgmr.msra.gmra.mrb[6].mxu1 %vm1041_vm6, %v982_v51 }
 0x33c   : > { %2447 = vmatpush1.msk.msra.mxu1 %vm212_vm0, %v2651_v16  ;;  %1784 = vmatprep.mubr.f32.mxu1 %v2588_v46 }
 0x33d   : > { %2449 = vmatprep.subr.msk.mxu1 %vm212_vm0, %v1026_v58 }
 0x33f   : > { %2448 = vmatmul.mubr.msk.f32.vlgmr.msra.gmra.mrb[8].mxu1 %vm1041_vm6, %v1661_v59 }
 0x340   : > { %2450 = vmatpush1.msk.msra.mxu1 %vm212_vm0, %v2654_v17  ;;  %1855 = vmatprep.mubr.f32.mxu1 %v2588_v46 }
 0x341   : > { %2452 = vmatprep.subr.msk.mxu1 %vm212_vm0, %v1027_v60 }
 0x343   : > { %2451 = vmatmul.mubr.msk.f32.vlgmr.msra.gmra.mrb[10].mxu1 %vm1041_vm6, %v1661_v59 }
 0x344   : > { %2453 = vmatpush1.msk.msra.mxu1 %vm212_vm0, %v2661_v22  ;;  %1926 = vmatprep.mubr.f32.mxu1 %v2588_v46 }
 0x345   : > { %2455 = vmatprep.subr.msk.mxu1 %vm212_vm0, %v1028_v61 }
 0x347   : > { %2454 = vmatmul.mubr.msk.f32.vlgmr.msra.gmra.mrb[12].mxu1 %vm1041_vm6, %v1661_v59 }
 0x348   : > { %2456 = vmatpush1.msk.msra.mxu1 %vm212_vm0, %v2679_v36  ;;  %1997 = vmatprep.mubr.f32.mxu1 %v2588_v46 }
 0x349   : > { %2458 = vmatprep.subr.msk.mxu1 %vm212_vm0, %v2862_v62 }
 0x34b   : > { %2457 = vmatmul.mubr.msk.f32.vlgmr.msra.gmra.mrb[14].mxu1 %vm1041_vm6, %v1661_v59 }
 0x34c   : > { %2459 = vmatpush1.msk.msra.mxu1 %vm212_vm0, %v2693_v50  ;;  %2068 = vmatprep.mubr.f32.mxu1 %v2588_v46 }
 0x34d   : > { %2461 = vmatprep.subr.msk.mxu1 %vm212_vm0, %v2872_v63 }
 0x34f   : > { %2460 = vmatmul.mubr.msk.f32.vlgmr.msra.gmra.mrb[0].mxu1 %vm1041_vm6, %v1661_v59 }
 0x350   : > { %2462 = vmatpush1.msk.msra.mxu1 %vm212_vm0, %v2707_v3  ;;  %2139 = vmatprep.mubr.f32.mxu1 %v2588_v46 }
 0x351   : > { %2464 = vmatprep.subr.msk.mxu1 %vm212_vm0, %v2882_v4 }
 0x353   : > { %2463 = vmatmul.mubr.msk.f32.vlgmr.msra.gmra.mrb[2].mxu1 %vm1041_vm6, %v1661_v59 }
 0x354   : > { %2465 = vmatpush1.msk.msra.mxu1 %vm212_vm0, %v2718_v20  ;;  %2210 = vmatprep.mubr.f32.mxu1 %v2588_v46 }
 0x355   : > { %2467 = vmatprep.subr.msk.mxu1 %vm212_vm0, %v2892_v5 }
 0x357   : > { %2466 = vmatmul.mubr.msk.f32.vlgmr.msra.gmra.mrb[4].mxu1 %vm1041_vm6, %v1661_v59 }
 0x358   : > { %2468 = vmatpush1.msk.msra.mxu1 %vm212_vm0, %v2727_v34  ;;  %2281 = vmatprep.mubr.f32.mxu1 %v2588_v46 }
 0x35b   : > { %2469 = vmatmul.mubr.msk.f32.vlgmr.msra.gmra.mrb[6].mxu1 %vm1041_vm6, %v1661_v59 }
 0x402   : > { %v1143_v6 = vpop.f32.mrb[2].mxu0 }
 0x403   : > { %v1145_v7 = vpop.f32.mrb[3].mxu0  ;;  %v2476_v21 = vadd.f32 %v2475_v13, %v1143_v6  ;;  %v2509_v13 = vadd.f32 %v2882_v4, %v2789_v52 }
 0x404   : > { %v2479_v24 = vadd.f32 %v2478_v14, %v1145_v7  ;;  %v2503_v7 = vadd.f32 %v2668_v25, %v2707_v3 }
 0x406   : > { %v1214_v9 = vpop.f32.mrb[4].mxu0 }
 0x407   : > { %v1216_v10 = vpop.f32.mrb[5].mxu0  ;;  %v2482_v31 = vadd.f32 %v2481_v23, %v1214_v9 }
 0x408   : > { %v2485_v0 = vadd.f32 %v2484_v26, %v1216_v10  ;;  %v2505_v10 = vadd.f32 %v2872_v63, %v2767_v45  ;;  %v2511_v45 = vadd.f32 %v2700_v56, %v2727_v34 }
 0x40a   : > { %v1285_v11 = vpop.f32.mrb[6].mxu0 }
 0x40b   : > { %v1287_v12 = vpop.f32.mrb[7].mxu0  ;;  %v2488_v38 = vadd.f32 %v2487_v32, %v1285_v11 }
 0x40c   : > { %v2491_v22 = vadd.f32 %v2490_v1, %v1287_v12 }
 0x40e   : > { %v1356_v15 = vpop.f32.mrb[8].mxu0 }
 0x40f   : > { %v1358_v19 = vpop.f32.mrb[9].mxu0  ;;  %v2494_v48 = vadd.f32 %v2493_v2, %v1356_v15 }
 0x410   : > { %v2497_v49 = vadd.f32 %v2496_v39, %v1358_v19  ;;  %v2513_v19 = vadd.f32 %v2892_v5, %v2809_v54 }
 0x412   : > { %v1786_v27 = vpop.f32.mrb[8].mxu1 }
 0x413   : > { %v2477_v28 = vadd.f32 %v2476_v21, %v1786_v27  ;;  %v1788_v29 = vpop.f32.mrb[9].mxu1 }
 0x414   : > { %v2480_v30 = vadd.f32 %v2479_v24, %v1788_v29 }
 0x416   : > { %v2320_v16 = vcombine.low %v2477_v28, %v2480_v30  ;;  %v1857_v17 = vpop.f32.mrb[10].mxu1 }
 0x417   : > { %v2483_v33 = vadd.f32 %v2482_v31, %v1857_v17  ;;  %v1859_v35 = vpop.f32.mrb[11].mxu1 }
 0x418   : > { %2336 = vst [vmem:[%s2917_s20] sm:$0xff] %v2320_v16  ;;  %v2486_v37 = vadd.f32 %v2485_v0, %v1859_v35 }
 0x41a   : > { %v2321_v40 = vcombine.low %v2483_v33, %v2486_v37  ;;  %v1928_v41 = vpop.f32.mrb[12].mxu1 }
 0x41b   : > { %v2489_v44 = vadd.f32 %v2488_v38, %v1928_v41  ;;  %v1930_v46 = vpop.f32.mrb[13].mxu1 }
 0x41c   : > { %2337 = vst [vmem:[%s2917_s20 + $0x8] sm:$0xff] %v2321_v40  ;;  %v2492_v47 = vadd.f32 %v2491_v22, %v1930_v46 }
 0x41e   : > { %v2322_v51 = vcombine.low %v2489_v44, %v2492_v47  ;;  %v1999_v53 = vpop.f32.mrb[14].mxu1 }
 0x41f   : > { %v2495_v57 = vadd.f32 %v2494_v48, %v1999_v53  ;;  %v2001_v58 = vpop.f32.mrb[15].mxu1 }
 0x420   : > { %2338 = vst [vmem:[%s2917_s20 + $0x10] sm:$0xff] %v2322_v51  ;;  %v2498_v36 = vadd.f32 %v2497_v49, %v2001_v58 }
 0x422   : > { %v2323_v59 = vcombine.low %v2495_v57, %v2498_v36  ;;  %v2070_v60 = vpop.f32.mrb[0].mxu1 }
 0x423   : > { %v2500_v61 = vadd.f32 %v2499_v8, %v2070_v60  ;;  %v2072_v6 = vpop.f32.mrb[1].mxu1 }
 0x424   : > { %2339 = vst [vmem:[%s2917_s20 + $0x18] sm:$0xff] %v2323_v59  ;;  %v2502_v9 = vadd.f32 %v2501_v55, %v2072_v6 }
 0x426   : > { %v2324_v18 = vcombine.low %v2500_v61, %v2502_v9  ;;  %v2141_v50 = vpop.f32.mrb[2].mxu1 }
 0x427   : > { %v2504_v11 = vadd.f32 %v2503_v7, %v2141_v50  ;;  %v2143_v12 = vpop.f32.mrb[3].mxu1 }
 0x428   : > { %2340 = vst [vmem:[%s2917_s20 + $0x20] sm:$0xff] %v2324_v18  ;;  %v2506_v62 = vadd.f32 %v2505_v10, %v2143_v12 }
 0x42a   : > { %v2325_v25 = vcombine.low %v2504_v11, %v2506_v62  ;;  %v2212_v3 = vpop.f32.mrb[4].mxu1 }
 0x42b   : > { %v2508_v14 = vadd.f32 %v2507_v43, %v2212_v3  ;;  %v2214_v15 = vpop.f32.mrb[5].mxu1 }
 0x42c   : > { %2341 = vst [vmem:[%s2917_s20 + $0x28] sm:$0xff] %v2325_v25  ;;  %v2510_v63 = vadd.f32 %v2509_v13, %v2214_v15 }
 0x42e   : > { %v2326_v42 = vcombine.low %v2508_v14, %v2510_v63  ;;  %v2283_v20 = vpop.f32.mrb[6].mxu1 }
 0x42f   : > { %v2512_v21 = vadd.f32 %v2511_v45, %v2283_v20  ;;  %v2285_v23 = vpop.f32.mrb[7].mxu1 }
 0x430   : > { %2342 = vst [vmem:[%s2917_s20 + $0x30] sm:$0xff] %v2326_v42  ;;  %v2514_v24 = vadd.f32 %v2513_v19, %v2285_v23 }
 0x432   : > { %v2327_v52 = vcombine.low %v2512_v21, %v2514_v24 }
 0x434   : > { %2343 = vst [vmem:[%s2917_s20 + $0x38] sm:$0xff] %v2327_v52 }
 0x435 PF: > { %s12_s9 = sadd.s32 1, %s2585_s9  }
 0x436   : > { %p9_p4 = scmp.ge.s32.totalorder %s12_s9, 4  }
 0x438   :  { %11 = sbr.rel (!%p9_p4) target bundleno = 1 (0x1), region = 61 }

// kernel: afnet_forward.9
= control target key start
LH: loop header
LB: loop body
LE: loop exit
PB: predicated region body
PF: predicated region fallthrough
CT: control target
= control target key end

     0   :  { %s4355_s0 = inlined_call_operand.vmem [shape: bf16[32,18432], index: 0, kind: input, shape index: {}]   ;;  %s4356_s1 = inlined_call_operand.hbm [shape: bf16[18432,512], index: 1, kind: input, shape index: {}]   ;;  %s4357_s2 = inlined_call_operand.vmem [shape: f32[1,512], index: 2, kind: input, shape index: {}]   ;;  %s4358_s3 = inlined_call_operand.vmem [shape: f32[32,512], index: 3, kind: output, shape index: {}]  }
   0x1   :  { %4362 = sst [smem:[#allocation12_spill]] %s4355_s0 }
   0x2   :  { %8 = vsyncpa [#allocation5], 0 }
   0x3   :  { %10 = vsyncpa [#allocation5 + $0x1], 0  ;;  %s3709_s12 = smov 0   ;;  %s3711_s13 = smov 0  }
   0x4   :  { %s3713_s14 = smov 0   ;;  %s3715_s15 = smov 0  }
   0x5   :  { %s3717_s16 = smov 0   ;;  %s3719_s17 = smov 0  }
   0x6   :  { %s3721_s18 = smov 0   ;;  %s3723_s19 = smov 0  }
   0x7   :  { %s3725_s20 = smov 0   ;;  %s3727_s21 = smov 0  }
   0x8   :  { %s3729_s22 = smov 0   ;;  %s3731_s23 = smov 0  }
   0x9 LB: > { %4363 = sst [smem:[#allocation8_spill]] %s3678_s22  ;;  %s2699_s24 = sadd.s32 4294967295, %s3682_s23   ;;  %s3682_s23 = sphi %s3731_s23, %s16_s23   ;;  %s3678_s22 = sphi %s3729_s22, %s4376_s22   ;;  %s3674_s21 = sphi %s3727_s21, %s4386_s21   ;;  %s3670_s20 = sphi %s3725_s20, %s4385_s20   ;;  %s3666_s19 = sphi %s3723_s19, %s4384_s19   ;;  %s3662_s18 = sphi %s3721_s18, %s4383_s18   ;;  %s3658_s17 = sphi %s3719_s17, %s4382_s17   ;;  %s3654_s16 = sphi %s3717_s16, %s4381_s16   ;;  %s3650_s15 = sphi %s3715_s15, %s4380_s15   ;;  %s3646_s14 = sphi %s3713_s14, %s4379_s14   ;;  %s3642_s13 = sphi %s3711_s13, %s4378_s13   ;;  %s3638_s12 = sphi %s3709_s12, %s4377_s12  }
   0xa   : > { %s25_s25 = sadd.s32 1, %s3674_s21  ;;  %s28_s26 = sadd.s32 1, %s3678_s22 }
   0xb   : > { %p26_p0 = scmp.ge.s32.totalorder %s25_s25, 9  ;;  %s35_s27 = sadd.s32 1, %s3662_s18 }
   0xc   : > { %p42_p1 = scmp.ne.s32.totalorder %s3662_s18, %s3658_s17  ;;  %p43_p2 = scmp.eq.s32.totalorder %s3682_s23, 0 }
   0xd   : > { %s4388_s25 = smov (%p26_p0, %s25_s25), 0  ;;  %s4390_s26 = smov (!%p26_p0, %s28_s26), %s3678_s22 }
   0xe   : > { %4364 = sst [smem:[#allocation9_spill]] %s4388_s25  ;;  %s32_s28 = ssub.s32 %s3674_s21, %s4388_s25 }
   0xf   : > { %p30_p3 = scmp.ge.s32.totalorder %s4390_s26, 2  ;;  %p33_p4 = scmp.eq.s32.totalorder %s32_s28, 0 }
  0x10   : > { %p3781_p5 = por %p43_p2, %p42_p1  ;;  %s63_s30 = sadd.s32 1, %s3654_s16 }
  0x11   : > { %s4392_s26 = smov (%p30_p3, %s4390_s26), 0  ;;  %p70_p6 = scmp.ne.s32.totalorder %s3654_s16, %s3650_s15 }
  0x12   : > { %4366 = sst [smem:[#allocation10_spill]] %s4392_s26  ;;  %s59_s5 = ssub.s32 %s3678_s22, %s4392_s26 }
  0x13   : > { %s3789_s4 = scalar_select %p33_p4, %s3662_s18, %s35_s27  }
  0x14   : > { %s60_s6 = sor.u32 %s59_s5, %s32_s28  ;;  %p76_p7 = scmp.ne.s32.totalorder %s3650_s15, %s3646_s14 }
  0x15   : > { %4367 = sst [smem:[#allocation11_spill]] %s3789_s4  ;;  %p61_p8 = scmp.eq.s32.totalorder %s60_s6, 0 }
  0x16   : > { %p3797_p9 = por %p70_p6, %p43_p2  ;;  %p77_p10 = scmp.eq.s32.totalorder %s2699_s24, 0 }
  0x17   : > { %p113_p11 = scmp.eq.s32.totalorder %s59_s5, 0  ;;  %s115_s10 = sadd.s32 1, %s3642_s13 }
  0x18   : > { %s3804_s8 = scalar_select %p61_p8, %s3654_s16, %s63_s30  }
  0x19   : > { %p3806_p12 = por %p77_p10, %p76_p7  ;;  %p125_p13 = scmp.ne.s32.totalorder %s3642_s13, %s3638_s12 }
  0x1a   : > { %s3812_s11 = scalar_select %p113_p11, %s3642_s13, %s115_s10  }
  0x1b   : > { %p126_p0 = scmp.eq.s32.totalorder %s2699_s24, 17  ;;  %p2702_p2 = scmp.ge.s32.totalorder %s3682_s23, 18 }
  0x1d   : > { %p3818_p1 = por %p126_p0, %p125_p13  ;;  %148 = sbr.rel (%p2702_p2) target bundleno = 91 (0x5b), region = 16 }
  0x1f   : > { %s4370_s14 = scalar_select %p3818_p1, 1, 0 }
  0x24   : > { %151 = sbr.rel (!%p3781_p5) target bundleno = 62 (0x3e), region = 20  ;;  %s153_s27 = sand.u32 (%p3781_p5), 1, %s3662_s18  }
  0x25   : > { %s3011_s28 = sshll.u32 (%p3781_p5), %s3674_s21, 6  ;;  %s2703_s30 = sshll.u32 (%p3781_p5), %s153_s27, 8 }
  0x26   : > { %s4371_s0 = sld [smem:[#allocation12_spill]] (%p3781_p5)  ;;  %s3835_s24 = scalar_lea.vmem (%p3781_p5), [#allocation3], %s2703_s30 }
  0x2c   : > { %s3830_s10 = scalar_lea.vmem %s4371_s0, %s3011_s28 }
  0x2d   : > { %v171_v0 = vld [vmem:[%s3830_s10] sm:$0xff]  ;;  %v173_v1 = vld [vmem:[%s3830_s10 + $0x8] sm:$0xff]  ;;  %v175_v2 = vld [vmem:[%s3830_s10 + $0x10] sm:$0xff] }
  0x2e   : > { %172 = vst [vmem:[%s3835_s24] sm:$0xff] %v171_v0  ;;  %174 = vst [vmem:[%s3835_s24 + $0x8] sm:$0xff] %v173_v1  ;;  %v177_v3 = vld [vmem:[%s3830_s10 + $0x18] sm:$0xff]  ;;  %v179_v4 = vld [vmem:[%s3830_s10 + $0x20] sm:$0xff] }
  0x2f   : > { %176 = vst [vmem:[%s3835_s24 + $0x10] sm:$0xff] %v175_v2  ;;  %v181_v5 = vld [vmem:[%s3830_s10 + $0x28] sm:$0xff]  ;;  %178 = vst [vmem:[%s3835_s24 + $0x18] sm:$0xff] %v177_v3  ;;  %v183_v6 = vld [vmem:[%s3830_s10 + $0x30] sm:$0xff] }
  0x30   : > { %180 = vst [vmem:[%s3835_s24 + $0x20] sm:$0xff] %v179_v4  ;;  %182 = vst [vmem:[%s3835_s24 + $0x28] sm:$0xff] %v181_v5  ;;  %v185_v7 = vld [vmem:[%s3830_s10 + $0x38] sm:$0xff]  ;;  %v187_v8 = vld [vmem:[%s3830_s10 + $0x240] sm:$0xff] }
  0x31   : > { %184 = vst [vmem:[%s3835_s24 + $0x30] sm:$0xff] %v183_v6  ;;  %186 = vst [vmem:[%s3835_s24 + $0x38] sm:$0xff] %v185_v7  ;;  %v189_v9 = vld [vmem:[%s3830_s10 + $0x248] sm:$0xff]  ;;  %v191_v10 = vld [vmem:[%s3830_s10 + $0x250] sm:$0xff] }
  0x32   : > { %188 = vst [vmem:[%s3835_s24 + $0x40] sm:$0xff] %v187_v8  ;;  %v193_v11 = vld [vmem:[%s3830_s10 + $0x258] sm:$0xff]  ;;  %190 = vst [vmem:[%s3835_s24 + $0x48] sm:$0xff] %v189_v9  ;;  %v195_v12 = vld [vmem:[%s3830_s10 + $0x260] sm:$0xff] }
  0x33   : > { %192 = vst [vmem:[%s3835_s24 + $0x50] sm:$0xff] %v191_v10  ;;  %194 = vst [vmem:[%s3835_s24 + $0x58] sm:$0xff] %v193_v11  ;;  %v197_v13 = vld [vmem:[%s3830_s10 + $0x268] sm:$0xff]  ;;  %v199_v14 = vld [vmem:[%s3830_s10 + $0x270] sm:$0xff] }
  0x34   : > { %196 = vst [vmem:[%s3835_s24 + $0x60] sm:$0xff] %v195_v12  ;;  %198 = vst [vmem:[%s3835_s24 + $0x68] sm:$0xff] %v197_v13  ;;  %v201_v15 = vld [vmem:[%s3830_s10 + $0x278] sm:$0xff]  ;;  %v203_v16 = vld [vmem:[%s3830_s10 + $0x480] sm:$0xff] }
  0x35   : > { %200 = vst [vmem:[%s3835_s24 + $0x70] sm:$0xff] %v199_v14  ;;  %v205_v17 = vld [vmem:[%s3830_s10 + $0x488] sm:$0xff]  ;;  %202 = vst [vmem:[%s3835_s24 + $0x78] sm:$0xff] %v201_v15  ;;  %v207_v18 = vld [vmem:[%s3830_s10 + $0x490] sm:$0xff] }
  0x36   : > { %204 = vst [vmem:[%s3835_s24 + $0x80] sm:$0xff] %v203_v16  ;;  %206 = vst [vmem:[%s3835_s24 + $0x88] sm:$0xff] %v205_v17  ;;  %v209_v19 = vld [vmem:[%s3830_s10 + $0x498] sm:$0xff]  ;;  %v211_v20 = vld [vmem:[%s3830_s10 + $0x4a0] sm:$0xff] }
  0x37   : > { %208 = vst [vmem:[%s3835_s24 + $0x90] sm:$0xff] %v207_v18  ;;  %210 = vst [vmem:[%s3835_s24 + $0x98] sm:$0xff] %v209_v19  ;;  %v213_v21 = vld [vmem:[%s3830_s10 + $0x4a8] sm:$0xff]  ;;  %v215_v22 = vld [vmem:[%s3830_s10 + $0x4b0] sm:$0xff] }
  0x38   : > { %212 = vst [vmem:[%s3835_s24 + $0xa0] sm:$0xff] %v211_v20  ;;  %v217_v23 = vld [vmem:[%s3830_s10 + $0x4b8] sm:$0xff]  ;;  %214 = vst [vmem:[%s3835_s24 + $0xa8] sm:$0xff] %v213_v21  ;;  %v219_v24 = vld [vmem:[%s3830_s10 + $0x6c0] sm:$0xff] }
  0x39   : > { %216 = vst [vmem:[%s3835_s24 + $0xb0] sm:$0xff] %v215_v22  ;;  %218 = vst [vmem:[%s3835_s24 + $0xb8] sm:$0xff] %v217_v23  ;;  %v221_v25 = vld [vmem:[%s3830_s10 + $0x6c8] sm:$0xff]  ;;  %v223_v26 = vld [vmem:[%s3830_s10 + $0x6d0] sm:$0xff] }
  0x3a   : > { %220 = vst [vmem:[%s3835_s24 + $0xc0] sm:$0xff] %v219_v24  ;;  %222 = vst [vmem:[%s3835_s24 + $0xc8] sm:$0xff] %v221_v25  ;;  %v225_v27 = vld [vmem:[%s3830_s10 + $0x6d8] sm:$0xff]  ;;  %v227_v28 = vld [vmem:[%s3830_s10 + $0x6e0] sm:$0xff] }
  0x3b   : > { %224 = vst [vmem:[%s3835_s24 + $0xd0] sm:$0xff] %v223_v26  ;;  %v229_v29 = vld [vmem:[%s3830_s10 + $0x6e8] sm:$0xff]  ;;  %226 = vst [vmem:[%s3835_s24 + $0xd8] sm:$0xff] %v225_v27  ;;  %v231_v30 = vld [vmem:[%s3830_s10 + $0x6f0] sm:$0xff] }
  0x3c   : > { %228 = vst [vmem:[%s3835_s24 + $0xe0] sm:$0xff] %v227_v28  ;;  %230 = vst [vmem:[%s3835_s24 + $0xe8] sm:$0xff] %v229_v29  ;;  %v233_v31 = vld [vmem:[%s3830_s10 + $0x6f8] sm:$0xff] }
  0x3d   : > { %232 = vst [vmem:[%s3835_s24 + $0xf0] sm:$0xff] %v231_v30  ;;  %234 = vst [vmem:[%s3835_s24 + $0xf8] sm:$0xff] %v233_v31 }
  0x3e PF: > { %s241_s29 = sand.u32 1, %s3654_s16   ;;  %s2708_s27 = sshll.u32 %s3678_s22, 1 }
  0x3f   : > { %s2706_s28 = sshll.u32 %s241_s29, 11  ;;  %s3012_s30 = sshll.u32 %s3674_s21, 10 }
  0x40   : > { %s252_s5 = sadd.s32 %s3012_s30, %s2708_s27  ;;  %s245_s6 = scalar_lea.vmem [#allocation4], %s2706_s28 }
  0x41   : > { %s255_s0 = sshll.u32 %s245_s6, 4  ;;  %s2710_s26 = sshll.u32 %s252_s5, 6  ;;  %s3901_s0 = int_to_ptr.vmem [resolvable:$true] %s255_s0 }
  0x42   : > { %s3906_s10 = scalar_lea.hbm %s4356_s1, %s2710_s26  ;;  %s3908_s24 = scalar_lea.sflag [#allocation5], %s241_s29 }
  0x43   : > { %s3556_s22 = scalar_lea.hbm %s3906_s10, 32768  ;;  %s3560_s30 = scalar_lea.hbm %s4356_s1, 589824 }
  0x44   : > { %p3557_p3 = scmp.ne.s32.totalorder %s3906_s10, %s3556_s22  ;;  %p3561_p6 = scmp.lt.u32.totalorder %s3906_s10, %s4356_s1 }
  0x45   : > { %p3562_p7 = scmp.lt.u32.totalorder %s3560_s30, %s3556_s22  ;;  %p3564_p10 = scmp.lt.u32.totalorder %s3556_s22, %s3906_s10 }
  0x46   : > { %p3558_p4 = pnand %p3557_p3, %p3797_p9 }
  0x47   : > { %p3563_p8 = por %p3562_p7, %p3561_p6 }
  0x48   : > { %p3559_p5 = pneg %p3558_p4 }
  0x49   : > { %p3565_p11 = por %p3564_p10, %p3563_p8 }
  0x4b   : > { %p3566_p13 = pnand %p3565_p11, %p3559_p5 }
  0x4d   : > { %3569 = shalt.err (!%p3566_p13)
}
  0x4e   : > { %s3570_s25 = scalar_lea.vmem %s3901_s0, 32768  ;;  %s3684_s26 = smov [#allocation4]  }
  0x4f   : > { %p3571_p0 = scmp.ne.s32.totalorder %s3901_s0, %s3570_s25  ;;  %s3574_s4 = sshll.u32 %s3684_s26, 4  ;;  %s3575_s4 = int_to_ptr.vmem [resolvable:$false] %s3574_s4 }
  0x50   : > { %s3576_s29 = scalar_lea.vmem %s3575_s4, 65536  ;;  %p3577_p4 = scmp.lt.s32.totalorder %s3901_s0, %s3575_s4 }
  0x51   : > { %p3572_p2 = pnand %p3571_p0, %p3797_p9  ;;  %p3578_p1 = scmp.lt.s32.totalorder %s3576_s29, %s3570_s25 }
  0x53   : > { %p3573_p3 = pneg %p3572_p2  ;;  %p3579_p6 = por %p3578_p1, %p3577_p4 }
  0x55   : > { %p3580_p7 = pnand %p3579_p6, %p3573_p3 }
  0x57   : > { %3583 = shalt.err (!%p3580_p7)
}
  0x58   : > { %s3685_s22 = smov 256   ;;  %s3686_s27 = smov 128  }
  0x59   : > { %s3687_s28 = smov 8  }
  0x5a   : > { %3070 = dma.hbm_to_vmem [thread:$0]  (%p3797_p9), %s3906_s10, 32768, %s3901_s0, %s3908_s24, %s3685_s22, %s3686_s27, %s3687_s28  }
  0x5b PF: > { %p2711_p5 = scmp.ge.s32.totalorder %s3682_s23, 1  ;;  %p271_p8 = scmp.lt.s32.totalorder %s3682_s23, 19 }
  0x5d   : > { %p272_p10 = pnand %p2711_p5, %p271_p8 }
  0x5e   : > { %s278_s30 = sand.u32 (!%p272_p10), 1, %s3658_s17   ;;  %s284_s5 = sand.u32 (!%p272_p10), 1, %s3650_s15  }
  0x5f   : > { %275 = sbr.rel (%p272_p10) target bundleno = 619 (0x26b), region = 51  ;;  %s2712_s6 = sshll.u32 (!%p272_p10), %s278_s30, 8 }
  0x60   : > { %s2713_s25 = sshll.u32 (!%p272_p10), %s284_s5, 11  ;;  %s3936_s26 = scalar_lea.vmem (!%p272_p10), [#allocation3], %s2712_s6 }
  0x61   : > { %s285_s4 = scalar_lea.sflag (!%p272_p10), [#allocation5], %s284_s5  ;;  %s3938_s29 = scalar_lea.vmem (!%p272_p10), [#allocation4], %s2713_s25 }
  0x66   : > { %3633 = dma.done.wait (%p3806_p12), %s285_s4, 32768  }
  0x67   : > { %3635 = vsyncadd (%p3806_p12), %s285_s4, 4294934528  ;;  %s315_s0 = sand.u32 1, %s3638_s12   ;;  %s2715_s7 = sshll.u32 %s3670_s20, 1 }
  0x68   : > { %s2714_s10 = sshll.u32 %s315_s0, 6  ;;  %p322_p9 = scmp.lt.s32.totalorder %s2715_s7, 3 }
  0x69   : > { %s3952_s27 = scalar_lea.vmem [#allocation6], %s2714_s10  ;;  %p2716_p1 = scmp.ne.s32.totalorder %s3666_s19, 0 }
  0x6a   : > { %s4394_s7 = smov (!%p322_p9, %s2715_s7), 3  ;;  %v3688_v32 = vmov (!%p2716_p1), 0.0  }
  0x6b   : > { %s324_s22 = scalar_lea.vmem %s4357_s2, %s4394_s7  ;;  %330 = sbr.rel (%p2716_p1) target bundleno = 114 (0x72), region = 63  ;;  %331 = vst [vmem:[#allocation2] sm:$0xff] (!%p2716_p1), %v3688_v32  ;;  %332 = vst [vmem:[#allocation2 + $0x8] sm:$0xff] (!%p2716_p1), %v3688_v32 }
  0x6c   : > { %333 = vst [vmem:[#allocation2 + $0x10] sm:$0xff] (!%p2716_p1), %v3688_v32  ;;  %334 = vst [vmem:[#allocation2 + $0x18] sm:$0xff] (!%p2716_p1), %v3688_v32 }
  0x6d   : > { %335 = vst [vmem:[#allocation2 + $0x20] sm:$0xff] (!%p2716_p1), %v3688_v32  ;;  %336 = vst [vmem:[#allocation2 + $0x28] sm:$0xff] (!%p2716_p1), %v3688_v32 }
  0x6e   : > { %337 = vst [vmem:[#allocation2 + $0x30] sm:$0xff] (!%p2716_p1), %v3688_v32  ;;  %338 = vst [vmem:[#allocation2 + $0x38] sm:$0xff] (!%p2716_p1), %v3688_v32 }
  0x72 PF: > { %v3172_v33 = vld [vmem:[%s3938_s29 + $0x4] ss:$8 sps:$4 sm:$0xff]   ;;  %v3176_v35 = vld [vmem:[%s3938_s29] ss:$8 sps:$4 sm:$0xff]   ;;  %v3178_v37 = vld [vmem:[%s3938_s29 + $0x14] ss:$8 sps:$4 sm:$0xff]  }
  0x73   : > { %v3174_v34 = vld [vmem:[%s3938_s29 + $0x404] ss:$8 sps:$4 sm:$0xff]   ;;  %2075 = vmatprep.subr.bf16.mxu1 %v3172_v33  ;;  %v3177_v36 = vld [vmem:[%s3938_s29 + $0x400] ss:$8 sps:$4 sm:$0xff]   ;;  %v3180_v38 = vld [vmem:[%s3938_s29 + $0x414] ss:$8 sps:$4 sm:$0xff]  }
  0x74   : > { %2287 = vmatprep.subr.bf16.mxu0 %v3174_v34  ;;  %2076 = vmatpush1.bf16.msra.mxu1 %v3176_v35  ;;  %v3182_v39 = vld [vmem:[%s3938_s29 + $0x10] ss:$8 sps:$4 sm:$0xff]   ;;  %v3184_v41 = vld [vmem:[%s3938_s29 + $0x24] ss:$8 sps:$4 sm:$0xff]   ;;  %v3188_v43 = vld [vmem:[%s3938_s29 + $0x20] ss:$8 sps:$4 sm:$0xff]  }
  0x75   : > { %2288 = vmatpush1.bf16.msra.mxu0 %v3177_v36  ;;  %2077 = vmatprep.subr.bf16.mxu1 %v3178_v37  ;;  %v3183_v40 = vld [vmem:[%s3938_s29 + $0x410] ss:$8 sps:$4 sm:$0xff]   ;;  %v3186_v42 = vld [vmem:[%s3938_s29 + $0x424] ss:$8 sps:$4 sm:$0xff]   ;;  %v3189_v44 = vld [vmem:[%s3938_s29 + $0x420] ss:$8 sps:$4 sm:$0xff]  }
  0x76   : > { %2289 = vmatprep.subr.bf16.mxu0 %v3180_v38  ;;  %v3190_v45 = vld [vmem:[%s3938_s29 + $0x34] ss:$8 sps:$4 sm:$0xff]   ;;  %v3194_v47 = vld [vmem:[%s3938_s29 + $0x30] ss:$8 sps:$4 sm:$0xff]   ;;  %v3196_v49 = vld [vmem:[%s3938_s29 + $0x44] ss:$8 sps:$4 sm:$0xff]  }
  0x77   : > { %v3192_v46 = vld [vmem:[%s3938_s29 + $0x434] ss:$8 sps:$4 sm:$0xff]   ;;  %v3195_v48 = vld [vmem:[%s3938_s29 + $0x430] ss:$8 sps:$4 sm:$0xff]   ;;  %v3198_v50 = vld [vmem:[%s3938_s29 + $0x444] ss:$8 sps:$4 sm:$0xff]  }
  0x78   : > { %2078 = vmatpush1.bf16.msra.mxu1 %v3182_v39  ;;  %v3200_v51 = vld [vmem:[%s3938_s29 + $0x40] ss:$8 sps:$4 sm:$0xff]   ;;  %v3202_v53 = vld [vmem:[%s3938_s29 + $0x54] ss:$8 sps:$4 sm:$0xff]   ;;  %v3206_v55 = vld [vmem:[%s3938_s29 + $0x50] ss:$8 sps:$4 sm:$0xff]  }
  0x79   : > { %2290 = vmatpush1.bf16.msra.mxu0 %v3183_v40  ;;  %2079 = vmatprep.subr.bf16.mxu1 %v3184_v41  ;;  %v3201_v52 = vld [vmem:[%s3938_s29 + $0x440] ss:$8 sps:$4 sm:$0xff]   ;;  %v3204_v54 = vld [vmem:[%s3938_s29 + $0x454] ss:$8 sps:$4 sm:$0xff]   ;;  %v3207_v56 = vld [vmem:[%s3938_s29 + $0x450] ss:$8 sps:$4 sm:$0xff]  }
  0x7a   : > { %2291 = vmatprep.subr.bf16.mxu0 %v3186_v42  ;;  %v3208_v57 = vld [vmem:[%s3938_s29 + $0x64] ss:$8 sps:$4 sm:$0xff]   ;;  %v3212_v59 = vld [vmem:[%s3938_s29 + $0x60] ss:$8 sps:$4 sm:$0xff]   ;;  %v3214_v61 = vld [vmem:[%s3938_s29 + $0x74] ss:$8 sps:$4 sm:$0xff]  }
  0x7b   : > { %v3210_v58 = vld [vmem:[%s3938_s29 + $0x464] ss:$8 sps:$4 sm:$0xff]   ;;  %v3213_v60 = vld [vmem:[%s3938_s29 + $0x460] ss:$8 sps:$4 sm:$0xff]   ;;  %v3216_v62 = vld [vmem:[%s3938_s29 + $0x474] ss:$8 sps:$4 sm:$0xff]  }
  0x7c   : > { %2080 = vmatpush1.bf16.msra.mxu1 %v3188_v43  ;;  %v3218_v63 = vld [vmem:[%s3938_s29 + $0x70] ss:$8 sps:$4 sm:$0xff]   ;;  %v3220_v1 = vld [vmem:[%s3938_s29 + $0x84] ss:$8 sps:$4 sm:$0xff]   ;;  %v3224_v3 = vld [vmem:[%s3938_s29 + $0x80] ss:$8 sps:$4 sm:$0xff]  }
  0x7d   : > { %2292 = vmatpush1.bf16.msra.mxu0 %v3189_v44  ;;  %2081 = vmatprep.subr.bf16.mxu1 %v3190_v45  ;;  %v3219_v0 = vld [vmem:[%s3938_s29 + $0x470] ss:$8 sps:$4 sm:$0xff]   ;;  %v3222_v2 = vld [vmem:[%s3938_s29 + $0x484] ss:$8 sps:$4 sm:$0xff]   ;;  %v3225_v4 = vld [vmem:[%s3938_s29 + $0x480] ss:$8 sps:$4 sm:$0xff]  }
  0x7e   : > { %2293 = vmatprep.subr.bf16.mxu0 %v3192_v46  ;;  %v3226_v5 = vld [vmem:[%s3938_s29 + $0x94] ss:$8 sps:$4 sm:$0xff]   ;;  %v3230_v7 = vld [vmem:[%s3938_s29 + $0x90] ss:$8 sps:$4 sm:$0xff]   ;;  %v3232_v9 = vld [vmem:[%s3938_s29 + $0xa4] ss:$8 sps:$4 sm:$0xff]  }
  0x7f   : > { %v3228_v6 = vld [vmem:[%s3938_s29 + $0x494] ss:$8 sps:$4 sm:$0xff]   ;;  %v3231_v8 = vld [vmem:[%s3938_s29 + $0x490] ss:$8 sps:$4 sm:$0xff]   ;;  %v3234_v10 = vld [vmem:[%s3938_s29 + $0x4a4] ss:$8 sps:$4 sm:$0xff]  }
  0x80   : > { %2082 = vmatpush1.bf16.msra.mxu1 %v3194_v47  ;;  %v3236_v11 = vld [vmem:[%s3938_s29 + $0xa0] ss:$8 sps:$4 sm:$0xff]   ;;  %v3238_v13 = vld [vmem:[%s3938_s29 + $0xb4] ss:$8 sps:$4 sm:$0xff]   ;;  %v3242_v15 = vld [vmem:[%s3938_s29 + $0xb0] ss:$8 sps:$4 sm:$0xff]  }
  0x81   : > { %2294 = vmatpush1.bf16.msra.mxu0 %v3195_v48  ;;  %2083 = vmatprep.subr.bf16.mxu1 %v3196_v49  ;;  %v3237_v12 = vld [vmem:[%s3938_s29 + $0x4a0] ss:$8 sps:$4 sm:$0xff]   ;;  %v3240_v14 = vld [vmem:[%s3938_s29 + $0x4b4] ss:$8 sps:$4 sm:$0xff]   ;;  %v3243_v16 = vld [vmem:[%s3938_s29 + $0x4b0] ss:$8 sps:$4 sm:$0xff]  }
  0x82   : > { %2295 = vmatprep.subr.bf16.mxu0 %v3198_v50  ;;  %v347_v17 = vld [vmem:[%s3936_s26] sm:$0xff]  ;;  %v3250_v27 = vld [vmem:[%s3938_s29 + $0xd4] ss:$8 sps:$4 sm:$0xff]   ;;  %v3254_v29 = vld [vmem:[%s3938_s29 + $0xd0] ss:$8 sps:$4 sm:$0xff]   ;;  %p3005_p12 = scmp.ne.s32.totalorder %s3666_s19, 8 }
  0x83   : > { %v355_v18 = vld [vmem:[%s3936_s26 + $0x40] sm:$0xff]  ;;  %v3252_v28 = vld [vmem:[%s3938_s29 + $0x4d4] ss:$8 sps:$4 sm:$0xff]   ;;  %v3255_v30 = vld [vmem:[%s3938_s29 + $0x4d0] ss:$8 sps:$4 sm:$0xff]  }
  0x84   : > { %2084 = vmatpush1.bf16.msra.mxu1 %v3200_v51  ;;  %v3244_v19 = vld [vmem:[%s3938_s29 + $0xc4] ss:$8 sps:$4 sm:$0xff]   ;;  %v2718_v21 = vcombine.high %v347_v17, %v355_v18  ;;  %v3248_v25 = vld [vmem:[%s3938_s29 + $0xc0] ss:$8 sps:$4 sm:$0xff]   ;;  %v3262_v35 = vld [vmem:[%s3938_s29 + $0xf4] ss:$8 sps:$4 sm:$0xff]   ;;  %v2717_v41 = vcombine.low %v347_v17, %v355_v18 }
  0x85   : > { %2296 = vmatpush1.bf16.msra.mxu0 %v3201_v52  ;;  %2085 = vmatprep.subr.bf16.mxu1 %v3202_v53  ;;  %v3246_v20 = vld [vmem:[%s3938_s29 + $0x4c4] ss:$8 sps:$4 sm:$0xff]   ;;  %v3249_v26 = vld [vmem:[%s3938_s29 + $0x4c0] ss:$8 sps:$4 sm:$0xff]   ;;  %v3264_v36 = vld [vmem:[%s3938_s29 + $0x4f4] ss:$8 sps:$4 sm:$0xff]  }
  0x86   : > { %2297 = vmatprep.subr.bf16.mxu0 %v3204_v54  ;;  %v351_v22 = vld [vmem:[%s3936_s26 + $0x20] sm:$0xff]  ;;  %2107 = vmatprep.mubr.bf16.mxu1 %v2718_v21  ;;  %v3266_v37 = vld [vmem:[%s3938_s29 + $0xf0] ss:$8 sps:$4 sm:$0xff]   ;;  %v3276_v45 = vld [vmem:[%s3938_s29 + $0x114] ss:$8 sps:$4 sm:$0xff]  }
  0x87   : > { %v359_v23 = vld [vmem:[%s3936_s26 + $0x60] sm:$0xff]  ;;  %v3267_v38 = vld [vmem:[%s3938_s29 + $0x4f0] ss:$8 sps:$4 sm:$0xff]   ;;  %v3279_v46 = vld [vmem:[%s3938_s29 + $0x514] ss:$8 sps:$4 sm:$0xff]  }
  0x88   : > { %2086 = vmatpush1.bf16.msra.mxu1 %v3206_v55  ;;  %v2726_v24 = vcombine.high %v351_v22, %v359_v23  ;;  %v3256_v31 = vld [vmem:[%s3938_s29 + $0xe4] ss:$8 sps:$4 sm:$0xff]   ;;  %v3260_v33 = vld [vmem:[%s3938_s29 + $0xe0] ss:$8 sps:$4 sm:$0xff]   ;;  %v2725_v43 = vcombine.low %v351_v22, %v359_v23  ;;  %v3274_v47 = vld [vmem:[%s3938_s29 + $0x110] ss:$8 sps:$4 sm:$0xff]  }
  0x89   : > { %2298 = vmatpush1.bf16.msra.mxu0 %v3207_v56  ;;  %2087 = vmatprep.subr.bf16.mxu1 %v3208_v57  ;;  %v3258_v32 = vld [vmem:[%s3938_s29 + $0x4e4] ss:$8 sps:$4 sm:$0xff]   ;;  %v3261_v34 = vld [vmem:[%s3938_s29 + $0x4e0] ss:$8 sps:$4 sm:$0xff]   ;;  %v3277_v48 = vld [vmem:[%s3938_s29 + $0x510] ss:$8 sps:$4 sm:$0xff]  }
  0x8a   : > { %2299 = vmatprep.subr.bf16.mxu0 %v3210_v58  ;;  %2319 = vmatprep.mubr.bf16.mxu0 %v2726_v24  ;;  %v3270_v39 = vld [vmem:[%s3938_s29 + $0x104] ss:$8 sps:$4 sm:$0xff]   ;;  %v3268_v42 = vld [vmem:[%s3938_s29 + $0x100] ss:$8 sps:$4 sm:$0xff]   ;;  %v3288_v53 = vld [vmem:[%s3938_s29 + $0x134] ss:$8 sps:$4 sm:$0xff]  }
  0x8b   : > { %v3273_v40 = vld [vmem:[%s3938_s29 + $0x504] ss:$8 sps:$4 sm:$0xff]   ;;  %v3271_v44 = vld [vmem:[%s3938_s29 + $0x500] ss:$8 sps:$4 sm:$0xff]   ;;  %v3291_v54 = vld [vmem:[%s3938_s29 + $0x534] ss:$8 sps:$4 sm:$0xff]  }
  0x8c   : > { %2088 = vmatpush1.bf16.msra.mxu1 %v3212_v59  ;;  %v3282_v49 = vld [vmem:[%s3938_s29 + $0x124] ss:$8 sps:$4 sm:$0xff]   ;;  %v3280_v51 = vld [vmem:[%s3938_s29 + $0x120] ss:$8 sps:$4 sm:$0xff]   ;;  %v3286_v55 = vld [vmem:[%s3938_s29 + $0x130] ss:$8 sps:$4 sm:$0xff]  }
  0x8d   : > { %2300 = vmatpush1.bf16.msra.mxu0 %v3213_v60  ;;  %2089 = vmatprep.subr.bf16.mxu1 %v3214_v61  ;;  %v3285_v50 = vld [vmem:[%s3938_s29 + $0x524] ss:$8 sps:$4 sm:$0xff]   ;;  %v3283_v52 = vld [vmem:[%s3938_s29 + $0x520] ss:$8 sps:$4 sm:$0xff]   ;;  %v3289_v56 = vld [vmem:[%s3938_s29 + $0x530] ss:$8 sps:$4 sm:$0xff]  }
  0x8e   : > { %2301 = vmatprep.subr.bf16.mxu0 %v3216_v62  ;;  %v3294_v57 = vld [vmem:[%s3938_s29 + $0x144] ss:$8 sps:$4 sm:$0xff]   ;;  %v3292_v59 = vld [vmem:[%s3938_s29 + $0x140] ss:$8 sps:$4 sm:$0xff]   ;;  %v3300_v61 = vld [vmem:[%s3938_s29 + $0x154] ss:$8 sps:$4 sm:$0xff]  }
  0x8f   : > { %v3297_v58 = vld [vmem:[%s3938_s29 + $0x544] ss:$8 sps:$4 sm:$0xff]   ;;  %v3295_v60 = vld [vmem:[%s3938_s29 + $0x540] ss:$8 sps:$4 sm:$0xff]   ;;  %v3303_v62 = vld [vmem:[%s3938_s29 + $0x554] ss:$8 sps:$4 sm:$0xff]  }
  0x90   : > { %2090 = vmatpush1.bf16.msra.mxu1 %v3218_v63  ;;  %v363_v63 = vld [vmem:[%s3936_s26 + $0x80] sm:$0xff]  ;;  %v4066_v18 = vld [vmem:[%s3936_s26 + $0x28] sm:$0xff]  ;;  %v3313_v21 = vld [vmem:[%s3938_s29 + $0x570] ss:$8 sps:$4 sm:$0xff]  }
  0x91   : > { %2302 = vmatpush1.bf16.msra.mxu0 %v3219_v0  ;;  %2091 = vmatprep.subr.bf16.mxu1 %v3220_v1  ;;  %v371_v0 = vld [vmem:[%s3936_s26 + $0xc0] sm:$0xff]  ;;  %v3298_v1 = vld [vmem:[%s3938_s29 + $0x150] ss:$8 sps:$4 sm:$0xff]  }
  0x92   : > { %2303 = vmatprep.subr.bf16.mxu0 %v3222_v2  ;;  %v2734_v2 = vcombine.high %v363_v63, %v371_v0  ;;  %v3318_v23 = vld [vmem:[%s3938_s29 + $0x184] ss:$8 sps:$4 sm:$0xff]  }
  0x93   : > { %v3321_v24 = vld [vmem:[%s3938_s29 + $0x584] ss:$8 sps:$4 sm:$0xff]  }
  0x94   : > { %2092 = vmatpush1.bf16.msra.mxu1 %v3224_v3  ;;  %v3301_v3 = vld [vmem:[%s3938_s29 + $0x550] ss:$8 sps:$4 sm:$0xff]  }
  0x95   : > { %2304 = vmatpush1.bf16.msra.mxu0 %v3225_v4  ;;  %2093 = vmatprep.subr.bf16.mxu1 %v3226_v5  ;;  %v367_v4 = vld [vmem:[%s3936_s26 + $0xa0] sm:$0xff] }
  0x96   : > { %2305 = vmatprep.subr.bf16.mxu0 %v3228_v6  ;;  %v375_v5 = vld [vmem:[%s3936_s26 + $0xe0] sm:$0xff]  ;;  %v2733_v6 = vcombine.low %v363_v63, %v371_v0  ;;  %v3372_v63 = vld [vmem:[%s3938_s29 + $0x214] ss:$8 sps:$4 sm:$0xff]  }
  0x97   : > { %v3375_v0 = vld [vmem:[%s3938_s29 + $0x614] ss:$8 sps:$4 sm:$0xff]  }
  0x98   : > { %2094 = vmatpush1.bf16.msra.mxu1 %v3230_v7  ;;  %v3306_v7 = vld [vmem:[%s3938_s29 + $0x164] ss:$8 sps:$4 sm:$0xff]  }
  0x99   : > { %2306 = vmatpush1.bf16.msra.mxu0 %v3231_v8  ;;  %2095 = vmatprep.subr.bf16.mxu1 %v3232_v9  ;;  %v2742_v8 = vcombine.high %v367_v4, %v375_v5  ;;  %v2741_v9 = vcombine.low %v367_v4, %v375_v5  ;;  %v3370_v5 = vld [vmem:[%s3938_s29 + $0x210] ss:$8 sps:$4 sm:$0xff]  }
  0x9a   : > { %2307 = vmatprep.subr.bf16.mxu0 %v3234_v10  ;;  %v3309_v10 = vld [vmem:[%s3938_s29 + $0x564] ss:$8 sps:$4 sm:$0xff]  }
  0x9c   : > { %2096 = vmatpush1.bf16.msra.mxu1 %v3236_v11  ;;  %v3304_v11 = vld [vmem:[%s3938_s29 + $0x160] ss:$8 sps:$4 sm:$0xff]  }
  0x9d   : > { %2308 = vmatpush1.bf16.msra.mxu0 %v3237_v12  ;;  %2097 = vmatprep.subr.bf16.mxu1 %v3238_v13  ;;  %v3307_v12 = vld [vmem:[%s3938_s29 + $0x560] ss:$8 sps:$4 sm:$0xff]  }
  0x9e   : > { %2309 = vmatprep.subr.bf16.mxu0 %v3240_v14  ;;  %v4056_v13 = vld [vmem:[%s3936_s26 + $0x8] sm:$0xff] }
  0x9f   : > { %v4059_v14 = vld [vmem:[%s3936_s26 + $0x48] sm:$0xff] }
  0xa0   : > { %2098 = vmatpush1.bf16.msra.mxu1 %v3242_v15  ;;  %v3312_v15 = vld [vmem:[%s3938_s29 + $0x174] ss:$8 sps:$4 sm:$0xff]   ;;  %v2720_v17 = vcombine.high %v4056_v13, %v4059_v14 }
  0xa1   : > { %2310 = vmatpush1.bf16.msra.mxu0 %v3243_v16  ;;  %2099 = vmatprep.subr.bf16.mxu1 %v3244_v19  ;;  %v3315_v16 = vld [vmem:[%s3938_s29 + $0x574] ss:$8 sps:$4 sm:$0xff]   ;;  %v4069_v19 = vld [vmem:[%s3936_s26 + $0x68] sm:$0xff] }
  0xa2   : > { %2311 = vmatprep.subr.bf16.mxu0 %v3246_v20  ;;  %v3310_v20 = vld [vmem:[%s3938_s29 + $0x170] ss:$8 sps:$4 sm:$0xff]   ;;  %v2728_v22 = vcombine.high %v4066_v18, %v4069_v19 }
  0xa4   : > { %2100 = vmatpush1.bf16.msra.mxu1 %v3248_v25  ;;  %v3316_v25 = vld [vmem:[%s3938_s29 + $0x180] ss:$8 sps:$4 sm:$0xff]  }
  0xa5   : > { %2312 = vmatpush1.bf16.msra.mxu0 %v3249_v26  ;;  %2101 = vmatprep.subr.bf16.mxu1 %v3250_v27  ;;  %v3319_v26 = vld [vmem:[%s3938_s29 + $0x580] ss:$8 sps:$4 sm:$0xff]   ;;  %v3324_v27 = vld [vmem:[%s3938_s29 + $0x194] ss:$8 sps:$4 sm:$0xff]  }
  0xa6   : > { %2313 = vmatprep.subr.bf16.mxu0 %v3252_v28  ;;  %v3327_v28 = vld [vmem:[%s3938_s29 + $0x594] ss:$8 sps:$4 sm:$0xff]  }
  0xa8   : > { %2102 = vmatpush1.bf16.msra.mxu1 %v3254_v29  ;;  %v3322_v29 = vld [vmem:[%s3938_s29 + $0x190] ss:$8 sps:$4 sm:$0xff]  }
  0xa9   : > { %2314 = vmatpush1.bf16.msra.mxu0 %v3255_v30  ;;  %2103 = vmatprep.subr.bf16.mxu1 %v3256_v31  ;;  %v3325_v30 = vld [vmem:[%s3938_s29 + $0x590] ss:$8 sps:$4 sm:$0xff]   ;;  %v3330_v31 = vld [vmem:[%s3938_s29 + $0x1a4] ss:$8 sps:$4 sm:$0xff]  }
  0xaa   : > { %2315 = vmatprep.subr.bf16.mxu0 %v3258_v32  ;;  %v3333_v32 = vld [vmem:[%s3938_s29 + $0x5a4] ss:$8 sps:$4 sm:$0xff]  }
  0xac   : > { %2104 = vmatpush1.bf16.msra.mxu1 %v3260_v33  ;;  %v3328_v33 = vld [vmem:[%s3938_s29 + $0x1a0] ss:$8 sps:$4 sm:$0xff]  }
  0xad   : > { %2316 = vmatpush1.bf16.msra.mxu0 %v3261_v34  ;;  %2105 = vmatprep.subr.bf16.mxu1 %v3262_v35  ;;  %v3331_v34 = vld [vmem:[%s3938_s29 + $0x5a0] ss:$8 sps:$4 sm:$0xff]   ;;  %v3336_v35 = vld [vmem:[%s3938_s29 + $0x1b4] ss:$8 sps:$4 sm:$0xff]  }
  0xae   : > { %2317 = vmatprep.subr.bf16.mxu0 %v3264_v36  ;;  %v3339_v36 = vld [vmem:[%s3938_s29 + $0x5b4] ss:$8 sps:$4 sm:$0xff]  }
  0xb0   : > { %2106 = vmatpush1.bf16.msra.mxu1 %v3266_v37  ;;  %v3334_v37 = vld [vmem:[%s3938_s29 + $0x1b0] ss:$8 sps:$4 sm:$0xff]  }
  0xb1   : > { %2318 = vmatpush1.bf16.msra.mxu0 %v3267_v38  ;;  %2128 = vmatprep.subr.bf16.mxu1 %v3270_v39  ;;  %v3337_v38 = vld [vmem:[%s3938_s29 + $0x5b0] ss:$8 sps:$4 sm:$0xff]   ;;  %v3342_v39 = vld [vmem:[%s3938_s29 + $0x1c4] ss:$8 sps:$4 sm:$0xff]  }
  0xb2   : > { %2340 = vmatprep.subr.bf16.mxu0 %v3273_v40  ;;  %v3345_v40 = vld [vmem:[%s3938_s29 + $0x5c4] ss:$8 sps:$4 sm:$0xff]  }
  0xb3   : > { %2108 = vmatmul.mubr.bf16.vlgmr.msra.gmra.mrb[0].mxu1 %v2717_v41  ;;  %v3340_v41 = vld [vmem:[%s3938_s29 + $0x1c0] ss:$8 sps:$4 sm:$0xff]  }
  0xb4   : > { %2320 = vmatmul.mubr.bf16.vlgmr.msra.gmra.mrb[0].mxu0 %v2725_v43  ;;  %2129 = vmatpush1.bf16.msra.mxu1 %v3268_v42  ;;  %v3343_v42 = vld [vmem:[%s3938_s29 + $0x5c0] ss:$8 sps:$4 sm:$0xff]   ;;  %v3348_v43 = vld [vmem:[%s3938_s29 + $0x1d4] ss:$8 sps:$4 sm:$0xff]  }
  0xb5   : > { %2341 = vmatpush1.bf16.msra.mxu0 %v3271_v44  ;;  %2130 = vmatprep.subr.bf16.mxu1 %v3276_v45  ;;  %v3351_v44 = vld [vmem:[%s3938_s29 + $0x5d4] ss:$8 sps:$4 sm:$0xff]   ;;  %v3346_v45 = vld [vmem:[%s3938_s29 + $0x1d0] ss:$8 sps:$4 sm:$0xff]  }
  0xb6   : > { %2342 = vmatprep.subr.bf16.mxu0 %v3279_v46  ;;  %2117 = vmatprep.mubr.bf16.mxu1 %v2734_v2  ;;  %v3349_v46 = vld [vmem:[%s3938_s29 + $0x5d0] ss:$8 sps:$4 sm:$0xff]   ;;  %v376_v2 = vld [vmem:[%s3936_s26 + $0xe8] sm:$0xff] }
  0xb7   : > { %2329 = vmatprep.mubr.bf16.mxu0 %v2742_v8  ;;  %v3381_v8 = vld [vmem:[%s3938_s29 + $0x624] ss:$8 sps:$4 sm:$0xff]  }
  0xb8   : > { %2131 = vmatpush1.bf16.msra.mxu1 %v3274_v47  ;;  %v3354_v47 = vld [vmem:[%s3938_s29 + $0x1e4] ss:$8 sps:$4 sm:$0xff]  }
  0xb9   : > { %2343 = vmatpush1.bf16.msra.mxu0 %v3277_v48  ;;  %2132 = vmatprep.subr.bf16.mxu1 %v3282_v49  ;;  %v3357_v48 = vld [vmem:[%s3938_s29 + $0x5e4] ss:$8 sps:$4 sm:$0xff]   ;;  %v3352_v49 = vld [vmem:[%s3938_s29 + $0x1e0] ss:$8 sps:$4 sm:$0xff]  }
  0xba   : > { %2344 = vmatprep.subr.bf16.mxu0 %v3285_v50  ;;  %v3355_v50 = vld [vmem:[%s3938_s29 + $0x5e0] ss:$8 sps:$4 sm:$0xff]  }
  0xbb   : > { %2118 = vmatmul.mubr.bf16.gmra.mrb[4].mxu1 %v2733_v6  ;;  %v3373_v6 = vld [vmem:[%s3938_s29 + $0x610] ss:$8 sps:$4 sm:$0xff]  }
  0xbc   : > { %2133 = vmatpush1.bf16.msra.mxu1 %v3280_v51  ;;  %2330 = vmatmul.mubr.bf16.gmra.mrb[4].mxu0 %v2741_v9  ;;  %v3360_v51 = vld [vmem:[%s3938_s29 + $0x1f4] ss:$8 sps:$4 sm:$0xff]   ;;  %v3376_v9 = vld [vmem:[%s3938_s29 + $0x220] ss:$8 sps:$4 sm:$0xff]  }
  0xbd   : > { %2345 = vmatpush1.bf16.msra.mxu0 %v3283_v52  ;;  %2134 = vmatprep.subr.bf16.mxu1 %v3288_v53  ;;  %v3363_v52 = vld [vmem:[%s3938_s29 + $0x5f4] ss:$8 sps:$4 sm:$0xff]   ;;  %v3358_v53 = vld [vmem:[%s3938_s29 + $0x1f0] ss:$8 sps:$4 sm:$0xff]  }
  0xbe   : > { %2346 = vmatprep.subr.bf16.mxu0 %v3291_v54  ;;  %2160 = vmatprep.mubr.bf16.mxu1 %v2720_v17  ;;  %v3361_v54 = vld [vmem:[%s3938_s29 + $0x5f0] ss:$8 sps:$4 sm:$0xff]   ;;  %v3384_v17 = vld [vmem:[%s3938_s29 + $0x234] ss:$8 sps:$4 sm:$0xff]  }
  0xbf   : > { %2372 = vmatprep.mubr.bf16.mxu0 %v2728_v22  ;;  %v3385_v22 = vld [vmem:[%s3938_s29 + $0x630] ss:$8 sps:$4 sm:$0xff]  }
  0xc0   : > { %2135 = vmatpush1.bf16.msra.mxu1 %v3286_v55  ;;  %v3366_v55 = vld [vmem:[%s3938_s29 + $0x204] ss:$8 sps:$4 sm:$0xff]  }
  0xc1   : > { %2347 = vmatpush1.bf16.msra.mxu0 %v3289_v56  ;;  %2136 = vmatprep.subr.bf16.mxu1 %v3294_v57  ;;  %v3369_v56 = vld [vmem:[%s3938_s29 + $0x604] ss:$8 sps:$4 sm:$0xff]   ;;  %v3364_v57 = vld [vmem:[%s3938_s29 + $0x200] ss:$8 sps:$4 sm:$0xff]  }
  0xc2   : > { %2348 = vmatprep.subr.bf16.mxu0 %v3297_v58  ;;  %v3367_v58 = vld [vmem:[%s3938_s29 + $0x600] ss:$8 sps:$4 sm:$0xff]  }
  0xc4   : > { %2137 = vmatpush1.bf16.msra.mxu1 %v3292_v59  ;;  %v364_v59 = vld [vmem:[%s3936_s26 + $0x88] sm:$0xff] }
  0xc5   : > { %2349 = vmatpush1.bf16.msra.mxu0 %v3295_v60  ;;  %2138 = vmatprep.subr.bf16.mxu1 %v3300_v61  ;;  %v2719_v60 = vcombine.low %v4056_v13, %v4059_v14  ;;  %v2727_v61 = vcombine.low %v4066_v18, %v4069_v19  ;;  %v4131_v14 = vld [vmem:[%s3936_s26 + $0x50] sm:$0xff] }
  0xc6   : > { %2350 = vmatprep.subr.bf16.mxu0 %v3303_v62  ;;  %v372_v62 = vld [vmem:[%s3936_s26 + $0xc8] sm:$0xff]  ;;  %v3387_v18 = vld [vmem:[%s3938_s29 + $0x634] ss:$8 sps:$4 sm:$0xff]  }
  0xc8   : > { %2139 = vmatpush1.bf16.msra.mxu1 %v3298_v1  ;;  %v368_v1 = vld [vmem:[%s3936_s26 + $0xa8] sm:$0xff] }
  0xc9   : > { %2351 = vmatpush1.bf16.msra.mxu0 %v3301_v3  ;;  %2140 = vmatprep.subr.bf16.mxu1 %v3306_v7  ;;  %v2736_v3 = vcombine.high %v364_v59, %v372_v62  ;;  %v2744_v4 = vcombine.high %v368_v1, %v376_v2  ;;  %v3378_v7 = vld [vmem:[%s3938_s29 + $0x224] ss:$8 sps:$4 sm:$0xff]   ;;  %v2743_v13 = vcombine.low %v368_v1, %v376_v2  ;;  %v3448_v1 = vld [vmem:[%s3938_s29 + $0x2e0] ss:$8 sps:$4 sm:$0xff]  }
  0xca   : > { %2352 = vmatprep.subr.bf16.mxu0 %v3309_v10  ;;  %v3379_v10 = vld [vmem:[%s3938_s29 + $0x620] ss:$8 sps:$4 sm:$0xff]  }
  0xcb   : > { %v3451_v2 = vld [vmem:[%s3938_s29 + $0x6e0] ss:$8 sps:$4 sm:$0xff]  }
  0xcc   : > { %2141 = vmatpush1.bf16.msra.mxu1 %v3304_v11  ;;  %v4128_v11 = vld [vmem:[%s3936_s26 + $0x10] sm:$0xff] }
  0xcd   : > { %2353 = vmatpush1.bf16.msra.mxu0 %v3307_v12  ;;  %2142 = vmatprep.subr.bf16.mxu1 %v3312_v15  ;;  %v2735_v12 = vcombine.low %v364_v59, %v372_v62  ;;  %v4134_v15 = vld [vmem:[%s3936_s26 + $0x30] sm:$0xff]  ;;  %v2722_v19 = vcombine.high %v4128_v11, %v4131_v14 }
  0xce   : > { %2354 = vmatprep.subr.bf16.mxu0 %v3315_v16  ;;  %v4137_v16 = vld [vmem:[%s3936_s26 + $0x70] sm:$0xff] }
  0xcf   : > { %v3444_v59 = vld [vmem:[%s3938_s29 + $0x2d4] ss:$8 sps:$4 sm:$0xff]   ;;  %v3445_v62 = vld [vmem:[%s3938_s29 + $0x6d0] ss:$8 sps:$4 sm:$0xff]  }
  0xd0   : > { %2143 = vmatpush1.bf16.msra.mxu1 %v3310_v20  ;;  %v2730_v20 = vcombine.high %v4134_v15, %v4137_v16 }
  0xd1   : > { %2355 = vmatpush1.bf16.msra.mxu0 %v3313_v21  ;;  %2144 = vmatprep.subr.bf16.mxu1 %v3318_v23  ;;  %v3382_v21 = vld [vmem:[%s3938_s29 + $0x230] ss:$8 sps:$4 sm:$0xff]   ;;  %v3390_v23 = vld [vmem:[%s3938_s29 + $0x244] ss:$8 sps:$4 sm:$0xff]  }
  0xd2   : > { %2356 = vmatprep.subr.bf16.mxu0 %v3321_v24  ;;  %v3393_v24 = vld [vmem:[%s3938_s29 + $0x644] ss:$8 sps:$4 sm:$0xff]  }
  0xd4   : > { %2145 = vmatpush1.bf16.msra.mxu1 %v3316_v25  ;;  %v3388_v25 = vld [vmem:[%s3938_s29 + $0x240] ss:$8 sps:$4 sm:$0xff]  }
  0xd5   : > { %2357 = vmatpush1.bf16.msra.mxu0 %v3319_v26  ;;  %2146 = vmatprep.subr.bf16.mxu1 %v3324_v27  ;;  %v3391_v26 = vld [vmem:[%s3938_s29 + $0x640] ss:$8 sps:$4 sm:$0xff]   ;;  %v3396_v27 = vld [vmem:[%s3938_s29 + $0x254] ss:$8 sps:$4 sm:$0xff]  }
  0xd6   : > { %2358 = vmatprep.subr.bf16.mxu0 %v3327_v28  ;;  %v3399_v28 = vld [vmem:[%s3938_s29 + $0x654] ss:$8 sps:$4 sm:$0xff]  }
  0xd8   : > { %2147 = vmatpush1.bf16.msra.mxu1 %v3322_v29  ;;  %v3394_v29 = vld [vmem:[%s3938_s29 + $0x250] ss:$8 sps:$4 sm:$0xff]  }
  0xd9   : > { %2359 = vmatpush1.bf16.msra.mxu0 %v3325_v30  ;;  %2148 = vmatprep.subr.bf16.mxu1 %v3330_v31  ;;  %v3397_v30 = vld [vmem:[%s3938_s29 + $0x650] ss:$8 sps:$4 sm:$0xff]   ;;  %v3402_v31 = vld [vmem:[%s3938_s29 + $0x264] ss:$8 sps:$4 sm:$0xff]  }
  0xda   : > { %2360 = vmatprep.subr.bf16.mxu0 %v3333_v32  ;;  %v3405_v32 = vld [vmem:[%s3938_s29 + $0x664] ss:$8 sps:$4 sm:$0xff]  }
  0xdc   : > { %2149 = vmatpush1.bf16.msra.mxu1 %v3328_v33  ;;  %v3400_v33 = vld [vmem:[%s3938_s29 + $0x260] ss:$8 sps:$4 sm:$0xff]  }
  0xdd   : > { %2361 = vmatpush1.bf16.msra.mxu0 %v3331_v34  ;;  %2150 = vmatprep.subr.bf16.mxu1 %v3336_v35  ;;  %v3403_v34 = vld [vmem:[%s3938_s29 + $0x660] ss:$8 sps:$4 sm:$0xff]   ;;  %v3408_v35 = vld [vmem:[%s3938_s29 + $0x274] ss:$8 sps:$4 sm:$0xff]  }
  0xde   : > { %2362 = vmatprep.subr.bf16.mxu0 %v3339_v36  ;;  %v3411_v36 = vld [vmem:[%s3938_s29 + $0x674] ss:$8 sps:$4 sm:$0xff]  }
  0xe0   : > { %2151 = vmatpush1.bf16.msra.mxu1 %v3334_v37  ;;  %v3406_v37 = vld [vmem:[%s3938_s29 + $0x270] ss:$8 sps:$4 sm:$0xff]  }
  0xe1   : > { %2363 = vmatpush1.bf16.msra.mxu0 %v3337_v38  ;;  %2152 = vmatprep.subr.bf16.mxu1 %v3342_v39  ;;  %v3409_v38 = vld [vmem:[%s3938_s29 + $0x670] ss:$8 sps:$4 sm:$0xff]   ;;  %v3414_v39 = vld [vmem:[%s3938_s29 + $0x284] ss:$8 sps:$4 sm:$0xff]  }
  0xe2   : > { %2364 = vmatprep.subr.bf16.mxu0 %v3345_v40  ;;  %v3417_v40 = vld [vmem:[%s3938_s29 + $0x684] ss:$8 sps:$4 sm:$0xff]  }
  0xe4   : > { %2153 = vmatpush1.bf16.msra.mxu1 %v3340_v41  ;;  %v3412_v41 = vld [vmem:[%s3938_s29 + $0x280] ss:$8 sps:$4 sm:$0xff]  }
  0xe5   : > { %2365 = vmatpush1.bf16.msra.mxu0 %v3343_v42  ;;  %2154 = vmatprep.subr.bf16.mxu1 %v3348_v43  ;;  %v3415_v42 = vld [vmem:[%s3938_s29 + $0x680] ss:$8 sps:$4 sm:$0xff]   ;;  %v3420_v43 = vld [vmem:[%s3938_s29 + $0x294] ss:$8 sps:$4 sm:$0xff]  }
  0xe6   : > { %2366 = vmatprep.subr.bf16.mxu0 %v3351_v44  ;;  %v3423_v44 = vld [vmem:[%s3938_s29 + $0x694] ss:$8 sps:$4 sm:$0xff]  }
  0xe8   : > { %2155 = vmatpush1.bf16.msra.mxu1 %v3346_v45  ;;  %v3418_v45 = vld [vmem:[%s3938_s29 + $0x290] ss:$8 sps:$4 sm:$0xff]  }
  0xe9   : > { %2367 = vmatpush1.bf16.msra.mxu0 %v3349_v46  ;;  %2156 = vmatprep.subr.bf16.mxu1 %v3354_v47  ;;  %v3421_v46 = vld [vmem:[%s3938_s29 + $0x690] ss:$8 sps:$4 sm:$0xff]   ;;  %v3426_v47 = vld [vmem:[%s3938_s29 + $0x2a4] ss:$8 sps:$4 sm:$0xff]  }
  0xea   : > { %2368 = vmatprep.subr.bf16.mxu0 %v3357_v48  ;;  %v3429_v48 = vld [vmem:[%s3938_s29 + $0x6a4] ss:$8 sps:$4 sm:$0xff]  }
  0xec   : > { %2157 = vmatpush1.bf16.msra.mxu1 %v3352_v49  ;;  %v3424_v49 = vld [vmem:[%s3938_s29 + $0x2a0] ss:$8 sps:$4 sm:$0xff]  }
  0xed   : > { %2369 = vmatpush1.bf16.msra.mxu0 %v3355_v50  ;;  %2158 = vmatprep.subr.bf16.mxu1 %v3360_v51  ;;  %v3427_v50 = vld [vmem:[%s3938_s29 + $0x6a0] ss:$8 sps:$4 sm:$0xff]   ;;  %v3432_v51 = vld [vmem:[%s3938_s29 + $0x2b4] ss:$8 sps:$4 sm:$0xff]  }
  0xee   : > { %2370 = vmatprep.subr.bf16.mxu0 %v3363_v52  ;;  %v3435_v52 = vld [vmem:[%s3938_s29 + $0x6b4] ss:$8 sps:$4 sm:$0xff]  }
  0xf0   : > { %2159 = vmatpush1.bf16.msra.mxu1 %v3358_v53  ;;  %v3430_v53 = vld [vmem:[%s3938_s29 + $0x2b0] ss:$8 sps:$4 sm:$0xff]  }
  0xf1   : > { %2371 = vmatpush1.bf16.msra.mxu0 %v3361_v54  ;;  %2181 = vmatprep.subr.bf16.mxu1 %v3366_v55  ;;  %v3433_v54 = vld [vmem:[%s3938_s29 + $0x6b0] ss:$8 sps:$4 sm:$0xff]   ;;  %v3438_v55 = vld [vmem:[%s3938_s29 + $0x2c4] ss:$8 sps:$4 sm:$0xff]  }
  0xf2   : > { %2393 = vmatprep.subr.bf16.mxu0 %v3369_v56  ;;  %v3441_v56 = vld [vmem:[%s3938_s29 + $0x6c4] ss:$8 sps:$4 sm:$0xff]  }
  0xf3   : > { %2161 = vmatmul.mubr.bf16.vlgmr.msra.gmra.mrb[0].mxu1 %v2719_v60  ;;  %v3447_v60 = vld [vmem:[%s3938_s29 + $0x6d4] ss:$8 sps:$4 sm:$0xff]  }
  0xf4   : > { %2373 = vmatmul.mubr.bf16.vlgmr.msra.gmra.mrb[0].mxu0 %v2727_v61  ;;  %2182 = vmatpush1.bf16.msra.mxu1 %v3364_v57  ;;  %v3436_v57 = vld [vmem:[%s3938_s29 + $0x2c0] ss:$8 sps:$4 sm:$0xff]   ;;  %v3442_v61 = vld [vmem:[%s3938_s29 + $0x2d0] ss:$8 sps:$4 sm:$0xff]  }
  0xf5   : > { %2394 = vmatpush1.bf16.msra.mxu0 %v3367_v58  ;;  %2183 = vmatprep.subr.bf16.mxu1 %v3372_v63  ;;  %v3439_v58 = vld [vmem:[%s3938_s29 + $0x6c0] ss:$8 sps:$4 sm:$0xff]   ;;  %v3450_v63 = vld [vmem:[%s3938_s29 + $0x2e4] ss:$8 sps:$4 sm:$0xff]  }
  0xf6   : > { %2395 = vmatprep.subr.bf16.mxu0 %v3375_v0  ;;  %2170 = vmatprep.mubr.bf16.mxu1 %v2736_v3  ;;  %v3453_v0 = vld [vmem:[%s3938_s29 + $0x6e4] ss:$8 sps:$4 sm:$0xff]   ;;  %v3456_v3 = vld [vmem:[%s3938_s29 + $0x2f4] ss:$8 sps:$4 sm:$0xff]  }
  0xf7   : > { %2382 = vmatprep.mubr.bf16.mxu0 %v2744_v4  ;;  %v3459_v4 = vld [vmem:[%s3938_s29 + $0x6f4] ss:$8 sps:$4 sm:$0xff]  }
  0xf8   : > { %2184 = vmatpush1.bf16.msra.mxu1 %v3370_v5  ;;  %v3454_v5 = vld [vmem:[%s3938_s29 + $0x2f0] ss:$8 sps:$4 sm:$0xff]  }
  0xf9   : > { %2396 = vmatpush1.bf16.msra.mxu0 %v3373_v6  ;;  %2185 = vmatprep.subr.bf16.mxu1 %v3378_v7  ;;  %v3457_v6 = vld [vmem:[%s3938_s29 + $0x6f0] ss:$8 sps:$4 sm:$0xff]   ;;  %v3462_v7 = vld [vmem:[%s3938_s29 + $0x304] ss:$8 sps:$4 sm:$0xff]  }
  0xfa   : > { %2397 = vmatprep.subr.bf16.mxu0 %v3381_v8  ;;  %v3465_v8 = vld [vmem:[%s3938_s29 + $0x704] ss:$8 sps:$4 sm:$0xff]  }
  0xfb   : > { %2171 = vmatmul.mubr.bf16.gmra.mrb[4].mxu1 %v2735_v12  ;;  %v2729_v12 = vcombine.low %v4134_v15, %v4137_v16  ;;  %v3466_v15 = vld [vmem:[%s3938_s29 + $0x310] ss:$8 sps:$4 sm:$0xff]  }
  0xfc   : > { %2383 = vmatmul.mubr.bf16.gmra.mrb[4].mxu0 %v2743_v13  ;;  %2186 = vmatpush1.bf16.msra.mxu1 %v3376_v9  ;;  %v365_v9 = vld [vmem:[%s3936_s26 + $0x90] sm:$0xff] }
  0xfd   : > { %2398 = vmatpush1.bf16.msra.mxu0 %v3379_v10  ;;  %2187 = vmatprep.subr.bf16.mxu1 %v3384_v17  ;;  %v2721_v10 = vcombine.low %v4128_v11, %v4131_v14  ;;  %v373_v13 = vld [vmem:[%s3936_s26 + $0xd0] sm:$0xff] }
  0xfe   : > { %2399 = vmatprep.subr.bf16.mxu0 %v3387_v18  ;;  %2213 = vmatprep.mubr.bf16.mxu1 %v2722_v19  ;;  %v369_v17 = vld [vmem:[%s3936_s26 + $0xb0] sm:$0xff]  ;;  %v3460_v19 = vld [vmem:[%s3938_s29 + $0x300] ss:$8 sps:$4 sm:$0xff]   ;;  %v2738_v11 = vcombine.high %v365_v9, %v373_v13 }
  0xff   : > { %2425 = vmatprep.mubr.bf16.mxu0 %v2730_v20  ;;  %v377_v18 = vld [vmem:[%s3936_s26 + $0xf0] sm:$0xff]  ;;  %v3463_v20 = vld [vmem:[%s3938_s29 + $0x700] ss:$8 sps:$4 sm:$0xff]  }
 0x100   : > { %2188 = vmatpush1.bf16.msra.mxu1 %v3382_v21  ;;  %v3468_v21 = vld [vmem:[%s3938_s29 + $0x314] ss:$8 sps:$4 sm:$0xff]   ;;  %v2746_v14 = vcombine.high %v369_v17, %v377_v18  ;;  %v3469_v16 = vld [vmem:[%s3938_s29 + $0x710] ss:$8 sps:$4 sm:$0xff]  }
 0x101   : > { %2400 = vmatpush1.bf16.msra.mxu0 %v3385_v22  ;;  %2189 = vmatprep.subr.bf16.mxu1 %v3390_v23  ;;  %v3471_v22 = vld [vmem:[%s3938_s29 + $0x714] ss:$8 sps:$4 sm:$0xff]   ;;  %v3474_v23 = vld [vmem:[%s3938_s29 + $0x324] ss:$8 sps:$4 sm:$0xff]  }
 0x102   : > { %2401 = vmatprep.subr.bf16.mxu0 %v3393_v24  ;;  %v3477_v24 = vld [vmem:[%s3938_s29 + $0x724] ss:$8 sps:$4 sm:$0xff]  }
 0x104   : > { %2190 = vmatpush1.bf16.msra.mxu1 %v3388_v25  ;;  %v4214_v25 = vld [vmem:[%s3936_s26 + $0x18] sm:$0xff] }
 0x105   : > { %2402 = vmatpush1.bf16.msra.mxu0 %v3391_v26  ;;  %2191 = vmatprep.subr.bf16.mxu1 %v3396_v27  ;;  %v2737_v26 = vcombine.low %v365_v9, %v373_v13  ;;  %v2745_v27 = vcombine.low %v369_v17, %v377_v18  ;;  %v3532_v9 = vld [vmem:[%s3938_s29 + $0x3c0] ss:$8 sps:$4 sm:$0xff]   ;;  %v3543_v13 = vld [vmem:[%s3938_s29 + $0x7d4] ss:$8 sps:$4 sm:$0xff]   ;;  %v3538_v17 = vld [vmem:[%s3938_s29 + $0x3d0] ss:$8 sps:$4 sm:$0xff]  }
 0x106   : > { %2403 = vmatprep.subr.bf16.mxu0 %v3399_v28  ;;  %v4217_v28 = vld [vmem:[%s3936_s26 + $0x58] sm:$0xff] }
 0x107   : > { %v3541_v18 = vld [vmem:[%s3938_s29 + $0x7d0] ss:$8 sps:$4 sm:$0xff]  }
 0x108   : > { %2192 = vmatpush1.bf16.msra.mxu1 %v3394_v29  ;;  %v4220_v29 = vld [vmem:[%s3936_s26 + $0x38] sm:$0xff] }
 0x109   : > { %2404 = vmatpush1.bf16.msra.mxu0 %v3397_v30  ;;  %2193 = vmatprep.subr.bf16.mxu1 %v3402_v31  ;;  %v4223_v30 = vld [vmem:[%s3936_s26 + $0x78] sm:$0xff]  ;;  %v3472_v31 = vld [vmem:[%s3938_s29 + $0x320] ss:$8 sps:$4 sm:$0xff]  }
 0x10a   : > { %2405 = vmatprep.subr.bf16.mxu0 %v3405_v32  ;;  %v3475_v32 = vld [vmem:[%s3938_s29 + $0x720] ss:$8 sps:$4 sm:$0xff]  }
 0x10c   : > { %2194 = vmatpush1.bf16.msra.mxu1 %v3400_v33  ;;  %v3480_v33 = vld [vmem:[%s3938_s29 + $0x334] ss:$8 sps:$4 sm:$0xff]  }
 0x10d   : > { %2406 = vmatpush1.bf16.msra.mxu0 %v3403_v34  ;;  %2195 = vmatprep.subr.bf16.mxu1 %v3408_v35  ;;  %v3483_v34 = vld [vmem:[%s3938_s29 + $0x734] ss:$8 sps:$4 sm:$0xff]   ;;  %v2724_v35 = vcombine.high %v4214_v25, %v4217_v28 }
 0x10e   : > { %2407 = vmatprep.subr.bf16.mxu0 %v3411_v36  ;;  %v2732_v36 = vcombine.high %v4220_v29, %v4223_v30 }
 0x110   : > { %2196 = vmatpush1.bf16.msra.mxu1 %v3406_v37  ;;  %v3478_v37 = vld [vmem:[%s3938_s29 + $0x330] ss:$8 sps:$4 sm:$0xff]  }
 0x111   : > { %2408 = vmatpush1.bf16.msra.mxu0 %v3409_v38  ;;  %2197 = vmatprep.subr.bf16.mxu1 %v3414_v39  ;;  %v3481_v38 = vld [vmem:[%s3938_s29 + $0x730] ss:$8 sps:$4 sm:$0xff]   ;;  %v3486_v39 = vld [vmem:[%s3938_s29 + $0x344] ss:$8 sps:$4 sm:$0xff]  }
 0x112   : > { %2409 = vmatprep.subr.bf16.mxu0 %v3417_v40  ;;  %v3489_v40 = vld [vmem:[%s3938_s29 + $0x744] ss:$8 sps:$4 sm:$0xff]  }
 0x114   : > { %2198 = vmatpush1.bf16.msra.mxu1 %v3412_v41  ;;  %v3484_v41 = vld [vmem:[%s3938_s29 + $0x340] ss:$8 sps:$4 sm:$0xff]  }
 0x115   : > { %2410 = vmatpush1.bf16.msra.mxu0 %v3415_v42  ;;  %2199 = vmatprep.subr.bf16.mxu1 %v3420_v43  ;;  %v3487_v42 = vld [vmem:[%s3938_s29 + $0x740] ss:$8 sps:$4 sm:$0xff]   ;;  %v3492_v43 = vld [vmem:[%s3938_s29 + $0x354] ss:$8 sps:$4 sm:$0xff]  }
 0x116   : > { %2411 = vmatprep.subr.bf16.mxu0 %v3423_v44  ;;  %v3495_v44 = vld [vmem:[%s3938_s29 + $0x754] ss:$8 sps:$4 sm:$0xff]  }
 0x118   : > { %2200 = vmatpush1.bf16.msra.mxu1 %v3418_v45  ;;  %v3490_v45 = vld [vmem:[%s3938_s29 + $0x350] ss:$8 sps:$4 sm:$0xff]  }
 0x119   : > { %2412 = vmatpush1.bf16.msra.mxu0 %v3421_v46  ;;  %2201 = vmatprep.subr.bf16.mxu1 %v3426_v47  ;;  %v3493_v46 = vld [vmem:[%s3938_s29 + $0x750] ss:$8 sps:$4 sm:$0xff]   ;;  %v3498_v47 = vld [vmem:[%s3938_s29 + $0x364] ss:$8 sps:$4 sm:$0xff]  }
 0x11a   : > { %2413 = vmatprep.subr.bf16.mxu0 %v3429_v48  ;;  %v3501_v48 = vld [vmem:[%s3938_s29 + $0x764] ss:$8 sps:$4 sm:$0xff]  }
 0x11c   : > { %2202 = vmatpush1.bf16.msra.mxu1 %v3424_v49  ;;  %v3496_v49 = vld [vmem:[%s3938_s29 + $0x360] ss:$8 sps:$4 sm:$0xff]  }
 0x11d   : > { %2414 = vmatpush1.bf16.msra.mxu0 %v3427_v50  ;;  %2203 = vmatprep.subr.bf16.mxu1 %v3432_v51  ;;  %v3499_v50 = vld [vmem:[%s3938_s29 + $0x760] ss:$8 sps:$4 sm:$0xff]   ;;  %v3504_v51 = vld [vmem:[%s3938_s29 + $0x374] ss:$8 sps:$4 sm:$0xff]  }
 0x11e   : > { %2415 = vmatprep.subr.bf16.mxu0 %v3435_v52  ;;  %v3507_v52 = vld [vmem:[%s3938_s29 + $0x774] ss:$8 sps:$4 sm:$0xff]  }
 0x120   : > { %2204 = vmatpush1.bf16.msra.mxu1 %v3430_v53  ;;  %v3502_v53 = vld [vmem:[%s3938_s29 + $0x370] ss:$8 sps:$4 sm:$0xff]  }
 0x121   : > { %2416 = vmatpush1.bf16.msra.mxu0 %v3433_v54  ;;  %2205 = vmatprep.subr.bf16.mxu1 %v3438_v55  ;;  %v3505_v54 = vld [vmem:[%s3938_s29 + $0x770] ss:$8 sps:$4 sm:$0xff]   ;;  %v3510_v55 = vld [vmem:[%s3938_s29 + $0x384] ss:$8 sps:$4 sm:$0xff]  }
 0x122   : > { %2417 = vmatprep.subr.bf16.mxu0 %v3441_v56  ;;  %v3513_v56 = vld [vmem:[%s3938_s29 + $0x784] ss:$8 sps:$4 sm:$0xff]  }
 0x124   : > { %2206 = vmatpush1.bf16.msra.mxu1 %v3436_v57  ;;  %v3508_v57 = vld [vmem:[%s3938_s29 + $0x380] ss:$8 sps:$4 sm:$0xff]  }
 0x125   : > { %2418 = vmatpush1.bf16.msra.mxu0 %v3439_v58  ;;  %2207 = vmatprep.subr.bf16.mxu1 %v3444_v59  ;;  %v3511_v58 = vld [vmem:[%s3938_s29 + $0x780] ss:$8 sps:$4 sm:$0xff]   ;;  %v3516_v59 = vld [vmem:[%s3938_s29 + $0x394] ss:$8 sps:$4 sm:$0xff]  }
 0x126   : > { %2419 = vmatprep.subr.bf16.mxu0 %v3447_v60  ;;  %v3519_v60 = vld [vmem:[%s3938_s29 + $0x794] ss:$8 sps:$4 sm:$0xff]  }
 0x128   : > { %2208 = vmatpush1.bf16.msra.mxu1 %v3442_v61  ;;  %v3514_v61 = vld [vmem:[%s3938_s29 + $0x390] ss:$8 sps:$4 sm:$0xff]  }
 0x129   : > { %2420 = vmatpush1.bf16.msra.mxu0 %v3445_v62  ;;  %2209 = vmatprep.subr.bf16.mxu1 %v3450_v63  ;;  %v3517_v62 = vld [vmem:[%s3938_s29 + $0x790] ss:$8 sps:$4 sm:$0xff]   ;;  %v3522_v63 = vld [vmem:[%s3938_s29 + $0x3a4] ss:$8 sps:$4 sm:$0xff]  }
 0x12a   : > { %2421 = vmatprep.subr.bf16.mxu0 %v3453_v0  ;;  %v3525_v0 = vld [vmem:[%s3938_s29 + $0x7a4] ss:$8 sps:$4 sm:$0xff]  }
 0x12c   : > { %2210 = vmatpush1.bf16.msra.mxu1 %v3448_v1  ;;  %v3520_v1 = vld [vmem:[%s3938_s29 + $0x3a0] ss:$8 sps:$4 sm:$0xff]  }
 0x12d   : > { %2422 = vmatpush1.bf16.msra.mxu0 %v3451_v2  ;;  %2211 = vmatprep.subr.bf16.mxu1 %v3456_v3  ;;  %v3523_v2 = vld [vmem:[%s3938_s29 + $0x7a0] ss:$8 sps:$4 sm:$0xff]   ;;  %v3528_v3 = vld [vmem:[%s3938_s29 + $0x3b4] ss:$8 sps:$4 sm:$0xff]  }
 0x12e   : > { %2423 = vmatprep.subr.bf16.mxu0 %v3459_v4  ;;  %v3531_v4 = vld [vmem:[%s3938_s29 + $0x7b4] ss:$8 sps:$4 sm:$0xff]  }
 0x130   : > { %2212 = vmatpush1.bf16.msra.mxu1 %v3454_v5  ;;  %v3526_v5 = vld [vmem:[%s3938_s29 + $0x3b0] ss:$8 sps:$4 sm:$0xff]  }
 0x131   : > { %2424 = vmatpush1.bf16.msra.mxu0 %v3457_v6  ;;  %2234 = vmatprep.subr.bf16.mxu1 %v3462_v7  ;;  %v3529_v6 = vld [vmem:[%s3938_s29 + $0x7b0] ss:$8 sps:$4 sm:$0xff]   ;;  %v3534_v7 = vld [vmem:[%s3938_s29 + $0x3c4] ss:$8 sps:$4 sm:$0xff]  }
 0x132   : > { %2446 = vmatprep.subr.bf16.mxu0 %v3465_v8  ;;  %v3537_v8 = vld [vmem:[%s3938_s29 + $0x7c4] ss:$8 sps:$4 sm:$0xff]  }
 0x133   : > { %2214 = vmatmul.mubr.bf16.vlgmr.msra.gmra.mrb[0].mxu1 %v2721_v10  ;;  %v3535_v10 = vld [vmem:[%s3938_s29 + $0x7c0] ss:$8 sps:$4 sm:$0xff]  }
 0x134   : > { %2426 = vmatmul.mubr.bf16.vlgmr.msra.gmra.mrb[0].mxu0 %v2729_v12  ;;  %2235 = vmatpush1.bf16.msra.mxu1 %v3460_v19  ;;  %v3540_v12 = vld [vmem:[%s3938_s29 + $0x3d4] ss:$8 sps:$4 sm:$0xff]   ;;  %v3546_v19 = vld [vmem:[%s3938_s29 + $0x3e4] ss:$8 sps:$4 sm:$0xff]  }
 0x135   : > { %2447 = vmatpush1.bf16.msra.mxu0 %v3463_v20  ;;  %2236 = vmatprep.subr.bf16.mxu1 %v3468_v21  ;;  %v3549_v20 = vld [vmem:[%s3938_s29 + $0x7e4] ss:$8 sps:$4 sm:$0xff]   ;;  %v3544_v21 = vld [vmem:[%s3938_s29 + $0x3e0] ss:$8 sps:$4 sm:$0xff]  }
 0x136   : > { %2448 = vmatprep.subr.bf16.mxu0 %v3471_v22  ;;  %2223 = vmatprep.mubr.bf16.mxu1 %v2738_v11  ;;  %v3547_v22 = vld [vmem:[%s3938_s29 + $0x7e0] ss:$8 sps:$4 sm:$0xff]   ;;  %v3552_v11 = vld [vmem:[%s3938_s29 + $0x3f4] ss:$8 sps:$4 sm:$0xff]  }
 0x137   : > { %2435 = vmatprep.mubr.bf16.mxu0 %v2746_v14  ;;  %v3555_v14 = vld [vmem:[%s3938_s29 + $0x7f4] ss:$8 sps:$4 sm:$0xff]  }
 0x138   : > { %2237 = vmatpush1.bf16.msra.mxu1 %v3466_v15  ;;  %v3550_v15 = vld [vmem:[%s3938_s29 + $0x3f0] ss:$8 sps:$4 sm:$0xff]  }
 0x139   : > { %2449 = vmatpush1.bf16.msra.mxu0 %v3469_v16  ;;  %2238 = vmatprep.subr.bf16.mxu1 %v3474_v23  ;;  %v3553_v16 = vld [vmem:[%s3938_s29 + $0x7f0] ss:$8 sps:$4 sm:$0xff]  }
 0x13a   : > { %2450 = vmatprep.subr.bf16.mxu0 %v3477_v24  ;;  %v366_v23 = vld [vmem:[%s3936_s26 + $0x98] sm:$0xff] }
 0x13b   : > { %2224 = vmatmul.mubr.bf16.gmra.mrb[4].mxu1 %v2737_v26  ;;  %v374_v24 = vld [vmem:[%s3936_s26 + $0xd8] sm:$0xff] }
 0x13c   : > { %2436 = vmatmul.mubr.bf16.gmra.mrb[4].mxu0 %v2745_v27  ;;  %2239 = vmatpush1.bf16.msra.mxu1 %v3472_v31  ;;  %v370_v26 = vld [vmem:[%s3936_s26 + $0xb8] sm:$0xff]  ;;  %v2723_v31 = vcombine.low %v4214_v25, %v4217_v28  ;;  %v340_v28 = vld [vmem:[#allocation2 + $0x8] sm:$0xff] }
 0x13d   : > { %2451 = vmatpush1.bf16.msra.mxu0 %v3475_v32  ;;  %2240 = vmatprep.subr.bf16.mxu1 %v3480_v33  ;;  %v378_v27 = vld [vmem:[%s3936_s26 + $0xf8] sm:$0xff]  ;;  %v2731_v32 = vcombine.low %v4220_v29, %v4223_v30  ;;  %v2740_v33 = vcombine.high %v366_v23, %v374_v24 }
 0x13e   : > { %2452 = vmatprep.subr.bf16.mxu0 %v3483_v34  ;;  %2266 = vmatprep.mubr.bf16.mxu1 %v2724_v35  ;;  %v2748_v34 = vcombine.high %v370_v26, %v378_v27  ;;  %v2739_v35 = vcombine.low %v366_v23, %v374_v24 }
 0x13f   : > { %2478 = vmatprep.mubr.bf16.mxu0 %v2732_v36  ;;  %v2747_v36 = vcombine.low %v370_v26, %v378_v27 }
 0x140   : > { %2241 = vmatpush1.bf16.msra.mxu1 %v3478_v37 }
 0x141   : > { %2453 = vmatpush1.bf16.msra.mxu0 %v3481_v38  ;;  %2242 = vmatprep.subr.bf16.mxu1 %v3486_v39  ;;  %v339_v38 = vld [vmem:[#allocation2] sm:$0xff] }
 0x142   : > { %2454 = vmatprep.subr.bf16.mxu0 %v3489_v40 }
 0x144   : > { %2243 = vmatpush1.bf16.msra.mxu1 %v3484_v41 }
 0x145   : > { %2455 = vmatpush1.bf16.msra.mxu0 %v3487_v42  ;;  %2244 = vmatprep.subr.bf16.mxu1 %v3492_v43  ;;  %v341_v42 = vld [vmem:[#allocation2 + $0x10] sm:$0xff] }
 0x146   : > { %2456 = vmatprep.subr.bf16.mxu0 %v3495_v44 }
 0x148   : > { %2245 = vmatpush1.bf16.msra.mxu1 %v3490_v45 }
 0x149   : > { %2457 = vmatpush1.bf16.msra.mxu0 %v3493_v46  ;;  %2246 = vmatprep.subr.bf16.mxu1 %v3498_v47  ;;  %v342_v47 = vld [vmem:[#allocation2 + $0x18] sm:$0xff] }
 0x14a   : > { %2458 = vmatprep.subr.bf16.mxu0 %v3501_v48 }
 0x14c   : > { %2247 = vmatpush1.bf16.msra.mxu1 %v3496_v49 }
 0x14d   : > { %2459 = vmatpush1.bf16.msra.mxu0 %v3499_v50  ;;  %2248 = vmatprep.subr.bf16.mxu1 %v3504_v51 }
 0x14e   : > { %2460 = vmatprep.subr.bf16.mxu0 %v3507_v52 }
 0x150   : > { %2249 = vmatpush1.bf16.msra.mxu1 %v3502_v53 }
 0x151   : > { %2461 = vmatpush1.bf16.msra.mxu0 %v3505_v54  ;;  %2250 = vmatprep.subr.bf16.mxu1 %v3510_v55  ;;  %v343_v54 = vld [vmem:[#allocation2 + $0x20] sm:$0xff] }
 0x152   : > { %2462 = vmatprep.subr.bf16.mxu0 %v3513_v56 }
 0x154   : > { %2251 = vmatpush1.bf16.msra.mxu1 %v3508_v57 }
 0x155   : > { %2463 = vmatpush1.bf16.msra.mxu0 %v3511_v58  ;;  %2252 = vmatprep.subr.bf16.mxu1 %v3516_v59  ;;  %v344_v58 = vld [vmem:[#allocation2 + $0x28] sm:$0xff] }
 0x156   : > { %2464 = vmatprep.subr.bf16.mxu0 %v3519_v60 }
 0x158   : > { %2253 = vmatpush1.bf16.msra.mxu1 %v3514_v61 }
 0x159   : > { %2465 = vmatpush1.bf16.msra.mxu0 %v3517_v62  ;;  %2254 = vmatprep.subr.bf16.mxu1 %v3522_v63  ;;  %v345_v62 = vld [vmem:[#allocation2 + $0x30] sm:$0xff] }
 0x15a   : > { %2466 = vmatprep.subr.bf16.mxu0 %v3525_v0 }
 0x15c   : > { %2255 = vmatpush1.bf16.msra.mxu1 %v3520_v1 }
 0x15d   : > { %2467 = vmatpush1.bf16.msra.mxu0 %v3523_v2  ;;  %2256 = vmatprep.subr.bf16.mxu1 %v3528_v3  ;;  %v346_v3 = vld [vmem:[#allocation2 + $0x38] sm:$0xff] }
 0x15e   : > { %2468 = vmatprep.subr.bf16.mxu0 %v3531_v4 }
 0x160   : > { %2257 = vmatpush1.bf16.msra.mxu1 %v3526_v5 }
 0x161   : > { %2469 = vmatpush1.bf16.msra.mxu0 %v3529_v6  ;;  %2258 = vmatprep.subr.bf16.mxu1 %v3534_v7 }
 0x162   : > { %2470 = vmatprep.subr.bf16.mxu0 %v3537_v8 }
 0x164   : > { %2259 = vmatpush1.bf16.msra.mxu1 %v3532_v9  ;;  %v2529_v9 = vlaneseq (!%p3005_p12) }
 0x165   : > { %2471 = vmatpush1.bf16.msra.mxu0 %v3535_v10  ;;  %2260 = vmatprep.subr.bf16.mxu1 %v3540_v12  ;;  %v2527_v12 = vld [vmem:[%s324_s22] sm:$0x3] (!%p3005_p12) }
 0x166   : > { %2472 = vmatprep.subr.bf16.mxu0 %v3543_v13  ;;  %v2530_v10 = vshrl.u32 (!%p3005_p12), %v2529_v9, 7 }
 0x168   : > { %2261 = vmatpush1.bf16.msra.mxu1 %v3538_v17  ;;  %v2531_v17 = vsub.s32 (!%p3005_p12), 0, %v2530_v10 }
 0x169   : > { %2473 = vmatpush1.bf16.msra.mxu0 %v3541_v18  ;;  %2262 = vmatprep.subr.bf16.mxu1 %v3546_v19  ;;  %v2535_v19 = vsub.s32 (!%p3005_p12), 1, %v2530_v10 }
 0x16a   : > { %2474 = vmatprep.subr.bf16.mxu0 %v3549_v20 }
 0x16c   : > { %2263 = vmatpush1.bf16.msra.mxu1 %v3544_v21 }
 0x16d   : > { %2475 = vmatpush1.bf16.msra.mxu0 %v3547_v22  ;;  %2264 = vmatprep.subr.bf16.mxu1 %v3552_v11  ;;  %v2532_v11 = vrot.slane (!%p3005_p12), %v2527_v12, %v2531_v17 }
 0x16e   : > { %2476 = vmatprep.subr.bf16.mxu0 %v3555_v14  ;;  %v2536_v14 = vrot.slane (!%p3005_p12), %v2527_v12, %v2535_v19 }
 0x170   : > { %2265 = vmatpush1.bf16.msra.mxu1 %v3550_v15 }
 0x171   : > { %2477 = vmatpush1.bf16.msra.mxu0 %v3553_v16 }
 0x173   : > { %2267 = vmatmul.mubr.bf16.vlgmr.msra.gmra.mrb[0].mxu1 %v2723_v31 }
 0x174   : > { %2479 = vmatmul.mubr.bf16.vlgmr.msra.gmra.mrb[0].mxu0 %v2731_v32  ;;  %2276 = vmatprep.mubr.bf16.mxu1 %v2740_v33 }
 0x175   : > { %2488 = vmatprep.mubr.bf16.mxu0 %v2748_v34 }
 0x17b   : > { %2277 = vmatmul.mubr.bf16.gmra.mrb[4].mxu1 %v2739_v35 }
 0x17c   : > { %2489 = vmatmul.mubr.bf16.gmra.mrb[4].mxu0 %v2747_v36 }
 0x246   : > { %v2268_v37 = vpop.f32.mrb[0].mxu1 }
 0x247   : > { %v2480_v39 = vpop.f32.mrb[0].mxu0  ;;  %v2270_v25 = vpop.f32.mrb[1].mxu1 }
 0x248   : > { %v3014_v40 = vadd.f32 %v2480_v39, %v2268_v37  ;;  %v2482_v41 = vpop.f32.mrb[1].mxu0  ;;  %v2272_v30 = vpop.f32.mrb[2].mxu1 }
 0x249   : > { %v3015_v29 = vadd.f32 %v2482_v41, %v2270_v25  ;;  %v2484_v43 = vpop.f32.mrb[2].mxu0  ;;  %v2274_v46 = vpop.f32.mrb[3].mxu1 }
 0x24a   : > { %v2499_v44 = vadd.f32 %v3014_v40, %v339_v38  ;;  %v3016_v45 = vadd.f32 %v2484_v43, %v2272_v30  ;;  %v2486_v48 = vpop.f32.mrb[3].mxu0 }
 0x24b   : > { %v2500_v49 = vadd.f32 %v3015_v29, %v340_v28  ;;  %v3017_v50 = vadd.f32 %v2486_v48, %v2274_v46 }
 0x24c   : > { %2507 = vst [vmem:[#allocation2] sm:$0xff] %v2499_v44  ;;  %v2501_v51 = vadd.f32 %v3016_v45, %v341_v42 }
 0x24d   : > { %2508 = vst [vmem:[#allocation2 + $0x8] sm:$0xff] %v2500_v49  ;;  %v2502_v52 = vadd.f32 %v3017_v50, %v342_v47 }
 0x24e   : > { %2509 = vst [vmem:[#allocation2 + $0x10] sm:$0xff] %v2501_v51  ;;  %v2278_v53 = vpop.f32.mrb[4].mxu1 }
 0x24f   : > { %2510 = vst [vmem:[#allocation2 + $0x18] sm:$0xff] %v2502_v52  ;;  %v2490_v55 = vpop.f32.mrb[4].mxu0  ;;  %v2280_v57 = vpop.f32.mrb[5].mxu1 }
 0x250   : > { %v3018_v56 = vadd.f32 %v2490_v55, %v2278_v53  ;;  %v2492_v59 = vpop.f32.mrb[5].mxu0  ;;  %v2282_v61 = vpop.f32.mrb[6].mxu1 }
 0x251   : > { %v3019_v60 = vadd.f32 %v2492_v59, %v2280_v57  ;;  %v2494_v63 = vpop.f32.mrb[6].mxu0  ;;  %v2284_v2 = vpop.f32.mrb[7].mxu1  ;;  %2518 = sbr.rel (%p3005_p12) target bundleno = 610 (0x262), region = 67 }
 0x252   : > { %v2503_v0 = vadd.f32 %v3018_v56, %v343_v54  ;;  %v3020_v1 = vadd.f32 %v2494_v63, %v2282_v61  ;;  %v2496_v4 = vpop.f32.mrb[7].mxu0 }
 0x253   : > { %v2504_v5 = vadd.f32 %v3019_v60, %v344_v58  ;;  %v3021_v6 = vadd.f32 %v2496_v4, %v2284_v2  ;;  %v2519_v13 = vld [vmem:[#allocation2] sm:$0xff] (!%p3005_p12) }
 0x254   : > { %2511 = vst [vmem:[#allocation2 + $0x20] sm:$0xff] %v2503_v0  ;;  %v2505_v7 = vadd.f32 %v3020_v1, %v345_v62  ;;  %v2520_v18 = vld [vmem:[#allocation2 + $0x8] sm:$0xff] (!%p3005_p12)  ;;  %v2539_v24 = vadd.f32 (!%p3005_p12), %v2532_v11, %v2519_v13 }
 0x255   : > { %2512 = vst [vmem:[#allocation2 + $0x28] sm:$0xff] %v2504_v5  ;;  %v2506_v8 = vadd.f32 %v3021_v6, %v346_v3  ;;  %v2521_v20 = vld [vmem:[#allocation2 + $0x10] sm:$0xff] (!%p3005_p12)  ;;  %v2540_v26 = vadd.f32 (!%p3005_p12), %v2536_v14, %v2520_v18 }
 0x256   : > { %2513 = vst [vmem:[#allocation2 + $0x30] sm:$0xff] %v2505_v7  ;;  %v2522_v21 = vld [vmem:[#allocation2 + $0x18] sm:$0xff] (!%p3005_p12)  ;;  %v2541_v27 = vadd.f32 (!%p3005_p12), %v2532_v11, %v2521_v20  ;;  %2547 = vst [vmem:[%s3952_s27] sm:$0xff] (!%p3005_p12), %v2539_v24 }
 0x257   : > { %2514 = vst [vmem:[#allocation2 + $0x38] sm:$0xff] %v2506_v8  ;;  %v2542_v31 = vadd.f32 (!%p3005_p12), %v2536_v14, %v2522_v21  ;;  %2548 = vst [vmem:[%s3952_s27 + $0x8] sm:$0xff] (!%p3005_p12), %v2540_v26 }
 0x258   : > { %2549 = vst [vmem:[%s3952_s27 + $0x10] sm:$0xff] %v2541_v27 }
 0x259   : > { %2550 = vst [vmem:[%s3952_s27 + $0x18] sm:$0xff] %v2542_v31 }
 0x25b   : > { %v2523_v22 = vld [vmem:[#allocation2 + $0x20] sm:$0xff] }
 0x25c   : > { %v2524_v15 = vld [vmem:[#allocation2 + $0x28] sm:$0xff]  ;;  %v2543_v32 = vadd.f32 %v2532_v11, %v2523_v22 }
 0x25d   : > { %v2525_v16 = vld [vmem:[#allocation2 + $0x30] sm:$0xff]  ;;  %v2544_v33 = vadd.f32 %v2536_v14, %v2524_v15 }
 0x25e   : > { %v2526_v23 = vld [vmem:[#allocation2 + $0x38] sm:$0xff]  ;;  %v2545_v34 = vadd.f32 %v2532_v11, %v2525_v16  ;;  %2551 = vst [vmem:[%s3952_s27 + $0x20] sm:$0xff] %v2543_v32 }
 0x25f   : > { %v2546_v35 = vadd.f32 %v2536_v14, %v2526_v23  ;;  %2552 = vst [vmem:[%s3952_s27 + $0x28] sm:$0xff] %v2544_v33 }
 0x260   : > { %2553 = vst [vmem:[%s3952_s27 + $0x30] sm:$0xff] %v2545_v34 }
 0x261   : > { %2554 = vst [vmem:[%s3952_s27 + $0x38] sm:$0xff] %v2546_v35 }
 0x262 PF: > { %p4372_p11 = scmp.ne.s32.totalorder %s4370_s14, 0 }
 0x263   : > { %s3013_s19 = sshll.u32 (%p4372_p11), %s3670_s20, 4  ;;  %v2583_v39 = vld [vmem:[%s3952_s27 + $0x18] sm:$0xff] (%p4372_p11) }
 0x264   : > { %2561 = sbr.rel (!%p4372_p11) target bundleno = 619 (0x26b), region = 71  ;;  %s2564_s5 = scalar_lea.vmem (%p4372_p11), %s4358_s3, %s3013_s19 }
 0x265   : > { %v2585_v40 = vld [vmem:[%s3952_s27 + $0x20] sm:$0xff] (%p4372_p11)  ;;  %2584 = vst [vmem:[%s2564_s5 + $0x28] sm:$0xff] (%p4372_p11), %v2583_v39 }
 0x266   : > { %v2587_v25 = vld [vmem:[%s3952_s27 + $0x28] sm:$0xff] (%p4372_p11)  ;;  %2586 = vst [vmem:[%s2564_s5 + $0x40] sm:$0xff] (%p4372_p11), %v2585_v40 }
 0x267   : > { %v2577_v36 = vld [vmem:[%s3952_s27] sm:$0xff] (%p4372_p11)  ;;  %2588 = vst [vmem:[%s2564_s5 + $0x48] sm:$0xff] (%p4372_p11), %v2587_v25  ;;  %v2589_v28 = vld [vmem:[%s3952_s27 + $0x30] sm:$0xff] (%p4372_p11) }
 0x268   : > { %v2579_v37 = vld [vmem:[%s3952_s27 + $0x8] sm:$0xff] (%p4372_p11)  ;;  %2578 = vst [vmem:[%s2564_s5] sm:$0xff] (%p4372_p11), %v2577_v36  ;;  %v2591_v41 = vld [vmem:[%s3952_s27 + $0x38] sm:$0xff] (%p4372_p11)  ;;  %2590 = vst [vmem:[%s2564_s5 + $0x60] sm:$0xff] (%p4372_p11), %v2589_v28 }
 0x269   : > { %v2581_v38 = vld [vmem:[%s3952_s27 + $0x10] sm:$0xff] (%p4372_p11)  ;;  %2580 = vst [vmem:[%s2564_s5 + $0x8] sm:$0xff] (%p4372_p11), %v2579_v37  ;;  %2592 = vst [vmem:[%s2564_s5 + $0x68] sm:$0xff] (%p4372_p11), %v2591_v41 }
 0x26a   : > { %2582 = vst [vmem:[%s2564_s5 + $0x20] sm:$0xff] (%p4372_p11), %v2581_v38 }
 0x26b PF: > { %s16_s23 = sadd.s32 1, %s3682_s23   ;;  %s4373_s20 = sld [smem:[#allocation11_spill]] }
 0x26c   : > { %p13_p13 = scmp.ge.s32.totalorder %s16_s23, 20   ;;  %s4374_s6 = sld [smem:[#allocation8_spill]] }
 0x26d   : > { %s4375_s25 = sld [smem:[#allocation9_spill]]  ;;  %s4376_s22 = sld [smem:[#allocation10_spill]] }
 0x26e   : > { %s4377_s12 = smov %s3642_s13  ;;  %s4378_s13 = smov %s3812_s11 }
 0x26f   : > { %s4379_s14 = smov %s3650_s15  ;;  %s4380_s15 = smov %s3654_s16 }
 0x270   : > { %s4381_s16 = smov %s3804_s8  ;;  %s4382_s17 = smov %s3662_s18 }
 0x271   : > { %s4383_s18 = smov %s4373_s20  ;;  %s4384_s19 = smov %s3674_s21 }
 0x272   : > { %s4385_s20 = smov %s4374_s6  ;;  %15 = sbr.rel (!%p13_p13) target bundleno = 9 (0x9), region = 137 }
 0x273   : > { %s4386_s21 = smov %s4375_s25 }
 0x279   :  { %2608 = vsyncpa [#allocation5], 1 }
 0x27a   :  { %2610 = vsyncpa [#allocation5 + $0x1], 1 }

// kernel: afnet_forward.10
= control target key start
LH: loop header
LB: loop body
LE: loop exit
PB: predicated region body
PF: predicated region fallthrough
CT: control target
= control target key end

     0   :  { %s3519_s12 = smov 0   ;;  %s3521_s13 = smov 0   ;;  %s4125_s0 = inlined_call_operand.vmem [shape: bf16[128,4608], index: 0, kind: input, shape index: {}]   ;;  %s4126_s1 = inlined_call_operand.vmem [shape: bf16[4608,128], index: 1, kind: input, shape index: {}]   ;;  %s4127_s2 = inlined_call_operand.vmem [shape: f32[1,128], index: 2, kind: input, shape index: {}]   ;;  %s4128_s3 = inlined_call_operand.vmem [shape: f32[128,128], index: 3, kind: output, shape index: {}]  }
   0x1   :  { %s3523_s14 = smov 0   ;;  %s3525_s15 = smov 0  }
   0x2   :  { %s3527_s16 = smov 0  }
   0x3 LB: > { %s22_s17 = sadd.s32 1, %s3492_s15  ;;  %p39_p1 = scmp.ne.s32.totalorder %s3484_s13, %s3480_s12  ;;  %s3496_s16 = sphi %s3527_s16, %s13_s16   ;;  %s3492_s15 = sphi %s3525_s15, %s4132_s15   ;;  %s3488_s14 = sphi %s3523_s14, %s4131_s14   ;;  %s3484_s13 = sphi %s3521_s13, %s4130_s13   ;;  %s3480_s12 = sphi %s3519_s12, %s4129_s12  }
   0x4   : > { %p23_p0 = scmp.ge.s32.totalorder %s22_s17, 3  ;;  %p40_p2 = scmp.eq.s32.totalorder %s3496_s16, 0 }
   0x5   : > { %s32_s19 = sadd.s32 1, %s3484_s13  ;;  %p2588_p5 = scmp.ge.s32.totalorder %s3496_s16, 3 }
   0x6   : > { %s4134_s17 = smov (%p23_p0, %s22_s17), 0  ;;  %p41_p3 = por %p40_p2, %p39_p1 }
   0x7   : > { %s29_s18 = ssub.s32 %s3492_s15, %s4134_s17  ;;  %151 = sbr.rel (%p2588_p5) target bundleno = 67 (0x43), region = 20 }
   0x8   : > { %p30_p4 = scmp.eq.s32.totalorder %s29_s18, 0 }
   0xa   : > { %s3554_s20 = scalar_select %p30_p4, %s3484_s13, %s32_s19  }
   0xe   : > { %154 = sbr.rel (!%p41_p3) target bundleno = 67 (0x43), region = 24  ;;  %s156_s21 = sand.u32 (%p41_p3), 1, %s3484_s13  }
   0xf   : > { %s2790_s22 = smul.u32 (%p41_p3), 48, %s3492_s15 }
  0x10   : > { %s3175_s23 = smul.u32 (%p41_p3), 768, %s156_s21 }
  0x11   : > { %s3562_s26 = scalar_lea.vmem (%p41_p3), %s4125_s0, %s2790_s22 }
  0x12   : > { %v174_v0 = vld [vmem:[%s3562_s26] sm:$0xff] (%p41_p3)  ;;  %v176_v1 = vld [vmem:[%s3562_s26 + $0x8] sm:$0xff] (%p41_p3)  ;;  %v178_v2 = vld [vmem:[%s3562_s26 + $0x10] sm:$0xff] (%p41_p3)  ;;  %s3567_s27 = scalar_lea.vmem (%p41_p3), [#allocation3], %s3175_s23 }
  0x13   : > { %175 = vst [vmem:[%s3567_s27] sm:$0xff] (%p41_p3), %v174_v0  ;;  %177 = vst [vmem:[%s3567_s27 + $0x8] sm:$0xff] (%p41_p3), %v176_v1  ;;  %v180_v3 = vld [vmem:[%s3562_s26 + $0x18] sm:$0xff] (%p41_p3)  ;;  %v182_v4 = vld [vmem:[%s3562_s26 + $0x20] sm:$0xff] (%p41_p3) }
  0x14   : > { %179 = vst [vmem:[%s3567_s27 + $0x10] sm:$0xff] (%p41_p3), %v178_v2  ;;  %v184_v5 = vld [vmem:[%s3562_s26 + $0x28] sm:$0xff] (%p41_p3)  ;;  %181 = vst [vmem:[%s3567_s27 + $0x18] sm:$0xff] (%p41_p3), %v180_v3  ;;  %v186_v6 = vld [vmem:[%s3562_s26 + $0x90] sm:$0xff] (%p41_p3) }
  0x15   : > { %183 = vst [vmem:[%s3567_s27 + $0x20] sm:$0xff] %v182_v4  ;;  %185 = vst [vmem:[%s3567_s27 + $0x28] sm:$0xff] %v184_v5  ;;  %v188_v7 = vld [vmem:[%s3562_s26 + $0x98] sm:$0xff]  ;;  %v190_v8 = vld [vmem:[%s3562_s26 + $0xa0] sm:$0xff] }
  0x16   : > { %187 = vst [vmem:[%s3567_s27 + $0x30] sm:$0xff] %v186_v6  ;;  %189 = vst [vmem:[%s3567_s27 + $0x38] sm:$0xff] %v188_v7  ;;  %v192_v9 = vld [vmem:[%s3562_s26 + $0xa8] sm:$0xff]  ;;  %v194_v10 = vld [vmem:[%s3562_s26 + $0xb0] sm:$0xff] }
  0x17   : > { %191 = vst [vmem:[%s3567_s27 + $0x40] sm:$0xff] %v190_v8  ;;  %v196_v11 = vld [vmem:[%s3562_s26 + $0xb8] sm:$0xff]  ;;  %193 = vst [vmem:[%s3567_s27 + $0x48] sm:$0xff] %v192_v9  ;;  %v198_v12 = vld [vmem:[%s3562_s26 + $0x120] sm:$0xff] }
  0x18   : > { %195 = vst [vmem:[%s3567_s27 + $0x50] sm:$0xff] %v194_v10  ;;  %197 = vst [vmem:[%s3567_s27 + $0x58] sm:$0xff] %v196_v11  ;;  %v200_v13 = vld [vmem:[%s3562_s26 + $0x128] sm:$0xff]  ;;  %v202_v14 = vld [vmem:[%s3562_s26 + $0x130] sm:$0xff] }
  0x19   : > { %199 = vst [vmem:[%s3567_s27 + $0x60] sm:$0xff] %v198_v12  ;;  %201 = vst [vmem:[%s3567_s27 + $0x68] sm:$0xff] %v200_v13  ;;  %v204_v15 = vld [vmem:[%s3562_s26 + $0x138] sm:$0xff]  ;;  %v206_v16 = vld [vmem:[%s3562_s26 + $0x140] sm:$0xff] }
  0x1a   : > { %203 = vst [vmem:[%s3567_s27 + $0x70] sm:$0xff] %v202_v14  ;;  %v208_v17 = vld [vmem:[%s3562_s26 + $0x148] sm:$0xff]  ;;  %205 = vst [vmem:[%s3567_s27 + $0x78] sm:$0xff] %v204_v15  ;;  %v210_v18 = vld [vmem:[%s3562_s26 + $0x1b0] sm:$0xff] }
  0x1b   : > { %207 = vst [vmem:[%s3567_s27 + $0x80] sm:$0xff] %v206_v16  ;;  %209 = vst [vmem:[%s3567_s27 + $0x88] sm:$0xff] %v208_v17  ;;  %v212_v19 = vld [vmem:[%s3562_s26 + $0x1b8] sm:$0xff]  ;;  %v214_v20 = vld [vmem:[%s3562_s26 + $0x1c0] sm:$0xff] }
  0x1c   : > { %211 = vst [vmem:[%s3567_s27 + $0x90] sm:$0xff] %v210_v18  ;;  %213 = vst [vmem:[%s3567_s27 + $0x98] sm:$0xff] %v212_v19  ;;  %v216_v21 = vld [vmem:[%s3562_s26 + $0x1c8] sm:$0xff]  ;;  %v218_v22 = vld [vmem:[%s3562_s26 + $0x1d0] sm:$0xff] }
  0x1d   : > { %215 = vst [vmem:[%s3567_s27 + $0xa0] sm:$0xff] %v214_v20  ;;  %v220_v23 = vld [vmem:[%s3562_s26 + $0x1d8] sm:$0xff]  ;;  %217 = vst [vmem:[%s3567_s27 + $0xa8] sm:$0xff] %v216_v21  ;;  %v222_v24 = vld [vmem:[%s3562_s26 + $0x240] sm:$0xff] }
  0x1e   : > { %219 = vst [vmem:[%s3567_s27 + $0xb0] sm:$0xff] %v218_v22  ;;  %221 = vst [vmem:[%s3567_s27 + $0xb8] sm:$0xff] %v220_v23  ;;  %v224_v25 = vld [vmem:[%s3562_s26 + $0x248] sm:$0xff]  ;;  %v226_v26 = vld [vmem:[%s3562_s26 + $0x250] sm:$0xff] }
  0x1f   : > { %223 = vst [vmem:[%s3567_s27 + $0xc0] sm:$0xff] %v222_v24  ;;  %225 = vst [vmem:[%s3567_s27 + $0xc8] sm:$0xff] %v224_v25  ;;  %v228_v27 = vld [vmem:[%s3562_s26 + $0x258] sm:$0xff]  ;;  %v230_v28 = vld [vmem:[%s3562_s26 + $0x260] sm:$0xff] }
  0x20   : > { %227 = vst [vmem:[%s3567_s27 + $0xd0] sm:$0xff] %v226_v26  ;;  %v232_v29 = vld [vmem:[%s3562_s26 + $0x268] sm:$0xff]  ;;  %229 = vst [vmem:[%s3567_s27 + $0xd8] sm:$0xff] %v228_v27  ;;  %v234_v30 = vld [vmem:[%s3562_s26 + $0x2d0] sm:$0xff] }
  0x21   : > { %231 = vst [vmem:[%s3567_s27 + $0xe0] sm:$0xff] %v230_v28  ;;  %233 = vst [vmem:[%s3567_s27 + $0xe8] sm:$0xff] %v232_v29  ;;  %v236_v31 = vld [vmem:[%s3562_s26 + $0x2d8] sm:$0xff]  ;;  %v238_v32 = vld [vmem:[%s3562_s26 + $0x2e0] sm:$0xff] }
  0x22   : > { %235 = vst [vmem:[%s3567_s27 + $0xf0] sm:$0xff] %v234_v30  ;;  %237 = vst [vmem:[%s3567_s27 + $0xf8] sm:$0xff] %v236_v31  ;;  %v240_v33 = vld [vmem:[%s3562_s26 + $0x2e8] sm:$0xff]  ;;  %v242_v34 = vld [vmem:[%s3562_s26 + $0x2f0] sm:$0xff] }
  0x23   : > { %239 = vst [vmem:[%s3567_s27 + $0x100] sm:$0xff] %v238_v32  ;;  %v244_v35 = vld [vmem:[%s3562_s26 + $0x2f8] sm:$0xff]  ;;  %241 = vst [vmem:[%s3567_s27 + $0x108] sm:$0xff] %v240_v33  ;;  %v246_v36 = vld [vmem:[%s3562_s26 + $0x360] sm:$0xff] }
  0x24   : > { %243 = vst [vmem:[%s3567_s27 + $0x110] sm:$0xff] %v242_v34  ;;  %245 = vst [vmem:[%s3567_s27 + $0x118] sm:$0xff] %v244_v35  ;;  %v248_v37 = vld [vmem:[%s3562_s26 + $0x368] sm:$0xff]  ;;  %v250_v38 = vld [vmem:[%s3562_s26 + $0x370] sm:$0xff] }
  0x25   : > { %247 = vst [vmem:[%s3567_s27 + $0x120] sm:$0xff] %v246_v36  ;;  %249 = vst [vmem:[%s3567_s27 + $0x128] sm:$0xff] %v248_v37  ;;  %v252_v39 = vld [vmem:[%s3562_s26 + $0x378] sm:$0xff]  ;;  %v254_v40 = vld [vmem:[%s3562_s26 + $0x380] sm:$0xff] }
  0x26   : > { %251 = vst [vmem:[%s3567_s27 + $0x130] sm:$0xff] %v250_v38  ;;  %v256_v41 = vld [vmem:[%s3562_s26 + $0x388] sm:$0xff]  ;;  %253 = vst [vmem:[%s3567_s27 + $0x138] sm:$0xff] %v252_v39  ;;  %v258_v42 = vld [vmem:[%s3562_s26 + $0x3f0] sm:$0xff] }
  0x27   : > { %255 = vst [vmem:[%s3567_s27 + $0x140] sm:$0xff] %v254_v40  ;;  %257 = vst [vmem:[%s3567_s27 + $0x148] sm:$0xff] %v256_v41  ;;  %v260_v43 = vld [vmem:[%s3562_s26 + $0x3f8] sm:$0xff]  ;;  %v262_v44 = vld [vmem:[%s3562_s26 + $0x400] sm:$0xff] }
  0x28   : > { %259 = vst [vmem:[%s3567_s27 + $0x150] sm:$0xff] %v258_v42  ;;  %261 = vst [vmem:[%s3567_s27 + $0x158] sm:$0xff] %v260_v43  ;;  %v264_v45 = vld [vmem:[%s3562_s26 + $0x408] sm:$0xff]  ;;  %v266_v46 = vld [vmem:[%s3562_s26 + $0x410] sm:$0xff] }
  0x29   : > { %263 = vst [vmem:[%s3567_s27 + $0x160] sm:$0xff] %v262_v44  ;;  %v268_v47 = vld [vmem:[%s3562_s26 + $0x418] sm:$0xff]  ;;  %265 = vst [vmem:[%s3567_s27 + $0x168] sm:$0xff] %v264_v45  ;;  %v270_v48 = vld [vmem:[%s3562_s26 + $0x480] sm:$0xff] }
  0x2a   : > { %267 = vst [vmem:[%s3567_s27 + $0x170] sm:$0xff] %v266_v46  ;;  %269 = vst [vmem:[%s3567_s27 + $0x178] sm:$0xff] %v268_v47  ;;  %v272_v49 = vld [vmem:[%s3562_s26 + $0x488] sm:$0xff]  ;;  %v274_v50 = vld [vmem:[%s3562_s26 + $0x490] sm:$0xff] }
  0x2b   : > { %271 = vst [vmem:[%s3567_s27 + $0x180] sm:$0xff] %v270_v48  ;;  %273 = vst [vmem:[%s3567_s27 + $0x188] sm:$0xff] %v272_v49  ;;  %v276_v51 = vld [vmem:[%s3562_s26 + $0x498] sm:$0xff]  ;;  %v278_v52 = vld [vmem:[%s3562_s26 + $0x4a0] sm:$0xff] }
  0x2c   : > { %275 = vst [vmem:[%s3567_s27 + $0x190] sm:$0xff] %v274_v50  ;;  %v280_v53 = vld [vmem:[%s3562_s26 + $0x4a8] sm:$0xff]  ;;  %277 = vst [vmem:[%s3567_s27 + $0x198] sm:$0xff] %v276_v51  ;;  %v282_v54 = vld [vmem:[%s3562_s26 + $0x510] sm:$0xff] }
  0x2d   : > { %279 = vst [vmem:[%s3567_s27 + $0x1a0] sm:$0xff] %v278_v52  ;;  %281 = vst [vmem:[%s3567_s27 + $0x1a8] sm:$0xff] %v280_v53  ;;  %v284_v55 = vld [vmem:[%s3562_s26 + $0x518] sm:$0xff]  ;;  %v286_v56 = vld [vmem:[%s3562_s26 + $0x520] sm:$0xff] }
  0x2e   : > { %283 = vst [vmem:[%s3567_s27 + $0x1b0] sm:$0xff] %v282_v54  ;;  %285 = vst [vmem:[%s3567_s27 + $0x1b8] sm:$0xff] %v284_v55  ;;  %v288_v57 = vld [vmem:[%s3562_s26 + $0x528] sm:$0xff]  ;;  %v290_v58 = vld [vmem:[%s3562_s26 + $0x530] sm:$0xff] }
  0x2f   : > { %287 = vst [vmem:[%s3567_s27 + $0x1c0] sm:$0xff] %v286_v56  ;;  %v292_v59 = vld [vmem:[%s3562_s26 + $0x538] sm:$0xff]  ;;  %289 = vst [vmem:[%s3567_s27 + $0x1c8] sm:$0xff] %v288_v57  ;;  %v294_v60 = vld [vmem:[%s3562_s26 + $0x5a0] sm:$0xff] }
  0x30   : > { %291 = vst [vmem:[%s3567_s27 + $0x1d0] sm:$0xff] %v290_v58  ;;  %293 = vst [vmem:[%s3567_s27 + $0x1d8] sm:$0xff] %v292_v59  ;;  %v296_v61 = vld [vmem:[%s3562_s26 + $0x5a8] sm:$0xff]  ;;  %v298_v62 = vld [vmem:[%s3562_s26 + $0x5b0] sm:$0xff] }
  0x31   : > { %295 = vst [vmem:[%s3567_s27 + $0x1e0] sm:$0xff] %v294_v60  ;;  %297 = vst [vmem:[%s3567_s27 + $0x1e8] sm:$0xff] %v296_v61  ;;  %v300_v63 = vld [vmem:[%s3562_s26 + $0x5b8] sm:$0xff]  ;;  %v302_v0 = vld [vmem:[%s3562_s26 + $0x5c0] sm:$0xff] }
  0x32   : > { %299 = vst [vmem:[%s3567_s27 + $0x1f0] sm:$0xff] %v298_v62  ;;  %v304_v1 = vld [vmem:[%s3562_s26 + $0x5c8] sm:$0xff]  ;;  %301 = vst [vmem:[%s3567_s27 + $0x1f8] sm:$0xff] %v300_v63  ;;  %v306_v2 = vld [vmem:[%s3562_s26 + $0x630] sm:$0xff] }
  0x33   : > { %303 = vst [vmem:[%s3567_s27 + $0x200] sm:$0xff] %v302_v0  ;;  %305 = vst [vmem:[%s3567_s27 + $0x208] sm:$0xff] %v304_v1  ;;  %v308_v3 = vld [vmem:[%s3562_s26 + $0x638] sm:$0xff]  ;;  %v310_v4 = vld [vmem:[%s3562_s26 + $0x640] sm:$0xff] }
  0x34   : > { %307 = vst [vmem:[%s3567_s27 + $0x210] sm:$0xff] %v306_v2  ;;  %309 = vst [vmem:[%s3567_s27 + $0x218] sm:$0xff] %v308_v3  ;;  %v312_v5 = vld [vmem:[%s3562_s26 + $0x648] sm:$0xff]  ;;  %v314_v6 = vld [vmem:[%s3562_s26 + $0x650] sm:$0xff] }
  0x35   : > { %311 = vst [vmem:[%s3567_s27 + $0x220] sm:$0xff] %v310_v4  ;;  %v316_v7 = vld [vmem:[%s3562_s26 + $0x658] sm:$0xff]  ;;  %313 = vst [vmem:[%s3567_s27 + $0x228] sm:$0xff] %v312_v5  ;;  %v318_v8 = vld [vmem:[%s3562_s26 + $0x6c0] sm:$0xff] }
  0x36   : > { %315 = vst [vmem:[%s3567_s27 + $0x230] sm:$0xff] %v314_v6  ;;  %317 = vst [vmem:[%s3567_s27 + $0x238] sm:$0xff] %v316_v7  ;;  %v320_v9 = vld [vmem:[%s3562_s26 + $0x6c8] sm:$0xff]  ;;  %v322_v10 = vld [vmem:[%s3562_s26 + $0x6d0] sm:$0xff] }
  0x37   : > { %319 = vst [vmem:[%s3567_s27 + $0x240] sm:$0xff] %v318_v8  ;;  %321 = vst [vmem:[%s3567_s27 + $0x248] sm:$0xff] %v320_v9  ;;  %v324_v11 = vld [vmem:[%s3562_s26 + $0x6d8] sm:$0xff]  ;;  %v326_v12 = vld [vmem:[%s3562_s26 + $0x6e0] sm:$0xff] }
  0x38   : > { %323 = vst [vmem:[%s3567_s27 + $0x250] sm:$0xff] %v322_v10  ;;  %v328_v13 = vld [vmem:[%s3562_s26 + $0x6e8] sm:$0xff]  ;;  %325 = vst [vmem:[%s3567_s27 + $0x258] sm:$0xff] %v324_v11  ;;  %v330_v14 = vld [vmem:[%s3562_s26 + $0x750] sm:$0xff] }
  0x39   : > { %327 = vst [vmem:[%s3567_s27 + $0x260] sm:$0xff] %v326_v12  ;;  %329 = vst [vmem:[%s3567_s27 + $0x268] sm:$0xff] %v328_v13  ;;  %v332_v15 = vld [vmem:[%s3562_s26 + $0x758] sm:$0xff]  ;;  %v334_v16 = vld [vmem:[%s3562_s26 + $0x760] sm:$0xff] }
  0x3a   : > { %331 = vst [vmem:[%s3567_s27 + $0x270] sm:$0xff] %v330_v14  ;;  %333 = vst [vmem:[%s3567_s27 + $0x278] sm:$0xff] %v332_v15  ;;  %v336_v17 = vld [vmem:[%s3562_s26 + $0x768] sm:$0xff]  ;;  %v338_v18 = vld [vmem:[%s3562_s26 + $0x770] sm:$0xff] }
  0x3b   : > { %335 = vst [vmem:[%s3567_s27 + $0x280] sm:$0xff] %v334_v16  ;;  %v340_v19 = vld [vmem:[%s3562_s26 + $0x778] sm:$0xff]  ;;  %337 = vst [vmem:[%s3567_s27 + $0x288] sm:$0xff] %v336_v17  ;;  %v342_v20 = vld [vmem:[%s3562_s26 + $0x7e0] sm:$0xff] }
  0x3c   : > { %339 = vst [vmem:[%s3567_s27 + $0x290] sm:$0xff] %v338_v18  ;;  %341 = vst [vmem:[%s3567_s27 + $0x298] sm:$0xff] %v340_v19  ;;  %v344_v21 = vld [vmem:[%s3562_s26 + $0x7e8] sm:$0xff]  ;;  %v346_v22 = vld [vmem:[%s3562_s26 + $0x7f0] sm:$0xff] }
  0x3d   : > { %343 = vst [vmem:[%s3567_s27 + $0x2a0] sm:$0xff] %v342_v20  ;;  %345 = vst [vmem:[%s3567_s27 + $0x2a8] sm:$0xff] %v344_v21  ;;  %v348_v23 = vld [vmem:[%s3562_s26 + $0x7f8] sm:$0xff]  ;;  %v350_v24 = vld [vmem:[%s3562_s26 + $0x800] sm:$0xff] }
  0x3e   : > { %347 = vst [vmem:[%s3567_s27 + $0x2b0] sm:$0xff] %v346_v22  ;;  %v352_v25 = vld [vmem:[%s3562_s26 + $0x808] sm:$0xff]  ;;  %349 = vst [vmem:[%s3567_s27 + $0x2b8] sm:$0xff] %v348_v23  ;;  %v354_v26 = vld [vmem:[%s3562_s26 + $0x870] sm:$0xff] }
  0x3f   : > { %351 = vst [vmem:[%s3567_s27 + $0x2c0] sm:$0xff] %v350_v24  ;;  %353 = vst [vmem:[%s3567_s27 + $0x2c8] sm:$0xff] %v352_v25  ;;  %v356_v27 = vld [vmem:[%s3562_s26 + $0x878] sm:$0xff]  ;;  %v358_v28 = vld [vmem:[%s3562_s26 + $0x880] sm:$0xff] }
  0x40   : > { %355 = vst [vmem:[%s3567_s27 + $0x2d0] sm:$0xff] %v354_v26  ;;  %357 = vst [vmem:[%s3567_s27 + $0x2d8] sm:$0xff] %v356_v27  ;;  %v360_v29 = vld [vmem:[%s3562_s26 + $0x888] sm:$0xff]  ;;  %v362_v30 = vld [vmem:[%s3562_s26 + $0x890] sm:$0xff] }
  0x41   : > { %359 = vst [vmem:[%s3567_s27 + $0x2e0] sm:$0xff] %v358_v28  ;;  %v364_v31 = vld [vmem:[%s3562_s26 + $0x898] sm:$0xff]  ;;  %361 = vst [vmem:[%s3567_s27 + $0x2e8] sm:$0xff] %v360_v29 }
  0x42   : > { %363 = vst [vmem:[%s3567_s27 + $0x2f0] sm:$0xff] %v362_v30  ;;  %365 = vst [vmem:[%s3567_s27 + $0x2f8] sm:$0xff] %v364_v31 }
  0x43 PF: > { %p2590_p6 = scmp.ge.s32.totalorder %s3496_s16, 1  ;;  %p382_p7 = scmp.lt.s32.totalorder %s3496_s16, 4 }
  0x45   : > { %p383_p8 = pnand %p2590_p6, %p382_p7 }
  0x46   : > { %s389_s28 = sand.u32 (!%p383_p8), 1, %s3480_s12   ;;  %s423_s29 = smul.u32 (!%p383_p8), 192, %s3488_s14 }
  0x47   : > { %386 = sbr.rel (%p383_p8) target bundleno = 540 (0x21c), region = 51  ;;  %p2592_p10 = scmp.ne.s32.totalorder (!%p383_p8), %s3488_s14, 0 }
  0x48   : > { %s3176_s30 = smul.u32 (!%p383_p8), 768, %s389_s28  ;;  %p424_p9 = scmp.lt.s32.totalorder (!%p383_p8), %s423_s29, 575 }
  0x4a   : > { %s3767_s8 = scalar_lea.vmem (!%p383_p8), [#allocation3], %s3176_s30 }
  0x4e   : > { %s4136_s29 = smov (!%p424_p9, %s423_s29), 575  ;;  %443 = sbr.rel (%p2592_p10) target bundleno = 88 (0x58), region = 59 }
  0x4f   : > { %s2591_s4 = sshll.u32 %s4136_s29, 2  ;;  %v3498_v32 = vmov (!%p2592_p10), 0.0  }
  0x50   : > { %s3765_s7 = scalar_lea.vmem %s4126_s1, %s2591_s4  ;;  %444 = vst [vmem:[#allocation2] sm:$0xff] (!%p2592_p10), %v3498_v32  ;;  %445 = vst [vmem:[#allocation2 + $0x8] sm:$0xff] (!%p2592_p10), %v3498_v32 }
  0x51   : > { %446 = vst [vmem:[#allocation2 + $0x10] sm:$0xff] (!%p2592_p10), %v3498_v32  ;;  %447 = vst [vmem:[#allocation2 + $0x18] sm:$0xff] (!%p2592_p10), %v3498_v32 }
  0x52   : > { %448 = vst [vmem:[#allocation2 + $0x20] sm:$0xff] (!%p2592_p10), %v3498_v32  ;;  %449 = vst [vmem:[#allocation2 + $0x28] sm:$0xff] (!%p2592_p10), %v3498_v32 }
  0x53   : > { %450 = vst [vmem:[#allocation2 + $0x30] sm:$0xff] (!%p2592_p10), %v3498_v32  ;;  %451 = vst [vmem:[#allocation2 + $0x38] sm:$0xff] (!%p2592_p10), %v3498_v32 }
  0x54   : > { %452 = vst [vmem:[#allocation2 + $0x40] sm:$0xff] (!%p2592_p10), %v3498_v32  ;;  %453 = vst [vmem:[#allocation2 + $0x48] sm:$0xff] (!%p2592_p10), %v3498_v32 }
  0x55   : > { %454 = vst [vmem:[#allocation2 + $0x50] sm:$0xff] %v3498_v32  ;;  %455 = vst [vmem:[#allocation2 + $0x58] sm:$0xff] %v3498_v32 }
  0x56   : > { %456 = vst [vmem:[#allocation2 + $0x60] sm:$0xff] %v3498_v32  ;;  %457 = vst [vmem:[#allocation2 + $0x68] sm:$0xff] %v3498_v32 }
  0x57   : > { %458 = vst [vmem:[#allocation2 + $0x70] sm:$0xff] %v3498_v32  ;;  %459 = vst [vmem:[#allocation2 + $0x78] sm:$0xff] %v3498_v32 }
  0x58 PF: > { %v3218_v33 = vld [vmem:[%s3765_s7 + $0x40] sm:$0xff]   ;;  %v3222_v37 = vld [vmem:[%s3765_s7 + $0x48] sm:$0xff]   ;;  %v3226_v41 = vld [vmem:[%s3765_s7 + $0x50] sm:$0xff]   ;;  %p2785_p11 = scmp.ne.s32.totalorder %s3488_s14, 2 }
  0x59   : > { %v3219_v34 = vld [vmem:[%s3765_s7 + $0xc0] sm:$0xff]   ;;  %2791 = vmatprep.subr.bf16.mxu0 %v3218_v33  ;;  %v3223_v38 = vld [vmem:[%s3765_s7 + $0xc8] sm:$0xff]   ;;  %v3227_v42 = vld [vmem:[%s3765_s7 + $0xd0] sm:$0xff]  }
  0x5a   : > { %v3220_v35 = vld [vmem:[%s3765_s7] sm:$0xff]   ;;  %2855 = vmatprep.subr.bf16.mxu1 %v3219_v34  ;;  %v3224_v39 = vld [vmem:[%s3765_s7 + $0x8] sm:$0xff]   ;;  %v3228_v43 = vld [vmem:[%s3765_s7 + $0x10] sm:$0xff]  }
  0x5b   : > { %v3221_v36 = vld [vmem:[%s3765_s7 + $0x80] sm:$0xff]   ;;  %2792 = vmatpush3.bf16.msra.mxu0 %v3220_v35  ;;  %v3225_v40 = vld [vmem:[%s3765_s7 + $0x88] sm:$0xff]   ;;  %v3229_v44 = vld [vmem:[%s3765_s7 + $0x90] sm:$0xff]  }
  0x5c   : > { %2856 = vmatpush3.bf16.msra.mxu1 %v3221_v36  ;;  %2793 = vmatprep.subr.bf16.mxu0 %v3222_v37  ;;  %v3230_v45 = vld [vmem:[%s3765_s7 + $0x58] sm:$0xff]   ;;  %v3234_v49 = vld [vmem:[%s3765_s7 + $0x60] sm:$0xff]   ;;  %v3238_v53 = vld [vmem:[%s3765_s7 + $0x68] sm:$0xff]  }
  0x5d   : > { %2857 = vmatprep.subr.bf16.mxu1 %v3223_v38  ;;  %v3231_v46 = vld [vmem:[%s3765_s7 + $0xd8] sm:$0xff]   ;;  %v3235_v50 = vld [vmem:[%s3765_s7 + $0xe0] sm:$0xff]   ;;  %v3239_v54 = vld [vmem:[%s3765_s7 + $0xe8] sm:$0xff]  }
  0x5e   : > { %v3232_v47 = vld [vmem:[%s3765_s7 + $0x18] sm:$0xff]   ;;  %v3236_v51 = vld [vmem:[%s3765_s7 + $0x20] sm:$0xff]   ;;  %v3240_v55 = vld [vmem:[%s3765_s7 + $0x28] sm:$0xff]  }
  0x5f   : > { %2794 = vmatpush3.bf16.msra.mxu0 %v3224_v39  ;;  %v3233_v48 = vld [vmem:[%s3765_s7 + $0x98] sm:$0xff]   ;;  %v3237_v52 = vld [vmem:[%s3765_s7 + $0xa0] sm:$0xff]   ;;  %v3241_v56 = vld [vmem:[%s3765_s7 + $0xa8] sm:$0xff]  }
  0x60   : > { %2858 = vmatpush3.bf16.msra.mxu1 %v3225_v40  ;;  %2795 = vmatprep.subr.bf16.mxu0 %v3226_v41  ;;  %v3242_v57 = vld [vmem:[%s3765_s7 + $0x70] sm:$0xff]   ;;  %v3246_v61 = vld [vmem:[%s3765_s7 + $0x78] sm:$0xff]   ;;  %v3256_v5 = vld [vmem:[%s3765_s7 + $0x140] sm:$0xff]  }
  0x61   : > { %2859 = vmatprep.subr.bf16.mxu1 %v3227_v42  ;;  %v3243_v58 = vld [vmem:[%s3765_s7 + $0xf0] sm:$0xff]   ;;  %v3247_v62 = vld [vmem:[%s3765_s7 + $0xf8] sm:$0xff]   ;;  %v3257_v6 = vld [vmem:[%s3765_s7 + $0x100] sm:$0xff]  }
  0x62   : > { %v3244_v59 = vld [vmem:[%s3765_s7 + $0x30] sm:$0xff]   ;;  %v3248_v63 = vld [vmem:[%s3765_s7 + $0x38] sm:$0xff]   ;;  %v3258_v7 = vld [vmem:[%s3765_s7 + $0x1c0] sm:$0xff]  }
  0x63   : > { %2796 = vmatpush3.bf16.msra.mxu0 %v3228_v43  ;;  %v3245_v60 = vld [vmem:[%s3765_s7 + $0xb0] sm:$0xff]   ;;  %v3249_v0 = vld [vmem:[%s3765_s7 + $0xb8] sm:$0xff]   ;;  %v3259_v8 = vld [vmem:[%s3765_s7 + $0x180] sm:$0xff]  }
  0x64   : > { %2860 = vmatpush3.bf16.msra.mxu1 %v3229_v44  ;;  %2797 = vmatprep.subr.bf16.mxu0 %v3230_v45  ;;  %v3250_v1 = vld [vmem:[%s3767_s8] ss:$48 sps:$4 sm:$0xff]   ;;  %v3252_v2 = vld [vmem:[%s3767_s8 + $0x4] ss:$48 sps:$4 sm:$0xff]   ;;  %v3253_v3 = vld [vmem:[%s3767_s8 + $0x8] ss:$48 sps:$4 sm:$0xff]  }
  0x65   : > { %2861 = vmatprep.subr.bf16.mxu1 %v3231_v46  ;;  %v3255_v4 = vld [vmem:[%s3767_s8 + $0xc] ss:$48 sps:$4 sm:$0xff]   ;;  %1852 = vmatprep.mubr.bf16.mxu0 %v3252_v2  ;;  %v3260_v9 = vld [vmem:[%s3767_s8 + $0x64] ss:$48 sps:$4 sm:$0xff]   ;;  %v3264_v11 = vld [vmem:[%s3767_s8 + $0x60] ss:$48 sps:$4 sm:$0xff]  }
  0x66   : > { %1949 = vmatprep.mubr.bf16.mxu1 %v3255_v4  ;;  %v3262_v10 = vld [vmem:[%s3767_s8 + $0x6c] ss:$48 sps:$4 sm:$0xff]   ;;  %v3265_v12 = vld [vmem:[%s3767_s8 + $0x68] ss:$48 sps:$4 sm:$0xff]   ;;  %v3270_v17 = vld [vmem:[%s3767_s8 + $0xc4] ss:$48 sps:$4 sm:$0xff]  }
  0x67   : > { %2798 = vmatpush3.bf16.msra.mxu0 %v3232_v47  ;;  %v3266_v13 = vld [vmem:[%s3765_s7 + $0x148] sm:$0xff]   ;;  %v3274_v19 = vld [vmem:[%s3767_s8 + $0xc0] ss:$48 sps:$4 sm:$0xff]   ;;  %v3280_v25 = vld [vmem:[%s3767_s8 + $0x124] ss:$48 sps:$4 sm:$0xff]  }
  0x68   : > { %2862 = vmatpush3.bf16.msra.mxu1 %v3233_v48  ;;  %2799 = vmatprep.subr.bf16.mxu0 %v3234_v49  ;;  %v3267_v14 = vld [vmem:[%s3765_s7 + $0x108] sm:$0xff]   ;;  %v3276_v21 = vld [vmem:[%s3765_s7 + $0x150] sm:$0xff]   ;;  %v3286_v29 = vld [vmem:[%s3765_s7 + $0x158] sm:$0xff]  }
  0x69   : > { %2863 = vmatprep.subr.bf16.mxu1 %v3235_v50  ;;  %v3268_v15 = vld [vmem:[%s3765_s7 + $0x1c8] sm:$0xff]   ;;  %v3277_v22 = vld [vmem:[%s3765_s7 + $0x110] sm:$0xff]   ;;  %v3287_v30 = vld [vmem:[%s3765_s7 + $0x118] sm:$0xff]  }
  0x6a   : > { %v3269_v16 = vld [vmem:[%s3765_s7 + $0x188] sm:$0xff]   ;;  %v3278_v23 = vld [vmem:[%s3765_s7 + $0x1d0] sm:$0xff]   ;;  %v3288_v31 = vld [vmem:[%s3765_s7 + $0x1d8] sm:$0xff]  }
  0x6b   : > { %2800 = vmatpush3.bf16.msra.mxu0 %v3236_v51  ;;  %v3272_v18 = vld [vmem:[%s3767_s8 + $0xcc] ss:$48 sps:$4 sm:$0xff]   ;;  %v3275_v20 = vld [vmem:[%s3767_s8 + $0xc8] ss:$48 sps:$4 sm:$0xff]   ;;  %v3279_v24 = vld [vmem:[%s3765_s7 + $0x190] sm:$0xff]  }
  0x6c   : > { %2864 = vmatpush3.bf16.msra.mxu1 %v3237_v52  ;;  %2801 = vmatprep.subr.bf16.mxu0 %v3238_v53  ;;  %v3282_v26 = vld [vmem:[%s3767_s8 + $0x12c] ss:$48 sps:$4 sm:$0xff]   ;;  %v3284_v27 = vld [vmem:[%s3767_s8 + $0x120] ss:$48 sps:$4 sm:$0xff]   ;;  %v3285_v28 = vld [vmem:[%s3767_s8 + $0x128] ss:$48 sps:$4 sm:$0xff]  }
  0x6d   : > { %2865 = vmatprep.subr.bf16.mxu1 %v3239_v54  ;;  %v3289_v32 = vld [vmem:[%s3765_s7 + $0x198] sm:$0xff]   ;;  %v3290_v33 = vld [vmem:[%s3767_s8 + $0x184] ss:$48 sps:$4 sm:$0xff]   ;;  %v3294_v35 = vld [vmem:[%s3767_s8 + $0x180] ss:$48 sps:$4 sm:$0xff]  }
  0x6e   : > { %v3292_v34 = vld [vmem:[%s3767_s8 + $0x18c] ss:$48 sps:$4 sm:$0xff]   ;;  %v3296_v36 = vld [vmem:[%s3765_s7 + $0x160] sm:$0xff]   ;;  %v3295_v37 = vld [vmem:[%s3767_s8 + $0x188] ss:$48 sps:$4 sm:$0xff]  }
  0x6f   : > { %2802 = vmatpush3.bf16.msra.mxu0 %v3240_v55  ;;  %v3297_v38 = vld [vmem:[%s3765_s7 + $0x120] sm:$0xff]   ;;  %v3302_v42 = vld [vmem:[%s3767_s8 + $0x1ec] ss:$48 sps:$4 sm:$0xff]   ;;  %v3305_v48 = vld [vmem:[%s3767_s8 + $0x1e8] ss:$48 sps:$4 sm:$0xff]  }
  0x70   : > { %2866 = vmatpush3.bf16.msra.mxu1 %v3241_v56  ;;  %2803 = vmatprep.subr.bf16.mxu0 %v3242_v57  ;;  %v3298_v39 = vld [vmem:[%s3765_s7 + $0x1e0] sm:$0xff]   ;;  %v3306_v43 = vld [vmem:[%s3765_s7 + $0x168] sm:$0xff]   ;;  %v3316_v51 = vld [vmem:[%s3765_s7 + $0x170] sm:$0xff]  }
  0x71   : > { %2867 = vmatprep.subr.bf16.mxu1 %v3243_v58  ;;  %v3299_v40 = vld [vmem:[%s3765_s7 + $0x1a0] sm:$0xff]   ;;  %v3307_v44 = vld [vmem:[%s3765_s7 + $0x128] sm:$0xff]   ;;  %v3317_v52 = vld [vmem:[%s3765_s7 + $0x130] sm:$0xff]  }
  0x72   : > { %v3300_v41 = vld [vmem:[%s3767_s8 + $0x1e4] ss:$48 sps:$4 sm:$0xff]   ;;  %v3304_v45 = vld [vmem:[%s3767_s8 + $0x1e0] ss:$48 sps:$4 sm:$0xff]   ;;  %v3308_v46 = vld [vmem:[%s3765_s7 + $0x1e8] sm:$0xff]  }
  0x73   : > { %2804 = vmatpush3.bf16.msra.mxu0 %v3244_v59  ;;  %v3309_v47 = vld [vmem:[%s3765_s7 + $0x1a8] sm:$0xff]   ;;  %v3310_v49 = vld [vmem:[%s3767_s8 + $0x244] ss:$48 sps:$4 sm:$0xff]   ;;  %v3314_v55 = vld [vmem:[%s3767_s8 + $0x240] ss:$48 sps:$4 sm:$0xff]  }
  0x74   : > { %2868 = vmatpush3.bf16.msra.mxu1 %v3245_v60  ;;  %2805 = vmatprep.subr.bf16.mxu0 %v3246_v61  ;;  %v3312_v50 = vld [vmem:[%s3767_s8 + $0x24c] ss:$48 sps:$4 sm:$0xff]   ;;  %v3318_v53 = vld [vmem:[%s3765_s7 + $0x1f0] sm:$0xff]   ;;  %v3315_v56 = vld [vmem:[%s3767_s8 + $0x248] ss:$48 sps:$4 sm:$0xff]  }
  0x75   : > { %2869 = vmatprep.subr.bf16.mxu1 %v3247_v62  ;;  %v3319_v54 = vld [vmem:[%s3765_s7 + $0x1b0] sm:$0xff]   ;;  %v3322_v58 = vld [vmem:[%s3767_s8 + $0x2ac] ss:$48 sps:$4 sm:$0xff]   ;;  %v3336_v2 = vld [vmem:[%s3765_s7 + $0x240] sm:$0xff]  }
  0x76   : > { %v3320_v57 = vld [vmem:[%s3767_s8 + $0x2a4] ss:$48 sps:$4 sm:$0xff]   ;;  %v3326_v59 = vld [vmem:[%s3765_s7 + $0x178] sm:$0xff]  }
  0x77   : > { %2806 = vmatpush3.bf16.msra.mxu0 %v3248_v63  ;;  %v3327_v60 = vld [vmem:[%s3765_s7 + $0x138] sm:$0xff]   ;;  %v3324_v63 = vld [vmem:[%s3767_s8 + $0x2a0] ss:$48 sps:$4 sm:$0xff]  }
  0x78   : > { %2870 = vmatpush3.bf16.msra.mxu1 %v3249_v0  ;;  %2919 = vmatprep.subr.bf16.mxu0 %v3256_v5  ;;  %v3328_v61 = vld [vmem:[%s3765_s7 + $0x1f8] sm:$0xff]   ;;  %v3338_v4 = vld [vmem:[%s3765_s7 + $0x2c0] sm:$0xff]  }
  0x79   : > { %2983 = vmatprep.subr.bf16.mxu1 %v3258_v7  ;;  %v3329_v62 = vld [vmem:[%s3765_s7 + $0x1b8] sm:$0xff]   ;;  %v3330_v5 = vld [vmem:[%s3767_s8 + $0x10] ss:$48 sps:$4 sm:$0xff]  }
  0x7a   : > { %1853 = vmatmul.mubr.bf16.vlgmr.msra.gmra.mrb[0].mxu0 %v3250_v1  ;;  %v3325_v0 = vld [vmem:[%s3767_s8 + $0x2a8] ss:$48 sps:$4 sm:$0xff]   ;;  %v3332_v1 = vld [vmem:[%s3767_s8 + $0x14] ss:$48 sps:$4 sm:$0xff]  }
  0x7b   : > { %1950 = vmatmul.mubr.bf16.vlgmr.msra.gmra.mrb[0].mxu1 %v3253_v3  ;;  %2920 = vmatpush3.bf16.msra.mxu0 %v3257_v6  ;;  %v3335_v3 = vld [vmem:[%s3767_s8 + $0x1c] ss:$48 sps:$4 sm:$0xff]   ;;  %v3333_v6 = vld [vmem:[%s3767_s8 + $0x18] ss:$48 sps:$4 sm:$0xff]   ;;  %v3337_v7 = vld [vmem:[%s3765_s7 + $0x200] sm:$0xff]  }
  0x7c   : > { %2984 = vmatpush3.bf16.msra.mxu1 %v3259_v8  ;;  %1860 = vmatprep.mubr.bf16.mxu0 %v3260_v9  ;;  %v3339_v8 = vld [vmem:[%s3765_s7 + $0x280] sm:$0xff]  }
  0x7d   : > { %1957 = vmatprep.mubr.bf16.mxu1 %v3262_v10  ;;  %2921 = vmatprep.subr.bf16.mxu0 %v3266_v13  ;;  %v3340_v9 = vld [vmem:[%s3767_s8 + $0x74] ss:$48 sps:$4 sm:$0xff]   ;;  %v3342_v10 = vld [vmem:[%s3767_s8 + $0x7c] ss:$48 sps:$4 sm:$0xff]  }
  0x7e   : > { %2985 = vmatprep.subr.bf16.mxu1 %v3268_v15  ;;  %v3348_v13 = vld [vmem:[%s3765_s7 + $0x2c8] sm:$0xff]   ;;  %v3344_v15 = vld [vmem:[%s3767_s8 + $0x70] ss:$48 sps:$4 sm:$0xff]  }
  0x7f   : > { %2922 = vmatpush3.bf16.msra.mxu0 %v3267_v14  ;;  %v3349_v14 = vld [vmem:[%s3765_s7 + $0x288] sm:$0xff]  }
  0x80   : > { %2986 = vmatpush3.bf16.msra.mxu1 %v3269_v16  ;;  %2923 = vmatprep.subr.bf16.mxu0 %v3276_v21  ;;  %v3356_v16 = vld [vmem:[%s3765_s7 + $0x250] sm:$0xff]  }
  0x81   : > { %2987 = vmatprep.subr.bf16.mxu1 %v3278_v23  ;;  %v3357_v21 = vld [vmem:[%s3765_s7 + $0x210] sm:$0xff]   ;;  %v3366_v23 = vld [vmem:[%s3765_s7 + $0x258] sm:$0xff]  }
  0x82   : > { %1861 = vmatmul.mubr.bf16.gmra.mrb[4].mxu0 %v3264_v11  ;;  %v3346_v11 = vld [vmem:[%s3765_s7 + $0x248] sm:$0xff]  }
  0x83   : > { %1958 = vmatmul.mubr.bf16.gmra.mrb[4].mxu1 %v3265_v12  ;;  %1868 = vmatprep.mubr.bf16.mxu0 %v3270_v17  ;;  %v3347_v12 = vld [vmem:[%s3765_s7 + $0x208] sm:$0xff]  }
  0x84   : > { %1965 = vmatprep.mubr.bf16.mxu1 %v3272_v18  ;;  %2924 = vmatpush3.bf16.msra.mxu0 %v3277_v22  ;;  %v3345_v17 = vld [vmem:[%s3767_s8 + $0x78] ss:$48 sps:$4 sm:$0xff]   ;;  %v3350_v18 = vld [vmem:[%s3767_s8 + $0xd4] ss:$48 sps:$4 sm:$0xff]  }
  0x85   : > { %2988 = vmatpush3.bf16.msra.mxu1 %v3279_v24  ;;  %2925 = vmatprep.subr.bf16.mxu0 %v3286_v29  ;;  %v3359_v22 = vld [vmem:[%s3765_s7 + $0x290] sm:$0xff]   ;;  %v3367_v24 = vld [vmem:[%s3765_s7 + $0x218] sm:$0xff]  }
  0x86   : > { %2989 = vmatprep.subr.bf16.mxu1 %v3288_v31  ;;  %v3360_v29 = vld [vmem:[%s3767_s8 + $0x134] ss:$48 sps:$4 sm:$0xff]  }
  0x87   : > { %v3376_v31 = vld [vmem:[%s3765_s7 + $0x260] sm:$0xff]  }
  0x88   : > { %2926 = vmatpush3.bf16.msra.mxu0 %v3287_v30  ;;  %v3362_v30 = vld [vmem:[%s3767_s8 + $0x13c] ss:$48 sps:$4 sm:$0xff]  }
  0x89   : > { %2990 = vmatpush3.bf16.msra.mxu1 %v3289_v32  ;;  %2927 = vmatprep.subr.bf16.mxu0 %v3296_v36  ;;  %v3377_v32 = vld [vmem:[%s3765_s7 + $0x220] sm:$0xff]   ;;  %v3365_v36 = vld [vmem:[%s3767_s8 + $0x138] ss:$48 sps:$4 sm:$0xff]  }
  0x8a   : > { %1869 = vmatmul.mubr.bf16.gmra.mrb[8].mxu0 %v3274_v19  ;;  %2991 = vmatprep.subr.bf16.mxu1 %v3298_v39  ;;  %v3358_v19 = vld [vmem:[%s3765_s7 + $0x2d0] sm:$0xff]   ;;  %v3386_v39 = vld [vmem:[%s3765_s7 + $0x268] sm:$0xff]  }
  0x8b   : > { %1966 = vmatmul.mubr.bf16.gmra.mrb[8].mxu1 %v3275_v20  ;;  %1876 = vmatprep.mubr.bf16.mxu0 %v3280_v25  ;;  %v3352_v20 = vld [vmem:[%s3767_s8 + $0xdc] ss:$48 sps:$4 sm:$0xff]   ;;  %v3354_v25 = vld [vmem:[%s3767_s8 + $0xd0] ss:$48 sps:$4 sm:$0xff]  }
  0x8c   : > { %1973 = vmatprep.mubr.bf16.mxu1 %v3282_v26  ;;  %2928 = vmatpush3.bf16.msra.mxu0 %v3297_v38  ;;  %v3368_v26 = vld [vmem:[%s3765_s7 + $0x2d8] sm:$0xff]  }
  0x8d   : > { %2992 = vmatpush3.bf16.msra.mxu1 %v3299_v40  ;;  %2929 = vmatprep.subr.bf16.mxu0 %v3306_v43  ;;  %v3372_v38 = vld [vmem:[%s3767_s8 + $0x19c] ss:$48 sps:$4 sm:$0xff]   ;;  %v3374_v43 = vld [vmem:[%s3767_s8 + $0x190] ss:$48 sps:$4 sm:$0xff]  }
  0x8e   : > { %2993 = vmatprep.subr.bf16.mxu1 %v3308_v46  ;;  %v3387_v40 = vld [vmem:[%s3765_s7 + $0x228] sm:$0xff]  }
  0x8f   : > { %v3382_v46 = vld [vmem:[%s3767_s8 + $0x1fc] ss:$48 sps:$4 sm:$0xff]  }
  0x90   : > { %2930 = vmatpush3.bf16.msra.mxu0 %v3307_v44  ;;  %v3375_v44 = vld [vmem:[%s3767_s8 + $0x198] ss:$48 sps:$4 sm:$0xff]  }
  0x91   : > { %2994 = vmatpush3.bf16.msra.mxu1 %v3309_v47  ;;  %2931 = vmatprep.subr.bf16.mxu0 %v3316_v51  ;;  %v3396_v47 = vld [vmem:[%s3765_s7 + $0x270] sm:$0xff]  }
  0x92   : > { %1877 = vmatmul.mubr.bf16.gmra.mrb[12].mxu0 %v3284_v27  ;;  %2995 = vmatprep.subr.bf16.mxu1 %v3318_v53  ;;  %v3369_v27 = vld [vmem:[%s3765_s7 + $0x298] sm:$0xff]   ;;  %v3384_v51 = vld [vmem:[%s3767_s8 + $0x1f0] ss:$48 sps:$4 sm:$0xff]   ;;  %v3390_v53 = vld [vmem:[%s3767_s8 + $0x254] ss:$48 sps:$4 sm:$0xff]  }
  0x93   : > { %1974 = vmatmul.mubr.bf16.gmra.mrb[12].mxu1 %v3285_v28  ;;  %1884 = vmatprep.mubr.bf16.mxu0 %v3290_v33  ;;  %v3355_v28 = vld [vmem:[%s3767_s8 + $0xd8] ss:$48 sps:$4 sm:$0xff]   ;;  %v3378_v33 = vld [vmem:[%s3765_s7 + $0x2e0] sm:$0xff]  }
  0x94   : > { %1981 = vmatprep.mubr.bf16.mxu1 %v3292_v34  ;;  %2932 = vmatpush3.bf16.msra.mxu0 %v3317_v52  ;;  %v3379_v34 = vld [vmem:[%s3765_s7 + $0x2a0] sm:$0xff]   ;;  %v3385_v52 = vld [vmem:[%s3767_s8 + $0x1f8] ss:$48 sps:$4 sm:$0xff]  }
  0x95   : > { %2996 = vmatpush3.bf16.msra.mxu1 %v3319_v54  ;;  %2933 = vmatprep.subr.bf16.mxu0 %v3326_v59  ;;  %v3406_v54 = vld [vmem:[%s3765_s7 + $0x278] sm:$0xff]   ;;  %v3394_v59 = vld [vmem:[%s3767_s8 + $0x250] ss:$48 sps:$4 sm:$0xff]  }
  0x96   : > { %2997 = vmatprep.subr.bf16.mxu1 %v3328_v61  ;;  %v3400_v61 = vld [vmem:[%s3767_s8 + $0x2b4] ss:$48 sps:$4 sm:$0xff]  }
  0x98   : > { %2934 = vmatpush3.bf16.msra.mxu0 %v3327_v60  ;;  %v3395_v60 = vld [vmem:[%s3767_s8 + $0x258] ss:$48 sps:$4 sm:$0xff]  }
  0x99   : > { %2998 = vmatpush3.bf16.msra.mxu1 %v3329_v62  ;;  %3047 = vmatprep.subr.bf16.mxu0 %v3336_v2  ;;  %v3402_v62 = vld [vmem:[%s3767_s8 + $0x2bc] ss:$48 sps:$4 sm:$0xff]  }
  0x9a   : > { %1885 = vmatmul.mubr.bf16.gmra.mrb[16].mxu0 %v3294_v35  ;;  %3111 = vmatprep.subr.bf16.mxu1 %v3338_v4  ;;  %v3364_v35 = vld [vmem:[%s3767_s8 + $0x130] ss:$48 sps:$4 sm:$0xff]   ;;  %v3415_v2 = vld [vmem:[%s3767_s8 + $0x2c] ss:$48 sps:$4 sm:$0xff]   ;;  %v3413_v4 = vld [vmem:[%s3767_s8 + $0x28] ss:$48 sps:$4 sm:$0xff]  }
  0x9b   : > { %1982 = vmatmul.mubr.bf16.gmra.mrb[16].mxu1 %v3295_v37  ;;  %1892 = vmatprep.mubr.bf16.mxu0 %v3300_v41  ;;  %v3370_v37 = vld [vmem:[%s3767_s8 + $0x194] ss:$48 sps:$4 sm:$0xff]   ;;  %v3388_v41 = vld [vmem:[%s3765_s7 + $0x2e8] sm:$0xff]  }
  0x9c   : > { %1989 = vmatprep.mubr.bf16.mxu1 %v3302_v42  ;;  %v3389_v42 = vld [vmem:[%s3765_s7 + $0x2a8] sm:$0xff]  }
  0xa2   : > { %1893 = vmatmul.mubr.bf16.gmra.mrb[20].mxu0 %v3304_v45  ;;  %v3380_v45 = vld [vmem:[%s3767_s8 + $0x1f4] ss:$48 sps:$4 sm:$0xff]  }
  0xa3   : > { %1990 = vmatmul.mubr.bf16.gmra.mrb[20].mxu1 %v3305_v48  ;;  %1900 = vmatprep.mubr.bf16.mxu0 %v3310_v49  ;;  %v3397_v48 = vld [vmem:[%s3765_s7 + $0x230] sm:$0xff]  }
  0xa4   : > { %1997 = vmatprep.mubr.bf16.mxu1 %v3312_v50  ;;  %v3398_v49 = vld [vmem:[%s3765_s7 + $0x2f0] sm:$0xff]  }
  0xa5   : > { %v3399_v50 = vld [vmem:[%s3765_s7 + $0x2b0] sm:$0xff]  }
  0xaa   : > { %1901 = vmatmul.mubr.bf16.gmra.mrb[24].mxu0 %v3314_v55  ;;  %v3392_v55 = vld [vmem:[%s3767_s8 + $0x25c] ss:$48 sps:$4 sm:$0xff]  }
  0xab   : > { %1998 = vmatmul.mubr.bf16.gmra.mrb[24].mxu1 %v3315_v56  ;;  %1908 = vmatprep.mubr.bf16.mxu0 %v3320_v57  ;;  %v3407_v56 = vld [vmem:[%s3765_s7 + $0x238] sm:$0xff]  }
  0xac   : > { %2005 = vmatprep.mubr.bf16.mxu1 %v3322_v58  ;;  %v3408_v57 = vld [vmem:[%s3765_s7 + $0x2f8] sm:$0xff]  }
  0xad   : > { %v3409_v58 = vld [vmem:[%s3765_s7 + $0x2b8] sm:$0xff]  }
  0xb2   : > { %1909 = vmatmul.mubr.bf16.gmra.mrb[28].mxu0 %v3324_v63  ;;  %v3404_v63 = vld [vmem:[%s3767_s8 + $0x2b0] ss:$48 sps:$4 sm:$0xff]  }
  0xb3   : > { %2006 = vmatmul.mubr.bf16.gmra.mrb[28].mxu1 %v3325_v0  ;;  %2046 = vmatprep.mubr.bf16.mxu0 %v3332_v1  ;;  %v3405_v0 = vld [vmem:[%s3767_s8 + $0x2b8] ss:$48 sps:$4 sm:$0xff]   ;;  %v3412_v1 = vld [vmem:[%s3767_s8 + $0x24] ss:$48 sps:$4 sm:$0xff]  }
  0xb4   : > { %2143 = vmatprep.mubr.bf16.mxu1 %v3335_v3  ;;  %v3410_v3 = vld [vmem:[%s3767_s8 + $0x20] ss:$48 sps:$4 sm:$0xff]  }
  0xba   : > { %2047 = vmatmul.mubr.bf16.vlgmr.msra.gmra.mrb[32].mxu0 %v3330_v5  ;;  %v3416_v5 = vld [vmem:[%s3767_s8 + $0x84] ss:$48 sps:$4 sm:$0xff]  }
  0xbb   : > { %2144 = vmatmul.mubr.bf16.vlgmr.msra.gmra.mrb[32].mxu1 %v3333_v6  ;;  %3048 = vmatpush3.bf16.msra.mxu0 %v3337_v7  ;;  %v3418_v6 = vld [vmem:[%s3767_s8 + $0x8c] ss:$48 sps:$4 sm:$0xff]   ;;  %v3420_v7 = vld [vmem:[%s3767_s8 + $0x80] ss:$48 sps:$4 sm:$0xff]  }
  0xbc   : > { %3112 = vmatpush3.bf16.msra.mxu1 %v3339_v8  ;;  %2054 = vmatprep.mubr.bf16.mxu0 %v3340_v9  ;;  %v3421_v8 = vld [vmem:[%s3767_s8 + $0x88] ss:$48 sps:$4 sm:$0xff]   ;;  %v3422_v9 = vld [vmem:[%s3767_s8 + $0xe4] ss:$48 sps:$4 sm:$0xff]  }
  0xbd   : > { %2151 = vmatprep.mubr.bf16.mxu1 %v3342_v10  ;;  %3049 = vmatprep.subr.bf16.mxu0 %v3346_v11  ;;  %v3424_v10 = vld [vmem:[%s3767_s8 + $0xec] ss:$48 sps:$4 sm:$0xff]   ;;  %v3426_v11 = vld [vmem:[%s3767_s8 + $0xe0] ss:$48 sps:$4 sm:$0xff]  }
  0xbe   : > { %3113 = vmatprep.subr.bf16.mxu1 %v3348_v13  ;;  %v3428_v13 = vld [vmem:[%s3767_s8 + $0x144] ss:$48 sps:$4 sm:$0xff]  }
  0xbf   : > { %3050 = vmatpush3.bf16.msra.mxu0 %v3347_v12  ;;  %v3427_v12 = vld [vmem:[%s3767_s8 + $0xe8] ss:$48 sps:$4 sm:$0xff]  }
  0xc0   : > { %3114 = vmatpush3.bf16.msra.mxu1 %v3349_v14  ;;  %3051 = vmatprep.subr.bf16.mxu0 %v3356_v16  ;;  %v3430_v14 = vld [vmem:[%s3767_s8 + $0x14c] ss:$48 sps:$4 sm:$0xff]   ;;  %v3433_v16 = vld [vmem:[%s3767_s8 + $0x148] ss:$48 sps:$4 sm:$0xff]  }
  0xc1   : > { %3115 = vmatprep.subr.bf16.mxu1 %v3358_v19  ;;  %v3438_v19 = vld [vmem:[%s3767_s8 + $0x1a0] ss:$48 sps:$4 sm:$0xff]  }
  0xc2   : > { %2055 = vmatmul.mubr.bf16.gmra.mrb[36].mxu0 %v3344_v15  ;;  %v3432_v15 = vld [vmem:[%s3767_s8 + $0x140] ss:$48 sps:$4 sm:$0xff]  }
  0xc3   : > { %2152 = vmatmul.mubr.bf16.gmra.mrb[36].mxu1 %v3345_v17  ;;  %2062 = vmatprep.mubr.bf16.mxu0 %v3350_v18  ;;  %v3434_v17 = vld [vmem:[%s3767_s8 + $0x1a4] ss:$48 sps:$4 sm:$0xff]   ;;  %v3436_v18 = vld [vmem:[%s3767_s8 + $0x1ac] ss:$48 sps:$4 sm:$0xff]  }
  0xc4   : > { %2159 = vmatprep.mubr.bf16.mxu1 %v3352_v20  ;;  %3052 = vmatpush3.bf16.msra.mxu0 %v3357_v21  ;;  %v3439_v20 = vld [vmem:[%s3767_s8 + $0x1a8] ss:$48 sps:$4 sm:$0xff]   ;;  %v3440_v21 = vld [vmem:[%s3767_s8 + $0x204] ss:$48 sps:$4 sm:$0xff]  }
  0xc5   : > { %3116 = vmatpush3.bf16.msra.mxu1 %v3359_v22  ;;  %3053 = vmatprep.subr.bf16.mxu0 %v3366_v23  ;;  %v3442_v22 = vld [vmem:[%s3767_s8 + $0x20c] ss:$48 sps:$4 sm:$0xff]   ;;  %v3444_v23 = vld [vmem:[%s3767_s8 + $0x200] ss:$48 sps:$4 sm:$0xff]  }
  0xc6   : > { %3117 = vmatprep.subr.bf16.mxu1 %v3368_v26  ;;  %v3448_v26 = vld [vmem:[%s3767_s8 + $0x26c] ss:$48 sps:$4 sm:$0xff]  }
  0xc8   : > { %3054 = vmatpush3.bf16.msra.mxu0 %v3367_v24  ;;  %v3445_v24 = vld [vmem:[%s3767_s8 + $0x208] ss:$48 sps:$4 sm:$0xff]  }
  0xc9   : > { %3118 = vmatpush3.bf16.msra.mxu1 %v3369_v27  ;;  %3055 = vmatprep.subr.bf16.mxu0 %v3376_v31  ;;  %v3450_v27 = vld [vmem:[%s3767_s8 + $0x260] ss:$48 sps:$4 sm:$0xff]  }
  0xca   : > { %2063 = vmatmul.mubr.bf16.gmra.mrb[40].mxu0 %v3354_v25  ;;  %3119 = vmatprep.subr.bf16.mxu1 %v3378_v33  ;;  %v3446_v25 = vld [vmem:[%s3767_s8 + $0x264] ss:$48 sps:$4 sm:$0xff]   ;;  %v3456_v31 = vld [vmem:[%s3767_s8 + $0x2c0] ss:$48 sps:$4 sm:$0xff]  }
  0xcb   : > { %2160 = vmatmul.mubr.bf16.gmra.mrb[40].mxu1 %v3355_v28  ;;  %2070 = vmatprep.mubr.bf16.mxu0 %v3360_v29  ;;  %v3451_v28 = vld [vmem:[%s3767_s8 + $0x268] ss:$48 sps:$4 sm:$0xff]   ;;  %v3452_v29 = vld [vmem:[%s3767_s8 + $0x2c4] ss:$48 sps:$4 sm:$0xff]  }
  0xcc   : > { %2167 = vmatprep.mubr.bf16.mxu1 %v3362_v30  ;;  %3056 = vmatpush3.bf16.msra.mxu0 %v3377_v32  ;;  %v3454_v30 = vld [vmem:[%s3767_s8 + $0x2cc] ss:$48 sps:$4 sm:$0xff]   ;;  %v3457_v32 = vld [vmem:[%s3767_s8 + $0x2c8] ss:$48 sps:$4 sm:$0xff]  }
  0xcd   : > { %3120 = vmatpush3.bf16.msra.mxu1 %v3379_v34  ;;  %3057 = vmatprep.subr.bf16.mxu0 %v3386_v39 }
  0xce   : > { %3121 = vmatprep.subr.bf16.mxu1 %v3388_v41 }
  0xd0   : > { %3058 = vmatpush3.bf16.msra.mxu0 %v3387_v40 }
  0xd1   : > { %3122 = vmatpush3.bf16.msra.mxu1 %v3389_v42  ;;  %3059 = vmatprep.subr.bf16.mxu0 %v3396_v47 }
  0xd2   : > { %2071 = vmatmul.mubr.bf16.gmra.mrb[44].mxu0 %v3364_v35  ;;  %3123 = vmatprep.subr.bf16.mxu1 %v3398_v49 }
  0xd3   : > { %2168 = vmatmul.mubr.bf16.gmra.mrb[44].mxu1 %v3365_v36  ;;  %2078 = vmatprep.mubr.bf16.mxu0 %v3370_v37 }
  0xd4   : > { %2175 = vmatprep.mubr.bf16.mxu1 %v3372_v38  ;;  %3060 = vmatpush3.bf16.msra.mxu0 %v3397_v48 }
  0xd5   : > { %3124 = vmatpush3.bf16.msra.mxu1 %v3399_v50  ;;  %3061 = vmatprep.subr.bf16.mxu0 %v3406_v54 }
  0xd6   : > { %3125 = vmatprep.subr.bf16.mxu1 %v3408_v57 }
  0xd8   : > { %3062 = vmatpush3.bf16.msra.mxu0 %v3407_v56 }
  0xd9   : > { %3126 = vmatpush3.bf16.msra.mxu1 %v3409_v58 }
  0xda   : > { %2079 = vmatmul.mubr.bf16.gmra.mrb[48].mxu0 %v3374_v43 }
  0xdb   : > { %2176 = vmatmul.mubr.bf16.gmra.mrb[48].mxu1 %v3375_v44  ;;  %2086 = vmatprep.mubr.bf16.mxu0 %v3380_v45 }
  0xdc   : > { %2183 = vmatprep.mubr.bf16.mxu1 %v3382_v46 }
  0xe2   : > { %2087 = vmatmul.mubr.bf16.gmra.mrb[52].mxu0 %v3384_v51 }
  0xe3   : > { %2184 = vmatmul.mubr.bf16.gmra.mrb[52].mxu1 %v3385_v52  ;;  %2094 = vmatprep.mubr.bf16.mxu0 %v3390_v53 }
  0xe4   : > { %2191 = vmatprep.mubr.bf16.mxu1 %v3392_v55 }
  0xea   : > { %2095 = vmatmul.mubr.bf16.gmra.mrb[56].mxu0 %v3394_v59 }
  0xeb   : > { %2192 = vmatmul.mubr.bf16.gmra.mrb[56].mxu1 %v3395_v60  ;;  %2102 = vmatprep.mubr.bf16.mxu0 %v3400_v61 }
  0xec   : > { %2199 = vmatprep.mubr.bf16.mxu1 %v3402_v62 }
  0xf2   : > { %2103 = vmatmul.mubr.bf16.gmra.mrb[60].mxu0 %v3404_v63 }
  0xf3   : > { %2200 = vmatmul.mubr.bf16.gmra.mrb[60].mxu1 %v3405_v0  ;;  %2240 = vmatprep.mubr.bf16.mxu0 %v3412_v1 }
  0xf4   : > { %2337 = vmatprep.mubr.bf16.mxu1 %v3415_v2 }
  0xfa   : > { %2241 = vmatmul.mubr.bf16.vlgmr.msra.gmra.mrb[64].mxu0 %v3410_v3 }
  0xfb   : > { %2338 = vmatmul.mubr.bf16.vlgmr.msra.gmra.mrb[64].mxu1 %v3413_v4  ;;  %2248 = vmatprep.mubr.bf16.mxu0 %v3416_v5 }
  0xfc   : > { %2345 = vmatprep.mubr.bf16.mxu1 %v3418_v6 }
 0x102   : > { %2249 = vmatmul.mubr.bf16.gmra.mrb[68].mxu0 %v3420_v7 }
 0x103   : > { %2346 = vmatmul.mubr.bf16.gmra.mrb[68].mxu1 %v3421_v8  ;;  %2256 = vmatprep.mubr.bf16.mxu0 %v3422_v9 }
 0x104   : > { %2353 = vmatprep.mubr.bf16.mxu1 %v3424_v10 }
 0x10a   : > { %2257 = vmatmul.mubr.bf16.gmra.mrb[72].mxu0 %v3426_v11 }
 0x10b   : > { %2354 = vmatmul.mubr.bf16.gmra.mrb[72].mxu1 %v3427_v12  ;;  %2264 = vmatprep.mubr.bf16.mxu0 %v3428_v13 }
 0x10c   : > { %2361 = vmatprep.mubr.bf16.mxu1 %v3430_v14 }
 0x112   : > { %2265 = vmatmul.mubr.bf16.gmra.mrb[76].mxu0 %v3432_v15 }
 0x113   : > { %2362 = vmatmul.mubr.bf16.gmra.mrb[76].mxu1 %v3433_v16  ;;  %2272 = vmatprep.mubr.bf16.mxu0 %v3434_v17 }
 0x114   : > { %2369 = vmatprep.mubr.bf16.mxu1 %v3436_v18 }
 0x11a   : > { %2273 = vmatmul.mubr.bf16.gmra.mrb[80].mxu0 %v3438_v19 }
 0x11b   : > { %2370 = vmatmul.mubr.bf16.gmra.mrb[80].mxu1 %v3439_v20  ;;  %2280 = vmatprep.mubr.bf16.mxu0 %v3440_v21 }
 0x11c   : > { %2377 = vmatprep.mubr.bf16.mxu1 %v3442_v22 }
 0x122   : > { %2281 = vmatmul.mubr.bf16.gmra.mrb[84].mxu0 %v3444_v23 }
 0x123   : > { %2378 = vmatmul.mubr.bf16.gmra.mrb[84].mxu1 %v3445_v24  ;;  %2288 = vmatprep.mubr.bf16.mxu0 %v3446_v25 }
 0x124   : > { %2385 = vmatprep.mubr.bf16.mxu1 %v3448_v26 }
 0x12a   : > { %2289 = vmatmul.mubr.bf16.gmra.mrb[88].mxu0 %v3450_v27 }
 0x12b   : > { %2386 = vmatmul.mubr.bf16.gmra.mrb[88].mxu1 %v3451_v28  ;;  %2296 = vmatprep.mubr.bf16.mxu0 %v3452_v29 }
 0x12c   : > { %2393 = vmatprep.mubr.bf16.mxu1 %v3454_v30 }
 0x132   : > { %2297 = vmatmul.mubr.bf16.gmra.mrb[92].mxu0 %v3456_v31 }
 0x133   : > { %2394 = vmatmul.mubr.bf16.gmra.mrb[92].mxu1 %v3457_v32 }
 0x14d   : > { %v2807_v33 = vpop.f32.mrb[0].mxu0 }
 0x14e   : > { %v2871_v34 = vpop.f32.mrb[0].mxu1  ;;  %v2808_v35 = vpop.f32.mrb[1].mxu0 }
 0x14f   : > { %v2809_v36 = vadd.f32 %v2808_v35, %v2807_v33  ;;  %v2872_v37 = vpop.f32.mrb[1].mxu1  ;;  %v2810_v38 = vpop.f32.mrb[2].mxu0 }
 0x150   : > { %v2873_v39 = vadd.f32 %v2872_v37, %v2871_v34  ;;  %v2874_v40 = vpop.f32.mrb[2].mxu1  ;;  %v2811_v41 = vpop.f32.mrb[3].mxu0 }
 0x151   : > { %v2812_v42 = vadd.f32 %v2811_v41, %v2810_v38  ;;  %v2875_v43 = vpop.f32.mrb[3].mxu1 }
 0x152   : > { %v3962_v44 = vadd.f32 %v2873_v39, %v2809_v36  ;;  %v2876_v45 = vadd.f32 %v2875_v43, %v2874_v40 }
 0x154   : > { %v3964_v46 = vadd.f32 %v2876_v45, %v2812_v42 }
 0x155   : > { %v2813_v47 = vpop.f32.mrb[4].mxu0 }
 0x156   : > { %v2877_v48 = vpop.f32.mrb[4].mxu1  ;;  %v2814_v49 = vpop.f32.mrb[5].mxu0 }
 0x157   : > { %v2815_v50 = vadd.f32 %v2814_v49, %v2813_v47  ;;  %v2878_v51 = vpop.f32.mrb[5].mxu1  ;;  %v2816_v52 = vpop.f32.mrb[6].mxu0 }
 0x158   : > { %v2879_v53 = vadd.f32 %v2878_v51, %v2877_v48  ;;  %v2880_v54 = vpop.f32.mrb[6].mxu1  ;;  %v2817_v55 = vpop.f32.mrb[7].mxu0 }
 0x159   : > { %v2818_v56 = vadd.f32 %v2817_v55, %v2816_v52  ;;  %v2881_v57 = vpop.f32.mrb[7].mxu1 }
 0x15a   : > { %v3966_v58 = vadd.f32 %v2879_v53, %v2815_v50  ;;  %v2882_v59 = vadd.f32 %v2881_v57, %v2880_v54 }
 0x15c   : > { %v3968_v60 = vadd.f32 %v2882_v59, %v2818_v56 }
 0x15d   : > { %v2819_v61 = vpop.f32.mrb[8].mxu0 }
 0x15e   : > { %v2883_v62 = vpop.f32.mrb[8].mxu1  ;;  %v2820_v63 = vpop.f32.mrb[9].mxu0 }
 0x15f   : > { %v2821_v0 = vadd.f32 %v2820_v63, %v2819_v61  ;;  %v2884_v1 = vpop.f32.mrb[9].mxu1  ;;  %v2822_v2 = vpop.f32.mrb[10].mxu0 }
 0x160   : > { %v2885_v3 = vadd.f32 %v2884_v1, %v2883_v62  ;;  %v2886_v4 = vpop.f32.mrb[10].mxu1  ;;  %v2823_v5 = vpop.f32.mrb[11].mxu0 }
 0x161   : > { %v2824_v6 = vadd.f32 %v2823_v5, %v2822_v2  ;;  %v2887_v7 = vpop.f32.mrb[11].mxu1 }
 0x162   : > { %v3970_v8 = vadd.f32 %v2885_v3, %v2821_v0  ;;  %v2888_v9 = vadd.f32 %v2887_v7, %v2886_v4 }
 0x164   : > { %v3972_v10 = vadd.f32 %v2888_v9, %v2824_v6 }
 0x165   : > { %v2825_v11 = vpop.f32.mrb[12].mxu0 }
 0x166   : > { %v2889_v12 = vpop.f32.mrb[12].mxu1  ;;  %v2826_v13 = vpop.f32.mrb[13].mxu0 }
 0x167   : > { %v2827_v14 = vadd.f32 %v2826_v13, %v2825_v11  ;;  %v2890_v15 = vpop.f32.mrb[13].mxu1  ;;  %v2828_v16 = vpop.f32.mrb[14].mxu0 }
 0x168   : > { %v2891_v17 = vadd.f32 %v2890_v15, %v2889_v12  ;;  %v2892_v18 = vpop.f32.mrb[14].mxu1  ;;  %v2829_v19 = vpop.f32.mrb[15].mxu0 }
 0x169   : > { %v2830_v20 = vadd.f32 %v2829_v19, %v2828_v16  ;;  %v2893_v21 = vpop.f32.mrb[15].mxu1 }
 0x16a   : > { %v3974_v22 = vadd.f32 %v2891_v17, %v2827_v14  ;;  %v2894_v23 = vadd.f32 %v2893_v21, %v2892_v18 }
 0x16c   : > { %v3976_v24 = vadd.f32 %v2894_v23, %v2830_v20 }
 0x16d   : > { %v2831_v25 = vpop.f32.mrb[16].mxu0 }
 0x16e   : > { %v2895_v26 = vpop.f32.mrb[16].mxu1  ;;  %v2832_v27 = vpop.f32.mrb[17].mxu0 }
 0x16f   : > { %v2833_v28 = vadd.f32 %v2832_v27, %v2831_v25  ;;  %v2896_v29 = vpop.f32.mrb[17].mxu1  ;;  %v2834_v30 = vpop.f32.mrb[18].mxu0 }
 0x170   : > { %v2897_v31 = vadd.f32 %v2896_v29, %v2895_v26  ;;  %v2898_v32 = vpop.f32.mrb[18].mxu1  ;;  %v2835_v33 = vpop.f32.mrb[19].mxu0 }
 0x171   : > { %v2836_v34 = vadd.f32 %v2835_v33, %v2834_v30  ;;  %v2899_v35 = vpop.f32.mrb[19].mxu1 }
 0x172   : > { %v3978_v36 = vadd.f32 %v2897_v31, %v2833_v28  ;;  %v2900_v37 = vadd.f32 %v2899_v35, %v2898_v32 }
 0x174   : > { %v3980_v38 = vadd.f32 %v2900_v37, %v2836_v34 }
 0x175   : > { %v2837_v39 = vpop.f32.mrb[20].mxu0 }
 0x176   : > { %v2901_v40 = vpop.f32.mrb[20].mxu1  ;;  %v2838_v41 = vpop.f32.mrb[21].mxu0 }
 0x177   : > { %v2839_v42 = vadd.f32 %v2838_v41, %v2837_v39  ;;  %v2902_v43 = vpop.f32.mrb[21].mxu1  ;;  %v2840_v45 = vpop.f32.mrb[22].mxu0 }
 0x178   : > { %v2903_v47 = vadd.f32 %v2902_v43, %v2901_v40  ;;  %v2904_v48 = vpop.f32.mrb[22].mxu1  ;;  %v2841_v49 = vpop.f32.mrb[23].mxu0 }
 0x179   : > { %v2842_v50 = vadd.f32 %v2841_v49, %v2840_v45  ;;  %v2905_v51 = vpop.f32.mrb[23].mxu1 }
 0x17a   : > { %v3982_v52 = vadd.f32 %v2903_v47, %v2839_v42  ;;  %v2906_v53 = vadd.f32 %v2905_v51, %v2904_v48 }
 0x17c   : > { %v3984_v54 = vadd.f32 %v2906_v53, %v2842_v50 }
 0x17d   : > { %v2843_v55 = vpop.f32.mrb[24].mxu0 }
 0x17e   : > { %v2907_v56 = vpop.f32.mrb[24].mxu1  ;;  %v2844_v57 = vpop.f32.mrb[25].mxu0 }
 0x17f   : > { %v2845_v59 = vadd.f32 %v2844_v57, %v2843_v55  ;;  %v2908_v61 = vpop.f32.mrb[25].mxu1  ;;  %v2846_v62 = vpop.f32.mrb[26].mxu0 }
 0x180   : > { %v2909_v63 = vadd.f32 %v2908_v61, %v2907_v56  ;;  %v2910_v0 = vpop.f32.mrb[26].mxu1  ;;  %v2847_v1 = vpop.f32.mrb[27].mxu0 }
 0x181   : > { %v2848_v2 = vadd.f32 %v2847_v1, %v2846_v62  ;;  %v2911_v3 = vpop.f32.mrb[27].mxu1 }
 0x182   : > { %v3986_v4 = vadd.f32 %v2909_v63, %v2845_v59  ;;  %v2912_v5 = vadd.f32 %v2911_v3, %v2910_v0 }
 0x184   : > { %v3988_v6 = vadd.f32 %v2912_v5, %v2848_v2 }
 0x185   : > { %v2849_v7 = vpop.f32.mrb[28].mxu0 }
 0x186   : > { %v2913_v9 = vpop.f32.mrb[28].mxu1  ;;  %v2850_v11 = vpop.f32.mrb[29].mxu0 }
 0x187   : > { %v2851_v12 = vadd.f32 %v2850_v11, %v2849_v7  ;;  %v2914_v13 = vpop.f32.mrb[29].mxu1  ;;  %v2852_v14 = vpop.f32.mrb[30].mxu0 }
 0x188   : > { %v2915_v15 = vadd.f32 %v2914_v13, %v2913_v9  ;;  %v2916_v16 = vpop.f32.mrb[30].mxu1  ;;  %v2853_v17 = vpop.f32.mrb[31].mxu0 }
 0x189   : > { %v2854_v18 = vadd.f32 %v2853_v17, %v2852_v14  ;;  %v2917_v19 = vpop.f32.mrb[31].mxu1 }
 0x18a   : > { %v3990_v20 = vadd.f32 %v2915_v15, %v2851_v12  ;;  %v2918_v21 = vadd.f32 %v2917_v19, %v2916_v16 }
 0x18c   : > { %v3992_v23 = vadd.f32 %v2918_v21, %v2854_v18 }
 0x18d   : > { %v2935_v25 = vpop.f32.mrb[32].mxu0 }
 0x18e   : > { %v2999_v26 = vpop.f32.mrb[32].mxu1  ;;  %v2936_v27 = vpop.f32.mrb[33].mxu0 }
 0x18f   : > { %v2937_v28 = vadd.f32 %v2936_v27, %v2935_v25  ;;  %v3000_v29 = vpop.f32.mrb[33].mxu1  ;;  %v2938_v30 = vpop.f32.mrb[34].mxu0 }
 0x190   : > { %v3001_v31 = vadd.f32 %v3000_v29, %v2999_v26  ;;  %v3002_v32 = vpop.f32.mrb[34].mxu1  ;;  %v2939_v33 = vpop.f32.mrb[35].mxu0 }
 0x191   : > { %v2049_v34 = vadd.f32 %v2937_v28, %v3962_v44  ;;  %v2940_v35 = vadd.f32 %v2939_v33, %v2938_v30  ;;  %v3003_v37 = vpop.f32.mrb[35].mxu1 }
 0x192   : > { %v3004_v39 = vadd.f32 %v3003_v37, %v3002_v32 }
 0x193   : > { %v3995_v40 = vadd.f32 %v3001_v31, %v2049_v34  ;;  %v2052_v41 = vadd.f32 %v2940_v35, %v3964_v46 }
 0x195   : > { %v3998_v42 = vadd.f32 %v3004_v39, %v2052_v41  ;;  %v2941_v43 = vpop.f32.mrb[36].mxu0 }
 0x196   : > { %v3005_v45 = vpop.f32.mrb[36].mxu1  ;;  %v2942_v47 = vpop.f32.mrb[37].mxu0 }
 0x197   : > { %v2943_v48 = vadd.f32 %v2942_v47, %v2941_v43  ;;  %v3006_v49 = vpop.f32.mrb[37].mxu1  ;;  %v2944_v50 = vpop.f32.mrb[38].mxu0 }
 0x198   : > { %v3007_v51 = vadd.f32 %v3006_v49, %v3005_v45  ;;  %v3008_v53 = vpop.f32.mrb[38].mxu1  ;;  %v2945_v55 = vpop.f32.mrb[39].mxu0 }
 0x199   : > { %v2057_v44 = vadd.f32 %v2943_v48, %v3966_v58  ;;  %v2946_v56 = vadd.f32 %v2945_v55, %v2944_v50  ;;  %v3009_v57 = vpop.f32.mrb[39].mxu1 }
 0x19a   : > { %v3010_v59 = vadd.f32 %v3009_v57, %v3008_v53 }
 0x19b   : > { %v4001_v61 = vadd.f32 %v3007_v51, %v2057_v44  ;;  %v2060_v46 = vadd.f32 %v2946_v56, %v3968_v60 }
 0x19d   : > { %v4004_v62 = vadd.f32 %v3010_v59, %v2060_v46  ;;  %v2947_v63 = vpop.f32.mrb[40].mxu0 }
 0x19e   : > { %v3011_v0 = vpop.f32.mrb[40].mxu1  ;;  %v2948_v1 = vpop.f32.mrb[41].mxu0 }
 0x19f   : > { %v2949_v2 = vadd.f32 %v2948_v1, %v2947_v63  ;;  %v3012_v3 = vpop.f32.mrb[41].mxu1  ;;  %v2950_v5 = vpop.f32.mrb[42].mxu0 }
 0x1a0   : > { %v3013_v7 = vadd.f32 %v3012_v3, %v3011_v0  ;;  %v3014_v9 = vpop.f32.mrb[42].mxu1  ;;  %v2951_v11 = vpop.f32.mrb[43].mxu0 }
 0x1a1   : > { %v2065_v58 = vadd.f32 %v2949_v2, %v3970_v8  ;;  %v2952_v12 = vadd.f32 %v2951_v11, %v2950_v5  ;;  %v3015_v13 = vpop.f32.mrb[43].mxu1 }
 0x1a2   : > { %v3016_v14 = vadd.f32 %v3015_v13, %v3014_v9 }
 0x1a3   : > { %v4007_v15 = vadd.f32 %v3013_v7, %v2065_v58  ;;  %v2068_v60 = vadd.f32 %v2952_v12, %v3972_v10 }
 0x1a5   : > { %v4010_v16 = vadd.f32 %v3016_v14, %v2068_v60  ;;  %v2953_v17 = vpop.f32.mrb[44].mxu0 }
 0x1a6   : > { %v3017_v18 = vpop.f32.mrb[44].mxu1  ;;  %v2954_v19 = vpop.f32.mrb[45].mxu0 }
 0x1a7   : > { %v2955_v21 = vadd.f32 %v2954_v19, %v2953_v17  ;;  %v3018_v25 = vpop.f32.mrb[45].mxu1  ;;  %v2956_v26 = vpop.f32.mrb[46].mxu0 }
 0x1a8   : > { %v3019_v27 = vadd.f32 %v3018_v25, %v3017_v18  ;;  %v3020_v28 = vpop.f32.mrb[46].mxu1  ;;  %v2957_v29 = vpop.f32.mrb[47].mxu0 }
 0x1a9   : > { %v2073_v8 = vadd.f32 %v2955_v21, %v3974_v22  ;;  %v2958_v30 = vadd.f32 %v2957_v29, %v2956_v26  ;;  %v3021_v31 = vpop.f32.mrb[47].mxu1 }
 0x1aa   : > { %v3022_v32 = vadd.f32 %v3021_v31, %v3020_v28 }
 0x1ab   : > { %v4013_v33 = vadd.f32 %v3019_v27, %v2073_v8  ;;  %v2076_v10 = vadd.f32 %v2958_v30, %v3976_v24 }
 0x1ad   : > { %v4016_v34 = vadd.f32 %v3022_v32, %v2076_v10  ;;  %v2959_v35 = vpop.f32.mrb[48].mxu0 }
 0x1ae   : > { %v3023_v37 = vpop.f32.mrb[48].mxu1  ;;  %v2960_v39 = vpop.f32.mrb[49].mxu0 }
 0x1af   : > { %v2961_v41 = vadd.f32 %v2960_v39, %v2959_v35  ;;  %v3024_v43 = vpop.f32.mrb[49].mxu1  ;;  %v2962_v45 = vpop.f32.mrb[50].mxu0 }
 0x1b0   : > { %v3025_v47 = vadd.f32 %v3024_v43, %v3023_v37  ;;  %v3026_v48 = vpop.f32.mrb[50].mxu1  ;;  %v2963_v49 = vpop.f32.mrb[51].mxu0 }
 0x1b1   : > { %v2081_v22 = vadd.f32 %v2961_v41, %v3978_v36  ;;  %v2964_v50 = vadd.f32 %v2963_v49, %v2962_v45  ;;  %v3027_v51 = vpop.f32.mrb[51].mxu1 }
 0x1b2   : > { %v3028_v53 = vadd.f32 %v3027_v51, %v3026_v48 }
 0x1b3   : > { %v4019_v55 = vadd.f32 %v3025_v47, %v2081_v22  ;;  %v2084_v24 = vadd.f32 %v2964_v50, %v3980_v38 }
 0x1b5   : > { %v4022_v44 = vadd.f32 %v3028_v53, %v2084_v24  ;;  %v2965_v56 = vpop.f32.mrb[52].mxu0 }
 0x1b6   : > { %v3029_v57 = vpop.f32.mrb[52].mxu1  ;;  %v2966_v59 = vpop.f32.mrb[53].mxu0 }
 0x1b7   : > { %v2967_v46 = vadd.f32 %v2966_v59, %v2965_v56  ;;  %v3030_v63 = vpop.f32.mrb[53].mxu1  ;;  %v2968_v0 = vpop.f32.mrb[54].mxu0 }
 0x1b8   : > { %v3031_v1 = vadd.f32 %v3030_v63, %v3029_v57  ;;  %v3032_v2 = vpop.f32.mrb[54].mxu1  ;;  %v2969_v3 = vpop.f32.mrb[55].mxu0 }
 0x1b9   : > { %v2089_v36 = vadd.f32 %v2967_v46, %v3982_v52  ;;  %v2970_v5 = vadd.f32 %v2969_v3, %v2968_v0  ;;  %v3033_v7 = vpop.f32.mrb[55].mxu1 }
 0x1ba   : > { %v3034_v9 = vadd.f32 %v3033_v7, %v3032_v2  ;;  %v460_v2 = vld [vmem:[#allocation2] sm:$0xff] }
 0x1bb   : > { %v4025_v11 = vadd.f32 %v3031_v1, %v2089_v36  ;;  %v2092_v38 = vadd.f32 %v2970_v5, %v3984_v54  ;;  %v461_v5 = vld [vmem:[#allocation2 + $0x8] sm:$0xff] }
 0x1bd   : > { %v4028_v58 = vadd.f32 %v3034_v9, %v2092_v38  ;;  %v2971_v12 = vpop.f32.mrb[56].mxu0 }
 0x1be   : > { %v3035_v13 = vpop.f32.mrb[56].mxu1  ;;  %v2972_v14 = vpop.f32.mrb[57].mxu0 }
 0x1bf   : > { %v2973_v60 = vadd.f32 %v2972_v14, %v2971_v12  ;;  %v3036_v17 = vpop.f32.mrb[57].mxu1  ;;  %v2974_v18 = vpop.f32.mrb[58].mxu0 }
 0x1c0   : > { %v3037_v19 = vadd.f32 %v3036_v17, %v3035_v13  ;;  %v3038_v21 = vpop.f32.mrb[58].mxu1  ;;  %v2975_v25 = vpop.f32.mrb[59].mxu0 }
 0x1c1   : > { %v2097_v52 = vadd.f32 %v2973_v60, %v3986_v4  ;;  %v2976_v26 = vadd.f32 %v2975_v25, %v2974_v18  ;;  %v3039_v27 = vpop.f32.mrb[59].mxu1 }
 0x1c2   : > { %v3040_v28 = vadd.f32 %v3039_v27, %v3038_v21 }
 0x1c3   : > { %v4031_v29 = vadd.f32 %v3037_v19, %v2097_v52  ;;  %v2100_v54 = vadd.f32 %v2976_v26, %v3988_v6 }
 0x1c5   : > { %v4034_v8 = vadd.f32 %v3040_v28, %v2100_v54  ;;  %v2977_v30 = vpop.f32.mrb[60].mxu0 }
 0x1c6   : > { %v3041_v31 = vpop.f32.mrb[60].mxu1  ;;  %v2978_v32 = vpop.f32.mrb[61].mxu0 }
 0x1c7   : > { %v2979_v10 = vadd.f32 %v2978_v32, %v2977_v30  ;;  %v3042_v35 = vpop.f32.mrb[61].mxu1  ;;  %v2980_v37 = vpop.f32.mrb[62].mxu0  ;;  %v463_v30 = vld [vmem:[#allocation2 + $0x18] sm:$0xff] }
 0x1c8   : > { %v3043_v39 = vadd.f32 %v3042_v35, %v3041_v31  ;;  %v3044_v41 = vpop.f32.mrb[62].mxu1  ;;  %v2981_v43 = vpop.f32.mrb[63].mxu0 }
 0x1c9   : > { %v2105_v4 = vadd.f32 %v2979_v10, %v3990_v20  ;;  %v2982_v45 = vadd.f32 %v2981_v43, %v2980_v37  ;;  %v3045_v47 = vpop.f32.mrb[63].mxu1 }
 0x1ca   : > { %v3046_v48 = vadd.f32 %v3045_v47, %v3044_v41 }
 0x1cb   : > { %v4037_v49 = vadd.f32 %v3043_v39, %v2105_v4  ;;  %v2108_v6 = vadd.f32 %v2982_v45, %v3992_v23 }
 0x1cd   : > { %v4040_v22 = vadd.f32 %v3046_v48, %v2108_v6  ;;  %v3063_v50 = vpop.f32.mrb[64].mxu0 }
 0x1ce   : > { %v3127_v51 = vpop.f32.mrb[64].mxu1  ;;  %v3064_v53 = vpop.f32.mrb[65].mxu0 }
 0x1cf   : > { %v3065_v24 = vadd.f32 %v3064_v53, %v3063_v50  ;;  %v3128_v56 = vpop.f32.mrb[65].mxu1  ;;  %v3066_v57 = vpop.f32.mrb[66].mxu0 }
 0x1d0   : > { %v3129_v59 = vadd.f32 %v3128_v56, %v3127_v51  ;;  %v3130_v46 = vpop.f32.mrb[66].mxu1  ;;  %v3067_v63 = vpop.f32.mrb[67].mxu0  ;;  %v465_v56 = vld [vmem:[#allocation2 + $0x28] sm:$0xff] }
 0x1d1   : > { %v2243_v20 = vadd.f32 %v3065_v24, %v3995_v40  ;;  %v3068_v0 = vadd.f32 %v3067_v63, %v3066_v57  ;;  %v3131_v1 = vpop.f32.mrb[67].mxu1 }
 0x1d2   : > { %v3132_v3 = vadd.f32 %v3131_v1, %v3130_v46 }
 0x1d3   : > { %v2340_v36 = vadd.f32 %v3129_v59, %v2243_v20  ;;  %v2246_v23 = vadd.f32 %v3068_v0, %v3998_v42  ;;  %v462_v42 = vld [vmem:[#allocation2 + $0x10] sm:$0xff] }
 0x1d5   : > { %v2402_v7 = vadd.f32 %v2340_v36, %v460_v2  ;;  %v2343_v9 = vadd.f32 %v3132_v3, %v2246_v23  ;;  %v3069_v38 = vpop.f32.mrb[68].mxu0 }
 0x1d6   : > { %v3133_v12 = vpop.f32.mrb[68].mxu1  ;;  %v3070_v13 = vpop.f32.mrb[69].mxu0 }
 0x1d7   : > { %2418 = vst [vmem:[#allocation2] sm:$0xff] %v2402_v7  ;;  %v2403_v14 = vadd.f32 %v2343_v9, %v461_v5  ;;  %v3071_v60 = vadd.f32 %v3070_v13, %v3069_v38  ;;  %v3134_v17 = vpop.f32.mrb[69].mxu1  ;;  %v3072_v18 = vpop.f32.mrb[70].mxu0 }
 0x1d8   : > { %v3135_v19 = vadd.f32 %v3134_v17, %v3133_v12  ;;  %v3136_v40 = vpop.f32.mrb[70].mxu1  ;;  %v3073_v21 = vpop.f32.mrb[71].mxu0 }
 0x1d9   : > { %2419 = vst [vmem:[#allocation2 + $0x8] sm:$0xff] %v2403_v14  ;;  %v2251_v25 = vadd.f32 %v3071_v60, %v4001_v61  ;;  %v3074_v52 = vadd.f32 %v3073_v21, %v3072_v18  ;;  %v3137_v26 = vpop.f32.mrb[71].mxu1  ;;  %v467_v14 = vld [vmem:[#allocation2 + $0x38] sm:$0xff] }
 0x1da   : > { %v3138_v27 = vadd.f32 %v3137_v26, %v3136_v40 }
 0x1db   : > { %v2348_v28 = vadd.f32 %v3135_v19, %v2251_v25  ;;  %v2254_v54 = vadd.f32 %v3074_v52, %v4004_v62  ;;  %v464_v62 = vld [vmem:[#allocation2 + $0x20] sm:$0xff] }
 0x1dd   : > { %v2404_v31 = vadd.f32 %v2348_v28, %v462_v42  ;;  %v2351_v32 = vadd.f32 %v3138_v27, %v2254_v54  ;;  %v3075_v10 = vpop.f32.mrb[72].mxu0 }
 0x1de   : > { %v3139_v35 = vpop.f32.mrb[72].mxu1  ;;  %v3076_v37 = vpop.f32.mrb[73].mxu0 }
 0x1df   : > { %2420 = vst [vmem:[#allocation2 + $0x10] sm:$0xff] %v2404_v31  ;;  %v2405_v39 = vadd.f32 %v2351_v32, %v463_v30  ;;  %v3077_v41 = vadd.f32 %v3076_v37, %v3075_v10  ;;  %v3140_v43 = vpop.f32.mrb[73].mxu1  ;;  %v3078_v4 = vpop.f32.mrb[74].mxu0 }
 0x1e0   : > { %v3141_v45 = vadd.f32 %v3140_v43, %v3139_v35  ;;  %v3142_v61 = vpop.f32.mrb[74].mxu1  ;;  %v3079_v47 = vpop.f32.mrb[75].mxu0  ;;  %v469_v35 = vld [vmem:[#allocation2 + $0x48] sm:$0xff] }
 0x1e1   : > { %2421 = vst [vmem:[#allocation2 + $0x18] sm:$0xff] %v2405_v39  ;;  %v2259_v48 = vadd.f32 %v3077_v41, %v4007_v15  ;;  %v3080_v6 = vadd.f32 %v3079_v47, %v3078_v4  ;;  %v3143_v50 = vpop.f32.mrb[75].mxu1 }
 0x1e2   : > { %v3144_v51 = vadd.f32 %v3143_v50, %v3142_v61 }
 0x1e3   : > { %v2356_v53 = vadd.f32 %v3141_v45, %v2259_v48  ;;  %v2262_v24 = vadd.f32 %v3080_v6, %v4010_v16  ;;  %v466_v16 = vld [vmem:[#allocation2 + $0x30] sm:$0xff] }
 0x1e5   : > { %v2406_v57 = vadd.f32 %v2356_v53, %v464_v62  ;;  %v2359_v59 = vadd.f32 %v3144_v51, %v2262_v24  ;;  %v3081_v46 = vpop.f32.mrb[76].mxu0 }
 0x1e6   : > { %v3145_v63 = vpop.f32.mrb[76].mxu1  ;;  %v3082_v20 = vpop.f32.mrb[77].mxu0 }
 0x1e7   : > { %2422 = vst [vmem:[#allocation2 + $0x20] sm:$0xff] %v2406_v57  ;;  %v2407_v0 = vadd.f32 %v2359_v59, %v465_v56  ;;  %v3083_v1 = vadd.f32 %v3082_v20, %v3081_v46  ;;  %v3146_v2 = vpop.f32.mrb[77].mxu1  ;;  %v3084_v3 = vpop.f32.mrb[78].mxu0  ;;  %v471_v59 = vld [vmem:[#allocation2 + $0x58] sm:$0xff] }
 0x1e8   : > { %v3147_v36 = vadd.f32 %v3146_v2, %v3145_v63  ;;  %v3148_v15 = vpop.f32.mrb[78].mxu1  ;;  %v3085_v23 = vpop.f32.mrb[79].mxu0 }
 0x1e9   : > { %2423 = vst [vmem:[#allocation2 + $0x28] sm:$0xff] %v2407_v0  ;;  %v2267_v5 = vadd.f32 %v3083_v1, %v4013_v33  ;;  %v3086_v7 = vadd.f32 %v3085_v23, %v3084_v3  ;;  %v3149_v9 = vpop.f32.mrb[79].mxu1 }
 0x1ea   : > { %v3150_v38 = vadd.f32 %v3149_v9, %v3148_v15 }
 0x1eb   : > { %v2364_v12 = vadd.f32 %v3147_v36, %v2267_v5  ;;  %v2270_v13 = vadd.f32 %v3086_v7, %v4016_v34  ;;  %v468_v34 = vld [vmem:[#allocation2 + $0x40] sm:$0xff] }
 0x1ed   : > { %v2408_v60 = vadd.f32 %v2364_v12, %v466_v16  ;;  %v2367_v17 = vadd.f32 %v3150_v38, %v2270_v13  ;;  %v3087_v18 = vpop.f32.mrb[80].mxu0 }
 0x1ee   : > { %v3151_v19 = vpop.f32.mrb[80].mxu1  ;;  %v3088_v40 = vpop.f32.mrb[81].mxu0 }
 0x1ef   : > { %2424 = vst [vmem:[#allocation2 + $0x30] sm:$0xff] %v2408_v60  ;;  %v2409_v21 = vadd.f32 %v2367_v17, %v467_v14  ;;  %v3089_v25 = vadd.f32 %v3088_v40, %v3087_v18  ;;  %v3152_v52 = vpop.f32.mrb[81].mxu1  ;;  %v3090_v26 = vpop.f32.mrb[82].mxu0  ;;  %v473_v14 = vld [vmem:[#allocation2 + $0x68] sm:$0xff] }
 0x1f0   : > { %v3153_v42 = vadd.f32 %v3152_v52, %v3151_v19  ;;  %v3154_v33 = vpop.f32.mrb[82].mxu1  ;;  %v3091_v27 = vpop.f32.mrb[83].mxu0 }
 0x1f1   : > { %2425 = vst [vmem:[#allocation2 + $0x38] sm:$0xff] %v2409_v21  ;;  %v2275_v28 = vadd.f32 %v3089_v25, %v4019_v55  ;;  %v3092_v54 = vadd.f32 %v3091_v27, %v3090_v26  ;;  %v3155_v30 = vpop.f32.mrb[83].mxu1 }
 0x1f2   : > { %v3156_v31 = vadd.f32 %v3155_v30, %v3154_v33 }
 0x1f3   : > { %v2372_v32 = vadd.f32 %v3153_v42, %v2275_v28  ;;  %v2278_v10 = vadd.f32 %v3092_v54, %v4022_v44  ;;  %v470_v44 = vld [vmem:[#allocation2 + $0x50] sm:$0xff] }
 0x1f5   : > { %v2410_v37 = vadd.f32 %v2372_v32, %v468_v34  ;;  %v2375_v39 = vadd.f32 %v3156_v31, %v2278_v10  ;;  %v3093_v41 = vpop.f32.mrb[84].mxu0  ;;  %v475_v32 = vld [vmem:[#allocation2 + $0x78] sm:$0xff] }
 0x1f6   : > { %v3157_v43 = vpop.f32.mrb[84].mxu1  ;;  %v3094_v4 = vpop.f32.mrb[85].mxu0 }
 0x1f7   : > { %2426 = vst [vmem:[#allocation2 + $0x40] sm:$0xff] %v2410_v37  ;;  %v2411_v45 = vadd.f32 %v2375_v39, %v469_v35  ;;  %v3095_v61 = vadd.f32 %v3094_v4, %v3093_v41  ;;  %v3158_v47 = vpop.f32.mrb[85].mxu1  ;;  %v3096_v48 = vpop.f32.mrb[86].mxu0  ;;  %v2438_v39 = vld [vmem:[#allocation2] sm:$0xff] (!%p2785_p11)  ;;  %v2439_v41 = vld [vmem:[#allocation2 + $0x8] sm:$0xff] (!%p2785_p11) }
 0x1f8   : > { %v3159_v6 = vadd.f32 %v3158_v47, %v3157_v43  ;;  %v3160_v55 = vpop.f32.mrb[86].mxu1  ;;  %v3097_v50 = vpop.f32.mrb[87].mxu0 }
 0x1f9   : > { %2427 = vst [vmem:[#allocation2 + $0x48] sm:$0xff] %v2411_v45  ;;  %v2283_v62 = vadd.f32 %v3095_v61, %v4025_v11  ;;  %v3098_v51 = vadd.f32 %v3097_v50, %v3096_v48  ;;  %v3161_v53 = vpop.f32.mrb[87].mxu1  ;;  %v2440_v45 = vld [vmem:[#allocation2 + $0x10] sm:$0xff] (!%p2785_p11)  ;;  %v2441_v61 = vld [vmem:[#allocation2 + $0x18] sm:$0xff] (!%p2785_p11) }
 0x1fa   : > { %v3162_v24 = vadd.f32 %v3161_v53, %v3160_v55  ;;  %v2443_v55 = vld [vmem:[#allocation2 + $0x28] sm:$0xff] (!%p2785_p11)  ;;  %v2444_v50 = vld [vmem:[#allocation2 + $0x30] sm:$0xff] (!%p2785_p11) }
 0x1fb   : > { %v2380_v56 = vadd.f32 %v3159_v6, %v2283_v62  ;;  %v2286_v57 = vadd.f32 %v3098_v51, %v4028_v58  ;;  %v472_v58 = vld [vmem:[#allocation2 + $0x60] sm:$0xff]  ;;  %v2445_v62 = vld [vmem:[#allocation2 + $0x38] sm:$0xff] (!%p2785_p11) }
 0x1fd   : > { %v2412_v46 = vadd.f32 %v2380_v56, %v470_v44  ;;  %v2383_v63 = vadd.f32 %v3162_v24, %v2286_v57  ;;  %v3099_v20 = vpop.f32.mrb[88].mxu0 }
 0x1fe   : > { %v3163_v0 = vpop.f32.mrb[88].mxu1  ;;  %v3100_v1 = vpop.f32.mrb[89].mxu0  ;;  %v2446_v24 = vld [vmem:[#allocation2 + $0x40] sm:$0xff] (!%p2785_p11) }
 0x1ff   : > { %2428 = vst [vmem:[#allocation2 + $0x50] sm:$0xff] %v2412_v46  ;;  %v2413_v2 = vadd.f32 %v2383_v63, %v471_v59  ;;  %v3101_v3 = vadd.f32 %v3100_v1, %v3099_v20  ;;  %v3164_v36 = vpop.f32.mrb[89].mxu1  ;;  %v3102_v15 = vpop.f32.mrb[90].mxu0 }
 0x200   : > { %v3165_v23 = vadd.f32 %v3164_v36, %v3163_v0  ;;  %v3166_v11 = vpop.f32.mrb[90].mxu1  ;;  %v3103_v5 = vpop.f32.mrb[91].mxu0  ;;  %v2447_v56 = vld [vmem:[#allocation2 + $0x48] sm:$0xff] (!%p2785_p11) }
 0x201   : > { %2429 = vst [vmem:[#allocation2 + $0x58] sm:$0xff] %v2413_v2  ;;  %v2291_v7 = vadd.f32 %v3101_v3, %v4031_v29  ;;  %v3104_v9 = vadd.f32 %v3103_v5, %v3102_v15  ;;  %v3167_v16 = vpop.f32.mrb[91].mxu1 }
 0x202   : > { %v3168_v38 = vadd.f32 %v3167_v16, %v3166_v11 }
 0x203   : > { %v2388_v12 = vadd.f32 %v3165_v23, %v2291_v7  ;;  %v2294_v13 = vadd.f32 %v3104_v9, %v4034_v8  ;;  %v474_v8 = vld [vmem:[#allocation2 + $0x70] sm:$0xff] }
 0x205   : > { %v2414_v60 = vadd.f32 %v2388_v12, %v472_v58  ;;  %v2391_v17 = vadd.f32 %v3168_v38, %v2294_v13  ;;  %v3105_v18 = vpop.f32.mrb[92].mxu0 }
 0x206   : > { %v3169_v19 = vpop.f32.mrb[92].mxu1  ;;  %v3106_v40 = vpop.f32.mrb[93].mxu0  ;;  %v2448_v57 = vld [vmem:[#allocation2 + $0x50] sm:$0xff] (!%p2785_p11) }
 0x207   : > { %2430 = vst [vmem:[#allocation2 + $0x60] sm:$0xff] %v2414_v60  ;;  %v2415_v21 = vadd.f32 %v2391_v17, %v473_v14  ;;  %v3107_v25 = vadd.f32 %v3106_v40, %v3105_v18  ;;  %v3170_v52 = vpop.f32.mrb[93].mxu1  ;;  %v3108_v26 = vpop.f32.mrb[94].mxu0 }
 0x208   : > { %v3171_v42 = vadd.f32 %v3170_v52, %v3169_v19  ;;  %v3172_v29 = vpop.f32.mrb[94].mxu1  ;;  %v3109_v33 = vpop.f32.mrb[95].mxu0  ;;  %v2449_v20 = vld [vmem:[#allocation2 + $0x58] sm:$0xff] (!%p2785_p11) }
 0x209   : > { %2431 = vst [vmem:[#allocation2 + $0x68] sm:$0xff] %v2415_v21  ;;  %v2299_v27 = vadd.f32 %v3107_v25, %v4037_v49  ;;  %v3110_v28 = vadd.f32 %v3109_v33, %v3108_v26  ;;  %v3173_v54 = vpop.f32.mrb[95].mxu1  ;;  %v2786_v49 = vld [vmem:[%s4127_s2] ss:$0 sm:$0xff] (!%p2785_p11) }
 0x20a   : > { %v3174_v30 = vadd.f32 %v3173_v54, %v3172_v29  ;;  %v2461_v43 = vadd.f32 (!%p2785_p11), %v2786_v49, %v2438_v39  ;;  %v2462_v4 = vadd.f32 (!%p2785_p11), %v2786_v49, %v2439_v41  ;;  %v2463_v47 = vadd.f32 (!%p2785_p11), %v2786_v49, %v2440_v45 }
 0x20b   : > { %v2396_v34 = vadd.f32 %v3171_v42, %v2299_v27  ;;  %v2302_v31 = vadd.f32 %v3110_v28, %v4040_v22  ;;  %2437 = sbr.rel (%p2785_p11) target bundleno = 540 (0x21c), region = 63  ;;  %v2442_v22 = vld [vmem:[#allocation2 + $0x20] sm:$0xff] (!%p2785_p11)  ;;  %v2464_v48 = vadd.f32 (!%p2785_p11), %v2786_v49, %v2441_v61  ;;  %v2466_v51 = vadd.f32 (!%p2785_p11), %v2786_v49, %v2443_v55 }
 0x20c   : > { %v2465_v6 = vadd.f32 (!%p2785_p11), %v2786_v49, %v2442_v22  ;;  %2477 = vst [vmem:[%s4128_s3] sm:$0xff] (!%p2785_p11), %v2461_v43  ;;  %2478 = vst [vmem:[%s4128_s3 + $0x8] sm:$0xff] (!%p2785_p11), %v2462_v4  ;;  %v2467_v53 = vadd.f32 (!%p2785_p11), %v2786_v49, %v2444_v50  ;;  %v2468_v44 = vadd.f32 (!%p2785_p11), %v2786_v49, %v2445_v62 }
 0x20d   : > { %v2416_v10 = vadd.f32 %v2396_v34, %v474_v8  ;;  %v2399_v35 = vadd.f32 %v3174_v30, %v2302_v31  ;;  %2479 = vst [vmem:[%s4128_s3 + $0x10] sm:$0xff] (!%p2785_p11), %v2463_v47  ;;  %2480 = vst [vmem:[%s4128_s3 + $0x18] sm:$0xff] (!%p2785_p11), %v2464_v48  ;;  %v2469_v59 = vadd.f32 (!%p2785_p11), %v2786_v49, %v2446_v24 }
 0x20e   : > { %2481 = vst [vmem:[%s4128_s3 + $0x20] sm:$0xff] (!%p2785_p11), %v2465_v6  ;;  %v2470_v46 = vadd.f32 (!%p2785_p11), %v2786_v49, %v2447_v56  ;;  %v2471_v63 = vadd.f32 (!%p2785_p11), %v2786_v49, %v2448_v57  ;;  %v2450_v0 = vld [vmem:[#allocation2 + $0x60] sm:$0xff] (!%p2785_p11)  ;;  %2482 = vst [vmem:[%s4128_s3 + $0x28] sm:$0xff] (!%p2785_p11), %v2466_v51  ;;  %v2472_v2 = vadd.f32 (!%p2785_p11), %v2786_v49, %v2449_v20 }
 0x20f   : > { %2432 = vst [vmem:[#allocation2 + $0x70] sm:$0xff] %v2416_v10  ;;  %v2417_v37 = vadd.f32 %v2399_v35, %v475_v32  ;;  %2483 = vst [vmem:[%s4128_s3 + $0x30] sm:$0xff] (!%p2785_p11), %v2467_v53  ;;  %v2473_v3 = vadd.f32 (!%p2785_p11), %v2786_v49, %v2450_v0 }
 0x210   : > { %v2451_v1 = vld [vmem:[#allocation2 + $0x68] sm:$0xff] (!%p2785_p11)  ;;  %2484 = vst [vmem:[%s4128_s3 + $0x38] sm:$0xff] (!%p2785_p11), %v2468_v44  ;;  %2485 = vst [vmem:[%s4128_s3 + $0x40] sm:$0xff] (!%p2785_p11), %v2469_v59 }
 0x211   : > { %2433 = vst [vmem:[#allocation2 + $0x78] sm:$0xff] %v2417_v37  ;;  %v2474_v36 = vadd.f32 (!%p2785_p11), %v2786_v49, %v2451_v1  ;;  %2486 = vst [vmem:[%s4128_s3 + $0x48] sm:$0xff] (!%p2785_p11), %v2470_v46 }
 0x212   : > { %2487 = vst [vmem:[%s4128_s3 + $0x50] sm:$0xff] %v2471_v63  ;;  %2488 = vst [vmem:[%s4128_s3 + $0x58] sm:$0xff] %v2472_v2 }
 0x213   : > { %2489 = vst [vmem:[%s4128_s3 + $0x60] sm:$0xff] %v2473_v3  ;;  %2490 = vst [vmem:[%s4128_s3 + $0x68] sm:$0xff] %v2474_v36 }
 0x216   : > { %v2452_v15 = vld [vmem:[#allocation2 + $0x70] sm:$0xff] }
 0x217   : > { %v2475_v11 = vadd.f32 %v2786_v49, %v2452_v15 }
 0x218   : > { %v2453_v23 = vld [vmem:[#allocation2 + $0x78] sm:$0xff] }
 0x219   : > { %v2476_v5 = vadd.f32 %v2786_v49, %v2453_v23  ;;  %2491 = vst [vmem:[%s4128_s3 + $0x70] sm:$0xff] %v2475_v11 }
 0x21b   : > { %2492 = vst [vmem:[%s4128_s3 + $0x78] sm:$0xff] %v2476_v5 }
 0x21c PF: > { %s13_s16 = sadd.s32 1, %s3496_s16   ;;  %s4129_s12 = smov %s3484_s13 }
 0x21d   : > { %p10_p12 = scmp.ge.s32.totalorder %s13_s16, 5   ;;  %s4130_s13 = smov %s3554_s20 }
 0x21e   : > { %s4131_s14 = smov %s3492_s15  ;;  %s4132_s15 = smov %s4134_s17 }
 0x21f   :  { %12 = sbr.rel (!%p10_p12) target bundleno = 3 (0x3), region = 104 }

// kernel: afnet_forward.11
= control target key start
LH: loop header
LB: loop body
LE: loop exit
PB: predicated region body
PF: predicated region fallthrough
CT: control target
= control target key end

     0   :  { %v5616_v0 = vmov 0   ;;  %s7480_s1 = inlined_call_operand.vmem [shape: bf16[1152,128], index: 1, kind: input, shape index: {}]   ;;  %s7481_s0 = inlined_call_operand.vmem [shape: bf16[512,1152], index: 0, kind: input, shape index: {}]   ;;  %s7482_s2 = inlined_call_operand.vmem [shape: f32[1,128], index: 2, kind: input, shape index: {}]   ;;  %s7483_s3 = inlined_call_operand.vmem [shape: f32[512,128], index: 3, kind: output, shape index: {}]  }
   0x1   :  { %2515 = vmatprep.subr.bf16.mxu1 %v5616_v0  ;;  %2804 = vmatprep.subr.bf16.mxu0 %v5616_v0  ;;  %v5128_v1 = vld [vmem:[%s7480_s1] sm:$0xff]   ;;  %v5130_v3 = vld [vmem:[%s7480_s1 + $0x8] sm:$0xff]   ;;  %v5132_v5 = vld [vmem:[%s7480_s1 + $0x10] sm:$0xff]  }
   0x2   :  { %v5645_v2 = vld [vmem:[%s7480_s1 + $0x80] sm:$0xff]   ;;  %2516 = vmatpush1.bf16.msra.mxu1 %v5128_v1  ;;  %v5655_v4 = vld [vmem:[%s7480_s1 + $0x88] sm:$0xff]   ;;  %v5666_v6 = vld [vmem:[%s7480_s1 + $0x90] sm:$0xff]  }
   0x3   :  { %2805 = vmatpush1.bf16.msra.mxu0 %v5645_v2  ;;  %2517 = vmatprep.subr.bf16.mxu1 %v5616_v0  ;;  %v5134_v7 = vld [vmem:[%s7480_s1 + $0x18] sm:$0xff]   ;;  %v5136_v9 = vld [vmem:[%s7480_s1 + $0x20] sm:$0xff]   ;;  %v5138_v11 = vld [vmem:[%s7480_s1 + $0x28] sm:$0xff]  }
   0x4   :  { %2806 = vmatprep.subr.bf16.mxu0 %v5616_v0  ;;  %v5677_v8 = vld [vmem:[%s7480_s1 + $0x98] sm:$0xff]   ;;  %v5688_v10 = vld [vmem:[%s7480_s1 + $0xa0] sm:$0xff]   ;;  %v5699_v12 = vld [vmem:[%s7480_s1 + $0xa8] sm:$0xff]  }
   0x5   :  { %v5140_v13 = vld [vmem:[%s7480_s1 + $0x30] sm:$0xff]   ;;  %v5142_v15 = vld [vmem:[%s7480_s1 + $0x38] sm:$0xff]   ;;  %v5144_v17 = vld [vmem:[%s7480_s1 + $0x40] sm:$0xff]  }
   0x6   :  { %2518 = vmatpush1.bf16.msra.mxu1 %v5130_v3  ;;  %v5710_v14 = vld [vmem:[%s7480_s1 + $0xb0] sm:$0xff]   ;;  %v5721_v16 = vld [vmem:[%s7480_s1 + $0xb8] sm:$0xff]   ;;  %v5732_v18 = vld [vmem:[%s7480_s1 + $0xc0] sm:$0xff]  }
   0x7   :  { %2807 = vmatpush1.bf16.msra.mxu0 %v5655_v4  ;;  %2519 = vmatprep.subr.bf16.mxu1 %v5616_v0  ;;  %v5162_v19 = vld [vmem:[%s7481_s0 + $0x4] ss:$36 sps:$4 sm:$0xff]   ;;  %v5165_v21 = vld [vmem:[%s7481_s0 + $0xc] ss:$36 sps:$4 sm:$0xff]   ;;  %v5150_v25 = vld [vmem:[%s7480_s1 + $0x58] sm:$0xff]  }
   0x8   :  { %2808 = vmatprep.subr.bf16.mxu0 %v5616_v0  ;;  %v5146_v20 = vld [vmem:[%s7480_s1 + $0x48] sm:$0xff]   ;;  %2547 = vmatprep.mubr.bf16.mxu1 %v5162_v19  ;;  %v5148_v23 = vld [vmem:[%s7480_s1 + $0x50] sm:$0xff]   ;;  %v5771_v26 = vld [vmem:[%s7480_s1 + $0xd8] sm:$0xff]  }
   0x9   :  { %v5749_v22 = vld [vmem:[%s7480_s1 + $0xc8] sm:$0xff]   ;;  %2836 = vmatprep.mubr.bf16.mxu0 %v5165_v21  ;;  %v5760_v24 = vld [vmem:[%s7480_s1 + $0xd0] sm:$0xff]   ;;  %v5152_v27 = vld [vmem:[%s7480_s1 + $0x60] sm:$0xff]  }
   0xa   :  { %2520 = vmatpush1.bf16.msra.mxu1 %v5132_v5  ;;  %v5782_v28 = vld [vmem:[%s7480_s1 + $0xe0] sm:$0xff]   ;;  %v5154_v29 = vld [vmem:[%s7480_s1 + $0x68] sm:$0xff]   ;;  %v5156_v31 = vld [vmem:[%s7480_s1 + $0x70] sm:$0xff]  }
   0xb   :  { %2809 = vmatpush1.bf16.msra.mxu0 %v5666_v6  ;;  %2521 = vmatprep.subr.bf16.mxu1 %v5616_v0  ;;  %v5793_v30 = vld [vmem:[%s7480_s1 + $0xe8] sm:$0xff]   ;;  %v5804_v32 = vld [vmem:[%s7480_s1 + $0xf0] sm:$0xff]   ;;  %v5158_v33 = vld [vmem:[%s7480_s1 + $0x78] sm:$0xff]  }
   0xc   :  { %2810 = vmatprep.subr.bf16.mxu0 %v5616_v0  ;;  %v5815_v34 = vld [vmem:[%s7480_s1 + $0xf8] sm:$0xff]   ;;  %v5160_v35 = vld [vmem:[%s7481_s0] ss:$36 sps:$4 sm:$0xff]   ;;  %v5163_v36 = vld [vmem:[%s7481_s0 + $0x8] ss:$36 sps:$4 sm:$0xff]  }
   0xd   :  { %v5166_v37 = vld [vmem:[%s7480_s1 + $0x100] sm:$0xff]   ;;  %v5168_v38 = vld [vmem:[%s7481_s0 + $0x4c] ss:$36 sps:$4 sm:$0xff]   ;;  %v5170_v39 = vld [vmem:[%s7481_s0 + $0x54] ss:$36 sps:$4 sm:$0xff]  }
   0xe   :  { %2522 = vmatpush1.bf16.msra.mxu1 %v5134_v7  ;;  %v5167_v40 = vld [vmem:[%s7480_s1 + $0x108] sm:$0xff]   ;;  %v5173_v42 = vld [vmem:[%s7481_s0 + $0x50] ss:$36 sps:$4 sm:$0xff]   ;;  %v5178_v45 = vld [vmem:[%s7481_s0 + $0x9c] ss:$36 sps:$4 sm:$0xff]  }
   0xf   :  { %2811 = vmatpush1.bf16.msra.mxu0 %v5677_v8  ;;  %2523 = vmatprep.subr.bf16.mxu1 %v5616_v0  ;;  %v5172_v41 = vld [vmem:[%s7481_s0 + $0x48] ss:$36 sps:$4 sm:$0xff]   ;;  %v5176_v43 = vld [vmem:[%s7481_s0 + $0x94] ss:$36 sps:$4 sm:$0xff]   ;;  %v5182_v49 = vld [vmem:[%s7480_s1 + $0x120] sm:$0xff]  }
  0x10   :  { %2812 = vmatprep.subr.bf16.mxu0 %v5616_v0  ;;  %v5174_v44 = vld [vmem:[%s7480_s1 + $0x110] sm:$0xff]   ;;  %v5175_v46 = vld [vmem:[%s7480_s1 + $0x118] sm:$0xff]   ;;  %v5186_v51 = vld [vmem:[%s7481_s0 + $0xe4] ss:$36 sps:$4 sm:$0xff]  }
  0x11   :  { %v5180_v47 = vld [vmem:[%s7481_s0 + $0x90] ss:$36 sps:$4 sm:$0xff]   ;;  %v5181_v48 = vld [vmem:[%s7481_s0 + $0x98] ss:$36 sps:$4 sm:$0xff]   ;;  %v5183_v52 = vld [vmem:[%s7480_s1 + $0x128] sm:$0xff]  }
  0x12   :  { %2524 = vmatpush1.bf16.msra.mxu1 %v5136_v9  ;;  %v5184_v50 = vld [vmem:[%s7481_s0 + $0xdc] ss:$36 sps:$4 sm:$0xff]   ;;  %v5192_v55 = vld [vmem:[%s7481_s0 + $0x124] ss:$36 sps:$4 sm:$0xff]   ;;  %v5190_v56 = vld [vmem:[%s7480_s1 + $0x130] sm:$0xff]  }
  0x13   :  { %2813 = vmatpush1.bf16.msra.mxu0 %v5688_v10  ;;  %2525 = vmatprep.subr.bf16.mxu1 %v5616_v0  ;;  %v5188_v53 = vld [vmem:[%s7481_s0 + $0xd8] ss:$36 sps:$4 sm:$0xff]   ;;  %v5189_v54 = vld [vmem:[%s7481_s0 + $0xe0] ss:$36 sps:$4 sm:$0xff]   ;;  %v5194_v57 = vld [vmem:[%s7481_s0 + $0x12c] ss:$36 sps:$4 sm:$0xff]  }
  0x14   :  { %2814 = vmatprep.subr.bf16.mxu0 %v5616_v0  ;;  %v5191_v58 = vld [vmem:[%s7480_s1 + $0x138] sm:$0xff]   ;;  %v5196_v59 = vld [vmem:[%s7481_s0 + $0x120] ss:$36 sps:$4 sm:$0xff]   ;;  %v5197_v60 = vld [vmem:[%s7481_s0 + $0x128] ss:$36 sps:$4 sm:$0xff]  }
  0x15   :  { %v5198_v61 = vld [vmem:[%s7480_s1 + $0x140] sm:$0xff]   ;;  %v5200_v62 = vld [vmem:[%s7481_s0 + $0x16c] ss:$36 sps:$4 sm:$0xff]   ;;  %v5202_v63 = vld [vmem:[%s7481_s0 + $0x174] ss:$36 sps:$4 sm:$0xff]  }
  0x16   :  { %2526 = vmatpush1.bf16.msra.mxu1 %v5138_v11  ;;  %v5199_v1 = vld [vmem:[%s7480_s1 + $0x148] sm:$0xff]   ;;  %v5205_v3 = vld [vmem:[%s7481_s0 + $0x170] ss:$36 sps:$4 sm:$0xff]   ;;  %v5207_v7 = vld [vmem:[%s7480_s1 + $0x158] sm:$0xff]  }
  0x17   :  { %2815 = vmatpush1.bf16.msra.mxu0 %v5699_v12  ;;  %2527 = vmatprep.subr.bf16.mxu1 %v5616_v0  ;;  %v5206_v5 = vld [vmem:[%s7480_s1 + $0x150] sm:$0xff]   ;;  %v5213_v9 = vld [vmem:[%s7481_s0 + $0x1b8] ss:$36 sps:$4 sm:$0xff]  }
  0x18   :  { %2816 = vmatprep.subr.bf16.mxu0 %v5616_v0  ;;  %v5216_v11 = vld [vmem:[%s7481_s0 + $0x1fc] ss:$36 sps:$4 sm:$0xff]   ;;  %v5226_v21 = vld [vmem:[%s7481_s0 + $0x10] ss:$36 sps:$4 sm:$0xff]  }
  0x19   :  { %v5223_v19 = vld [vmem:[%s7480_s1 + $0x178] sm:$0xff]  }
  0x1a   :  { %2528 = vmatpush1.bf16.msra.mxu1 %v5140_v13  ;;  %v5215_v13 = vld [vmem:[%s7480_s1 + $0x168] sm:$0xff]  }
  0x1b   :  { %2817 = vmatpush1.bf16.msra.mxu0 %v5710_v14  ;;  %2529 = vmatprep.subr.bf16.mxu1 %v5616_v0 }
  0x1c   :  { %2818 = vmatprep.subr.bf16.mxu0 %v5616_v0 }
  0x1e   :  { %2530 = vmatpush1.bf16.msra.mxu1 %v5142_v15  ;;  %v5221_v15 = vld [vmem:[%s7481_s0 + $0x200] ss:$36 sps:$4 sm:$0xff]  }
  0x1f   :  { %2819 = vmatpush1.bf16.msra.mxu0 %v5721_v16  ;;  %2531 = vmatprep.subr.bf16.mxu1 %v5616_v0 }
  0x20   :  { %2820 = vmatprep.subr.bf16.mxu0 %v5616_v0 }
  0x22   :  { %2532 = vmatpush1.bf16.msra.mxu1 %v5144_v17  ;;  %v5222_v17 = vld [vmem:[%s7480_s1 + $0x170] sm:$0xff]  }
  0x23   :  { %2821 = vmatpush1.bf16.msra.mxu0 %v5732_v18  ;;  %2533 = vmatprep.subr.bf16.mxu1 %v5616_v0 }
  0x24   :  { %2822 = vmatprep.subr.bf16.mxu0 %v5616_v0 }
  0x26   :  { %2534 = vmatpush1.bf16.msra.mxu1 %v5146_v20  ;;  %v5229_v20 = vld [vmem:[%s7481_s0 + $0x240] ss:$36 sps:$4 sm:$0xff]  }
  0x27   :  { %2823 = vmatpush1.bf16.msra.mxu0 %v5749_v22  ;;  %2535 = vmatprep.subr.bf16.mxu1 %v5616_v0 }
  0x28   :  { %2824 = vmatprep.subr.bf16.mxu0 %v5616_v0 }
  0x2a   :  { %2536 = vmatpush1.bf16.msra.mxu1 %v5148_v23  ;;  %v5230_v23 = vld [vmem:[%s7480_s1 + $0x180] sm:$0xff]  }
  0x2b   :  { %2825 = vmatpush1.bf16.msra.mxu0 %v5760_v24  ;;  %2537 = vmatprep.subr.bf16.mxu1 %v5616_v0 }
  0x2c   :  { %2826 = vmatprep.subr.bf16.mxu0 %v5616_v0 }
  0x2e   :  { %2538 = vmatpush1.bf16.msra.mxu1 %v5150_v25  ;;  %v5235_v25 = vld [vmem:[%s7481_s0 + $0x288] ss:$36 sps:$4 sm:$0xff]  }
  0x2f   :  { %2827 = vmatpush1.bf16.msra.mxu0 %v5771_v26  ;;  %2539 = vmatprep.subr.bf16.mxu1 %v5616_v0 }
  0x30   :  { %2828 = vmatprep.subr.bf16.mxu0 %v5616_v0 }
  0x32   :  { %2540 = vmatpush1.bf16.msra.mxu1 %v5152_v27  ;;  %v5236_v27 = vld [vmem:[%s7481_s0 + $0x58] ss:$36 sps:$4 sm:$0xff]  }
  0x33   :  { %2829 = vmatpush1.bf16.msra.mxu0 %v5782_v28  ;;  %2541 = vmatprep.subr.bf16.mxu1 %v5616_v0 }
  0x34   :  { %2830 = vmatprep.subr.bf16.mxu0 %v5616_v0 }
  0x36   :  { %2542 = vmatpush1.bf16.msra.mxu1 %v5154_v29  ;;  %v5239_v29 = vld [vmem:[%s7481_s0 + $0xa4] ss:$36 sps:$4 sm:$0xff]  }
  0x37   :  { %2831 = vmatpush1.bf16.msra.mxu0 %v5793_v30  ;;  %2543 = vmatprep.subr.bf16.mxu1 %v5616_v0 }
  0x38   :  { %2832 = vmatprep.subr.bf16.mxu0 %v5616_v0 }
  0x3a   :  { %2544 = vmatpush1.bf16.msra.mxu1 %v5156_v31  ;;  %v5241_v31 = vld [vmem:[%s7481_s0 + $0x2d0] ss:$36 sps:$4 sm:$0xff]  }
  0x3b   :  { %2833 = vmatpush1.bf16.msra.mxu0 %v5804_v32  ;;  %2545 = vmatprep.subr.bf16.mxu1 %v5616_v0 }
  0x3c   :  { %2834 = vmatprep.subr.bf16.mxu0 %v5616_v0 }
  0x3e   :  { %2546 = vmatpush1.bf16.msra.mxu1 %v5158_v33  ;;  %v5242_v33 = vld [vmem:[%s7481_s0 + $0xa0] ss:$36 sps:$4 sm:$0xff]  }
  0x3f   :  { %2835 = vmatpush1.bf16.msra.mxu0 %v5815_v34  ;;  %4775 = vmatprep.subr.bf16.mxu1 %v5616_v0 }
  0x40   :  { %3093 = vmatprep.subr.bf16.mxu0 %v5616_v0 }
  0x41   :  { %2548 = vmatmul.mubr.bf16.vlgmr.msra.gmra.mrb[0].mxu1 %v5160_v35  ;;  %v5246_v35 = vld [vmem:[%s7481_s0 + $0xec] ss:$36 sps:$4 sm:$0xff]  }
  0x42   :  { %2837 = vmatmul.mubr.bf16.vlgmr.msra.gmra.mrb[0].mxu0 %v5163_v36  ;;  %4791 = vmatpush1.bf16.msra.mxu1 %v5645_v2  ;;  %v5204_v2 = vld [vmem:[%s7481_s0 + $0x168] ss:$36 sps:$4 sm:$0xff]   ;;  %v5282_v36 = vld [vmem:[%s7480_s1 + $0x1a0] sm:$0xff]  }
  0x43   :  { %3094 = vmatpush1.bf16.msra.mxu0 %v5166_v37  ;;  %2555 = vmatprep.mubr.bf16.mxu1 %v5168_v38  ;;  %v5295_v37 = vld [vmem:[%s7480_s1 + $0x1a8] sm:$0xff]   ;;  %v5248_v38 = vld [vmem:[%s7481_s0 + $0x318] ss:$36 sps:$4 sm:$0xff]  }
  0x44   :  { %3095 = vmatprep.subr.bf16.mxu0 %v5616_v0  ;;  %2844 = vmatprep.mubr.bf16.mxu0 %v5170_v39  ;;  %v5249_v39 = vld [vmem:[%s7481_s0 + $0xe8] ss:$36 sps:$4 sm:$0xff]  }
  0x45   :  { %4776 = vmatprep.subr.bf16.mxu1 %v5616_v0 }
  0x46   :  { %4792 = vmatpush1.bf16.msra.mxu1 %v5655_v4  ;;  %v5208_v4 = vld [vmem:[%s7481_s0 + $0x1b4] ss:$36 sps:$4 sm:$0xff]  }
  0x47   :  { %3096 = vmatpush1.bf16.msra.mxu0 %v5167_v40  ;;  %4777 = vmatprep.subr.bf16.mxu1 %v5616_v0  ;;  %v5250_v40 = vld [vmem:[%s7481_s0 + $0x364] ss:$36 sps:$4 sm:$0xff]  }
  0x48   :  { %3097 = vmatprep.subr.bf16.mxu0 %v5616_v0 }
  0x49   :  { %2556 = vmatmul.mubr.bf16.gmra.mrb[4].mxu1 %v5172_v41  ;;  %v5252_v41 = vld [vmem:[%s7481_s0 + $0x134] ss:$36 sps:$4 sm:$0xff]  }
  0x4a   :  { %2845 = vmatmul.mubr.bf16.gmra.mrb[4].mxu0 %v5173_v42  ;;  %2563 = vmatprep.mubr.bf16.mxu1 %v5176_v43  ;;  %v5308_v42 = vld [vmem:[%s7480_s1 + $0x1b0] sm:$0xff]   ;;  %v5321_v43 = vld [vmem:[%s7480_s1 + $0x1b8] sm:$0xff]  }
  0x4b   :  { %3098 = vmatpush1.bf16.msra.mxu0 %v5174_v44  ;;  %2852 = vmatprep.mubr.bf16.mxu0 %v5178_v45  ;;  %v5254_v44 = vld [vmem:[%s7481_s0 + $0x360] ss:$36 sps:$4 sm:$0xff]   ;;  %v5255_v45 = vld [vmem:[%s7481_s0 + $0x130] ss:$36 sps:$4 sm:$0xff]  }
  0x4c   :  { %3099 = vmatprep.subr.bf16.mxu0 %v5616_v0  ;;  %4793 = vmatpush1.bf16.msra.mxu1 %v5666_v6  ;;  %v5210_v6 = vld [vmem:[%s7481_s0 + $0x1bc] ss:$36 sps:$4 sm:$0xff]  }
  0x4d   :  { %4778 = vmatprep.subr.bf16.mxu1 %v5616_v0 }
  0x4f   :  { %3100 = vmatpush1.bf16.msra.mxu0 %v5175_v46  ;;  %v5257_v46 = vld [vmem:[%s7481_s0 + $0x3ac] ss:$36 sps:$4 sm:$0xff]  }
  0x50   :  { %3101 = vmatprep.subr.bf16.mxu0 %v5616_v0  ;;  %4794 = vmatpush1.bf16.msra.mxu1 %v5677_v8  ;;  %v5212_v8 = vld [vmem:[%s7481_s0 + $0x1b0] ss:$36 sps:$4 sm:$0xff]  }
  0x51   :  { %2564 = vmatmul.mubr.bf16.gmra.mrb[8].mxu1 %v5180_v47  ;;  %4779 = vmatprep.subr.bf16.mxu1 %v5616_v0  ;;  %v5259_v47 = vld [vmem:[%s7481_s0 + $0x17c] ss:$36 sps:$4 sm:$0xff]  }
  0x52   :  { %2853 = vmatmul.mubr.bf16.gmra.mrb[8].mxu0 %v5181_v48  ;;  %2571 = vmatprep.mubr.bf16.mxu1 %v5184_v50  ;;  %v5334_v48 = vld [vmem:[%s7480_s1 + $0x1c0] sm:$0xff]   ;;  %v5261_v50 = vld [vmem:[%s7481_s0 + $0x3a8] ss:$36 sps:$4 sm:$0xff]  }
  0x53   :  { %3102 = vmatpush1.bf16.msra.mxu0 %v5182_v49  ;;  %2860 = vmatprep.mubr.bf16.mxu0 %v5186_v51  ;;  %v5347_v49 = vld [vmem:[%s7480_s1 + $0x1c8] sm:$0xff]   ;;  %v5262_v51 = vld [vmem:[%s7481_s0 + $0x178] ss:$36 sps:$4 sm:$0xff]  }
  0x54   :  { %3103 = vmatprep.subr.bf16.mxu0 %v5616_v0  ;;  %4795 = vmatpush1.bf16.msra.mxu1 %v5688_v10  ;;  %v5214_v10 = vld [vmem:[%s7480_s1 + $0x160] sm:$0xff]  }
  0x55   :  { %4780 = vmatprep.subr.bf16.mxu1 %v5616_v0 }
  0x57   :  { %3104 = vmatpush1.bf16.msra.mxu0 %v5183_v52  ;;  %v5263_v52 = vld [vmem:[%s7481_s0 + $0x3f4] ss:$36 sps:$4 sm:$0xff]  }
  0x58   :  { %3105 = vmatprep.subr.bf16.mxu0 %v5616_v0  ;;  %4796 = vmatpush1.bf16.msra.mxu1 %v5699_v12  ;;  %v5218_v12 = vld [vmem:[%s7481_s0 + $0x204] ss:$36 sps:$4 sm:$0xff]  }
  0x59   :  { %2572 = vmatmul.mubr.bf16.gmra.mrb[12].mxu1 %v5188_v53  ;;  %4781 = vmatprep.subr.bf16.mxu1 %v5616_v0  ;;  %v5265_v53 = vld [vmem:[%s7481_s0 + $0x1c4] ss:$36 sps:$4 sm:$0xff]  }
  0x5a   :  { %2861 = vmatmul.mubr.bf16.gmra.mrb[12].mxu0 %v5189_v54  ;;  %2579 = vmatprep.mubr.bf16.mxu1 %v5192_v55  ;;  %v5360_v54 = vld [vmem:[%s7480_s1 + $0x1d0] sm:$0xff]  }
  0x5b   :  { %3106 = vmatpush1.bf16.msra.mxu0 %v5190_v56  ;;  %2868 = vmatprep.mubr.bf16.mxu0 %v5194_v57  ;;  %v5267_v55 = vld [vmem:[%s7481_s0 + $0x3f0] ss:$36 sps:$4 sm:$0xff]   ;;  %v5268_v56 = vld [vmem:[%s7481_s0 + $0x1c0] ss:$36 sps:$4 sm:$0xff]  }
  0x5c   :  { %3107 = vmatprep.subr.bf16.mxu0 %v5616_v0  ;;  %4797 = vmatpush1.bf16.msra.mxu1 %v5710_v14  ;;  %v5220_v14 = vld [vmem:[%s7481_s0 + $0x1f8] ss:$36 sps:$4 sm:$0xff]  }
  0x5d   :  { %4782 = vmatprep.subr.bf16.mxu1 %v5616_v0  ;;  %v5270_v57 = vld [vmem:[%s7481_s0 + $0x43c] ss:$36 sps:$4 sm:$0xff]  }
  0x5f   :  { %3108 = vmatpush1.bf16.msra.mxu0 %v5191_v58  ;;  %v5272_v58 = vld [vmem:[%s7481_s0 + $0x20c] ss:$36 sps:$4 sm:$0xff]  }
  0x60   :  { %3109 = vmatprep.subr.bf16.mxu0 %v5616_v0  ;;  %4798 = vmatpush1.bf16.msra.mxu1 %v5721_v16  ;;  %v5224_v16 = vld [vmem:[%s7481_s0 + $0x244] ss:$36 sps:$4 sm:$0xff]  }
  0x61   :  { %2580 = vmatmul.mubr.bf16.gmra.mrb[16].mxu1 %v5196_v59  ;;  %4783 = vmatprep.subr.bf16.mxu1 %v5616_v0  ;;  %v5373_v59 = vld [vmem:[%s7480_s1 + $0x1d8] sm:$0xff]  }
  0x62   :  { %2869 = vmatmul.mubr.bf16.gmra.mrb[16].mxu0 %v5197_v60  ;;  %2587 = vmatprep.mubr.bf16.mxu1 %v5200_v62  ;;  %v5274_v60 = vld [vmem:[%s7481_s0 + $0x438] ss:$36 sps:$4 sm:$0xff]   ;;  %v5276_v62 = vld [vmem:[%s7481_s0 + $0x484] ss:$36 sps:$4 sm:$0xff]  }
  0x63   :  { %3110 = vmatpush1.bf16.msra.mxu0 %v5198_v61  ;;  %2876 = vmatprep.mubr.bf16.mxu0 %v5202_v63  ;;  %v5275_v61 = vld [vmem:[%s7481_s0 + $0x208] ss:$36 sps:$4 sm:$0xff]   ;;  %v5278_v63 = vld [vmem:[%s7481_s0 + $0x254] ss:$36 sps:$4 sm:$0xff]  }
  0x64   :  { %3111 = vmatprep.subr.bf16.mxu0 %v5616_v0  ;;  %4799 = vmatpush1.bf16.msra.mxu1 %v5732_v18  ;;  %v5228_v18 = vld [vmem:[%s7481_s0 + $0x14] ss:$36 sps:$4 sm:$0xff]  }
  0x65   :  { %4784 = vmatprep.subr.bf16.mxu1 %v5616_v0 }
  0x67   :  { %3112 = vmatpush1.bf16.msra.mxu0 %v5199_v1  ;;  %v5280_v1 = vld [vmem:[%s7481_s0 + $0x480] ss:$36 sps:$4 sm:$0xff]  }
  0x68   :  { %3113 = vmatprep.subr.bf16.mxu0 %v5616_v0  ;;  %4800 = vmatpush1.bf16.msra.mxu1 %v5749_v22  ;;  %v5231_v22 = vld [vmem:[%s7481_s0 + $0x28c] ss:$36 sps:$4 sm:$0xff]  }
  0x69   :  { %2588 = vmatmul.mubr.bf16.gmra.mrb[20].mxu1 %v5204_v2  ;;  %4785 = vmatprep.subr.bf16.mxu1 %v5616_v0  ;;  %v5281_v2 = vld [vmem:[%s7481_s0 + $0x250] ss:$36 sps:$4 sm:$0xff]  }
  0x6a   :  { %2877 = vmatmul.mubr.bf16.gmra.mrb[20].mxu0 %v5205_v3  ;;  %2595 = vmatprep.mubr.bf16.mxu1 %v5208_v4  ;;  %v5283_v3 = vld [vmem:[%s7481_s0 + $0x4cc] ss:$36 sps:$4 sm:$0xff]   ;;  %v5285_v4 = vld [vmem:[%s7481_s0 + $0x29c] ss:$36 sps:$4 sm:$0xff]  }
  0x6b   :  { %3114 = vmatpush1.bf16.msra.mxu0 %v5206_v5  ;;  %2884 = vmatprep.mubr.bf16.mxu0 %v5210_v6  ;;  %v5386_v5 = vld [vmem:[%s7480_s1 + $0x1e0] sm:$0xff]  }
  0x6c   :  { %3115 = vmatprep.subr.bf16.mxu0 %v5616_v0  ;;  %4801 = vmatpush1.bf16.msra.mxu1 %v5760_v24  ;;  %v5233_v24 = vld [vmem:[%s7481_s0 + $0x5c] ss:$36 sps:$4 sm:$0xff]  }
  0x6d   :  { %4786 = vmatprep.subr.bf16.mxu1 %v5616_v0  ;;  %v6174_v6 = vld [vmem:[%s7480_s1 + $0x200] sm:$0xff]  }
  0x6f   :  { %3116 = vmatpush1.bf16.msra.mxu0 %v5207_v7  ;;  %v5287_v7 = vld [vmem:[%s7481_s0 + $0x4c8] ss:$36 sps:$4 sm:$0xff]  }
  0x70   :  { %3117 = vmatprep.subr.bf16.mxu0 %v5616_v0  ;;  %4802 = vmatpush1.bf16.msra.mxu1 %v5771_v26  ;;  %v5243_v26 = vld [vmem:[%s7480_s1 + $0x188] sm:$0xff]  }
  0x71   :  { %2596 = vmatmul.mubr.bf16.gmra.mrb[24].mxu1 %v5212_v8  ;;  %4787 = vmatprep.subr.bf16.mxu1 %v5616_v0  ;;  %v5288_v8 = vld [vmem:[%s7481_s0 + $0x298] ss:$36 sps:$4 sm:$0xff]  }
  0x72   :  { %2885 = vmatmul.mubr.bf16.gmra.mrb[24].mxu0 %v5213_v9  ;;  %2603 = vmatprep.mubr.bf16.mxu1 %v5216_v11  ;;  %v5289_v9 = vld [vmem:[%s7481_s0 + $0x514] ss:$36 sps:$4 sm:$0xff]  }
  0x73   :  { %3118 = vmatpush1.bf16.msra.mxu0 %v5214_v10  ;;  %2892 = vmatprep.mubr.bf16.mxu0 %v5218_v12  ;;  %v5291_v10 = vld [vmem:[%s7481_s0 + $0x2e4] ss:$36 sps:$4 sm:$0xff]   ;;  %v5293_v11 = vld [vmem:[%s7481_s0 + $0x510] ss:$36 sps:$4 sm:$0xff]  }
  0x74   :  { %3119 = vmatprep.subr.bf16.mxu0 %v5616_v0  ;;  %4803 = vmatpush1.bf16.msra.mxu1 %v5782_v28  ;;  %v5237_v28 = vld [vmem:[%s7481_s0 + $0x2d4] ss:$36 sps:$4 sm:$0xff]   ;;  %v5294_v12 = vld [vmem:[%s7481_s0 + $0x2e0] ss:$36 sps:$4 sm:$0xff]  }
  0x75   :  { %4788 = vmatprep.subr.bf16.mxu1 %v5616_v0 }
  0x77   :  { %3120 = vmatpush1.bf16.msra.mxu0 %v5215_v13  ;;  %v5296_v13 = vld [vmem:[%s7481_s0 + $0x55c] ss:$36 sps:$4 sm:$0xff]  }
  0x78   :  { %3121 = vmatprep.subr.bf16.mxu0 %v5616_v0  ;;  %4804 = vmatpush1.bf16.msra.mxu1 %v5793_v30  ;;  %v5256_v30 = vld [vmem:[%s7480_s1 + $0x190] sm:$0xff]  }
  0x79   :  { %2604 = vmatmul.mubr.bf16.gmra.mrb[28].mxu1 %v5220_v14  ;;  %4789 = vmatprep.subr.bf16.mxu1 %v5616_v0  ;;  %v5298_v14 = vld [vmem:[%s7481_s0 + $0x32c] ss:$36 sps:$4 sm:$0xff]  }
  0x7a   :  { %2893 = vmatmul.mubr.bf16.gmra.mrb[28].mxu0 %v5221_v15  ;;  %2611 = vmatprep.mubr.bf16.mxu1 %v5224_v16  ;;  %v5400_v15 = vld [vmem:[%s7480_s1 + $0x1e8] sm:$0xff]   ;;  %v5300_v16 = vld [vmem:[%s7481_s0 + $0x558] ss:$36 sps:$4 sm:$0xff]  }
  0x7b   :  { %3122 = vmatpush1.bf16.msra.mxu0 %v5222_v17  ;;  %3125 = vmatprep.mubr.bf16.mxu0 %v5228_v18  ;;  %v5301_v17 = vld [vmem:[%s7481_s0 + $0x328] ss:$36 sps:$4 sm:$0xff]  }
  0x7c   :  { %3123 = vmatprep.subr.bf16.mxu0 %v5616_v0  ;;  %4805 = vmatpush1.bf16.msra.mxu1 %v5804_v32  ;;  %v5269_v32 = vld [vmem:[%s7480_s1 + $0x198] sm:$0xff]   ;;  %v5302_v18 = vld [vmem:[%s7481_s0 + $0x5a4] ss:$36 sps:$4 sm:$0xff]  }
  0x7d   :  { %4790 = vmatprep.subr.bf16.mxu1 %v5616_v0 }
  0x7f   :  { %3124 = vmatpush1.bf16.msra.mxu0 %v5223_v19  ;;  %v5304_v19 = vld [vmem:[%s7481_s0 + $0x374] ss:$36 sps:$4 sm:$0xff]  }
  0x80   :  { %3382 = vmatprep.subr.bf16.mxu0 %v5616_v0  ;;  %4806 = vmatpush1.bf16.msra.mxu1 %v5815_v34  ;;  %v5244_v34 = vld [vmem:[%s7481_s0 + $0x31c] ss:$36 sps:$4 sm:$0xff]  }
  0x81   :  { %2612 = vmatmul.mubr.bf16.gmra.mrb[32].mxu1 %v5229_v20  ;;  %4695 = vmatprep.subr.bf16.mxu1 %v6174_v6  ;;  %v5306_v20 = vld [vmem:[%s7481_s0 + $0x5a0] ss:$36 sps:$4 sm:$0xff]  }
  0x82   :  { %3126 = vmatmul.mubr.bf16.vlgmr.msra.gmra.mrb[0].mxu0 %v5226_v21  ;;  %2619 = vmatprep.mubr.bf16.mxu1 %v5231_v22  ;;  %v5307_v21 = vld [vmem:[%s7481_s0 + $0x370] ss:$36 sps:$4 sm:$0xff]  }
  0x83   :  { %3383 = vmatpush1.bf16.msra.mxu0 %v5230_v23  ;;  %3133 = vmatprep.mubr.bf16.mxu0 %v5233_v24  ;;  %v5309_v22 = vld [vmem:[%s7481_s0 + $0x5ec] ss:$36 sps:$4 sm:$0xff]   ;;  %v5311_v23 = vld [vmem:[%s7481_s0 + $0x3bc] ss:$36 sps:$4 sm:$0xff]  }
  0x84   :  { %3384 = vmatprep.subr.bf16.mxu0 %v5616_v0  ;;  %v5414_v24 = vld [vmem:[%s7480_s1 + $0x1f0] sm:$0xff]  }
  0x87   :  { %3385 = vmatpush1.bf16.msra.mxu0 %v5243_v26  ;;  %v5314_v26 = vld [vmem:[%s7481_s0 + $0x3b8] ss:$36 sps:$4 sm:$0xff]  }
  0x88   :  { %3386 = vmatprep.subr.bf16.mxu0 %v5616_v0 }
  0x89   :  { %2620 = vmatmul.mubr.bf16.gmra.mrb[36].mxu1 %v5235_v25  ;;  %v5313_v25 = vld [vmem:[%s7481_s0 + $0x5e8] ss:$36 sps:$4 sm:$0xff]  }
  0x8a   :  { %3134 = vmatmul.mubr.bf16.gmra.mrb[4].mxu0 %v5236_v27  ;;  %2627 = vmatprep.mubr.bf16.mxu1 %v5237_v28  ;;  %v5315_v27 = vld [vmem:[%s7481_s0 + $0x634] ss:$36 sps:$4 sm:$0xff]   ;;  %v5317_v28 = vld [vmem:[%s7481_s0 + $0x404] ss:$36 sps:$4 sm:$0xff]  }
  0x8b   :  { %3141 = vmatprep.mubr.bf16.mxu0 %v5239_v29  ;;  %3387 = vmatpush1.bf16.msra.mxu0 %v5256_v30  ;;  %v5320_v29 = vld [vmem:[%s7481_s0 + $0x400] ss:$36 sps:$4 sm:$0xff]  }
  0x8c   :  { %3388 = vmatprep.subr.bf16.mxu0 %v5616_v0  ;;  %v5322_v30 = vld [vmem:[%s7481_s0 + $0x67c] ss:$36 sps:$4 sm:$0xff]  }
  0x8f   :  { %3389 = vmatpush1.bf16.msra.mxu0 %v5269_v32  ;;  %v5427_v32 = vld [vmem:[%s7480_s1 + $0x1f8] sm:$0xff]  }
  0x90   :  { %3390 = vmatprep.subr.bf16.mxu0 %v5616_v0 }
  0x91   :  { %2628 = vmatmul.mubr.bf16.gmra.mrb[40].mxu1 %v5241_v31  ;;  %v5324_v31 = vld [vmem:[%s7481_s0 + $0x44c] ss:$36 sps:$4 sm:$0xff]  }
  0x92   :  { %3142 = vmatmul.mubr.bf16.gmra.mrb[8].mxu0 %v5242_v33  ;;  %2635 = vmatprep.mubr.bf16.mxu1 %v5244_v34  ;;  %v5326_v33 = vld [vmem:[%s7481_s0 + $0x678] ss:$36 sps:$4 sm:$0xff]   ;;  %v5327_v34 = vld [vmem:[%s7481_s0 + $0x448] ss:$36 sps:$4 sm:$0xff]  }
  0x93   :  { %3149 = vmatprep.mubr.bf16.mxu0 %v5246_v35  ;;  %3391 = vmatpush1.bf16.msra.mxu0 %v5282_v36  ;;  %v5328_v35 = vld [vmem:[%s7481_s0 + $0x6c4] ss:$36 sps:$4 sm:$0xff]   ;;  %v5330_v36 = vld [vmem:[%s7481_s0 + $0x494] ss:$36 sps:$4 sm:$0xff]  }
  0x94   :  { %3392 = vmatprep.subr.bf16.mxu0 %v5616_v0 }
  0x97   :  { %3393 = vmatpush1.bf16.msra.mxu0 %v5295_v37  ;;  %v5332_v37 = vld [vmem:[%s7481_s0 + $0x6c0] ss:$36 sps:$4 sm:$0xff]  }
  0x98   :  { %3394 = vmatprep.subr.bf16.mxu0 %v5616_v0 }
  0x99   :  { %2636 = vmatmul.mubr.bf16.gmra.mrb[44].mxu1 %v5248_v38  ;;  %v5333_v38 = vld [vmem:[%s7481_s0 + $0x490] ss:$36 sps:$4 sm:$0xff]  }
  0x9a   :  { %3150 = vmatmul.mubr.bf16.gmra.mrb[12].mxu0 %v5249_v39  ;;  %2643 = vmatprep.mubr.bf16.mxu1 %v5250_v40  ;;  %v5335_v39 = vld [vmem:[%s7481_s0 + $0x70c] ss:$36 sps:$4 sm:$0xff]   ;;  %v5337_v40 = vld [vmem:[%s7481_s0 + $0x4dc] ss:$36 sps:$4 sm:$0xff]  }
  0x9b   :  { %3157 = vmatprep.mubr.bf16.mxu0 %v5252_v41  ;;  %3395 = vmatpush1.bf16.msra.mxu0 %v5308_v42  ;;  %v5339_v41 = vld [vmem:[%s7481_s0 + $0x708] ss:$36 sps:$4 sm:$0xff]   ;;  %v5340_v42 = vld [vmem:[%s7481_s0 + $0x4d8] ss:$36 sps:$4 sm:$0xff]  }
  0x9c   :  { %3396 = vmatprep.subr.bf16.mxu0 %v5616_v0 }
  0x9f   :  { %3397 = vmatpush1.bf16.msra.mxu0 %v5321_v43  ;;  %v5341_v43 = vld [vmem:[%s7481_s0 + $0x754] ss:$36 sps:$4 sm:$0xff]  }
  0xa0   :  { %3398 = vmatprep.subr.bf16.mxu0 %v5616_v0 }
  0xa1   :  { %2644 = vmatmul.mubr.bf16.gmra.mrb[48].mxu1 %v5254_v44  ;;  %v5343_v44 = vld [vmem:[%s7481_s0 + $0x524] ss:$36 sps:$4 sm:$0xff]  }
  0xa2   :  { %3158 = vmatmul.mubr.bf16.gmra.mrb[16].mxu0 %v5255_v45  ;;  %2651 = vmatprep.mubr.bf16.mxu1 %v5257_v46  ;;  %v5345_v45 = vld [vmem:[%s7481_s0 + $0x750] ss:$36 sps:$4 sm:$0xff]   ;;  %v5346_v46 = vld [vmem:[%s7481_s0 + $0x520] ss:$36 sps:$4 sm:$0xff]  }
  0xa3   :  { %3165 = vmatprep.mubr.bf16.mxu0 %v5259_v47  ;;  %3399 = vmatpush1.bf16.msra.mxu0 %v5334_v48  ;;  %v5348_v47 = vld [vmem:[%s7481_s0 + $0x79c] ss:$36 sps:$4 sm:$0xff]   ;;  %v5350_v48 = vld [vmem:[%s7481_s0 + $0x56c] ss:$36 sps:$4 sm:$0xff]  }
  0xa4   :  { %3400 = vmatprep.subr.bf16.mxu0 %v5616_v0 }
  0xa7   :  { %3401 = vmatpush1.bf16.msra.mxu0 %v5347_v49 }
  0xa8   :  { %3402 = vmatprep.subr.bf16.mxu0 %v5616_v0 }
  0xa9   :  { %2652 = vmatmul.mubr.bf16.gmra.mrb[52].mxu1 %v5261_v50 }
  0xaa   :  { %3166 = vmatmul.mubr.bf16.gmra.mrb[20].mxu0 %v5262_v51  ;;  %2659 = vmatprep.mubr.bf16.mxu1 %v5263_v52  ;;  %v5352_v51 = vld [vmem:[%s7481_s0 + $0x798] ss:$36 sps:$4 sm:$0xff]  }
  0xab   :  { %3173 = vmatprep.mubr.bf16.mxu0 %v5265_v53  ;;  %3403 = vmatpush1.bf16.msra.mxu0 %v5360_v54  ;;  %v5353_v53 = vld [vmem:[%s7481_s0 + $0x568] ss:$36 sps:$4 sm:$0xff]  }
  0xac   :  { %3404 = vmatprep.subr.bf16.mxu0 %v5616_v0  ;;  %v5354_v54 = vld [vmem:[%s7481_s0 + $0x7e4] ss:$36 sps:$4 sm:$0xff]  }
  0xaf   :  { %3405 = vmatpush1.bf16.msra.mxu0 %v5373_v59  ;;  %v5358_v59 = vld [vmem:[%s7481_s0 + $0x7e0] ss:$36 sps:$4 sm:$0xff]  }
  0xb0   :  { %3406 = vmatprep.subr.bf16.mxu0 %v5616_v0 }
  0xb1   :  { %2660 = vmatmul.mubr.bf16.gmra.mrb[56].mxu1 %v5267_v55 }
  0xb2   :  { %3174 = vmatmul.mubr.bf16.gmra.mrb[24].mxu0 %v5268_v56  ;;  %2667 = vmatprep.mubr.bf16.mxu1 %v5270_v57  ;;  %v5356_v56 = vld [vmem:[%s7481_s0 + $0x5b4] ss:$36 sps:$4 sm:$0xff]  }
  0xb3   :  { %3181 = vmatprep.mubr.bf16.mxu0 %v5272_v58  ;;  %3407 = vmatpush1.bf16.msra.mxu0 %v5386_v5 }
  0xb4   :  { %3408 = vmatprep.subr.bf16.mxu0 %v5616_v0 }
  0xb7   :  { %3409 = vmatpush1.bf16.msra.mxu0 %v5400_v15  ;;  %v5372_v15 = vld [vmem:[%s7481_s0 + $0x640] ss:$36 sps:$4 sm:$0xff]  }
  0xb8   :  { %3410 = vmatprep.subr.bf16.mxu0 %v5616_v0 }
  0xb9   :  { %2668 = vmatmul.mubr.bf16.gmra.mrb[60].mxu1 %v5274_v60 }
  0xba   :  { %3182 = vmatmul.mubr.bf16.gmra.mrb[28].mxu0 %v5275_v61  ;;  %2675 = vmatprep.mubr.bf16.mxu1 %v5276_v62  ;;  %v5359_v61 = vld [vmem:[%s7481_s0 + $0x5b0] ss:$36 sps:$4 sm:$0xff]  }
  0xbb   :  { %3189 = vmatprep.mubr.bf16.mxu0 %v5278_v63  ;;  %3411 = vmatpush1.bf16.msra.mxu0 %v5414_v24  ;;  %v5361_v62 = vld [vmem:[%s7481_s0 + $0x82c] ss:$36 sps:$4 sm:$0xff]  }
  0xbc   :  { %3412 = vmatprep.subr.bf16.mxu0 %v5616_v0  ;;  %v5319_v0 = vld [vmem:[%s7481_s0 + $0x630] ss:$36 sps:$4 sm:$0xff]  }
  0xbd   :  { %v5382_v24 = vld [vmem:[%s7481_s0 + $0x24c] ss:$36 sps:$4 sm:$0xff]  }
  0xbf   :  { %3413 = vmatpush1.bf16.msra.mxu0 %v5427_v32  ;;  %v5388_v32 = vld [vmem:[%s7481_s0 + $0x294] ss:$36 sps:$4 sm:$0xff]  }
  0xc1   :  { %2676 = vmatmul.mubr.bf16.gmra.mrb[64].mxu1 %v5280_v1  ;;  %v5363_v1 = vld [vmem:[%s7481_s0 + $0x5fc] ss:$36 sps:$4 sm:$0xff]  }
  0xc2   :  { %3190 = vmatmul.mubr.bf16.gmra.mrb[32].mxu0 %v5281_v2  ;;  %2683 = vmatprep.mubr.bf16.mxu1 %v5283_v3 }
  0xc3   :  { %3197 = vmatprep.mubr.bf16.mxu0 %v5285_v4  ;;  %v5365_v4 = vld [vmem:[%s7481_s0 + $0x828] ss:$36 sps:$4 sm:$0xff]  }
  0xc9   :  { %2684 = vmatmul.mubr.bf16.gmra.mrb[68].mxu1 %v5287_v7  ;;  %v5366_v7 = vld [vmem:[%s7481_s0 + $0x5f8] ss:$36 sps:$4 sm:$0xff]  }
  0xca   :  { %3198 = vmatmul.mubr.bf16.gmra.mrb[36].mxu0 %v5288_v8  ;;  %2691 = vmatprep.mubr.bf16.mxu1 %v5289_v9  ;;  %v5367_v8 = vld [vmem:[%s7481_s0 + $0x874] ss:$36 sps:$4 sm:$0xff]  }
  0xcb   :  { %3205 = vmatprep.mubr.bf16.mxu0 %v5291_v10  ;;  %v5369_v10 = vld [vmem:[%s7481_s0 + $0x644] ss:$36 sps:$4 sm:$0xff]  }
  0xd1   :  { %2692 = vmatmul.mubr.bf16.gmra.mrb[72].mxu1 %v5293_v11 }
  0xd2   :  { %3206 = vmatmul.mubr.bf16.gmra.mrb[40].mxu0 %v5294_v12  ;;  %2699 = vmatprep.mubr.bf16.mxu1 %v5296_v13  ;;  %v5371_v13 = vld [vmem:[%s7481_s0 + $0x870] ss:$36 sps:$4 sm:$0xff]  }
  0xd3   :  { %3213 = vmatprep.mubr.bf16.mxu0 %v5298_v14 }
  0xd9   :  { %2700 = vmatmul.mubr.bf16.gmra.mrb[76].mxu1 %v5300_v16  ;;  %v5374_v16 = vld [vmem:[%s7481_s0 + $0x8bc] ss:$36 sps:$4 sm:$0xff]  }
  0xda   :  { %3214 = vmatmul.mubr.bf16.gmra.mrb[44].mxu0 %v5301_v17  ;;  %2707 = vmatprep.mubr.bf16.mxu1 %v5302_v18  ;;  %v5376_v18 = vld [vmem:[%s7481_s0 + $0x68c] ss:$36 sps:$4 sm:$0xff]  }
  0xdb   :  { %3221 = vmatprep.mubr.bf16.mxu0 %v5304_v19 }
  0xe1   :  { %2708 = vmatmul.mubr.bf16.gmra.mrb[80].mxu1 %v5306_v20 }
  0xe2   :  { %3222 = vmatmul.mubr.bf16.gmra.mrb[48].mxu0 %v5307_v21  ;;  %2715 = vmatprep.mubr.bf16.mxu1 %v5309_v22  ;;  %v5378_v21 = vld [vmem:[%s7481_s0 + $0x8b8] ss:$36 sps:$4 sm:$0xff]  }
  0xe3   :  { %3229 = vmatprep.mubr.bf16.mxu0 %v5311_v23  ;;  %v5379_v23 = vld [vmem:[%s7481_s0 + $0x688] ss:$36 sps:$4 sm:$0xff]  }
  0xe9   :  { %2716 = vmatmul.mubr.bf16.gmra.mrb[84].mxu1 %v5313_v25 }
  0xea   :  { %3230 = vmatmul.mubr.bf16.gmra.mrb[52].mxu0 %v5314_v26  ;;  %2723 = vmatprep.mubr.bf16.mxu1 %v5315_v27  ;;  %v5383_v26 = vld [vmem:[%s7481_s0 + $0x6d4] ss:$36 sps:$4 sm:$0xff]  }
  0xeb   :  { %3237 = vmatprep.mubr.bf16.mxu0 %v5317_v28 }
  0xf1   :  { %2724 = vmatmul.mubr.bf16.gmra.mrb[88].mxu1 %v5319_v0  ;;  %v5380_v0 = vld [vmem:[%s7481_s0 + $0x248] ss:$36 sps:$4 sm:$0xff]  }
  0xf2   :  { %3238 = vmatmul.mubr.bf16.gmra.mrb[56].mxu0 %v5320_v29  ;;  %2731 = vmatprep.mubr.bf16.mxu1 %v5322_v30  ;;  %v5385_v30 = vld [vmem:[%s7481_s0 + $0x6d0] ss:$36 sps:$4 sm:$0xff]  }
  0xf3   :  { %3245 = vmatprep.mubr.bf16.mxu0 %v5324_v31 }
  0xf9   :  { %2732 = vmatmul.mubr.bf16.gmra.mrb[92].mxu1 %v5326_v33  ;;  %v5390_v33 = vld [vmem:[%s7481_s0 + $0x71c] ss:$36 sps:$4 sm:$0xff]  }
  0xfa   :  { %3246 = vmatmul.mubr.bf16.gmra.mrb[60].mxu0 %v5327_v34  ;;  %2739 = vmatprep.mubr.bf16.mxu1 %v5328_v35  ;;  %v5407_v34 = vld [vmem:[%s7480_s1 + $0x208] sm:$0xff]   ;;  %v5428_v35 = vld [vmem:[%s7480_s1 + $0x210] sm:$0xff]  }
  0xfb   :  { %3253 = vmatprep.mubr.bf16.mxu0 %v5330_v36 }
 0x101   :  { %2740 = vmatmul.mubr.bf16.gmra.mrb[96].mxu1 %v5332_v37 }
 0x102   :  { %3254 = vmatmul.mubr.bf16.gmra.mrb[64].mxu0 %v5333_v38  ;;  %2747 = vmatprep.mubr.bf16.mxu1 %v5335_v39  ;;  %v5392_v38 = vld [vmem:[%s7481_s0 + $0x290] ss:$36 sps:$4 sm:$0xff]  }
 0x103   :  { %3261 = vmatprep.mubr.bf16.mxu0 %v5337_v40  ;;  %v5394_v40 = vld [vmem:[%s7481_s0 + $0x2dc] ss:$36 sps:$4 sm:$0xff]  }
 0x109   :  { %2748 = vmatmul.mubr.bf16.gmra.mrb[100].mxu1 %v5339_v41 }
 0x10a   :  { %3262 = vmatmul.mubr.bf16.gmra.mrb[68].mxu0 %v5340_v42  ;;  %2755 = vmatprep.mubr.bf16.mxu1 %v5341_v43  ;;  %v5396_v42 = vld [vmem:[%s7481_s0 + $0x764] ss:$36 sps:$4 sm:$0xff]   ;;  %v5447_v43 = vld [vmem:[%s7480_s1 + $0x218] sm:$0xff]  }
 0x10b   :  { %3269 = vmatprep.mubr.bf16.mxu0 %v5343_v44 }
 0x111   :  { %2756 = vmatmul.mubr.bf16.gmra.mrb[104].mxu1 %v5345_v45  ;;  %v5466_v45 = vld [vmem:[%s7480_s1 + $0x220] sm:$0xff]  }
 0x112   :  { %3270 = vmatmul.mubr.bf16.gmra.mrb[72].mxu0 %v5346_v46  ;;  %2763 = vmatprep.mubr.bf16.mxu1 %v5348_v47  ;;  %v5398_v47 = vld [vmem:[%s7481_s0 + $0x2d8] ss:$36 sps:$4 sm:$0xff]  }
 0x113   :  { %3277 = vmatprep.mubr.bf16.mxu0 %v5350_v48 }
 0x114   :  { %v6309_v49 = vpop.f32.mrb[0].mxu1 }
 0x115   :  { %v2551_v50 = vpop.f32.mrb[1].mxu1 }
 0x116   :  { %v6314_v52 = vpop.f32.mrb[2].mxu1  ;;  %v5399_v50 = vld [vmem:[%s7481_s0 + $0x760] ss:$36 sps:$4 sm:$0xff]  }
 0x117   :  { %v2554_v55 = vpop.f32.mrb[3].mxu1 }
 0x118   :  { %v5485_v55 = vld [vmem:[%s7480_s1 + $0x228] sm:$0xff]  }
 0x119   :  { %2764 = vmatmul.mubr.bf16.gmra.mrb[108].mxu1 %v5352_v51  ;;  %v5401_v51 = vld [vmem:[%s7481_s0 + $0x324] ss:$36 sps:$4 sm:$0xff]  }
 0x11a   :  { %3278 = vmatmul.mubr.bf16.gmra.mrb[76].mxu0 %v5353_v53  ;;  %2771 = vmatprep.mubr.bf16.mxu1 %v5354_v54  ;;  %v5403_v54 = vld [vmem:[%s7481_s0 + $0x7ac] ss:$36 sps:$4 sm:$0xff]  }
 0x11b   :  { %3285 = vmatprep.mubr.bf16.mxu0 %v5356_v56  ;;  %v5504_v56 = vld [vmem:[%s7480_s1 + $0x230] sm:$0xff]  }
 0x11c   :  { %v6325_v57 = vpop.f32.mrb[4].mxu1 }
 0x11d   :  { %v2559_v58 = vpop.f32.mrb[5].mxu1 }
 0x11e   :  { %v6330_v60 = vpop.f32.mrb[6].mxu1  ;;  %v5405_v58 = vld [vmem:[%s7481_s0 + $0x320] ss:$36 sps:$4 sm:$0xff]  }
 0x11f   :  { %v2562_v63 = vpop.f32.mrb[7].mxu1 }
 0x120   :  { %v5412_v63 = vld [vmem:[%s7481_s0 + $0x368] ss:$36 sps:$4 sm:$0xff]  }
 0x121   :  { %2772 = vmatmul.mubr.bf16.gmra.mrb[112].mxu1 %v5358_v59  ;;  %v5406_v59 = vld [vmem:[%s7481_s0 + $0x7a8] ss:$36 sps:$4 sm:$0xff]  }
 0x122   :  { %3286 = vmatmul.mubr.bf16.gmra.mrb[80].mxu0 %v5359_v61  ;;  %2779 = vmatprep.mubr.bf16.mxu1 %v5361_v62  ;;  %v5408_v61 = vld [vmem:[%s7481_s0 + $0x36c] ss:$36 sps:$4 sm:$0xff]   ;;  %v5410_v62 = vld [vmem:[%s7481_s0 + $0x7f4] ss:$36 sps:$4 sm:$0xff]  }
 0x123   :  { %3293 = vmatprep.mubr.bf16.mxu0 %v5363_v1  ;;  %v5413_v1 = vld [vmem:[%s7481_s0 + $0x7f0] ss:$36 sps:$4 sm:$0xff]  }
 0x124   :  { %v6341_v2 = vpop.f32.mrb[8].mxu1 }
 0x125   :  { %v2567_v3 = vpop.f32.mrb[9].mxu1 }
 0x126   :  { %v6346_v5 = vpop.f32.mrb[10].mxu1  ;;  %v5415_v3 = vld [vmem:[%s7481_s0 + $0x3b4] ss:$36 sps:$4 sm:$0xff]  }
 0x127   :  { %v2570_v9 = vpop.f32.mrb[11].mxu1 }
 0x128   :  { %v5421_v9 = vld [vmem:[%s7481_s0 + $0x3fc] ss:$36 sps:$4 sm:$0xff]  }
 0x129   :  { %2780 = vmatmul.mubr.bf16.gmra.mrb[116].mxu1 %v5365_v4  ;;  %v5417_v4 = vld [vmem:[%s7481_s0 + $0x83c] ss:$36 sps:$4 sm:$0xff]  }
 0x12a   :  { %3294 = vmatmul.mubr.bf16.gmra.mrb[84].mxu0 %v5366_v7  ;;  %2787 = vmatprep.mubr.bf16.mxu1 %v5367_v8  ;;  %v5419_v7 = vld [vmem:[%s7481_s0 + $0x3b0] ss:$36 sps:$4 sm:$0xff]   ;;  %v5420_v8 = vld [vmem:[%s7481_s0 + $0x838] ss:$36 sps:$4 sm:$0xff]  }
 0x12b   :  { %3301 = vmatprep.mubr.bf16.mxu0 %v5369_v10  ;;  %v5423_v10 = vld [vmem:[%s7481_s0 + $0x884] ss:$36 sps:$4 sm:$0xff]  }
 0x12c   :  { %v6357_v11 = vpop.f32.mrb[12].mxu1 }
 0x12d   :  { %v2575_v12 = vpop.f32.mrb[13].mxu1 }
 0x12e   :  { %v6362_v14 = vpop.f32.mrb[14].mxu1  ;;  %v5523_v12 = vld [vmem:[%s7480_s1 + $0x238] sm:$0xff]  }
 0x12f   :  { %v2578_v17 = vpop.f32.mrb[15].mxu1 }
 0x130   :  { %v5431_v17 = vld [vmem:[%s7481_s0 + $0x8cc] ss:$36 sps:$4 sm:$0xff]  }
 0x131   :  { %2788 = vmatmul.mubr.bf16.gmra.mrb[120].mxu1 %v5371_v13  ;;  %v5425_v13 = vld [vmem:[%s7481_s0 + $0x3f8] ss:$36 sps:$4 sm:$0xff]  }
 0x132   :  { %3302 = vmatmul.mubr.bf16.gmra.mrb[88].mxu0 %v5372_v15  ;;  %2795 = vmatprep.mubr.bf16.mxu1 %v5374_v16  ;;  %v5426_v15 = vld [vmem:[%s7481_s0 + $0x880] ss:$36 sps:$4 sm:$0xff]  }
 0x133   :  { %3309 = vmatprep.mubr.bf16.mxu0 %v5376_v18  ;;  %v5429_v16 = vld [vmem:[%s7481_s0 + $0x444] ss:$36 sps:$4 sm:$0xff]  }
 0x134   :  { %v6373_v19 = vpop.f32.mrb[16].mxu1  ;;  %v5433_v18 = vld [vmem:[%s7481_s0 + $0x440] ss:$36 sps:$4 sm:$0xff]  }
 0x135   :  { %v2583_v20 = vpop.f32.mrb[17].mxu1 }
 0x136   :  { %v6378_v22 = vpop.f32.mrb[18].mxu1  ;;  %v5434_v20 = vld [vmem:[%s7481_s0 + $0x8c8] ss:$36 sps:$4 sm:$0xff]  }
 0x137   :  { %v2586_v25 = vpop.f32.mrb[19].mxu1 }
 0x138   :  { %v5437_v25 = vld [vmem:[%s7481_s0 + $0x18] ss:$36 sps:$4 sm:$0xff]  }
 0x139   :  { %2796 = vmatmul.mubr.bf16.gmra.mrb[124].mxu1 %v5378_v21  ;;  %v5435_v21 = vld [vmem:[%s7481_s0 + $0x48c] ss:$36 sps:$4 sm:$0xff]  }
 0x13a   :  { %3310 = vmatmul.mubr.bf16.gmra.mrb[92].mxu0 %v5379_v23  ;;  %2900 = vmatprep.mubr.bf16.mxu1 %v5382_v24  ;;  %v5439_v23 = vld [vmem:[%s7481_s0 + $0x1c] ss:$36 sps:$4 sm:$0xff]   ;;  %v5440_v24 = vld [vmem:[%s7481_s0 + $0x488] ss:$36 sps:$4 sm:$0xff]  }
 0x13b   :  { %3317 = vmatprep.mubr.bf16.mxu0 %v5383_v26  ;;  %v5441_v26 = vld [vmem:[%s7481_s0 + $0x4d4] ss:$36 sps:$4 sm:$0xff]  }
 0x13c   :  { %v6389_v27 = vpop.f32.mrb[20].mxu1 }
 0x13d   :  { %v2591_v28 = vpop.f32.mrb[21].mxu1 }
 0x13e   :  { %v6394_v29 = vpop.f32.mrb[22].mxu1  ;;  %v5443_v28 = vld [vmem:[%s7481_s0 + $0x64] ss:$36 sps:$4 sm:$0xff]  }
 0x13f   :  { %v2594_v31 = vpop.f32.mrb[23].mxu1 }
 0x140   :  { %v5448_v31 = vld [vmem:[%s7481_s0 + $0x51c] ss:$36 sps:$4 sm:$0xff]  }
 0x141   :  { %2901 = vmatmul.mubr.bf16.vlgmr.msra.gmra.mrb[32].mxu1 %v5380_v0  ;;  %v5445_v0 = vld [vmem:[%s7481_s0 + $0x4d0] ss:$36 sps:$4 sm:$0xff]  }
 0x142   :  { %3318 = vmatmul.mubr.bf16.gmra.mrb[96].mxu0 %v5385_v30  ;;  %4696 = vmatpush3.bf16.msra.mxu1 %v6174_v6  ;;  %v5393_v6 = vld [vmem:[%s7481_s0 + $0x718] ss:$36 sps:$4 sm:$0xff]   ;;  %v5446_v30 = vld [vmem:[%s7481_s0 + $0x60] ss:$36 sps:$4 sm:$0xff]  }
 0x143   :  { %2908 = vmatprep.mubr.bf16.mxu1 %v5388_v32  ;;  %3325 = vmatprep.mubr.bf16.mxu0 %v5390_v33  ;;  %v5450_v32 = vld [vmem:[%s7481_s0 + $0xac] ss:$36 sps:$4 sm:$0xff]   ;;  %v5452_v33 = vld [vmem:[%s7481_s0 + $0x518] ss:$36 sps:$4 sm:$0xff]  }
 0x144   :  { %v6412_v36 = vpop.f32.mrb[24].mxu1  ;;  %4697 = vmatprep.subr.bf16.mxu1 %v5407_v34 }
 0x145   :  { %v2599_v37 = vpop.f32.mrb[25].mxu1 }
 0x146   :  { %v6417_v39 = vpop.f32.mrb[26].mxu1  ;;  %4698 = vmatpush3.bf16.msra.mxu1 %v5407_v34  ;;  %v5453_v34 = vld [vmem:[%s7481_s0 + $0xa8] ss:$36 sps:$4 sm:$0xff]   ;;  %v5456_v37 = vld [vmem:[%s7481_s0 + $0xf4] ss:$36 sps:$4 sm:$0xff]  }
 0x147   :  { %v2602_v41 = vpop.f32.mrb[27].mxu1  ;;  %4699 = vmatprep.subr.bf16.mxu1 %v5428_v35 }
 0x148   :  { %v5462_v41 = vld [vmem:[%s7481_s0 + $0x13c] ss:$36 sps:$4 sm:$0xff]  }
 0x149   :  { %2909 = vmatmul.mubr.bf16.gmra.mrb[36].mxu1 %v5392_v38  ;;  %v5458_v38 = vld [vmem:[%s7481_s0 + $0x560] ss:$36 sps:$4 sm:$0xff]  }
 0x14a   :  { %3326 = vmatmul.mubr.bf16.gmra.mrb[100].mxu0 %v5393_v6  ;;  %2916 = vmatprep.mubr.bf16.mxu1 %v5394_v40  ;;  %v5459_v6 = vld [vmem:[%s7481_s0 + $0xf0] ss:$36 sps:$4 sm:$0xff]  }
 0x14b   :  { %3333 = vmatprep.mubr.bf16.mxu0 %v5396_v42  ;;  %4700 = vmatpush3.bf16.msra.mxu1 %v5428_v35  ;;  %v5454_v35 = vld [vmem:[%s7481_s0 + $0x564] ss:$36 sps:$4 sm:$0xff]   ;;  %v5460_v40 = vld [vmem:[%s7481_s0 + $0x5ac] ss:$36 sps:$4 sm:$0xff]  }
 0x14c   :  { %v6431_v44 = vpop.f32.mrb[28].mxu1  ;;  %4701 = vmatprep.subr.bf16.mxu1 %v5447_v43  ;;  %v5464_v42 = vld [vmem:[%s7481_s0 + $0x5a8] ss:$36 sps:$4 sm:$0xff]  }
 0x14d   :  { %v2607_v46 = vpop.f32.mrb[29].mxu1 }
 0x14e   :  { %v6439_v48 = vpop.f32.mrb[30].mxu1  ;;  %v5469_v46 = vld [vmem:[%s7481_s0 + $0x184] ss:$36 sps:$4 sm:$0xff]  }
 0x14f   :  { %v2610_v53 = vpop.f32.mrb[31].mxu1  ;;  %4702 = vmatpush3.bf16.msra.mxu1 %v5447_v43  ;;  %v5465_v43 = vld [vmem:[%s7481_s0 + $0x138] ss:$36 sps:$4 sm:$0xff]  }
 0x150   :  { %4703 = vmatprep.subr.bf16.mxu1 %v5466_v45  ;;  %v5475_v53 = vld [vmem:[%s7481_s0 + $0x1cc] ss:$36 sps:$4 sm:$0xff]  }
 0x151   :  { %2917 = vmatmul.mubr.bf16.gmra.mrb[40].mxu1 %v5398_v47  ;;  %v5471_v47 = vld [vmem:[%s7481_s0 + $0x5f0] ss:$36 sps:$4 sm:$0xff]  }
 0x152   :  { %3334 = vmatmul.mubr.bf16.gmra.mrb[104].mxu0 %v5399_v50  ;;  %2924 = vmatprep.mubr.bf16.mxu1 %v5401_v51  ;;  %v5472_v50 = vld [vmem:[%s7481_s0 + $0x180] ss:$36 sps:$4 sm:$0xff]  }
 0x153   :  { %3341 = vmatprep.mubr.bf16.mxu0 %v5403_v54  ;;  %4704 = vmatpush3.bf16.msra.mxu1 %v5466_v45  ;;  %v5467_v45 = vld [vmem:[%s7481_s0 + $0x5f4] ss:$36 sps:$4 sm:$0xff]   ;;  %v5473_v51 = vld [vmem:[%s7481_s0 + $0x63c] ss:$36 sps:$4 sm:$0xff]  }
 0x154   :  { %4705 = vmatprep.subr.bf16.mxu1 %v5485_v55  ;;  %v5477_v54 = vld [vmem:[%s7481_s0 + $0x638] ss:$36 sps:$4 sm:$0xff]  }
 0x157   :  { %4706 = vmatpush3.bf16.msra.mxu1 %v5485_v55  ;;  %v5478_v55 = vld [vmem:[%s7481_s0 + $0x1c8] ss:$36 sps:$4 sm:$0xff]  }
 0x158   :  { %4707 = vmatprep.subr.bf16.mxu1 %v5504_v56 }
 0x159   :  { %2925 = vmatmul.mubr.bf16.gmra.mrb[44].mxu1 %v5405_v58  ;;  %v5481_v58 = vld [vmem:[%s7481_s0 + $0x214] ss:$36 sps:$4 sm:$0xff]  }
 0x15a   :  { %3342 = vmatmul.mubr.bf16.gmra.mrb[108].mxu0 %v5406_v59  ;;  %2932 = vmatprep.mubr.bf16.mxu1 %v5408_v61  ;;  %v5483_v59 = vld [vmem:[%s7481_s0 + $0x680] ss:$36 sps:$4 sm:$0xff]   ;;  %v5484_v61 = vld [vmem:[%s7481_s0 + $0x210] ss:$36 sps:$4 sm:$0xff]  }
 0x15b   :  { %3349 = vmatprep.mubr.bf16.mxu0 %v5410_v62  ;;  %4708 = vmatpush3.bf16.msra.mxu1 %v5504_v56  ;;  %v5479_v56 = vld [vmem:[%s7481_s0 + $0x684] ss:$36 sps:$4 sm:$0xff]   ;;  %v5486_v62 = vld [vmem:[%s7481_s0 + $0x6cc] ss:$36 sps:$4 sm:$0xff]  }
 0x15c   :  { %4709 = vmatprep.subr.bf16.mxu1 %v5523_v12 }
 0x15f   :  { %4710 = vmatpush3.bf16.msra.mxu1 %v5523_v12  ;;  %v5500_v12 = vld [vmem:[%s7481_s0 + $0x2ec] ss:$36 sps:$4 sm:$0xff]  }
 0x161   :  { %2933 = vmatmul.mubr.bf16.gmra.mrb[48].mxu1 %v5412_v63  ;;  %v5488_v63 = vld [vmem:[%s7481_s0 + $0x25c] ss:$36 sps:$4 sm:$0xff]  }
 0x162   :  { %3350 = vmatmul.mubr.bf16.gmra.mrb[112].mxu0 %v5413_v1  ;;  %2940 = vmatprep.mubr.bf16.mxu1 %v5415_v3  ;;  %v5490_v1 = vld [vmem:[%s7481_s0 + $0x6c8] ss:$36 sps:$4 sm:$0xff]   ;;  %v5491_v3 = vld [vmem:[%s7481_s0 + $0x258] ss:$36 sps:$4 sm:$0xff]  }
 0x163   :  { %3357 = vmatprep.mubr.bf16.mxu0 %v5417_v4  ;;  %v5492_v4 = vld [vmem:[%s7481_s0 + $0x714] ss:$36 sps:$4 sm:$0xff]  }
 0x169   :  { %2941 = vmatmul.mubr.bf16.gmra.mrb[52].mxu1 %v5419_v7  ;;  %v5494_v7 = vld [vmem:[%s7481_s0 + $0x2a4] ss:$36 sps:$4 sm:$0xff]  }
 0x16a   :  { %3358 = vmatmul.mubr.bf16.gmra.mrb[116].mxu0 %v5420_v8  ;;  %2948 = vmatprep.mubr.bf16.mxu1 %v5421_v9  ;;  %v5496_v8 = vld [vmem:[%s7481_s0 + $0x710] ss:$36 sps:$4 sm:$0xff]   ;;  %v5497_v9 = vld [vmem:[%s7481_s0 + $0x2a0] ss:$36 sps:$4 sm:$0xff]  }
 0x16b   :  { %3365 = vmatprep.mubr.bf16.mxu0 %v5423_v10  ;;  %v5498_v10 = vld [vmem:[%s7481_s0 + $0x75c] ss:$36 sps:$4 sm:$0xff]  }
 0x171   :  { %2949 = vmatmul.mubr.bf16.gmra.mrb[56].mxu1 %v5425_v13  ;;  %v5502_v13 = vld [vmem:[%s7481_s0 + $0x758] ss:$36 sps:$4 sm:$0xff]  }
 0x172   :  { %3366 = vmatmul.mubr.bf16.gmra.mrb[120].mxu0 %v5426_v15  ;;  %2956 = vmatprep.mubr.bf16.mxu1 %v5429_v16  ;;  %v5503_v15 = vld [vmem:[%s7481_s0 + $0x2e8] ss:$36 sps:$4 sm:$0xff]  }
 0x173   :  { %3373 = vmatprep.mubr.bf16.mxu0 %v5431_v17  ;;  %v5505_v16 = vld [vmem:[%s7481_s0 + $0x7a4] ss:$36 sps:$4 sm:$0xff]   ;;  %v5507_v17 = vld [vmem:[%s7481_s0 + $0x334] ss:$36 sps:$4 sm:$0xff]  }
 0x179   :  { %2957 = vmatmul.mubr.bf16.gmra.mrb[60].mxu1 %v5433_v18  ;;  %v5509_v18 = vld [vmem:[%s7481_s0 + $0x7a0] ss:$36 sps:$4 sm:$0xff]  }
 0x17a   :  { %3374 = vmatmul.mubr.bf16.gmra.mrb[124].mxu0 %v5434_v20  ;;  %2964 = vmatprep.mubr.bf16.mxu1 %v5435_v21  ;;  %v5510_v20 = vld [vmem:[%s7481_s0 + $0x330] ss:$36 sps:$4 sm:$0xff]  }
 0x17b   :  { %3414 = vmatprep.mubr.bf16.mxu0 %v5439_v23  ;;  %v5511_v21 = vld [vmem:[%s7481_s0 + $0x7ec] ss:$36 sps:$4 sm:$0xff]   ;;  %v5513_v23 = vld [vmem:[%s7481_s0 + $0x37c] ss:$36 sps:$4 sm:$0xff]  }
 0x181   :  { %2965 = vmatmul.mubr.bf16.gmra.mrb[64].mxu1 %v5440_v24  ;;  %v5515_v24 = vld [vmem:[%s7481_s0 + $0x7e8] ss:$36 sps:$4 sm:$0xff]  }
 0x182   :  { %3415 = vmatmul.mubr.bf16.vlgmr.msra.gmra.mrb[0].mxu0 %v5437_v25  ;;  %2972 = vmatprep.mubr.bf16.mxu1 %v5441_v26  ;;  %v5516_v25 = vld [vmem:[%s7481_s0 + $0x378] ss:$36 sps:$4 sm:$0xff]  }
 0x183   :  { %3422 = vmatprep.mubr.bf16.mxu0 %v5443_v28  ;;  %v5517_v26 = vld [vmem:[%s7481_s0 + $0x834] ss:$36 sps:$4 sm:$0xff]   ;;  %v5519_v28 = vld [vmem:[%s7481_s0 + $0x3c4] ss:$36 sps:$4 sm:$0xff]  }
 0x189   :  { %2973 = vmatmul.mubr.bf16.gmra.mrb[68].mxu1 %v5445_v0  ;;  %v5521_v0 = vld [vmem:[%s7481_s0 + $0x830] ss:$36 sps:$4 sm:$0xff]  }
 0x18a   :  { %3423 = vmatmul.mubr.bf16.gmra.mrb[4].mxu0 %v5446_v30  ;;  %2980 = vmatprep.mubr.bf16.mxu1 %v5448_v31  ;;  %v5522_v30 = vld [vmem:[%s7481_s0 + $0x3c0] ss:$36 sps:$4 sm:$0xff]  }
 0x18b   :  { %3430 = vmatprep.mubr.bf16.mxu0 %v5450_v32  ;;  %v5524_v31 = vld [vmem:[%s7481_s0 + $0x87c] ss:$36 sps:$4 sm:$0xff]   ;;  %v5526_v32 = vld [vmem:[%s7481_s0 + $0x40c] ss:$36 sps:$4 sm:$0xff]  }
 0x191   :  { %2981 = vmatmul.mubr.bf16.gmra.mrb[72].mxu1 %v5452_v33  ;;  %v5528_v33 = vld [vmem:[%s7481_s0 + $0x878] ss:$36 sps:$4 sm:$0xff]  }
 0x192   :  { %3431 = vmatmul.mubr.bf16.gmra.mrb[8].mxu0 %v5453_v34  ;;  %2988 = vmatprep.mubr.bf16.mxu1 %v5454_v35  ;;  %v5529_v34 = vld [vmem:[%s7481_s0 + $0x408] ss:$36 sps:$4 sm:$0xff]  }
 0x193   :  { %3438 = vmatprep.mubr.bf16.mxu0 %v5456_v37  ;;  %v5530_v35 = vld [vmem:[%s7481_s0 + $0x8c4] ss:$36 sps:$4 sm:$0xff]   ;;  %v5532_v37 = vld [vmem:[%s7481_s0 + $0x454] ss:$36 sps:$4 sm:$0xff]  }
 0x199   :  { %2989 = vmatmul.mubr.bf16.gmra.mrb[76].mxu1 %v5458_v38  ;;  %v5534_v38 = vld [vmem:[%s7481_s0 + $0x8c0] ss:$36 sps:$4 sm:$0xff]  }
 0x19a   :  { %3439 = vmatmul.mubr.bf16.gmra.mrb[12].mxu0 %v5459_v6  ;;  %2996 = vmatprep.mubr.bf16.mxu1 %v5460_v40  ;;  %v5535_v6 = vld [vmem:[%s7481_s0 + $0x450] ss:$36 sps:$4 sm:$0xff]   ;;  %v5538_v40 = vld [vmem:[%s7481_s0 + $0x20] ss:$36 sps:$4 sm:$0xff]  }
 0x19b   :  { %3446 = vmatprep.mubr.bf16.mxu0 %v5462_v41  ;;  %v5536_v41 = vld [vmem:[%s7481_s0 + $0x49c] ss:$36 sps:$4 sm:$0xff]  }
 0x1a1   :  { %2997 = vmatmul.mubr.bf16.gmra.mrb[80].mxu1 %v5464_v42  ;;  %v5540_v42 = vld [vmem:[%s7481_s0 + $0x68] ss:$36 sps:$4 sm:$0xff]  }
 0x1a2   :  { %3447 = vmatmul.mubr.bf16.gmra.mrb[16].mxu0 %v5465_v43  ;;  %3004 = vmatprep.mubr.bf16.mxu1 %v5467_v45  ;;  %v5539_v43 = vld [vmem:[%s7481_s0 + $0x498] ss:$36 sps:$4 sm:$0xff]   ;;  %v5543_v45 = vld [vmem:[%s7481_s0 + $0xb0] ss:$36 sps:$4 sm:$0xff]  }
 0x1a3   :  { %3454 = vmatprep.mubr.bf16.mxu0 %v5469_v46  ;;  %v5541_v46 = vld [vmem:[%s7481_s0 + $0x4e4] ss:$36 sps:$4 sm:$0xff]  }
 0x1a9   :  { %3005 = vmatmul.mubr.bf16.gmra.mrb[84].mxu1 %v5471_v47  ;;  %v5545_v47 = vld [vmem:[%s7481_s0 + $0xf8] ss:$36 sps:$4 sm:$0xff]  }
 0x1aa   :  { %3455 = vmatmul.mubr.bf16.gmra.mrb[20].mxu0 %v5472_v50  ;;  %3012 = vmatprep.mubr.bf16.mxu1 %v5473_v51  ;;  %v5544_v50 = vld [vmem:[%s7481_s0 + $0x4e0] ss:$36 sps:$4 sm:$0xff]  }
 0x1ab   :  { %3462 = vmatprep.mubr.bf16.mxu0 %v5475_v53  ;;  %v5548_v51 = vld [vmem:[%s7481_s0 + $0x140] ss:$36 sps:$4 sm:$0xff]   ;;  %v5546_v53 = vld [vmem:[%s7481_s0 + $0x52c] ss:$36 sps:$4 sm:$0xff]  }
 0x1b1   :  { %3013 = vmatmul.mubr.bf16.gmra.mrb[88].mxu1 %v5477_v54  ;;  %v5550_v54 = vld [vmem:[%s7481_s0 + $0x188] ss:$36 sps:$4 sm:$0xff]  }
 0x1b2   :  { %3463 = vmatmul.mubr.bf16.gmra.mrb[24].mxu0 %v5478_v55  ;;  %3020 = vmatprep.mubr.bf16.mxu1 %v5479_v56  ;;  %v5549_v55 = vld [vmem:[%s7481_s0 + $0x528] ss:$36 sps:$4 sm:$0xff]   ;;  %v5553_v56 = vld [vmem:[%s7481_s0 + $0x1d0] ss:$36 sps:$4 sm:$0xff]  }
 0x1b3   :  { %3470 = vmatprep.mubr.bf16.mxu0 %v5481_v58  ;;  %v5551_v58 = vld [vmem:[%s7481_s0 + $0x574] ss:$36 sps:$4 sm:$0xff]  }
 0x1b9   :  { %3021 = vmatmul.mubr.bf16.gmra.mrb[92].mxu1 %v5483_v59 }
 0x1ba   :  { %3471 = vmatmul.mubr.bf16.gmra.mrb[28].mxu0 %v5484_v61  ;;  %3028 = vmatprep.mubr.bf16.mxu1 %v5486_v62  ;;  %v5555_v62 = vld [vmem:[%s7481_s0 + $0x218] ss:$36 sps:$4 sm:$0xff]  }
 0x1bb   :  { %3478 = vmatprep.mubr.bf16.mxu0 %v5488_v63 }
 0x1c1   :  { %3029 = vmatmul.mubr.bf16.gmra.mrb[96].mxu1 %v5490_v1  ;;  %v5554_v1 = vld [vmem:[%s7481_s0 + $0x570] ss:$36 sps:$4 sm:$0xff]  }
 0x1c2   :  { %3479 = vmatmul.mubr.bf16.gmra.mrb[32].mxu0 %v5491_v3  ;;  %3036 = vmatprep.mubr.bf16.mxu1 %v5492_v4  ;;  %v5558_v3 = vld [vmem:[%s7481_s0 + $0x260] ss:$36 sps:$4 sm:$0xff]  }
 0x1c3   :  { %3486 = vmatprep.mubr.bf16.mxu0 %v5494_v7  ;;  %v5556_v7 = vld [vmem:[%s7481_s0 + $0x5bc] ss:$36 sps:$4 sm:$0xff]  }
 0x1c9   :  { %3037 = vmatmul.mubr.bf16.gmra.mrb[100].mxu1 %v5496_v8 }
 0x1ca   :  { %3487 = vmatmul.mubr.bf16.gmra.mrb[36].mxu0 %v5497_v9  ;;  %3044 = vmatprep.mubr.bf16.mxu1 %v5498_v10  ;;  %v5560_v10 = vld [vmem:[%s7481_s0 + $0x2a8] ss:$36 sps:$4 sm:$0xff]  }
 0x1cb   :  { %3494 = vmatprep.mubr.bf16.mxu0 %v5500_v12 }
 0x1d1   :  { %3045 = vmatmul.mubr.bf16.gmra.mrb[104].mxu1 %v5502_v13  ;;  %v5559_v13 = vld [vmem:[%s7481_s0 + $0x5b8] ss:$36 sps:$4 sm:$0xff]  }
 0x1d2   :  { %3495 = vmatmul.mubr.bf16.gmra.mrb[40].mxu0 %v5503_v15  ;;  %3052 = vmatprep.mubr.bf16.mxu1 %v5505_v16  ;;  %v5563_v15 = vld [vmem:[%s7481_s0 + $0x2f0] ss:$36 sps:$4 sm:$0xff]  }
 0x1d3   :  { %3502 = vmatprep.mubr.bf16.mxu0 %v5507_v17  ;;  %v5561_v17 = vld [vmem:[%s7481_s0 + $0x604] ss:$36 sps:$4 sm:$0xff]  }
 0x1d9   :  { %3053 = vmatmul.mubr.bf16.gmra.mrb[108].mxu1 %v5509_v18 }
 0x1da   :  { %3503 = vmatmul.mubr.bf16.gmra.mrb[44].mxu0 %v5510_v20  ;;  %3060 = vmatprep.mubr.bf16.mxu1 %v5511_v21  ;;  %v5565_v21 = vld [vmem:[%s7481_s0 + $0x338] ss:$36 sps:$4 sm:$0xff]  }
 0x1db   :  { %3510 = vmatprep.mubr.bf16.mxu0 %v5513_v23 }
 0x1e1   :  { %3061 = vmatmul.mubr.bf16.gmra.mrb[112].mxu1 %v5515_v24  ;;  %v5564_v24 = vld [vmem:[%s7481_s0 + $0x600] ss:$36 sps:$4 sm:$0xff]  }
 0x1e2   :  { %3511 = vmatmul.mubr.bf16.gmra.mrb[48].mxu0 %v5516_v25  ;;  %3068 = vmatprep.mubr.bf16.mxu1 %v5517_v26  ;;  %v5568_v25 = vld [vmem:[%s7481_s0 + $0x380] ss:$36 sps:$4 sm:$0xff]  }
 0x1e3   :  { %3518 = vmatprep.mubr.bf16.mxu0 %v5519_v28  ;;  %v5566_v28 = vld [vmem:[%s7481_s0 + $0x64c] ss:$36 sps:$4 sm:$0xff]  }
 0x1e9   :  { %3069 = vmatmul.mubr.bf16.gmra.mrb[116].mxu1 %v5521_v0 }
 0x1ea   :  { %3519 = vmatmul.mubr.bf16.gmra.mrb[52].mxu0 %v5522_v30  ;;  %3076 = vmatprep.mubr.bf16.mxu1 %v5524_v31  ;;  %v5570_v31 = vld [vmem:[%s7481_s0 + $0x3c8] ss:$36 sps:$4 sm:$0xff]  }
 0x1eb   :  { %3526 = vmatprep.mubr.bf16.mxu0 %v5526_v32 }
 0x1f1   :  { %3077 = vmatmul.mubr.bf16.gmra.mrb[120].mxu1 %v5528_v33  ;;  %v5569_v33 = vld [vmem:[%s7481_s0 + $0x648] ss:$36 sps:$4 sm:$0xff]  }
 0x1f2   :  { %3527 = vmatmul.mubr.bf16.gmra.mrb[56].mxu0 %v5529_v34  ;;  %3084 = vmatprep.mubr.bf16.mxu1 %v5530_v35  ;;  %v5573_v34 = vld [vmem:[%s7481_s0 + $0x410] ss:$36 sps:$4 sm:$0xff]  }
 0x1f3   :  { %3534 = vmatprep.mubr.bf16.mxu0 %v5532_v37  ;;  %v5571_v37 = vld [vmem:[%s7481_s0 + $0x694] ss:$36 sps:$4 sm:$0xff]  }
 0x1f9   :  { %3085 = vmatmul.mubr.bf16.gmra.mrb[124].mxu1 %v5534_v38 }
 0x1fa   :  { %3535 = vmatmul.mubr.bf16.gmra.mrb[60].mxu0 %v5535_v6  ;;  %4711 = vmatprep.mubr.bf16.mxu1 %v5538_v40  ;;  %v5575_v40 = vld [vmem:[%s7481_s0 + $0x458] ss:$36 sps:$4 sm:$0xff]  }
 0x1fb   :  { %3542 = vmatprep.mubr.bf16.mxu0 %v5536_v41 }
 0x201   :  { %4712 = vmatmul.mubr.bf16.vlgmr.msra.gmra.mrb[128].mxu1 %v5540_v42  ;;  %v5574_v42 = vld [vmem:[%s7481_s0 + $0x690] ss:$36 sps:$4 sm:$0xff]  }
 0x202   :  { %3543 = vmatmul.mubr.bf16.gmra.mrb[64].mxu0 %v5539_v43  ;;  %4715 = vmatprep.mubr.bf16.mxu1 %v5543_v45  ;;  %v5578_v43 = vld [vmem:[%s7481_s0 + $0x4a0] ss:$36 sps:$4 sm:$0xff]  }
 0x203   :  { %3550 = vmatprep.mubr.bf16.mxu0 %v5541_v46  ;;  %v5576_v46 = vld [vmem:[%s7481_s0 + $0x6dc] ss:$36 sps:$4 sm:$0xff]  }
 0x209   :  { %4716 = vmatmul.mubr.bf16.gmra.mrb[132].mxu1 %v5545_v47 }
 0x20a   :  { %3551 = vmatmul.mubr.bf16.gmra.mrb[68].mxu0 %v5544_v50  ;;  %4719 = vmatprep.mubr.bf16.mxu1 %v5548_v51  ;;  %v5580_v51 = vld [vmem:[%s7481_s0 + $0x4e8] ss:$36 sps:$4 sm:$0xff]  }
 0x20b   :  { %3558 = vmatprep.mubr.bf16.mxu0 %v5546_v53 }
 0x211   :  { %4720 = vmatmul.mubr.bf16.gmra.mrb[136].mxu1 %v5550_v54  ;;  %v5579_v54 = vld [vmem:[%s7481_s0 + $0x6d8] ss:$36 sps:$4 sm:$0xff]  }
 0x212   :  { %3559 = vmatmul.mubr.bf16.gmra.mrb[72].mxu0 %v5549_v55  ;;  %4723 = vmatprep.mubr.bf16.mxu1 %v5553_v56  ;;  %v5583_v55 = vld [vmem:[%s7481_s0 + $0x530] ss:$36 sps:$4 sm:$0xff]  }
 0x213   :  { %3566 = vmatprep.mubr.bf16.mxu0 %v5551_v58  ;;  %v5581_v58 = vld [vmem:[%s7481_s0 + $0x724] ss:$36 sps:$4 sm:$0xff]  }
 0x214   :  { %v6747_v59 = vpop.f32.mrb[32].mxu1 }
 0x215   :  { %v2904_v61 = vpop.f32.mrb[33].mxu1 }
 0x216   :  { %v6752_v63 = vpop.f32.mrb[34].mxu1 }
 0x217   :  { %v2907_v4 = vpop.f32.mrb[35].mxu1 }
 0x218   :  { %v5584_v4 = vld [vmem:[%s7481_s0 + $0x720] ss:$36 sps:$4 sm:$0xff]  }
 0x219   :  { %4724 = vmatmul.mubr.bf16.gmra.mrb[140].mxu1 %v5555_v62 }
 0x21a   :  { %3567 = vmatmul.mubr.bf16.gmra.mrb[76].mxu0 %v5554_v1  ;;  %4727 = vmatprep.mubr.bf16.mxu1 %v5558_v3  ;;  %v5585_v1 = vld [vmem:[%s7481_s0 + $0x578] ss:$36 sps:$4 sm:$0xff]  }
 0x21b   :  { %3574 = vmatprep.mubr.bf16.mxu0 %v5556_v7  ;;  %v5588_v7 = vld [vmem:[%s7481_s0 + $0x5c0] ss:$36 sps:$4 sm:$0xff]  }
 0x21c   :  { %v6763_v8 = vpop.f32.mrb[36].mxu1 }
 0x21d   :  { %v2912_v9 = vpop.f32.mrb[37].mxu1 }
 0x21e   :  { %v6768_v12 = vpop.f32.mrb[38].mxu1 }
 0x21f   :  { %v2915_v16 = vpop.f32.mrb[39].mxu1 }
 0x220   :  { %v5590_v16 = vld [vmem:[%s7481_s0 + $0x608] ss:$36 sps:$4 sm:$0xff]  }
 0x221   :  { %4728 = vmatmul.mubr.bf16.gmra.mrb[144].mxu1 %v5560_v10  ;;  %v5586_v10 = vld [vmem:[%s7481_s0 + $0x76c] ss:$36 sps:$4 sm:$0xff]  }
 0x222   :  { %3575 = vmatmul.mubr.bf16.gmra.mrb[80].mxu0 %v5559_v13  ;;  %4731 = vmatprep.mubr.bf16.mxu1 %v5563_v15 }
 0x223   :  { %3582 = vmatprep.mubr.bf16.mxu0 %v5561_v17 }
 0x224   :  { %v6779_v18 = vpop.f32.mrb[40].mxu1 }
 0x225   :  { %v2920_v20 = vpop.f32.mrb[41].mxu1 }
 0x226   :  { %v6784_v23 = vpop.f32.mrb[42].mxu1  ;;  %v5589_v20 = vld [vmem:[%s7481_s0 + $0x768] ss:$36 sps:$4 sm:$0xff]  }
 0x227   :  { %v2923_v26 = vpop.f32.mrb[43].mxu1 }
 0x229   :  { %4732 = vmatmul.mubr.bf16.gmra.mrb[148].mxu1 %v5565_v21  ;;  %v5593_v21 = vld [vmem:[%s7481_s0 + $0x650] ss:$36 sps:$4 sm:$0xff]  }
 0x22a   :  { %3583 = vmatmul.mubr.bf16.gmra.mrb[84].mxu0 %v5564_v24  ;;  %4735 = vmatprep.mubr.bf16.mxu1 %v5568_v25  ;;  %v5591_v25 = vld [vmem:[%s7481_s0 + $0x7b4] ss:$36 sps:$4 sm:$0xff]  }
 0x22b   :  { %3590 = vmatprep.mubr.bf16.mxu0 %v5566_v28 }
 0x22c   :  { %v6795_v0 = vpop.f32.mrb[44].mxu1 }
 0x22d   :  { %v2928_v30 = vpop.f32.mrb[45].mxu1 }
 0x22e   :  { %v6800_v32 = vpop.f32.mrb[46].mxu1 }
 0x22f   :  { %v2931_v35 = vpop.f32.mrb[47].mxu1 }
 0x231   :  { %4736 = vmatmul.mubr.bf16.gmra.mrb[152].mxu1 %v5570_v31  ;;  %v5595_v31 = vld [vmem:[%s7481_s0 + $0x698] ss:$36 sps:$4 sm:$0xff]  }
 0x232   :  { %3591 = vmatmul.mubr.bf16.gmra.mrb[88].mxu0 %v5569_v33  ;;  %4739 = vmatprep.mubr.bf16.mxu1 %v5573_v34 }
 0x233   :  { %3598 = vmatprep.mubr.bf16.mxu0 %v5571_v37  ;;  %v5594_v37 = vld [vmem:[%s7481_s0 + $0x7b0] ss:$36 sps:$4 sm:$0xff]  }
 0x234   :  { %v6811_v38 = vpop.f32.mrb[48].mxu1 }
 0x235   :  { %v2936_v6 = vpop.f32.mrb[49].mxu1 }
 0x236   :  { %v6816_v41 = vpop.f32.mrb[50].mxu1  ;;  %v5598_v6 = vld [vmem:[%s7481_s0 + $0x6e0] ss:$36 sps:$4 sm:$0xff]  }
 0x237   :  { %v2939_v45 = vpop.f32.mrb[51].mxu1 }
 0x239   :  { %4740 = vmatmul.mubr.bf16.gmra.mrb[156].mxu1 %v5575_v40 }
 0x23a   :  { %3599 = vmatmul.mubr.bf16.gmra.mrb[92].mxu0 %v5574_v42  ;;  %4743 = vmatprep.mubr.bf16.mxu1 %v5578_v43  ;;  %v5596_v43 = vld [vmem:[%s7481_s0 + $0x7fc] ss:$36 sps:$4 sm:$0xff]  }
 0x23b   :  { %3606 = vmatprep.mubr.bf16.mxu0 %v5576_v46 }
 0x23c   :  { %v6827_v47 = vpop.f32.mrb[52].mxu1 }
 0x23d   :  { %v2944_v50 = vpop.f32.mrb[53].mxu1 }
 0x23e   :  { %v6832_v53 = vpop.f32.mrb[54].mxu1 }
 0x23f   :  { %v2947_v56 = vpop.f32.mrb[55].mxu1 }
 0x241   :  { %4744 = vmatmul.mubr.bf16.gmra.mrb[160].mxu1 %v5580_v51 }
 0x242   :  { %3607 = vmatmul.mubr.bf16.gmra.mrb[96].mxu0 %v5579_v54  ;;  %4747 = vmatprep.mubr.bf16.mxu1 %v5583_v55  ;;  %v5600_v54 = vld [vmem:[%s7481_s0 + $0x728] ss:$36 sps:$4 sm:$0xff]  }
 0x243   :  { %3614 = vmatprep.mubr.bf16.mxu0 %v5581_v58 }
 0x244   :  { %v6843_v61 = vpop.f32.mrb[56].mxu1 }
 0x245   :  { %v2952_v62 = vpop.f32.mrb[57].mxu1 }
 0x246   :  { %v6848_v3 = vpop.f32.mrb[58].mxu1  ;;  %v5603_v62 = vld [vmem:[%s7481_s0 + $0x770] ss:$36 sps:$4 sm:$0xff]  }
 0x247   :  { %v2955_v9 = vpop.f32.mrb[59].mxu1 }
 0x249   :  { %4748 = vmatmul.mubr.bf16.gmra.mrb[164].mxu1 %v5585_v1 }
 0x24a   :  { %3615 = vmatmul.mubr.bf16.gmra.mrb[100].mxu0 %v5584_v4  ;;  %4751 = vmatprep.mubr.bf16.mxu1 %v5588_v7  ;;  %v5601_v7 = vld [vmem:[%s7481_s0 + $0x844] ss:$36 sps:$4 sm:$0xff]  }
 0x24b   :  { %3622 = vmatprep.mubr.bf16.mxu0 %v5586_v10 }
 0x24c   :  { %v6859_v13 = vpop.f32.mrb[60].mxu1 }
 0x24d   :  { %v2960_v15 = vpop.f32.mrb[61].mxu1 }
 0x24e   :  { %v6864_v17 = vpop.f32.mrb[62].mxu1 }
 0x24f   :  { %v2963_v24 = vpop.f32.mrb[63].mxu1 }
 0x251   :  { %4752 = vmatmul.mubr.bf16.gmra.mrb[168].mxu1 %v5590_v16 }
 0x252   :  { %3623 = vmatmul.mubr.bf16.gmra.mrb[104].mxu0 %v5589_v20  ;;  %4755 = vmatprep.mubr.bf16.mxu1 %v5593_v21  ;;  %v5605_v20 = vld [vmem:[%s7481_s0 + $0x7b8] ss:$36 sps:$4 sm:$0xff]  }
 0x253   :  { %3630 = vmatprep.mubr.bf16.mxu0 %v5591_v25 }
 0x254   :  { %v6875_v26 = vpop.f32.mrb[64].mxu1 }
 0x255   :  { %v3416_v28 = vpop.f32.mrb[0].mxu0  ;;  %v2968_v30 = vpop.f32.mrb[65].mxu1 }
 0x256   :  { %v6881_v33 = vadd.f32 %v3416_v28, %v6309_v49  ;;  %v3418_v34 = vpop.f32.mrb[1].mxu0  ;;  %v6883_v35 = vpop.f32.mrb[66].mxu1  ;;  %v5608_v28 = vld [vmem:[%s7481_s0 + $0x800] ss:$36 sps:$4 sm:$0xff]  }
 0x257   :  { %v3419_v40 = vpop.f32.mrb[2].mxu0  ;;  %v2971_v42 = vpop.f32.mrb[67].mxu1  ;;  %v5606_v34 = vld [vmem:[%s7481_s0 + $0x88c] ss:$36 sps:$4 sm:$0xff]  }
 0x258   :  { %v6895_v49 = vadd.f32 %v3419_v40, %v6314_v52  ;;  %v3421_v45 = vpop.f32.mrb[3].mxu0  ;;  %v5599_v52 = vld [vmem:[%s7481_s0 + $0x7f8] ss:$36 sps:$4 sm:$0xff]  }
 0x259   :  { %4756 = vmatmul.mubr.bf16.gmra.mrb[172].mxu1 %v5595_v31 }
 0x25a   :  { %3631 = vmatmul.mubr.bf16.gmra.mrb[108].mxu0 %v5594_v37  ;;  %4759 = vmatprep.mubr.bf16.mxu1 %v5598_v6 }
 0x25b   :  { %3638 = vmatprep.mubr.bf16.mxu0 %v5596_v43  ;;  %v5610_v43 = vld [vmem:[%s7481_s0 + $0x848] ss:$36 sps:$4 sm:$0xff]  }
 0x25c   :  { %v6897_v46 = vpop.f32.mrb[68].mxu1 }
 0x25d   :  { %v3424_v50 = vpop.f32.mrb[4].mxu0  ;;  %v2976_v51 = vpop.f32.mrb[69].mxu1 }
 0x25e   :  { %v6903_v55 = vadd.f32 %v3424_v50, %v6325_v57  ;;  %v3426_v56 = vpop.f32.mrb[5].mxu0  ;;  %v6905_v58 = vpop.f32.mrb[70].mxu1 }
 0x25f   :  { %v3427_v1 = vpop.f32.mrb[6].mxu0  ;;  %v2979_v4 = vpop.f32.mrb[71].mxu1 }
 0x260   :  { %v6917_v57 = vadd.f32 %v3427_v1, %v6330_v60  ;;  %v3429_v9 = vpop.f32.mrb[7].mxu0  ;;  %v5604_v60 = vld [vmem:[%s7481_s0 + $0x840] ss:$36 sps:$4 sm:$0xff]  }
 0x261   :  { %4760 = vmatmul.mubr.bf16.gmra.mrb[176].mxu1 %v5600_v54  ;;  %v5613_v54 = vld [vmem:[%s7481_s0 + $0x890] ss:$36 sps:$4 sm:$0xff]  }
 0x262   :  { %3639 = vmatmul.mubr.bf16.gmra.mrb[112].mxu0 %v5599_v52  ;;  %4763 = vmatprep.mubr.bf16.mxu1 %v5603_v62  ;;  %v5611_v62 = vld [vmem:[%s7481_s0 + $0x8d4] ss:$36 sps:$4 sm:$0xff]  }
 0x263   :  { %3646 = vmatprep.mubr.bf16.mxu0 %v5601_v7 }
 0x264   :  { %v6919_v10 = vpop.f32.mrb[72].mxu1 }
 0x265   :  { %v3432_v15 = vpop.f32.mrb[8].mxu0  ;;  %v2984_v16 = vpop.f32.mrb[73].mxu1 }
 0x266   :  { %v6925_v21 = vadd.f32 %v3432_v15, %v6341_v2  ;;  %v3434_v24 = vpop.f32.mrb[9].mxu0  ;;  %v6927_v25 = vpop.f32.mrb[74].mxu1  ;;  %v5615_v15 = vld [vmem:[%s7481_s0 + $0x8d8] ss:$36 sps:$4 sm:$0xff]  }
 0x267   :  { %v3435_v30 = vpop.f32.mrb[10].mxu0  ;;  %v2987_v31 = vpop.f32.mrb[75].mxu1 }
 0x268   :  { %v6939_v2 = vadd.f32 %v3435_v30, %v6346_v5  ;;  %v3437_v37 = vpop.f32.mrb[11].mxu0  ;;  %v5609_v5 = vld [vmem:[%s7481_s0 + $0x888] ss:$36 sps:$4 sm:$0xff]  }
 0x269   :  { %4764 = vmatmul.mubr.bf16.gmra.mrb[180].mxu1 %v5605_v20 }
 0x26a   :  { %3647 = vmatmul.mubr.bf16.gmra.mrb[116].mxu0 %v5604_v60  ;;  %4767 = vmatprep.mubr.bf16.mxu1 %v5608_v28 }
 0x26b   :  { %3654 = vmatprep.mubr.bf16.mxu0 %v5606_v34 }
 0x26c   :  { %v6941_v6 = vpop.f32.mrb[76].mxu1 }
 0x26d   :  { %v3440_v40 = vpop.f32.mrb[12].mxu0  ;;  %v2992_v42 = vpop.f32.mrb[77].mxu1 }
 0x26e   :  { %v6947_v45 = vadd.f32 %v3440_v40, %v6357_v11  ;;  %v3442_v50 = vpop.f32.mrb[13].mxu0  ;;  %v6949_v51 = vpop.f32.mrb[78].mxu1 }
 0x26f   :  { %v3443_v56 = vpop.f32.mrb[14].mxu0  ;;  %v2995_v52 = vpop.f32.mrb[79].mxu1 }
 0x270   :  { %v6961_v11 = vadd.f32 %v3443_v56, %v6362_v14  ;;  %v3445_v1 = vpop.f32.mrb[15].mxu0  ;;  %v5614_v14 = vld [vmem:[%s7481_s0 + $0x8d0] ss:$36 sps:$4 sm:$0xff]  }
 0x271   :  { %4768 = vmatmul.mubr.bf16.gmra.mrb[184].mxu1 %v5610_v43 }
 0x272   :  { %3655 = vmatmul.mubr.bf16.gmra.mrb[120].mxu0 %v5609_v5  ;;  %4771 = vmatprep.mubr.bf16.mxu1 %v5613_v54 }
 0x273   :  { %3662 = vmatprep.mubr.bf16.mxu0 %v5611_v62 }
 0x274   :  { %v6963_v4 = vpop.f32.mrb[80].mxu1 }
 0x275   :  { %v3448_v7 = vpop.f32.mrb[16].mxu0  ;;  %v3000_v9 = vpop.f32.mrb[81].mxu1 }
 0x276   :  { %v6969_v16 = vadd.f32 %v3448_v7, %v6373_v19  ;;  %v3450_v20 = vpop.f32.mrb[17].mxu0  ;;  %v6971_v24 = vpop.f32.mrb[82].mxu1 }
 0x277   :  { %v3451_v60 = vpop.f32.mrb[18].mxu0  ;;  %v3003_v28 = vpop.f32.mrb[83].mxu1 }
 0x278   :  { %v6977_v30 = vadd.f32 %v3451_v60, %v6378_v22  ;;  %v3453_v31 = vpop.f32.mrb[19].mxu0 }
 0x279   :  { %4772 = vmatmul.mubr.bf16.gmra.mrb[188].mxu1 %v5615_v15 }
 0x27a   :  { %3663 = vmatmul.mubr.bf16.gmra.mrb[124].mxu0 %v5614_v14 }
 0x27c   :  { %v6979_v34 = vpop.f32.mrb[84].mxu1 }
 0x27d   :  { %v3456_v37 = vpop.f32.mrb[20].mxu0  ;;  %v3008_v19 = vpop.f32.mrb[85].mxu1 }
 0x27e   :  { %v6982_v40 = vadd.f32 %v3456_v37, %v6389_v27  ;;  %v3458_v42 = vpop.f32.mrb[21].mxu0  ;;  %v6984_v43 = vpop.f32.mrb[86].mxu1 }
 0x27f   :  { %v3459_v50 = vpop.f32.mrb[22].mxu0  ;;  %v3011_v5 = vpop.f32.mrb[87].mxu1 }
 0x280   :  { %v6987_v54 = vadd.f32 %v3459_v50, %v6394_v29  ;;  %v3461_v22 = vpop.f32.mrb[23].mxu0 }
 0x284   :  { %v6989_v56 = vpop.f32.mrb[88].mxu1 }
 0x285   :  { %v3464_v52 = vpop.f32.mrb[24].mxu0  ;;  %v3016_v62 = vpop.f32.mrb[89].mxu1 }
 0x286   :  { %v6992_v1 = vadd.f32 %v3464_v52, %v6412_v36  ;;  %v3466_v7 = vpop.f32.mrb[25].mxu0  ;;  %v6994_v9 = vpop.f32.mrb[90].mxu1 }
 0x287   :  { %v3467_v27 = vpop.f32.mrb[26].mxu0  ;;  %v3019_v15 = vpop.f32.mrb[91].mxu1 }
 0x288   :  { %v6997_v20 = vadd.f32 %v3467_v27, %v6417_v39  ;;  %v3469_v14 = vpop.f32.mrb[27].mxu0 }
 0x28c   :  { %v6999_v60 = vpop.f32.mrb[92].mxu1 }
 0x28d   :  { %v3472_v29 = vpop.f32.mrb[28].mxu0  ;;  %v3024_v28 = vpop.f32.mrb[93].mxu1 }
 0x28e   :  { %v7002_v31 = vadd.f32 %v3472_v29, %v6431_v44  ;;  %v3474_v37 = vpop.f32.mrb[29].mxu0  ;;  %v7004_v19 = vpop.f32.mrb[94].mxu1 }
 0x28f   :  { %v3475_v36 = vpop.f32.mrb[30].mxu0  ;;  %v3027_v42 = vpop.f32.mrb[95].mxu1 }
 0x290   :  { %v7007_v50 = vadd.f32 %v3475_v36, %v6439_v48  ;;  %v3477_v5 = vpop.f32.mrb[31].mxu0 }
 0x294   :  { %v7009_v22 = vpop.f32.mrb[96].mxu1 }
 0x295   :  { %v3480_v39 = vpop.f32.mrb[32].mxu0  ;;  %v3032_v52 = vpop.f32.mrb[97].mxu1 }
 0x296   :  { %v7012_v62 = vadd.f32 %v3480_v39, %v6747_v59  ;;  %v3482_v7 = vpop.f32.mrb[33].mxu0  ;;  %v7014_v27 = vpop.f32.mrb[98].mxu1 }
 0x297   :  { %7484 = vst [vmem:[#allocation3_spill] sm:$0xff] %v7014_v27  ;;  %v3483_v44 = vpop.f32.mrb[34].mxu0  ;;  %v3035_v15 = vpop.f32.mrb[99].mxu1 }
 0x298   :  { %v7017_v14 = vadd.f32 %v3483_v44, %v6752_v63  ;;  %v3485_v29 = vpop.f32.mrb[35].mxu0 }
 0x29c   :  { %v7019_v28 = vpop.f32.mrb[100].mxu1 }
 0x29d   :  { %7485 = vst [vmem:[#allocation4_spill] sm:$0xff] %v7019_v28  ;;  %v3488_v48 = vpop.f32.mrb[36].mxu0  ;;  %v3040_v37 = vpop.f32.mrb[101].mxu1 }
 0x29e   :  { %v7022_v36 = vadd.f32 %v3488_v48, %v6763_v8  ;;  %v3490_v42 = vpop.f32.mrb[37].mxu0  ;;  %v7024_v5 = vpop.f32.mrb[102].mxu1 }
 0x29f   :  { %7486 = vst [vmem:[#allocation5_spill] sm:$0xff] %v7024_v5  ;;  %v3491_v59 = vpop.f32.mrb[38].mxu0  ;;  %v3043_v39 = vpop.f32.mrb[103].mxu1 }
 0x2a0   :  { %v7027_v52 = vadd.f32 %v3491_v59, %v6768_v12  ;;  %v3493_v7 = vpop.f32.mrb[39].mxu0 }
 0x2a4   :  { %v7029_v15 = vpop.f32.mrb[104].mxu1 }
 0x2a5   :  { %7487 = vst [vmem:[#allocation6_spill] sm:$0xff] %v7029_v15  ;;  %v3496_v63 = vpop.f32.mrb[40].mxu0  ;;  %v3048_v44 = vpop.f32.mrb[105].mxu1 }
 0x2a6   :  { %v7032_v29 = vadd.f32 %v3496_v63, %v6779_v18  ;;  %v3498_v37 = vpop.f32.mrb[41].mxu0  ;;  %v7034_v28 = vpop.f32.mrb[106].mxu1 }
 0x2a7   :  { %7488 = vst [vmem:[#allocation7_spill] sm:$0xff] %v7034_v28  ;;  %v3499_v8 = vpop.f32.mrb[42].mxu0  ;;  %v3051_v48 = vpop.f32.mrb[107].mxu1 }
 0x2a8   :  { %v7037_v42 = vadd.f32 %v3499_v8, %v6784_v23  ;;  %v3501_v39 = vpop.f32.mrb[43].mxu0 }
 0x2ac   :  { %v7039_v5 = vpop.f32.mrb[108].mxu1 }
 0x2ad   :  { %7489 = vst [vmem:[#allocation8_spill] sm:$0xff] %v7039_v5  ;;  %v3504_v12 = vpop.f32.mrb[44].mxu0  ;;  %v3056_v59 = vpop.f32.mrb[109].mxu1 }
 0x2ae   :  { %v7042_v7 = vadd.f32 %v3504_v12, %v6795_v0  ;;  %v3506_v44 = vpop.f32.mrb[45].mxu0  ;;  %v7044_v15 = vpop.f32.mrb[110].mxu1 }
 0x2af   :  { %7490 = vst [vmem:[#allocation9_spill] sm:$0xff] %v7044_v15  ;;  %v3507_v18 = vpop.f32.mrb[46].mxu0  ;;  %v3059_v63 = vpop.f32.mrb[111].mxu1 }
 0x2b0   :  { %v7047_v37 = vadd.f32 %v3507_v18, %v6800_v32  ;;  %v3509_v48 = vpop.f32.mrb[47].mxu0 }
 0x2b4   :  { %v7049_v28 = vpop.f32.mrb[112].mxu1 }
 0x2b5   :  { %7491 = vst [vmem:[#allocation10_spill] sm:$0xff] %v7049_v28  ;;  %v3512_v23 = vpop.f32.mrb[48].mxu0  ;;  %v3064_v8 = vpop.f32.mrb[113].mxu1 }
 0x2b6   :  { %v7052_v39 = vadd.f32 %v3512_v23, %v6811_v38  ;;  %v3514_v59 = vpop.f32.mrb[49].mxu0  ;;  %v7054_v5 = vpop.f32.mrb[114].mxu1 }
 0x2b7   :  { %7492 = vst [vmem:[#allocation11_spill] sm:$0xff] %v7054_v5  ;;  %v3515_v0 = vpop.f32.mrb[50].mxu0  ;;  %v3067_v12 = vpop.f32.mrb[115].mxu1 }
 0x2b8   :  { %v7057_v44 = vadd.f32 %v3515_v0, %v6816_v41  ;;  %v3517_v63 = vpop.f32.mrb[51].mxu0 }
 0x2bc   :  { %v7059_v15 = vpop.f32.mrb[116].mxu1 }
 0x2bd   :  { %7493 = vst [vmem:[#allocation12_spill] sm:$0xff] %v7059_v15  ;;  %v3520_v32 = vpop.f32.mrb[52].mxu0  ;;  %v3072_v18 = vpop.f32.mrb[117].mxu1 }
 0x2be   :  { %v7062_v48 = vadd.f32 %v3520_v32, %v6827_v47  ;;  %v3522_v8 = vpop.f32.mrb[53].mxu0  ;;  %v7064_v28 = vpop.f32.mrb[118].mxu1 }
 0x2bf   :  { %7494 = vst [vmem:[#allocation13_spill] sm:$0xff] %v7064_v28  ;;  %v3523_v38 = vpop.f32.mrb[54].mxu0  ;;  %v3075_v23 = vpop.f32.mrb[119].mxu1 }
 0x2c0   :  { %v7067_v59 = vadd.f32 %v3523_v38, %v6832_v53  ;;  %v3525_v12 = vpop.f32.mrb[55].mxu0 }
 0x2c4   :  { %v7069_v5 = vpop.f32.mrb[120].mxu1 }
 0x2c5   :  { %7495 = vst [vmem:[#allocation14_spill] sm:$0xff] %v7069_v5  ;;  %v3528_v41 = vpop.f32.mrb[56].mxu0  ;;  %v3080_v0 = vpop.f32.mrb[121].mxu1 }
 0x2c6   :  { %v7072_v63 = vadd.f32 %v3528_v41, %v6843_v61  ;;  %v3530_v18 = vpop.f32.mrb[57].mxu0  ;;  %v7074_v15 = vpop.f32.mrb[122].mxu1 }
 0x2c7   :  { %7496 = vst [vmem:[#allocation15_spill] sm:$0xff] %v7074_v15  ;;  %v3531_v47 = vpop.f32.mrb[58].mxu0  ;;  %v3083_v32 = vpop.f32.mrb[123].mxu1 }
 0x2c8   :  { %v7077_v8 = vadd.f32 %v3531_v47, %v6848_v3  ;;  %v3533_v23 = vpop.f32.mrb[59].mxu0  ;;  %v7092_v3 = vld [vmem:[%s7482_s2] ss:$0 sm:$0xff] }
 0x2cc   :  { %v7079_v28 = vpop.f32.mrb[124].mxu1 }
 0x2cd   :  { %7497 = vst [vmem:[#allocation16_spill] sm:$0xff] %v7079_v28  ;;  %v3536_v53 = vpop.f32.mrb[60].mxu0  ;;  %v3088_v38 = vpop.f32.mrb[125].mxu1 }
 0x2ce   :  { %v7082_v12 = vadd.f32 %v3536_v53, %v6859_v13  ;;  %v3538_v0 = vpop.f32.mrb[61].mxu0  ;;  %v7084_v5 = vpop.f32.mrb[126].mxu1 }
 0x2cf   :  { %7498 = vst [vmem:[#allocation17_spill] sm:$0xff] %v7084_v5  ;;  %v3539_v61 = vpop.f32.mrb[62].mxu0  ;;  %v3091_v41 = vpop.f32.mrb[127].mxu1 }
 0x2d0   :  { %v7087_v18 = vadd.f32 %v3539_v61, %v6864_v17  ;;  %v3541_v32 = vpop.f32.mrb[63].mxu0 }
 0x2d4   :  { %v4713_v15 = vpop.f32.mrb[128].mxu1 }
 0x2d5   :  { %v3544_v47 = vpop.f32.mrb[64].mxu0  ;;  %v3714_v23 = vadd.f32 %v6903_v55, %v4713_v15  ;;  %v3705_v13 = vpop.f32.mrb[129].mxu1 }
 0x2d6   :  { %v7096_v53 = vadd.f32 %v3544_v47, %v6875_v26  ;;  %v3546_v38 = vpop.f32.mrb[65].mxu0  ;;  %v3706_v0 = vadd.f32 %v6881_v33, %v3705_v13  ;;  %v4714_v41 = vpop.f32.mrb[130].mxu1 }
 0x2d7   :  { %v4164_v17 = vadd.f32 %v7092_v3, %v3714_v23  ;;  %v3547_v61 = vpop.f32.mrb[66].mxu0  ;;  %v3717_v32 = vadd.f32 %v6917_v57, %v4714_v41  ;;  %v3708_v5 = vpop.f32.mrb[131].mxu1 }
 0x2d8   :  { %v4162_v28 = vadd.f32 %v7092_v3, %v3706_v0  ;;  %v7103_v27 = vadd.f32 %v3547_v61, %v6883_v35  ;;  %v3549_v55 = vpop.f32.mrb[67].mxu0  ;;  %v3709_v15 = vadd.f32 %v6895_v49, %v3708_v5 }
 0x2d9   :  { %4228 = vst [vmem:[%s7483_s3 + $0x10] sm:$0xff] %v4164_v17  ;;  %v4165_v26 = vadd.f32 %v7092_v3, %v3717_v32 }
 0x2da   :  { %4226 = vst [vmem:[%s7483_s3] sm:$0xff] %v4162_v28  ;;  %v4163_v33 = vadd.f32 %v7092_v3, %v3709_v15 }
 0x2db   :  { %4229 = vst [vmem:[%s7483_s3 + $0x18] sm:$0xff] %v4165_v26 }
 0x2dc   :  { %4227 = vst [vmem:[%s7483_s3 + $0x8] sm:$0xff] %v4163_v33  ;;  %v4717_v35 = vpop.f32.mrb[132].mxu1 }
 0x2dd   :  { %v3552_v49 = vpop.f32.mrb[68].mxu0  ;;  %v3730_v57 = vadd.f32 %v6947_v45, %v4717_v35  ;;  %v3721_v5 = vpop.f32.mrb[133].mxu1 }
 0x2de   :  { %v7122_v47 = vadd.f32 %v3552_v49, %v6897_v46  ;;  %v3554_v23 = vpop.f32.mrb[69].mxu0  ;;  %v3722_v28 = vadd.f32 %v6925_v21, %v3721_v5  ;;  %v4718_v13 = vpop.f32.mrb[134].mxu1 }
 0x2df   :  { %v4168_v38 = vadd.f32 %v7092_v3, %v3730_v57  ;;  %v3555_v0 = vpop.f32.mrb[70].mxu0  ;;  %v3733_v41 = vadd.f32 %v6961_v11, %v4718_v13  ;;  %v3724_v17 = vpop.f32.mrb[135].mxu1 }
 0x2e0   :  { %v4166_v61 = vadd.f32 %v7092_v3, %v3722_v28  ;;  %v7129_v32 = vadd.f32 %v3555_v0, %v6905_v58  ;;  %v3557_v45 = vpop.f32.mrb[71].mxu0  ;;  %v3725_v55 = vadd.f32 %v6939_v2, %v3724_v17 }
 0x2e1   :  { %4232 = vst [vmem:[%s7483_s3 + $0x30] sm:$0xff] %v4168_v38  ;;  %v4169_v46 = vadd.f32 %v7092_v3, %v3733_v41 }
 0x2e2   :  { %4230 = vst [vmem:[%s7483_s3 + $0x20] sm:$0xff] %v4166_v61  ;;  %v4167_v21 = vadd.f32 %v7092_v3, %v3725_v55 }
 0x2e3   :  { %4233 = vst [vmem:[%s7483_s3 + $0x38] sm:$0xff] %v4169_v46 }
 0x2e4   :  { %4231 = vst [vmem:[%s7483_s3 + $0x28] sm:$0xff] %v4167_v21  ;;  %v4721_v58 = vpop.f32.mrb[136].mxu1 }
 0x2e5   :  { %v3560_v2 = vpop.f32.mrb[72].mxu0  ;;  %v3746_v11 = vadd.f32 %v6982_v40, %v4721_v58  ;;  %v3737_v15 = vpop.f32.mrb[137].mxu1 }
 0x2e6   :  { %v7148_v26 = vadd.f32 %v3560_v2, %v6919_v10  ;;  %v3562_v33 = vpop.f32.mrb[73].mxu0  ;;  %v3738_v35 = vadd.f32 %v6969_v16, %v3737_v15  ;;  %v4722_v49 = vpop.f32.mrb[138].mxu1 }
 0x2e7   :  { %v4172_v57 = vadd.f32 %v7092_v3, %v3746_v11  ;;  %v3563_v5 = vpop.f32.mrb[74].mxu0  ;;  %v3749_v23 = vadd.f32 %v6987_v54, %v4722_v49  ;;  %v3740_v28 = vpop.f32.mrb[139].mxu1 }
 0x2e8   :  { %v4170_v13 = vadd.f32 %v7092_v3, %v3738_v35  ;;  %v7155_v38 = vadd.f32 %v3563_v5, %v6927_v25  ;;  %v3565_v40 = vpop.f32.mrb[75].mxu0  ;;  %v3741_v0 = vadd.f32 %v6977_v30, %v3740_v28 }
 0x2e9   :  { %4236 = vst [vmem:[%s7483_s3 + $0x50] sm:$0xff] %v4172_v57  ;;  %v4173_v10 = vadd.f32 %v7092_v3, %v3749_v23 }
 0x2ea   :  { %4234 = vst [vmem:[%s7483_s3 + $0x40] sm:$0xff] %v4170_v13  ;;  %v4171_v16 = vadd.f32 %v7092_v3, %v3741_v0 }
 0x2eb   :  { %4237 = vst [vmem:[%s7483_s3 + $0x58] sm:$0xff] %v4173_v10 }
 0x2ec   :  { %4235 = vst [vmem:[%s7483_s3 + $0x48] sm:$0xff] %v4171_v16  ;;  %v4725_v25 = vpop.f32.mrb[140].mxu1 }
 0x2ed   :  { %v3568_v30 = vpop.f32.mrb[76].mxu0  ;;  %v3762_v54 = vadd.f32 %v7002_v31, %v4725_v25  ;;  %v3753_v41 = vpop.f32.mrb[141].mxu1 }
 0x2ee   :  { %v7174_v17 = vadd.f32 %v3568_v30, %v6941_v6  ;;  %v3570_v61 = vpop.f32.mrb[77].mxu0  ;;  %v3754_v45 = vadd.f32 %v6992_v1, %v3753_v41  ;;  %v4726_v55 = vpop.f32.mrb[142].mxu1 }
 0x2ef   :  { %v4176_v46 = vadd.f32 %v7092_v3, %v3762_v54  ;;  %v3571_v21 = vpop.f32.mrb[78].mxu0  ;;  %v3765_v58 = vadd.f32 %v7007_v50, %v4726_v55  ;;  %v3756_v2 = vpop.f32.mrb[143].mxu1 }
 0x2f0   :  { %v4174_v11 = vadd.f32 %v7092_v3, %v3754_v45  ;;  %v7181_v15 = vadd.f32 %v3571_v21, %v6949_v51  ;;  %v3573_v31 = vpop.f32.mrb[79].mxu0  ;;  %v3757_v33 = vadd.f32 %v6997_v20, %v3756_v2 }
 0x2f1   :  { %4240 = vst [vmem:[%s7483_s3 + $0x70] sm:$0xff] %v4176_v46  ;;  %v4177_v6 = vadd.f32 %v7092_v3, %v3765_v58 }
 0x2f2   :  { %4238 = vst [vmem:[%s7483_s3 + $0x60] sm:$0xff] %v4174_v11  ;;  %v4175_v1 = vadd.f32 %v7092_v3, %v3757_v33 }
 0x2f3   :  { %4241 = vst [vmem:[%s7483_s3 + $0x78] sm:$0xff] %v4177_v6 }
 0x2f4   :  { %4239 = vst [vmem:[%s7483_s3 + $0x68] sm:$0xff] %v4175_v1  ;;  %v4729_v51 = vpop.f32.mrb[144].mxu1 }
 0x2f5   :  { %v3576_v20 = vpop.f32.mrb[80].mxu0  ;;  %v3778_v50 = vadd.f32 %v7022_v36, %v4729_v51  ;;  %v3769_v35 = vpop.f32.mrb[145].mxu1 }
 0x2f6   :  { %v7200_v49 = vadd.f32 %v3576_v20, %v6963_v4  ;;  %v3578_v57 = vpop.f32.mrb[81].mxu0  ;;  %v3770_v5 = vadd.f32 %v7012_v62, %v3769_v35  ;;  %v4730_v23 = vpop.f32.mrb[146].mxu1 }
 0x2f7   :  { %v4180_v28 = vadd.f32 %v7092_v3, %v3778_v50  ;;  %v3579_v13 = vpop.f32.mrb[82].mxu0  ;;  %v3781_v40 = vadd.f32 %v7027_v52, %v4730_v23  ;;  %v3772_v0 = vpop.f32.mrb[147].mxu1 }
 0x2f8   :  { %v4178_v10 = vadd.f32 %v7092_v3, %v3770_v5  ;;  %v7207_v16 = vadd.f32 %v3579_v13, %v6971_v24  ;;  %v3581_v36 = vpop.f32.mrb[83].mxu0  ;;  %v3773_v25 = vadd.f32 %v7017_v14, %v3772_v0 }
 0x2f9   :  { %4244 = vst [vmem:[%s7483_s3 + $0x90] sm:$0xff] %v4180_v28  ;;  %v4181_v4 = vadd.f32 %v7092_v3, %v3781_v40 }
 0x2fa   :  { %4242 = vst [vmem:[%s7483_s3 + $0x80] sm:$0xff] %v4178_v10  ;;  %v4179_v62 = vadd.f32 %v7092_v3, %v3773_v25 }
 0x2fb   :  { %4245 = vst [vmem:[%s7483_s3 + $0x98] sm:$0xff] %v4181_v4 }
 0x2fc   :  { %4243 = vst [vmem:[%s7483_s3 + $0x88] sm:$0xff] %v4179_v62  ;;  %v4733_v24 = vpop.f32.mrb[148].mxu1 }
 0x2fd   :  { %v3584_v14 = vpop.f32.mrb[84].mxu0  ;;  %v3794_v52 = vadd.f32 %v7042_v7, %v4733_v24  ;;  %v3785_v30 = vpop.f32.mrb[149].mxu1 }
 0x2fe   :  { %v7226_v54 = vadd.f32 %v3584_v14, %v6979_v34  ;;  %v3586_v41 = vpop.f32.mrb[85].mxu0  ;;  %v3786_v61 = vadd.f32 %v7032_v29, %v3785_v30  ;;  %v4734_v45 = vpop.f32.mrb[150].mxu1 }
 0x2ff   :  { %v4184_v55 = vadd.f32 %v7092_v3, %v3794_v52  ;;  %v3587_v46 = vpop.f32.mrb[86].mxu0  ;;  %v3797_v21 = vadd.f32 %v7047_v37, %v4734_v45  ;;  %v3788_v58 = vpop.f32.mrb[151].mxu1 }
 0x300   :  { %v4182_v2 = vadd.f32 %v7092_v3, %v3786_v61  ;;  %v7233_v11 = vadd.f32 %v3587_v46, %v6984_v43  ;;  %v3589_v7 = vpop.f32.mrb[87].mxu0  ;;  %v3789_v31 = vadd.f32 %v7037_v42, %v3788_v58 }
 0x301   :  { %4248 = vst [vmem:[%s7483_s3 + $0xb0] sm:$0xff] %v4184_v55  ;;  %v4185_v34 = vadd.f32 %v7092_v3, %v3797_v21 }
 0x302   :  { %4246 = vst [vmem:[%s7483_s3 + $0xa0] sm:$0xff] %v4182_v2  ;;  %v4183_v29 = vadd.f32 %v7092_v3, %v3789_v31 }
 0x303   :  { %4249 = vst [vmem:[%s7483_s3 + $0xb8] sm:$0xff] %v4185_v34 }
 0x304   :  { %4247 = vst [vmem:[%s7483_s3 + $0xa8] sm:$0xff] %v4183_v29  ;;  %v4737_v43 = vpop.f32.mrb[152].mxu1  ;;  %v7499_v29 = vld [vmem:[#allocation3_spill] sm:$0xff] }
 0x305   :  { %v3592_v42 = vpop.f32.mrb[88].mxu0  ;;  %v3810_v37 = vadd.f32 %v7062_v48, %v4737_v43  ;;  %v3801_v33 = vpop.f32.mrb[153].mxu1 }
 0x306   :  { %v7252_v6 = vadd.f32 %v3592_v42, %v6989_v56  ;;  %v3594_v1 = vpop.f32.mrb[89].mxu0  ;;  %v3802_v51 = vadd.f32 %v7052_v39, %v3801_v33  ;;  %v4738_v20 = vpop.f32.mrb[154].mxu1 }
 0x307   :  { %v4188_v50 = vadd.f32 %v7092_v3, %v3810_v37  ;;  %v3595_v35 = vpop.f32.mrb[90].mxu0  ;;  %v3813_v57 = vadd.f32 %v7067_v59, %v4738_v20  ;;  %v3804_v5 = vpop.f32.mrb[155].mxu1  ;;  %v7500_v1 = vld [vmem:[#allocation4_spill] sm:$0xff] }
 0x308   :  { %v4186_v23 = vadd.f32 %v7092_v3, %v3802_v51  ;;  %v7259_v28 = vadd.f32 %v3595_v35, %v6994_v9  ;;  %v3597_v48 = vpop.f32.mrb[91].mxu0  ;;  %v3805_v13 = vadd.f32 %v7057_v44, %v3804_v5 }
 0x309   :  { %4252 = vst [vmem:[%s7483_s3 + $0xd0] sm:$0xff] %v4188_v50  ;;  %v4189_v56 = vadd.f32 %v7092_v3, %v3813_v57 }
 0x30a   :  { %4250 = vst [vmem:[%s7483_s3 + $0xc0] sm:$0xff] %v4186_v23  ;;  %v4187_v39 = vadd.f32 %v7092_v3, %v3805_v13 }
 0x30b   :  { %4253 = vst [vmem:[%s7483_s3 + $0xd8] sm:$0xff] %v4189_v56  ;;  %v7501_v56 = vld [vmem:[#allocation5_spill] sm:$0xff] }
 0x30c   :  { %4251 = vst [vmem:[%s7483_s3 + $0xc8] sm:$0xff] %v4187_v39  ;;  %v4741_v9 = vpop.f32.mrb[156].mxu1 }
 0x30d   :  { %v3600_v44 = vpop.f32.mrb[92].mxu0  ;;  %v3826_v59 = vadd.f32 %v7082_v12, %v4741_v9  ;;  %v3817_v40 = vpop.f32.mrb[157].mxu1 }
 0x30e   :  { %v7278_v0 = vadd.f32 %v3600_v44, %v6999_v60  ;;  %v3602_v10 = vpop.f32.mrb[93].mxu0  ;;  %v3818_v36 = vadd.f32 %v7072_v63, %v3817_v40  ;;  %v4742_v25 = vpop.f32.mrb[158].mxu1 }
 0x30f   :  { %v4192_v4 = vadd.f32 %v7092_v3, %v3826_v59  ;;  %v3603_v62 = vpop.f32.mrb[94].mxu0  ;;  %v3829_v24 = vadd.f32 %v7087_v18, %v4742_v25  ;;  %v3820_v14 = vpop.f32.mrb[159].mxu1  ;;  %v7502_v10 = vld [vmem:[#allocation6_spill] sm:$0xff] }
 0x310   :  { %v4190_v52 = vadd.f32 %v7092_v3, %v3818_v36  ;;  %v7285_v30 = vadd.f32 %v3603_v62, %v7004_v19  ;;  %v3605_v12 = vpop.f32.mrb[95].mxu0  ;;  %v3821_v41 = vadd.f32 %v7077_v8, %v3820_v14 }
 0x311   :  { %4256 = vst [vmem:[%s7483_s3 + $0xf0] sm:$0xff] %v4192_v4  ;;  %v4193_v60 = vadd.f32 %v7092_v3, %v3829_v24 }
 0x312   :  { %4254 = vst [vmem:[%s7483_s3 + $0xe0] sm:$0xff] %v4190_v52  ;;  %v4191_v63 = vadd.f32 %v7092_v3, %v3821_v41 }
 0x313   :  { %4257 = vst [vmem:[%s7483_s3 + $0xf8] sm:$0xff] %v4193_v60  ;;  %v7503_v60 = vld [vmem:[#allocation7_spill] sm:$0xff] }
 0x314   :  { %4255 = vst [vmem:[%s7483_s3 + $0xe8] sm:$0xff] %v4191_v63  ;;  %v4745_v19 = vpop.f32.mrb[160].mxu1 }
 0x315   :  { %v3608_v8 = vpop.f32.mrb[96].mxu0  ;;  %v3842_v18 = vadd.f32 %v7122_v47, %v4745_v19  ;;  %v3833_v61 = vpop.f32.mrb[161].mxu1 }
 0x316   :  { %v7304_v45 = vadd.f32 %v3608_v8, %v7009_v22  ;;  %v3610_v55 = vpop.f32.mrb[97].mxu0  ;;  %v3834_v46 = vadd.f32 %v7096_v53, %v3833_v61  ;;  %v4746_v21 = vpop.f32.mrb[162].mxu1 }
 0x317   :  { %v4196_v58 = vadd.f32 %v7092_v3, %v3842_v18  ;;  %v3611_v2 = vpop.f32.mrb[98].mxu0  ;;  %v3845_v7 = vadd.f32 %v7129_v32, %v4746_v21  ;;  %v3836_v31 = vpop.f32.mrb[163].mxu1  ;;  %v7504_v55 = vld [vmem:[#allocation8_spill] sm:$0xff] }
 0x318   :  { %v4194_v34 = vadd.f32 %v7092_v3, %v3834_v46  ;;  %v7311_v43 = vadd.f32 %v3611_v2, %v7499_v29  ;;  %v3613_v47 = vpop.f32.mrb[99].mxu0  ;;  %v3837_v42 = vadd.f32 %v7103_v27, %v3836_v31 }
 0x319   :  { %4260 = vst [vmem:[%s7483_s3 + $0x110] sm:$0xff] %v4196_v58  ;;  %v4197_v22 = vadd.f32 %v7092_v3, %v3845_v7 }
 0x31a   :  { %4258 = vst [vmem:[%s7483_s3 + $0x100] sm:$0xff] %v4194_v34  ;;  %v4195_v53 = vadd.f32 %v7092_v3, %v3837_v42  ;;  %v7505_v42 = vld [vmem:[#allocation9_spill] sm:$0xff] }
 0x31b   :  { %4261 = vst [vmem:[%s7483_s3 + $0x118] sm:$0xff] %v4197_v22 }
 0x31c   :  { %4259 = vst [vmem:[%s7483_s3 + $0x108] sm:$0xff] %v4195_v53  ;;  %v4749_v27 = vpop.f32.mrb[164].mxu1 }
 0x31d   :  { %v3616_v32 = vpop.f32.mrb[100].mxu0  ;;  %v3858_v37 = vadd.f32 %v7174_v17, %v4749_v27  ;;  %v3849_v33 = vpop.f32.mrb[165].mxu1 }
 0x31e   :  { %v7330_v51 = vadd.f32 %v3616_v32, %v7500_v1  ;;  %v3618_v20 = vpop.f32.mrb[101].mxu0  ;;  %v3850_v50 = vadd.f32 %v7148_v26, %v3849_v33  ;;  %v4750_v35 = vpop.f32.mrb[166].mxu1  ;;  %v7506_v33 = vld [vmem:[#allocation10_spill] sm:$0xff] }
 0x31f   :  { %v4200_v57 = vadd.f32 %v7092_v3, %v3858_v37  ;;  %v3619_v5 = vpop.f32.mrb[102].mxu0  ;;  %v3861_v23 = vadd.f32 %v7181_v15, %v4750_v35  ;;  %v3852_v48 = vpop.f32.mrb[167].mxu1 }
 0x320   :  { %v4198_v13 = vadd.f32 %v7092_v3, %v3850_v50  ;;  %v7337_v39 = vadd.f32 %v3619_v5, %v7501_v56  ;;  %v3621_v17 = vpop.f32.mrb[103].mxu0  ;;  %v3853_v9 = vadd.f32 %v7155_v38, %v3852_v48  ;;  %v7507_v56 = vld [vmem:[#allocation11_spill] sm:$0xff] }
 0x321   :  { %4264 = vst [vmem:[%s7483_s3 + $0x130] sm:$0xff] %v4200_v57  ;;  %v4201_v26 = vadd.f32 %v7092_v3, %v3861_v23 }
 0x322   :  { %4262 = vst [vmem:[%s7483_s3 + $0x120] sm:$0xff] %v4198_v13  ;;  %v4199_v15 = vadd.f32 %v7092_v3, %v3853_v9 }
 0x323   :  { %4265 = vst [vmem:[%s7483_s3 + $0x138] sm:$0xff] %v4201_v26 }
 0x324   :  { %4263 = vst [vmem:[%s7483_s3 + $0x128] sm:$0xff] %v4199_v15  ;;  %v4753_v38 = vpop.f32.mrb[168].mxu1 }
 0x325   :  { %v3624_v44 = vpop.f32.mrb[104].mxu0  ;;  %v3874_v59 = vadd.f32 %v7226_v54, %v4753_v38  ;;  %v3865_v40 = vpop.f32.mrb[169].mxu1 }
 0x326   :  { %v7356_v36 = vadd.f32 %v3624_v44, %v7502_v10  ;;  %v3626_v25 = vpop.f32.mrb[105].mxu0  ;;  %v3866_v4 = vadd.f32 %v7200_v49, %v3865_v40  ;;  %v4754_v62 = vpop.f32.mrb[170].mxu1  ;;  %v7508_v44 = vld [vmem:[#allocation12_spill] sm:$0xff] }
 0x327   :  { %v4204_v24 = vadd.f32 %v7092_v3, %v3874_v59  ;;  %v3627_v14 = vpop.f32.mrb[106].mxu0  ;;  %v3877_v52 = vadd.f32 %v7233_v11, %v4754_v62  ;;  %v3868_v12 = vpop.f32.mrb[171].mxu1 }
 0x328   :  { %v4202_v41 = vadd.f32 %v7092_v3, %v3866_v4  ;;  %v7363_v63 = vadd.f32 %v3627_v14, %v7503_v60  ;;  %v3629_v54 = vpop.f32.mrb[107].mxu0  ;;  %v3869_v19 = vadd.f32 %v7207_v16, %v3868_v12  ;;  %v7509_v12 = vld [vmem:[#allocation13_spill] sm:$0xff] }
 0x329   :  { %4268 = vst [vmem:[%s7483_s3 + $0x150] sm:$0xff] %v4204_v24  ;;  %v4205_v49 = vadd.f32 %v7092_v3, %v3877_v52 }
 0x32a   :  { %4266 = vst [vmem:[%s7483_s3 + $0x140] sm:$0xff] %v4202_v41  ;;  %v4203_v11 = vadd.f32 %v7092_v3, %v3869_v19 }
 0x32b   :  { %4269 = vst [vmem:[%s7483_s3 + $0x158] sm:$0xff] %v4205_v49 }
 0x32c   :  { %4267 = vst [vmem:[%s7483_s3 + $0x148] sm:$0xff] %v4203_v11  ;;  %v4757_v16 = vpop.f32.mrb[172].mxu1 }
 0x32d   :  { %v3632_v8 = vpop.f32.mrb[108].mxu0  ;;  %v3890_v18 = vadd.f32 %v7278_v0, %v4757_v16  ;;  %v3881_v61 = vpop.f32.mrb[173].mxu1 }
 0x32e   :  { %v4861_v46 = vadd.f32 %v3632_v8, %v7504_v55  ;;  %v3634_v21 = vpop.f32.mrb[109].mxu0  ;;  %v3882_v58 = vadd.f32 %v7252_v6, %v3881_v61  ;;  %v4758_v2 = vpop.f32.mrb[174].mxu1  ;;  %v7510_v8 = vld [vmem:[#allocation14_spill] sm:$0xff] }
 0x32f   :  { %v4208_v7 = vadd.f32 %v7092_v3, %v3890_v18  ;;  %v3635_v31 = vpop.f32.mrb[110].mxu0  ;;  %v3893_v34 = vadd.f32 %v7285_v30, %v4758_v2  ;;  %v3884_v29 = vpop.f32.mrb[175].mxu1 }
 0x330   :  { %v4206_v47 = vadd.f32 %v7092_v3, %v3882_v58  ;;  %v4862_v22 = vadd.f32 %v3635_v31, %v7505_v42  ;;  %v3637_v53 = vpop.f32.mrb[111].mxu0  ;;  %v3885_v0 = vadd.f32 %v7259_v28, %v3884_v29 }
 0x331   :  { %4272 = vst [vmem:[%s7483_s3 + $0x170] sm:$0xff] %v4208_v7  ;;  %v4209_v6 = vadd.f32 %v7092_v3, %v3893_v34  ;;  %v7511_v34 = vld [vmem:[#allocation15_spill] sm:$0xff] }
 0x332   :  { %4270 = vst [vmem:[%s7483_s3 + $0x160] sm:$0xff] %v4206_v47  ;;  %v4207_v30 = vadd.f32 %v7092_v3, %v3885_v0 }
 0x333   :  { %4273 = vst [vmem:[%s7483_s3 + $0x178] sm:$0xff] %v4209_v6 }
 0x334   :  { %4271 = vst [vmem:[%s7483_s3 + $0x168] sm:$0xff] %v4207_v30  ;;  %v4761_v28 = vpop.f32.mrb[176].mxu1 }
 0x335   :  { %v3640_v27 = vpop.f32.mrb[112].mxu0  ;;  %v3906_v32 = vadd.f32 %v7330_v51, %v4761_v28  ;;  %v3897_v37 = vpop.f32.mrb[177].mxu1  ;;  %v7512_v28 = vld [vmem:[#allocation16_spill] sm:$0xff] }
 0x336   :  { %v4863_v1 = vadd.f32 %v3640_v27, %v7506_v33  ;;  %v3642_v20 = vpop.f32.mrb[113].mxu0  ;;  %v3898_v50 = vadd.f32 %v7304_v45, %v3897_v37  ;;  %v4762_v35 = vpop.f32.mrb[178].mxu1 }
 0x337   :  { %v4212_v57 = vadd.f32 %v7092_v3, %v3906_v32  ;;  %v3643_v5 = vpop.f32.mrb[114].mxu0  ;;  %v3909_v23 = vadd.f32 %v7337_v39, %v4762_v35  ;;  %v3900_v48 = vpop.f32.mrb[179].mxu1 }
 0x338   :  { %v4210_v13 = vadd.f32 %v7092_v3, %v3898_v50  ;;  %v4864_v17 = vadd.f32 %v3643_v5, %v7507_v56  ;;  %v3645_v9 = vpop.f32.mrb[115].mxu0  ;;  %v3901_v51 = vadd.f32 %v7311_v43, %v3900_v48 }
 0x339   :  { %4276 = vst [vmem:[%s7483_s3 + $0x190] sm:$0xff] %v4212_v57  ;;  %v4213_v45 = vadd.f32 %v7092_v3, %v3909_v23  ;;  %v7513_v57 = vld [vmem:[#allocation17_spill] sm:$0xff] }
 0x33a   :  { %4274 = vst [vmem:[%s7483_s3 + $0x180] sm:$0xff] %v4210_v13  ;;  %v4211_v39 = vadd.f32 %v7092_v3, %v3901_v51 }
 0x33b   :  { %4277 = vst [vmem:[%s7483_s3 + $0x198] sm:$0xff] %v4213_v45 }
 0x33c   :  { %4275 = vst [vmem:[%s7483_s3 + $0x188] sm:$0xff] %v4211_v39  ;;  %v4765_v43 = vpop.f32.mrb[180].mxu1 }
 0x33d   :  { %v3648_v26 = vpop.f32.mrb[116].mxu0  ;;  %v3922_v15 = vadd.f32 %v4861_v46, %v4765_v43  ;;  %v3913_v38 = vpop.f32.mrb[181].mxu1 }
 0x33e   :  { %v4865_v59 = vadd.f32 %v3648_v26, %v7508_v44  ;;  %v3650_v40 = vpop.f32.mrb[117].mxu0  ;;  %v3914_v10 = vadd.f32 %v7356_v36, %v3913_v38  ;;  %v4766_v25 = vpop.f32.mrb[182].mxu1 }
 0x33f   :  { %v4216_v4 = vadd.f32 %v7092_v3, %v3922_v15  ;;  %v3651_v62 = vpop.f32.mrb[118].mxu0  ;;  %v3925_v24 = vadd.f32 %v4862_v22, %v4766_v25  ;;  %v3916_v14 = vpop.f32.mrb[183].mxu1 }
 0x340   :  { %v4214_v52 = vadd.f32 %v7092_v3, %v3914_v10  ;;  %v4866_v41 = vadd.f32 %v3651_v62, %v7509_v12  ;;  %v3653_v60 = vpop.f32.mrb[119].mxu0  ;;  %v3917_v54 = vadd.f32 %v7363_v63, %v3916_v14 }
 0x341   :  { %4280 = vst [vmem:[%s7483_s3 + $0x1b0] sm:$0xff] %v4216_v4  ;;  %v4217_v19 = vadd.f32 %v7092_v3, %v3925_v24 }
 0x342   :  { %4278 = vst [vmem:[%s7483_s3 + $0x1a0] sm:$0xff] %v4214_v52  ;;  %v4215_v36 = vadd.f32 %v7092_v3, %v3917_v54 }
 0x343   :  { %4281 = vst [vmem:[%s7483_s3 + $0x1b8] sm:$0xff] %v4217_v19 }
 0x344   :  { %4279 = vst [vmem:[%s7483_s3 + $0x1a8] sm:$0xff] %v4215_v36  ;;  %v4769_v63 = vpop.f32.mrb[184].mxu1 }
 0x345   :  { %v3656_v49 = vpop.f32.mrb[120].mxu0  ;;  %v3938_v11 = vadd.f32 %v4865_v59, %v4769_v63  ;;  %v3929_v16 = vpop.f32.mrb[185].mxu1 }
 0x346   :  { %v4867_v18 = vadd.f32 %v3656_v49, %v7510_v8  ;;  %v3658_v61 = vpop.f32.mrb[121].mxu0  ;;  %v3930_v55 = vadd.f32 %v4863_v1, %v3929_v16  ;;  %v4770_v46 = vpop.f32.mrb[186].mxu1 }
 0x347   :  { %v4220_v21 = vadd.f32 %v7092_v3, %v3938_v11  ;;  %v3659_v58 = vpop.f32.mrb[122].mxu0  ;;  %v3941_v2 = vadd.f32 %v4866_v41, %v4770_v46  ;;  %v3932_v7 = vpop.f32.mrb[187].mxu1 }
 0x348   :  { %v4218_v31 = vadd.f32 %v7092_v3, %v3930_v55  ;;  %v4868_v29 = vadd.f32 %v3659_v58, %v7511_v34  ;;  %v3661_v47 = vpop.f32.mrb[123].mxu0  ;;  %v3933_v42 = vadd.f32 %v4864_v17, %v3932_v7 }
 0x349   :  { %4284 = vst [vmem:[%s7483_s3 + $0x1d0] sm:$0xff] %v4220_v21  ;;  %v4221_v22 = vadd.f32 %v7092_v3, %v3941_v2 }
 0x34a   :  { %4282 = vst [vmem:[%s7483_s3 + $0x1c0] sm:$0xff] %v4218_v31  ;;  %v4219_v53 = vadd.f32 %v7092_v3, %v3933_v42 }
 0x34b   :  { %4285 = vst [vmem:[%s7483_s3 + $0x1d8] sm:$0xff] %v4221_v22 }
 0x34c   :  { %4283 = vst [vmem:[%s7483_s3 + $0x1c8] sm:$0xff] %v4219_v53  ;;  %v4773_v0 = vpop.f32.mrb[188].mxu1 }
 0x34d   :  { %v3664_v6 = vpop.f32.mrb[124].mxu0  ;;  %v3945_v30 = vpop.f32.mrb[189].mxu1 }
 0x34e   :  { %v4869_v27 = vadd.f32 %v3664_v6, %v7512_v28  ;;  %v3666_v32 = vpop.f32.mrb[125].mxu0  ;;  %v3946_v37 = vadd.f32 %v4867_v18, %v3945_v30  ;;  %v4774_v33 = vpop.f32.mrb[190].mxu1 }
 0x34f   :  { %v3667_v1 = vpop.f32.mrb[126].mxu0  ;;  %v3948_v20 = vpop.f32.mrb[191].mxu1 }
 0x350   :  { %v3954_v50 = vadd.f32 %v4869_v27, %v4773_v0  ;;  %v4222_v35 = vadd.f32 %v7092_v3, %v3946_v37  ;;  %v4870_v5 = vadd.f32 %v3667_v1, %v7513_v57  ;;  %v3669_v23 = vpop.f32.mrb[127].mxu0  ;;  %v3949_v48 = vadd.f32 %v4868_v29, %v3948_v20 }
 0x352   :  { %v4224_v13 = vadd.f32 %v7092_v3, %v3954_v50  ;;  %4286 = vst [vmem:[%s7483_s3 + $0x1e0] sm:$0xff] %v4222_v35  ;;  %v3957_v56 = vadd.f32 %v4870_v5, %v4774_v33  ;;  %v4223_v17 = vadd.f32 %v7092_v3, %v3949_v48 }
 0x354   :  { %4288 = vst [vmem:[%s7483_s3 + $0x1f0] sm:$0xff] %v4224_v13  ;;  %v4225_v9 = vadd.f32 %v7092_v3, %v3957_v56  ;;  %4287 = vst [vmem:[%s7483_s3 + $0x1e8] sm:$0xff] %v4223_v17 }
 0x356   :  { %4289 = vst [vmem:[%s7483_s3 + $0x1f8] sm:$0xff] %v4225_v9 }

</bundles_post_ra>
